<compile_context>
chip_gen: v5e
topology: v5e:2x2
jax: 0.10.0
libtpu: 0.0.40
codegen_flags: <defaults>
</compile_context>

<pallas_src>
import math

import jax
import jax.numpy as jnp
from jax import lax
from jax.experimental import pallas as pl
from jax.experimental.pallas import tpu as pltpu


def _round_up(v, m):
    return (v + m - 1) // m * m


def _vmem_plan():
    """(scratch budget for tiling decisions, vmem_limit_bytes) derived from the chip."""
    cap = 64 * 1024 * 1024                      # v7x floor: 64 MiB per TensorCore
    try:
        info = pltpu.get_tpu_info()
        cap_attr = getattr(info, "vmem_capacity_bytes", None)
        if cap_attr:
            cap = int(cap_attr)
    except Exception:
        pass
    budget = int(cap * 0.55)                    # headroom for compiler scratch / metadata
    limit = int(cap * 0.85)
    return budget, limit


def _choose_do_tile(Dout, HW, KKCp, Cout_p, Kd, sd, itemsize, budget):
    """Largest output-depth tile whose per-step buffers fit the VMEM budget."""
    if sd > 1:
        # TODO(synk): phase-deinterleave depth in the wrapper so strided-depth convs can
        # also use multi-plane tiles with purely contiguous in-kernel slices.
        return 1
    best = 1
    for cand in range(1, Dout + 1):
        rows8 = _round_up(cand * HW, 8)
        win8 = _round_up((cand - 1 + Kd) * HW, 8)
        xwin_b = 2 * win8 * KKCp * itemsize     # double-buffered depth window
        out_b = 2 * rows8 * Cout_p * itemsize   # Pallas-double-buffered output block
        acc_b = 2 * rows8 * Cout_p * 4          # f32 accumulator + one partial
        patch_b = 2 * rows8 * KKCp * itemsize   # live im2col slices feeding the MXU
        if xwin_b + out_b + acc_b + patch_b <= budget:
            best = cand
    return best


def _make_kernel(Kd, sd, do_tile, HW, KKCp, Cout_p, Dwin):
    rows = do_tile * HW            # matmul M per grid step
    win_rows = Dwin * HW           # depth-window rows resident in VMEM
    chunk = do_tile * sd * HW      # HBM row advance per depth tile

    def kernel(x_hbm, w_ref, b_ref, o_ref, xwin_ref, sem_ref):
        n = pl.program_id(0)
        t = pl.program_id(1)
        nt = pl.num_programs(1)
        slot = t & 1

        def window_copy(tt, s):
            return pltpu.make_async_copy(
                x_hbm.at[n, pl.ds(tt * chunk, win_rows)],   # (win_rows, KKCp) in HBM
                xwin_ref.at[s],                             # (win_rows, KKCp) in VMEM
                sem_ref.at[s])

        # Prime the pipeline at the first depth tile of each batch element.
        @pl.when(t == 0)
        def _():
            window_copy(0, 0).start()

        # Prefetch the next depth window while this one is being consumed.
        # TODO(synk): also prefetch across batch elements (window 0 of n+1 at t==nt-1).
        @pl.when(t + 1 < nt)
        def _():
            window_copy(t + 1, 1 - slot).start()

        window_copy(t, slot).wait()

        acc = b_ref[...].astype(jnp.float32)                # (1, Cout_p), broadcasts over rows
        for kd in range(Kd):                                # Kd static taps, value accumulation
            # contiguous slice: for sd > 1 do_tile is forced to 1, so no strided slicing needed
            patch = xwin_ref[slot, pl.ds(kd * HW, rows), :]
            acc = acc + jnp.dot(patch, w_ref[kd], preferred_element_type=jnp.float32)

        o_ref[...] = acc.astype(o_ref.dtype)                # single lane-dense store

    return kernel


def same_pad_conv3d(x, weight, bias=None, *, stride=1, padding_type="replicate"):
    """Matches SamePadConv3d.forward.  x: (N,Cin,D,H,W), weight: (Cout,Cin,Kd,Kh,Kw)."""
    if isinstance(stride, int):
        stride = (stride,) * 3
    Cout, Cin, Kd, Kh, Kw = weight.shape
    N, Cin_x, D, H, W = x.shape
    assert Cin_x == Cin
    sd, sh, sw = stride

    # asymmetric "same" padding exactly as the PyTorch module computes it
    pads = []
    for k, s in zip((Kd, Kh, Kw), stride):
        p = k - s
        pads.append((p // 2 + p % 2, p // 2))
    mode = {"replicate": "edge", "constant": "constant", "reflect": "reflect"}[padding_type]
    x_pad = jnp.pad(x, ((0, 0), (0, 0), pads[0], pads[1], pads[2]), mode=mode)
    Dp, Hp, Wp = x_pad.shape[2:]
    Dout = (Dp - Kd) // sd + 1
    Hout = (Hp - Kh) // sh + 1
    Wout = (Wp - Kw) // sw + 1
    HW = Hout * Wout
    itemsize = jnp.dtype(x.dtype).itemsize

    # --- glue (XLA): channels-last, Kh*Kw unfold, lane-dense zero padding ---
    x_cl = jnp.transpose(x_pad, (0, 2, 3, 4, 1))                     # (N,Dp,Hp,Wp,Cin)
    cols = []
    for kh in range(Kh):
        for kw in range(Kw):
            cols.append(x_cl[:, :,
                             kh:kh + (Hout - 1) * sh + 1:sh,
                             kw:kw + (Wout - 1) * sw + 1:sw, :])
    x_unf = cols[0] if len(cols) == 1 else jnp.concatenate(cols, axis=-1)
    KKC = Kh * Kw * Cin
    KKCp = _round_up(KKC, 128)                                       # lane-dense contraction dim
    Cout_p = _round_up(Cout, 128)                                    # lane-dense output stores

    budget, vmem_limit = _vmem_plan()
    w_resident = 2 * Kd * KKCp * Cout_p * itemsize + 2 * 8 * Cout_p * itemsize
    do_tile = _choose_do_tile(Dout, HW, KKCp, Cout_p, Kd, sd, itemsize,
                              max(budget - w_resident, 1 << 20))
    n_dtiles = pl.cdiv(Dout, do_tile)                                # no divisor cliff: pad Dout
    Dout_pad = n_dtiles * do_tile
    Dwin = (do_tile - 1) * sd + Kd
    Dp_need = (Dout_pad - 1) * sd + Kd
    rows = do_tile * HW

    x_unf = x_unf.reshape(N, Dp, HW, KKC)
    x_unf = jnp.pad(x_unf, ((0, 0), (0, max(0, Dp_need - Dp)), (0, 0), (0, KKCp - KKC)))
    x_unf = x_unf[:, :Dp_need].reshape(N, Dp_need * HW, KKCp)        # flat (depth*HW) rows

    # tap-major weights: one (KKCp, Cout_p) slab per depth tap, matching the unfold order
    w_t = jnp.transpose(weight, (2, 3, 4, 1, 0)).reshape(Kd, KKC, Cout)
    w_t = jnp.pad(w_t, ((0, 0), (0, KKCp - KKC), (0, Cout_p - Cout)))
    if bias is None:
        bias = jnp.zeros((Cout,), x.dtype)
    b_t = jnp.pad(bias.reshape(1, Cout), ((0, 0), (0, Cout_p - Cout)))

    kernel = _make_kernel(Kd, sd, do_tile, HW, KKCp, Cout_p, Dwin)

    out = pl.pallas_call(
        kernel,
        out_shape=jax.ShapeDtypeStruct((N, n_dtiles, rows, Cout_p), x.dtype),
        grid_spec=pltpu.PrefetchScalarGridSpec(
            num_scalar_prefetch=0,
            grid=(N, n_dtiles),
            in_specs=[
                pl.BlockSpec(memory_space=pl.ANY),                   # x stays in HBM, windowed DMA
                # TODO(synk): single-buffer these grid-invariant operands
                # (pipeline_mode=pl.Buffered(1)) once verified on all target toolchains.
                pl.BlockSpec((Kd, KKCp, Cout_p), lambda n, t: (0, 0, 0)),
                pl.BlockSpec((1, Cout_p), lambda n, t: (0, 0)),
            ],
            out_specs=pl.BlockSpec((None, None, rows, Cout_p), lambda n, t: (n, t, 0, 0)),
            scratch_shapes=[
                pltpu.VMEM((2, Dwin * HW, KKCp), x.dtype),           # double-buffered depth window
                pltpu.SemaphoreType.DMA((2,)),
            ],
        ),
        compiler_params=pltpu.CompilerParams(
            # TODO(synk): use pltpu.CORE_PARALLEL on the batch axis for explicit v7x dual-TC sharding.
            dimension_semantics=("parallel", "arbitrary"),
            vmem_limit_bytes=vmem_limit),
    )(x_unf, w_t, b_t)

    # (N, T, do_tile*HW, Cout_p) -> (N, Cout, Dout, Hout, Wout)  (glue)
    # TODO(synk): skip this transpose when the consumer accepts channels-last output.
    out = out.reshape(N, Dout_pad, Hout, Wout, Cout_p)[:, :Dout, :, :, :Cout]
    return jnp.transpose(out, (0, 4, 1, 2, 3))


if __name__ == "__main__":
    key = jax.random.PRNGKey(0)
    k_x, k_w, k_b = jax.random.split(key, 3)

    # small shapes consistent with the module: N=2, Cin=4, Cout=8, D=H=W=16, k=3, stride=1
    N, Cin, Cout = 2, 4, 8
    D = H = W = 16
    ksz, stride = 3, 1

    x = jax.random.normal(k_x, (N, Cin, D, H, W), jnp.float32)

    # deterministic Conv3d-style init (kaiming-uniform-like bounds)
    fan_in = Cin * ksz ** 3
    bound = 1.0 / math.sqrt(fan_in)
    weight = jax.random.uniform(k_w, (Cout, Cin, ksz, ksz, ksz), jnp.float32, -bound, bound)
    bias = jax.random.uniform(k_b, (Cout,), jnp.float32, -bound, bound)

    out = same_pad_conv3d(x, weight, bias, stride=stride, padding_type="replicate")
    out = jax.block_until_ready(out)

    # reference: replicate pad + VALID conv via XLA
    p = ksz - stride
    pad = (p // 2 + p % 2, p // 2)
    x_pad_ref = jnp.pad(x, ((0, 0), (0, 0), pad, pad, pad), mode="edge")
    ref = lax.conv_general_dilated(
        x_pad_ref, weight, (stride,) * 3, "VALID",
        dimension_numbers=("NCDHW", "OIDHW", "NCDHW"))
    ref = ref + bias.reshape(1, Cout, 1, 1, 1)

    assert out.shape == ref.shape, (out.shape, ref.shape)
    err = float(jnp.max(jnp.abs(out - ref)))
    assert jnp.allclose(out, ref, atol=2e-4, rtol=2e-4), err
    print("KERNEL_OK")
</pallas_src>

<mosaic_0001>
module attributes {stable_mosaic.version = 11 : i64} {
  func.func @kernel(%arg0: i32, %arg1: i32, %arg2: memref<2x4608x128xf32, #tpu.memory_space<any>>, %arg3: memref<3x128x128xf32, #tpu.memory_space<vmem>>, %arg4: memref<1x128xf32, #tpu.memory_space<vmem>>, %arg5: memref<1x1x4096x128xf32, #tpu.memory_space<vmem>>, %arg6: memref<2x4608x128xf32, #tpu.memory_space<vmem>>, %arg7: memref<2x!tpu.dma_semaphore, #tpu.memory_space<semaphore_mem>>) attributes {dimension_semantics = [#tpu.dimension_semantics<parallel>, #tpu.dimension_semantics<arbitrary>], iteration_bounds = array<i64: 2, 1>, scalar_prefetch = 0 : i64, scratch_operands = 2 : i64, tpu.core_type = #tpu.core_type<tc>, window_params = [{}, {pipeline_mode = #tpu.pipeline_mode<synchronous>, transform_indices = @transform_1, window_bounds = array<i64: 3, 128, 128>}, {pipeline_mode = #tpu.pipeline_mode<synchronous>, transform_indices = @transform_2, window_bounds = array<i64: 1, 128>}, {transform_indices = @transform_3, window_bounds = array<i64: 1, 1, 4096, 128>}]} {
    %c1_i32 = arith.constant 1 : i32
    %0 = arith.andi %arg1, %c1_i32 : i32
    %c0_i32 = arith.constant 0 : i32
    %1 = arith.cmpi eq, %arg1, %c0_i32 : i32
    %2 = arith.extui %1 : i1 to i32
    %c0_i32_0 = arith.constant 0 : i32
    %3 = arith.cmpi ne, %2, %c0_i32_0 : i32
    scf.if %3 {
      %c0_i32_25 = arith.constant 0 : i32
      %c0_i32_26 = arith.constant 0 : i32
      %c0_i32_27 = arith.constant 0 : i32
      %c0_i32_28 = arith.constant 0 : i32
      %41 = tpu.memref_slice %arg2[%arg0, %c0_i32_27, %c0_i32_28] : memref<2x4608x128xf32, #tpu.memory_space<any>> -> memref<1x4608x128xf32, #tpu.memory_space<any>>
      %42 = tpu.memref_squeeze %41 : memref<1x4608x128xf32, #tpu.memory_space<any>> -> memref<4608x128xf32, #tpu.memory_space<any>>
      %c0_i32_29 = arith.constant 0 : i32
      %c0_i32_30 = arith.constant 0 : i32
      %43 = tpu.memref_slice %arg6[%c0_i32_25, %c0_i32_29, %c0_i32_30] : memref<2x4608x128xf32, #tpu.memory_space<vmem>> -> memref<1x4608x128xf32, #tpu.memory_space<vmem>>
      %44 = tpu.memref_squeeze %43 : memref<1x4608x128xf32, #tpu.memory_space<vmem>> -> memref<4608x128xf32, #tpu.memory_space<vmem>>
      %45 = tpu.memref_slice %arg7[%c0_i32_26] : memref<2x!tpu.dma_semaphore, #tpu.memory_space<semaphore_mem>> -> memref<1x!tpu.dma_semaphore, #tpu.memory_space<semaphore_mem>>
      %46 = tpu.memref_squeeze %45 : memref<1x!tpu.dma_semaphore, #tpu.memory_space<semaphore_mem>> -> memref<!tpu.dma_semaphore, #tpu.memory_space<semaphore_mem>>
      tpu.enqueue_dma source(%42 : memref<4608x128xf32, #tpu.memory_space<any>>) target(%44 : memref<4608x128xf32, #tpu.memory_space<vmem>>) target_semaphore(%46 : memref<!tpu.dma_semaphore, #tpu.memory_space<semaphore_mem>>)
    } else {
    }
    %c1_i32_1 = arith.constant 1 : i32
    %4 = arith.addi %arg1, %c1_i32_1 : i32
    %c1_i32_2 = arith.constant 1 : i32
    %5 = arith.cmpi slt, %4, %c1_i32_2 : i32
    %6 = arith.extui %5 : i1 to i32
    %c0_i32_3 = arith.constant 0 : i32
    %7 = arith.cmpi ne, %6, %c0_i32_3 : i32
    scf.if %7 {
      %c1_i32_25 = arith.constant 1 : i32
      %41 = arith.addi %arg1, %c1_i32_25 : i32
      %c1_i32_26 = arith.constant 1 : i32
      %42 = arith.subi %c1_i32_26, %0 : i32
      %c4096_i32_27 = arith.constant 4096 : i32
      %43 = arith.muli %41, %c4096_i32_27 : i32
      %c0_i32_28 = arith.constant 0 : i32
      %44 = tpu.memref_slice %arg2[%arg0, %43, %c0_i32_28] : memref<2x4608x128xf32, #tpu.memory_space<any>> -> memref<1x4608x128xf32, #tpu.memory_space<any>>
      %45 = tpu.memref_squeeze %44 : memref<1x4608x128xf32, #tpu.memory_space<any>> -> memref<4608x128xf32, #tpu.memory_space<any>>
      %c0_i32_29 = arith.constant 0 : i32
      %c0_i32_30 = arith.constant 0 : i32
      %46 = tpu.memref_slice %arg6[%42, %c0_i32_29, %c0_i32_30] : memref<2x4608x128xf32, #tpu.memory_space<vmem>> -> memref<1x4608x128xf32, #tpu.memory_space<vmem>>
      %47 = tpu.memref_squeeze %46 : memref<1x4608x128xf32, #tpu.memory_space<vmem>> -> memref<4608x128xf32, #tpu.memory_space<vmem>>
      %48 = tpu.memref_slice %arg7[%42] : memref<2x!tpu.dma_semaphore, #tpu.memory_space<semaphore_mem>> -> memref<1x!tpu.dma_semaphore, #tpu.memory_space<semaphore_mem>>
      %49 = tpu.memref_squeeze %48 : memref<1x!tpu.dma_semaphore, #tpu.memory_space<semaphore_mem>> -> memref<!tpu.dma_semaphore, #tpu.memory_space<semaphore_mem>>
      tpu.enqueue_dma source(%45 : memref<4608x128xf32, #tpu.memory_space<any>>) target(%47 : memref<4608x128xf32, #tpu.memory_space<vmem>>) target_semaphore(%49 : memref<!tpu.dma_semaphore, #tpu.memory_space<semaphore_mem>>)
    } else {
    }
    %c4096_i32 = arith.constant 4096 : i32
    %8 = arith.muli %arg1, %c4096_i32 : i32
    %c0_i32_4 = arith.constant 0 : i32
    %9 = tpu.memref_slice %arg2[%arg0, %8, %c0_i32_4] : memref<2x4608x128xf32, #tpu.memory_space<any>> -> memref<1x4608x128xf32, #tpu.memory_space<any>>
    %10 = tpu.memref_squeeze %9 : memref<1x4608x128xf32, #tpu.memory_space<any>> -> memref<4608x128xf32, #tpu.memory_space<any>>
    %c0_i32_5 = arith.constant 0 : i32
    %c0_i32_6 = arith.constant 0 : i32
    %11 = tpu.memref_slice %arg6[%0, %c0_i32_5, %c0_i32_6] : memref<2x4608x128xf32, #tpu.memory_space<vmem>> -> memref<1x4608x128xf32, #tpu.memory_space<vmem>>
    %12 = tpu.memref_squeeze %11 : memref<1x4608x128xf32, #tpu.memory_space<vmem>> -> memref<4608x128xf32, #tpu.memory_space<vmem>>
    %13 = tpu.memref_slice %arg7[%0] : memref<2x!tpu.dma_semaphore, #tpu.memory_space<semaphore_mem>> -> memref<1x!tpu.dma_semaphore, #tpu.memory_space<semaphore_mem>>
    %14 = tpu.memref_squeeze %13 : memref<1x!tpu.dma_semaphore, #tpu.memory_space<semaphore_mem>> -> memref<!tpu.dma_semaphore, #tpu.memory_space<semaphore_mem>>
    tpu.wait_dma2 semaphore(%14 : memref<!tpu.dma_semaphore, #tpu.memory_space<semaphore_mem>>) src(%10 : memref<4608x128xf32, #tpu.memory_space<any>>) dst(%12 : memref<4608x128xf32, #tpu.memory_space<vmem>>)
    %c0 = arith.constant 0 : index
    %c0_7 = arith.constant 0 : index
    %15 = vector.load %arg4[%c0, %c0_7] : memref<1x128xf32, #tpu.memory_space<vmem>>, vector<1x128xf32>
    %16 = arith.index_cast %0 : i32 to index
    %c0_8 = arith.constant 0 : index
    %c0_9 = arith.constant 0 : index
    %17 = vector.load %arg6[%16, %c0_8, %c0_9] : memref<2x4608x128xf32, #tpu.memory_space<vmem>>, vector<1x4096x128xf32>
    %18 = vector.shape_cast %17 : vector<1x4096x128xf32> to vector<4096x128xf32>
    %c0_10 = arith.constant 0 : index
    %c0_11 = arith.constant 0 : index
    %c0_12 = arith.constant 0 : index
    %19 = vector.load %arg3[%c0_10, %c0_11, %c0_12] : memref<3x128x128xf32, #tpu.memory_space<vmem>>, vector<1x128x128xf32>
    %20 = vector.shape_cast %19 : vector<1x128x128xf32> to vector<128x128xf32>
    %cst = arith.constant dense<0.000000e+00> : vector<4096x128xf32>
    %21 = tpu.matmul %18, %20, %cst {dimension_numbers = #tpu.dot_dimension_numbers<[1], [0], [0], [1], [0, 0, 1, 1], [], []>} : vector<4096x128xf32>, vector<128x128xf32>, vector<4096x128xf32> -> vector<4096x128xf32>
    %22 = vector.broadcast %15 : vector<1x128xf32> to vector<4096x128xf32>
    %23 = arith.addf %22, %21 : vector<4096x128xf32>
    %24 = arith.index_cast %0 : i32 to index
    %c256 = arith.constant 256 : index
    %c0_13 = arith.constant 0 : index
    %25 = vector.load %arg6[%24, %c256, %c0_13] : memref<2x4608x128xf32, #tpu.memory_space<vmem>>, vector<1x4096x128xf32>
    %26 = vector.shape_cast %25 : vector<1x4096x128xf32> to vector<4096x128xf32>
    %c1 = arith.constant 1 : index
    %c0_14 = arith.constant 0 : index
    %c0_15 = arith.constant 0 : index
    %27 = vector.load %arg3[%c1, %c0_14, %c0_15] : memref<3x128x128xf32, #tpu.memory_space<vmem>>, vector<1x128x128xf32>
    %28 = vector.shape_cast %27 : vector<1x128x128xf32> to vector<128x128xf32>
    %cst_16 = arith.constant dense<0.000000e+00> : vector<4096x128xf32>
    %29 = tpu.matmul %26, %28, %cst_16 {dimension_numbers = #tpu.dot_dimension_numbers<[1], [0], [0], [1], [0, 0, 1, 1], [], []>} : vector<4096x128xf32>, vector<128x128xf32>, vector<4096x128xf32> -> vector<4096x128xf32>
    %30 = arith.addf %23, %29 : vector<4096x128xf32>
    %31 = arith.index_cast %0 : i32 to index
    %c512 = arith.constant 512 : index
    %c0_17 = arith.constant 0 : index
    %32 = vector.load %arg6[%31, %c512, %c0_17] : memref<2x4608x128xf32, #tpu.memory_space<vmem>>, vector<1x4096x128xf32>
    %33 = vector.shape_cast %32 : vector<1x4096x128xf32> to vector<4096x128xf32>
    %c2 = arith.constant 2 : index
    %c0_18 = arith.constant 0 : index
    %c0_19 = arith.constant 0 : index
    %34 = vector.load %arg3[%c2, %c0_18, %c0_19] : memref<3x128x128xf32, #tpu.memory_space<vmem>>, vector<1x128x128xf32>
    %35 = vector.shape_cast %34 : vector<1x128x128xf32> to vector<128x128xf32>
    %cst_20 = arith.constant dense<0.000000e+00> : vector<4096x128xf32>
    %36 = tpu.matmul %33, %35, %cst_20 {dimension_numbers = #tpu.dot_dimension_numbers<[1], [0], [0], [1], [0, 0, 1, 1], [], []>} : vector<4096x128xf32>, vector<128x128xf32>, vector<4096x128xf32> -> vector<4096x128xf32>
    %37 = arith.addf %30, %36 : vector<4096x128xf32>
    %c0_21 = arith.constant 0 : index
    %c0_22 = arith.constant 0 : index
    %c0_23 = arith.constant 0 : index
    %c0_24 = arith.constant 0 : index
    %38 = vector.load %arg5[%c0_21, %c0_22, %c0_23, %c0_24] : memref<1x1x4096x128xf32, #tpu.memory_space<vmem>>, vector<1x1x4096x128xf32>
    %39 = vector.shape_cast %38 : vector<1x1x4096x128xf32> to vector<4096x128xf32>
    %40 = vector.shape_cast %37 : vector<4096x128xf32> to vector<1x1x4096x128xf32>
    tpu.vector_store %arg5[%c0_21, %c0_22, %c0_23, %c0_24], %40 {strides = array<i32>} : memref<1x1x4096x128xf32, #tpu.memory_space<vmem>>, vector<1x1x4096x128xf32>,
    return
  }
  func.func @transform_1(%arg0: i32, %arg1: i32) -> (i32, i32, i32) {
    %c0_i32 = arith.constant 0 : i32
    %c0_i32_0 = arith.constant 0 : i32
    %c0_i32_1 = arith.constant 0 : i32
    %c0_i32_2 = arith.constant 0 : i32
    return %c0_i32, %c0_i32_0, %c0_i32_1 : i32, i32, i32
  }
  func.func @transform_2(%arg0: i32, %arg1: i32) -> (i32, i32) {
    %c0_i32 = arith.constant 0 : i32
    %c0_i32_0 = arith.constant 0 : i32
    %c0_i32_1 = arith.constant 0 : i32
    return %c0_i32, %c0_i32_0 : i32, i32
  }
  func.func @transform_3(%arg0: i32, %arg1: i32) -> (i32, i32, i32, i32) {
    %c0_i32 = arith.constant 0 : i32
    %c0_i32_0 = arith.constant 0 : i32
    %c0_i32_1 = arith.constant 0 : i32
    return %arg0, %arg1, %c0_i32, %c0_i32_0 : i32, i32, i32, i32
  }
}

</mosaic_0001>

<bundles_post_ra>
// kernel: tpu_custom_call.1
= control target key start
LH: loop header
LB: loop body
LE: loop exit
PB: predicated region body
PF: predicated region fallthrough
CT: control target
= control target key end

     0   :  { %8 = vsyncpa [#allocation5], 0  ;;  %s11172_s0 = inlined_call_operand.hbm [shape: f32[2,4608,128], index: 0, kind: input, shape index: {}]   ;;  %s11173_s1 = inlined_call_operand.hbm [shape: f32[3,128,128], index: 1, kind: input, shape index: {}]   ;;  %s11174_s2 = inlined_call_operand.hbm [shape: f32[1,128], index: 2, kind: input, shape index: {}]   ;;  %s11175_s3 = inlined_call_operand.hbm [shape: f32[2,1,4096,128], index: 3, kind: output, shape index: {}]  }
   0x1   :  { %9 = vsyncpa [#allocation8], 0 }
   0x2   :  { %10 = vsyncpa [#allocation6], 0 }
   0x3   :  { %12 = vsyncpa [#allocation6 + $0x1], 0  ;;  %s9005_s12 = smov 0   ;;  %s9007_s13 = smov 0  }
   0x4   :  { %s9009_s14 = smov 0   ;;  %s9011_s15 = smov 0  }
   0x5   :  { %s9013_s16 = smov 0   ;;  %s9015_s17 = smov 0  }
   0x6 LB: > { %s8645_s18 = sadd.s32 4294967295, %s8976_s17   ;;  %s8646_s19 = sadd.s32 4294967294, %s8976_s17   ;;  %s8976_s17 = sphi %s9015_s17, %s18_s17   ;;  %s8972_s16 = sphi %s9013_s16, %s11508_s16   ;;  %s8968_s15 = sphi %s9011_s15, %s11507_s15   ;;  %s8964_s14 = sphi %s9009_s14, %s11506_s14   ;;  %s8960_s13 = sphi %s9007_s13, %s11505_s13   ;;  %s8956_s12 = sphi %s9005_s12, %s11504_s12  }
   0x7   : > { %s30_s20 = sadd.s32 1, %s8972_s16  ;;  %s81_s21 = sadd.s32 1, %s8964_s14 }
   0x8   : > { %p32_p0 = scmp.ge.s32.totalorder %s30_s20, 2  ;;  %p91_p1 = scmp.ne.s32.totalorder %s8964_s14, %s8960_s13 }
   0x9   : > { %p92_p2 = scmp.eq.s32.totalorder %s8645_s18, 1  ;;  %p97_p3 = scmp.ne.s32.totalorder %s8960_s13, %s8956_s12 }
   0xa   : > { %s11510_s20 = smov (%p32_p0, %s30_s20), 0  ;;  %p98_p5 = scmp.eq.s32.totalorder %s8646_s19, 1 }
   0xb   : > { %p9045_p4 = por %p92_p2, %p91_p1  ;;  %s76_s23 = ssub.s32 %s8972_s16, %s11510_s20 }
   0xc   : > { %p8647_p6 = scmp.ge.s32.totalorder %s8976_s17, 1  ;;  %p79_p7 = scmp.eq.s32.totalorder %s76_s23, 0 }
   0xd   : > { %p9052_p8 = por %p98_p5, %p97_p3  ;;  %p105_p9 = scmp.lt.s32.totalorder %s8976_s17, 3 }
   0xe   : > { %s9058_s25 = scalar_select %p79_p7, %s8964_s14, %s81_s21  }
   0xf   : > { %p9060_p10 = pnand %p8647_p6, %p105_p9  ;;  %p9064_p11 = scmp.eq.s32.totalorder %s8645_s18, 0 }
  0x10   : > { %s116_s30 = sshll.u32 %s11173_s1, 4  ;;  %s8978_s4 = smov [#allocation4]   ;;  %s117_s30 = int_to_ptr.hbm [resolvable:$true] %s116_s30 }
  0x11   : > { %p8720_p12 = pneg %p9060_p10  ;;  %s118_s5 = sshll.u32 %s8978_s4, 4  ;;  %s119_s5 = int_to_ptr.vmem [resolvable:$true] %s118_s5 }
  0x12   : > { %s131_s8 = sshll.u32 %s11174_s2, 4  ;;  %s8979_s9 = smov 128   ;;  %s132_s8 = int_to_ptr.hbm [resolvable:$true] %s131_s8 }
  0x13   : > { %p8721_p13 = pnand %p9064_p11, %p8720_p12  ;;  %s8980_s10 = smov 8  }
  0x14   : > { %s8981_s11 = smov [#allocation7]   ;;  %146 = sbr.rel (%p9060_p10) target bundleno = 3280 (0xcd0), region = 28 }
  0x15   : > { %8723 = dma.hbm_to_vmem [thread:$0]  (!%p8721_p13), %s117_s30, 6144, %s119_s5, [#allocation5], %s8979_s9, %s8979_s9, %s8980_s10  }
  0x16   : > { %s133_s18 = sshll.u32 %s8981_s11, 4  ;;  %s134_s18 = int_to_ptr.vmem [resolvable:$true] %s133_s18 }
  0x17   : > { %8726 = dma.hbm_to_vmem [thread:$0]  (!%p8721_p13), %s132_s8, 16, %s134_s18, [#allocation8]  }
  0x19   : > { %8941 = dma.done.wait (%p9064_p11), [#allocation5], 6144  }
  0x1a   : > { %8943 = vsyncadd (%p9064_p11), [#allocation5], 4294961152 }
  0x1b   : > { %8945 = dma.done.wait (%p9064_p11), [#allocation8], 16  }
  0x1c   : > { %8947 = vsyncadd (%p9064_p11), [#allocation8], 4294967280  ;;  %s166_s19 = sand.u32 1, %s8960_s13   ;;  %s174_s21 = smul.u32 4608, %s8968_s15 }
  0x1d   : > { %s8653_s23 = sshll.u32 %s166_s19, 12  ;;  %s8982_s4 = smov [#allocation2]  }
  0x1e   : > { %s175_s29 = scalar_lea.hbm %s11172_s0, %s174_s21  ;;  %s185_s5 = sshll.u32 %s8982_s4, 4  ;;  %s186_s5 = int_to_ptr.vmem [resolvable:$true] %s185_s5 }
  0x1f   : > { %s183_s30 = sshll.u32 %s175_s29, 4  ;;  %s8868_s9 = scalar_lea.hbm %s11172_s0, 9216  ;;  %s184_s30 = int_to_ptr.hbm [resolvable:$true] %s183_s30 }
  0x20   : > { %s8864_s6 = sshra.s32 %s184_s30, 4  ;;  %s8865_s6 = int_to_ptr.hbm [resolvable:$true] %s8864_s6 }
  0x21   : > { %s8866_s27 = scalar_lea.hbm %s8865_s6, 4608  ;;  %p8869_p1 = scmp.lt.s32.totalorder %s8865_s6, %s11172_s0 }
  0x22   : > { %p8867_p0 = scmp.ne.s32.totalorder %s8865_s6, %s8866_s27  ;;  %p8870_p2 = scmp.lt.s32.totalorder %s8868_s9, %s8866_s27 }
  0x24   : > { %p8871_p3 = por %p8870_p2, %p8869_p1 }
  0x26   : > { %p8872_p5 = pnand %p8871_p3, %p8867_p0 }
  0x28   : > { %8875 = shalt.err (!%p8872_p5)  }
  0x29   : > { %188 = dma.hbm_to_vmem [thread:$0]  %s184_s30, 73728, %s186_s5, [#allocation3] }
  0x2a   : > { %s9101_s18 = scalar_lea.vmem [#allocation9], %s8653_s23 }
  0x2b   : > { %8948 = dma.done.wait [#allocation3], 73728 }
  0x2c   : > { %8949 = vsyncadd [#allocation3], 4294893568  ;;  %v749_v0 = vld [vmem:[#allocation4 + $0x78] sm:$0xff]  ;;  %v748_v2 = vld [vmem:[#allocation4 + $0x70] sm:$0xff]  ;;  %s8661_s21 = sshll.u32 %s8968_s15, 12  ;;  %s8533_s29 = sshll.u32 %s9101_s18, 4  ;;  %s8534_s29 = int_to_ptr.vmem [resolvable:$true] %s8533_s29 }
  0x2d   : > { %v9103_v1 = vld [vmem:[#allocation4 + $0x178] sm:$0xff]  ;;  %8662 = vmatpush.msra.mxu3 %v749_v0  ;;  %v9106_v3 = vld [vmem:[#allocation4 + $0x170] sm:$0xff]  ;;  %750 = vmatpush.msra.mxu0 %v749_v0  ;;  %v747_v5 = vld [vmem:[#allocation4 + $0x68] sm:$0xff]  ;;  %s8532_s28 = scalar_lea.hbm %s11175_s3, %s8661_s21  ;;  %s8519_s15 = scalar_lea.sflag [#allocation6], %s166_s19 }
  0x2e   : > { %5941 = vmatpush.msra.mxu2 %v9103_v1  ;;  %v9108_v4 = vld [vmem:[#allocation4 + $0xf8] sm:$0xff]  ;;  %v9111_v6 = vld [vmem:[#allocation4 + $0x168] sm:$0xff]  ;;  %v9113_v7 = vld [vmem:[#allocation4 + $0xf0] sm:$0xff]  ;;  %s8535_s30 = sshll.u32 %s8532_s28, 4  ;;  %s8908_s7 = scalar_lea.hbm %s11175_s3, 8192  ;;  %s8536_s30 = int_to_ptr.hbm [resolvable:$true] %s8535_s30 }
  0x2f   : > { %3347 = vmatpush.msra.mxu1 %v9108_v4  ;;  %8663 = vmatpush.msra.mxu3 %v748_v2  ;;  %v9116_v8 = vld [vmem:[#allocation4 + $0xe8] sm:$0xff]  ;;  %v746_v9 = vld [vmem:[#allocation4 + $0x60] sm:$0xff]  ;;  %v745_v12 = vld [vmem:[#allocation4 + $0x58] sm:$0xff]  ;;  %s8902_s4 = sshra.s32 %s8536_s30, 4  ;;  %s8903_s4 = int_to_ptr.hbm [resolvable:$true] %s8902_s4 }
  0x30   : > { %5942 = vmatpush.msra.mxu2 %v9106_v3  ;;  %751 = vmatpush.msra.mxu0 %v748_v2  ;;  %v9119_v10 = vld [vmem:[#allocation4 + $0x160] sm:$0xff]  ;;  %v9125_v13 = vld [vmem:[#allocation4 + $0x158] sm:$0xff]  ;;  %v744_v15 = vld [vmem:[#allocation4 + $0x50] sm:$0xff]  ;;  %s8904_s5 = scalar_lea.hbm %s8903_s4, 4096  ;;  %p8909_p10 = scmp.lt.s32.totalorder %s8903_s4, %s11175_s3 }
  0x31   : > { %3348 = vmatpush.msra.mxu1 %v9113_v7  ;;  %8664 = vmatpush.msra.mxu3 %v747_v5  ;;  %v9122_v11 = vld [vmem:[#allocation4 + $0xe0] sm:$0xff]  ;;  %v9128_v14 = vld [vmem:[#allocation4 + $0xd8] sm:$0xff]  ;;  %v9131_v16 = vld [vmem:[#allocation4 + $0x150] sm:$0xff]  ;;  %p8905_p6 = scmp.ne.s32.totalorder %s8903_s4, %s8904_s5  ;;  %p8910_p11 = scmp.lt.s32.totalorder %s8908_s7, %s8904_s5 }
  0x32   : > { %5943 = vmatpush.msra.mxu2 %v9111_v6  ;;  %752 = vmatpush.msra.mxu0 %v747_v5  ;;  %v9134_v17 = vld [vmem:[#allocation4 + $0xd0] sm:$0xff]  ;;  %v743_v18 = vld [vmem:[#allocation4 + $0x48] sm:$0xff]  ;;  %v742_v21 = vld [vmem:[#allocation4 + $0x40] sm:$0xff] }
  0x33   : > { %3349 = vmatpush.msra.mxu1 %v9116_v8  ;;  %8665 = vmatpush.msra.mxu3 %v746_v9  ;;  %v9137_v19 = vld [vmem:[#allocation4 + $0x148] sm:$0xff]  ;;  %v9143_v22 = vld [vmem:[#allocation4 + $0x140] sm:$0xff]  ;;  %v741_v24 = vld [vmem:[#allocation4 + $0x38] sm:$0xff]  ;;  %p8906_p7 = pnand %p8905_p6, %p9045_p4  ;;  %p8911_p12 = por %p8910_p11, %p8909_p10 }
  0x34   : > { %5944 = vmatpush.msra.mxu2 %v9119_v10  ;;  %753 = vmatpush.msra.mxu0 %v746_v9  ;;  %v9140_v20 = vld [vmem:[#allocation4 + $0xc8] sm:$0xff]  ;;  %v9146_v23 = vld [vmem:[#allocation4 + $0xc0] sm:$0xff]  ;;  %v9149_v25 = vld [vmem:[#allocation4 + $0x138] sm:$0xff] }
  0x35   : > { %3350 = vmatpush.msra.mxu1 %v9122_v11  ;;  %8666 = vmatpush.msra.mxu3 %v745_v12  ;;  %v9152_v26 = vld [vmem:[#allocation4 + $0xb8] sm:$0xff]  ;;  %v740_v27 = vld [vmem:[#allocation4 + $0x30] sm:$0xff]  ;;  %v739_v30 = vld [vmem:[#allocation4 + $0x28] sm:$0xff]  ;;  %p8907_p9 = pneg %p8906_p7 }
  0x36   : > { %5945 = vmatpush.msra.mxu2 %v9125_v13  ;;  %754 = vmatpush.msra.mxu0 %v745_v12  ;;  %v9155_v28 = vld [vmem:[#allocation4 + $0x130] sm:$0xff]  ;;  %v9161_v31 = vld [vmem:[#allocation4 + $0x128] sm:$0xff]  ;;  %v738_v33 = vld [vmem:[#allocation4 + $0x20] sm:$0xff] }
  0x37   : > { %3351 = vmatpush.msra.mxu1 %v9128_v14  ;;  %8667 = vmatpush.msra.mxu3 %v744_v15  ;;  %v9158_v29 = vld [vmem:[#allocation4 + $0xb0] sm:$0xff]  ;;  %v9164_v32 = vld [vmem:[#allocation4 + $0xa8] sm:$0xff]  ;;  %v9167_v34 = vld [vmem:[#allocation4 + $0x120] sm:$0xff]  ;;  %p8912_p13 = pnand %p8911_p12, %p8907_p9 }
  0x38   : > { %5946 = vmatpush.msra.mxu2 %v9131_v16  ;;  %755 = vmatpush.msra.mxu0 %v744_v15  ;;  %v9170_v35 = vld [vmem:[#allocation4 + $0xa0] sm:$0xff]  ;;  %v737_v36 = vld [vmem:[#allocation4 + $0x18] sm:$0xff]  ;;  %v736_v39 = vld [vmem:[#allocation4 + $0x10] sm:$0xff] }
  0x39   : > { %3352 = vmatpush.msra.mxu1 %v9134_v17  ;;  %8668 = vmatpush.msra.mxu3 %v743_v18  ;;  %v9173_v37 = vld [vmem:[#allocation4 + $0x118] sm:$0xff]  ;;  %v9179_v40 = vld [vmem:[#allocation4 + $0x110] sm:$0xff]  ;;  %v735_v42 = vld [vmem:[#allocation4 + $0x8] sm:$0xff] }
  0x3a   : > { %5947 = vmatpush.msra.mxu2 %v9137_v19  ;;  %756 = vmatpush.msra.mxu0 %v743_v18  ;;  %v9176_v38 = vld [vmem:[#allocation4 + $0x98] sm:$0xff]  ;;  %v9182_v41 = vld [vmem:[#allocation4 + $0x90] sm:$0xff]  ;;  %v9185_v43 = vld [vmem:[#allocation4 + $0x108] sm:$0xff] }
  0x3b   : > { %3353 = vmatpush.msra.mxu1 %v9140_v20  ;;  %8669 = vmatpush.msra.mxu3 %v742_v21  ;;  %v3332_v44 = vld [vmem:[#allocation4 + $0x88] sm:$0xff]  ;;  %v734_v45 = vld [vmem:[#allocation4] sm:$0xff]  ;;  %v608_v56 = vld [vmem:[#allocation2 + $0xc10] sm:$0xff] }
  0x3c   : > { %5948 = vmatpush.msra.mxu2 %v9143_v22  ;;  %757 = vmatpush.msra.mxu0 %v742_v21  ;;  %v9189_v46 = vld [vmem:[#allocation4 + $0x100] sm:$0xff]  ;;  %v607_v52 = vld [vmem:[#allocation2 + $0xc08] sm:$0xff]  ;;  %v9211_v57 = vld [vmem:[#allocation2 + $0x210] sm:$0xff] }
  0x3d   : > { %3354 = vmatpush.msra.mxu1 %v9146_v23  ;;  %8670 = vmatpush.msra.mxu3 %v741_v24  ;;  %v606_v47 = vld [vmem:[#allocation2 + $0xc00] sm:$0xff]  ;;  %v9201_v53 = vld [vmem:[#allocation2 + $0x208] sm:$0xff]  ;;  %v224_v58 = vld [vmem:[#allocation2 + $0x10] sm:$0xff] }
  0x3e   : > { %5949 = vmatpush.msra.mxu2 %v9149_v25  ;;  %758 = vmatpush.msra.mxu0 %v741_v24  ;;  %v9192_v48 = vld [vmem:[#allocation2 + $0x200] sm:$0xff]  ;;  %v223_v54 = vld [vmem:[#allocation2 + $0x8] sm:$0xff]  ;;  %v9216_v59 = vld [vmem:[#allocation2 + $0x110] sm:$0xff] }
  0x3f   : > { %3355 = vmatpush.msra.mxu1 %v9152_v26  ;;  %8671 = vmatpush.msra.mxu3 %v740_v27  ;;  %v222_v49 = vld [vmem:[#allocation2] sm:$0xff]  ;;  %v9206_v55 = vld [vmem:[#allocation2 + $0x108] sm:$0xff]  ;;  %v609_v60 = vld [vmem:[#allocation2 + $0xc18] sm:$0xff] }
  0x40   : > { %5950 = vmatpush.msra.mxu2 %v9155_v28  ;;  %759 = vmatpush.msra.mxu0 %v740_v27  ;;  %v3331_v50 = vld [vmem:[#allocation4 + $0x80] sm:$0xff]  ;;  %v9221_v61 = vld [vmem:[#allocation2 + $0x218] sm:$0xff]  ;;  %v227_v9 = vld [vmem:[#allocation2 + $0x28] sm:$0xff] }
  0x41   : > { %3356 = vmatpush.msra.mxu1 %v9158_v29  ;;  %8672 = vmatpush.msra.mxu3 %v739_v30  ;;  %v9196_v51 = vld [vmem:[#allocation2 + $0x100] sm:$0xff]  ;;  %v225_v62 = vld [vmem:[#allocation2 + $0x18] sm:$0xff]  ;;  %v9277_v21 = vld [vmem:[#allocation2 + $0x248] sm:$0xff] }
  0x42   : > { %5951 = vmatpush.msra.mxu2 %v9161_v31  ;;  %760 = vmatpush.msra.mxu0 %v739_v30  ;;  %v9226_v63 = vld [vmem:[#allocation2 + $0x118] sm:$0xff]  ;;  %v610_v0 = vld [vmem:[#allocation2 + $0xc20] sm:$0xff]  ;;  %v616_v24 = vld [vmem:[#allocation2 + $0xc50] sm:$0xff] }
  0x43   : > { %3357 = vmatpush.msra.mxu1 %v9164_v32  ;;  %8673 = vmatpush.msra.mxu3 %v738_v33  ;;  %v9231_v2 = vld [vmem:[#allocation2 + $0x220] sm:$0xff]  ;;  %v613_v12 = vld [vmem:[#allocation2 + $0xc38] sm:$0xff]  ;;  %v9286_v27 = vld [vmem:[#allocation2 + $0x150] sm:$0xff] }
  0x44   : > { %5952 = vmatpush.msra.mxu2 %v9167_v34  ;;  %761 = vmatpush.msra.mxu0 %v738_v33  ;;  %v9234_v5 = vld [vmem:[#allocation2 + $0x120] sm:$0xff]  ;;  %v9264_v15 = vld [vmem:[#allocation2 + $0x138] sm:$0xff] }
  0x45   : > { %3358 = vmatpush.msra.mxu1 %v9170_v35  ;;  %8674 = vmatpush.msra.mxu3 %v737_v36  ;;  %v230_v18 = vld [vmem:[#allocation2 + $0x40] sm:$0xff]  ;;  %v233_v30 = vld [vmem:[#allocation2 + $0x58] sm:$0xff] }
  0x46   : > { %5953 = vmatpush.msra.mxu2 %v9173_v37  ;;  %762 = vmatpush.msra.mxu0 %v737_v36  ;;  %v5424_v33 = vld [vmem:[#allocation2 + $0x260] sm:$0xff]  ;;  %v619_v36 = vld [vmem:[#allocation2 + $0xc68] sm:$0xff] }
  0x47   : > { %3359 = vmatpush.msra.mxu1 %v9176_v38  ;;  %8675 = vmatpush.msra.mxu3 %v736_v39 }
  0x48   : > { %5954 = vmatpush.msra.mxu2 %v9179_v40  ;;  %763 = vmatpush.msra.mxu0 %v736_v39  ;;  %v2831_v39 = vld [vmem:[#allocation2 + $0x168] sm:$0xff] }
  0x49   : > { %3360 = vmatpush.msra.mxu1 %v9182_v41  ;;  %8676 = vmatpush.msra.mxu3 %v735_v42 }
  0x4a   : > { %5955 = vmatpush.msra.mxu2 %v9185_v43  ;;  %764 = vmatpush.msra.mxu0 %v735_v42  ;;  %v236_v42 = vld [vmem:[#allocation2 + $0x70] sm:$0xff] }
  0x4b   : > { %3361 = vmatpush.msra.mxu1 %v3332_v44  ;;  %8677 = vmatpush.msra.mxu3 %v734_v45 }
  0x4c   : > { %5956 = vmatpush.msra.mxu2 %v9189_v46  ;;  %1918 = vmatmul.f32.vlgmr.msra.gmra.mxu3 %v606_v47  ;;  %v2833_v47 = vld [vmem:[#allocation2 + $0x178] sm:$0xff] }
  0x4d   : > { %5957 = vmatmul.f32.vlgmr.msra.gmra.mxu2 %v9192_v48  ;;  %8678 = vmatpush.msrb.mxu3 %v9108_v4  ;;  %v226_v4 = vld [vmem:[#allocation2 + $0x20] sm:$0xff] }
  0x4e   : > { %765 = vmatpush.msra.mxu0 %v734_v45  ;;  %3362 = vmatpush.msra.mxu1 %v3331_v50  ;;  %v5427_v45 = vld [vmem:[#allocation2 + $0x278] sm:$0xff] }
  0x4f   : > { %766 = vmatmul.f32.vlgmr.msra.gmra.mxu0 %v222_v49  ;;  %3363 = vmatmul.f32.vlgmr.msra.gmra.mxu1 %v9196_v51  ;;  %v9292_v49 = vld [vmem:[#allocation7] ss:$0 sm:$0xff] }
  0x50   : > { %8679 = vmatpush.msrb.mxu3 %v9113_v7  ;;  %v611_v7 = vld [vmem:[#allocation2 + $0xc28] sm:$0xff] }
  0x52   : > { %8680 = vmatpush.msrb.mxu3 %v9116_v8  ;;  %v9239_v8 = vld [vmem:[#allocation2 + $0x228] sm:$0xff] }
  0x54   : > { %8681 = vmatpush.msrb.mxu3 %v9122_v11  ;;  %v9244_v11 = vld [vmem:[#allocation2 + $0x128] sm:$0xff] }
  0x55   : > { %1921 = vmatmul.f32.gmra.mxu3 %v607_v52  ;;  %5960 = vmatmul.f32.gmra.mxu2 %v9201_v53  ;;  %v5428_v52 = vld [vmem:[#allocation2 + $0x280] sm:$0xff] }
  0x56   : > { %8682 = vmatpush.msrb.mxu3 %v9128_v14  ;;  %v229_v14 = vld [vmem:[#allocation2 + $0x38] sm:$0xff] }
  0x57   : > { %769 = vmatmul.f32.gmra.mxu0 %v223_v54  ;;  %3366 = vmatmul.f32.gmra.mxu1 %v9206_v55 }
  0x58   : > { %8683 = vmatpush.msrb.mxu3 %v9134_v17  ;;  %v9269_v17 = vld [vmem:[#allocation2 + $0x240] sm:$0xff] }
  0x5a   : > { %8684 = vmatpush.msrb.mxu3 %v9140_v20  ;;  %v615_v20 = vld [vmem:[#allocation2 + $0xc48] sm:$0xff] }
  0x5c   : > { %8685 = vmatpush.msrb.mxu3 %v9146_v23  ;;  %v9280_v23 = vld [vmem:[#allocation2 + $0x148] sm:$0xff] }
  0x5d   : > { %1924 = vmatmul.f32.gmra.mxu3 %v608_v56  ;;  %5963 = vmatmul.f32.gmra.mxu2 %v9211_v57  ;;  %v238_v56 = vld [vmem:[#allocation2 + $0x80] sm:$0xff] }
  0x5e   : > { %8686 = vmatpush.msrb.mxu3 %v9152_v26  ;;  %v232_v26 = vld [vmem:[#allocation2 + $0x50] sm:$0xff] }
  0x5f   : > { %772 = vmatmul.f32.gmra.mxu0 %v224_v58  ;;  %3369 = vmatmul.f32.gmra.mxu1 %v9216_v59 }
  0x60   : > { %8687 = vmatpush.msrb.mxu3 %v9158_v29  ;;  %v5423_v29 = vld [vmem:[#allocation2 + $0x258] sm:$0xff] }
  0x62   : > { %8688 = vmatpush.msrb.mxu3 %v9164_v32  ;;  %v618_v32 = vld [vmem:[#allocation2 + $0xc60] sm:$0xff] }
  0x64   : > { %8689 = vmatpush.msrb.mxu3 %v9170_v35  ;;  %v2830_v35 = vld [vmem:[#allocation2 + $0x160] sm:$0xff] }
  0x65   : > { %1927 = vmatmul.f32.gmra.mxu3 %v609_v60  ;;  %5966 = vmatmul.f32.gmra.mxu2 %v9221_v61 }
  0x66   : > { %8690 = vmatpush.msrb.mxu3 %v9176_v38  ;;  %v235_v38 = vld [vmem:[#allocation2 + $0x68] sm:$0xff] }
  0x67   : > { %775 = vmatmul.f32.gmra.mxu0 %v225_v62  ;;  %3372 = vmatmul.f32.gmra.mxu1 %v9226_v63  ;;  %v2834_v62 = vld [vmem:[#allocation2 + $0x180] sm:$0xff] }
  0x68   : > { %8691 = vmatpush.msrb.mxu3 %v9182_v41  ;;  %v5426_v41 = vld [vmem:[#allocation2 + $0x270] sm:$0xff] }
  0x6a   : > { %8692 = vmatpush.msrb.mxu3 %v3332_v44  ;;  %v621_v44 = vld [vmem:[#allocation2 + $0xc78] sm:$0xff] }
  0x6c   : > { %8693 = vmatpush.msrb.mxu3 %v3331_v50  ;;  %v622_v50 = vld [vmem:[#allocation2 + $0xc80] sm:$0xff] }
  0x6d   : > { %1930 = vmatmul.f32.gmra.mxu3 %v610_v0  ;;  %5969 = vmatmul.f32.gmra.mxu2 %v9231_v2 }
  0x6e   : > { %8694 = vmatpush.msra.mxu3 %v9103_v1  ;;  %v612_v1 = vld [vmem:[#allocation2 + $0xc30] sm:$0xff] }
  0x6f   : > { %778 = vmatmul.f32.gmra.mxu0 %v226_v4  ;;  %3375 = vmatmul.f32.gmra.mxu1 %v9234_v5 }
  0x70   : > { %8695 = vmatpush.msra.mxu3 %v9106_v3  ;;  %v9249_v3 = vld [vmem:[#allocation2 + $0x230] sm:$0xff] }
  0x72   : > { %8696 = vmatpush.msra.mxu3 %v9111_v6  ;;  %v228_v6 = vld [vmem:[#allocation2 + $0x30] sm:$0xff] }
  0x74   : > { %8697 = vmatpush.msra.mxu3 %v9119_v10  ;;  %v9254_v10 = vld [vmem:[#allocation2 + $0x130] sm:$0xff] }
  0x75   : > { %1933 = vmatmul.f32.gmra.mxu3 %v611_v7  ;;  %5972 = vmatmul.f32.gmra.mxu2 %v9239_v8 }
  0x76   : > { %8698 = vmatpush.msra.mxu3 %v9125_v13  ;;  %v9259_v13 = vld [vmem:[#allocation2 + $0x238] sm:$0xff] }
  0x77   : > { %781 = vmatmul.f32.gmra.mxu0 %v227_v9  ;;  %3378 = vmatmul.f32.gmra.mxu1 %v9244_v11 }
  0x78   : > { %8699 = vmatpush.msra.mxu3 %v9131_v16  ;;  %v614_v16 = vld [vmem:[#allocation2 + $0xc40] sm:$0xff] }
  0x7a   : > { %8700 = vmatpush.msra.mxu3 %v9137_v19  ;;  %v9274_v19 = vld [vmem:[#allocation2 + $0x140] sm:$0xff] }
  0x7c   : > { %8701 = vmatpush.msra.mxu3 %v9143_v22  ;;  %v231_v22 = vld [vmem:[#allocation2 + $0x48] sm:$0xff] }
  0x7d   : > { %1936 = vmatmul.f32.gmra.mxu3 %v612_v1  ;;  %5975 = vmatmul.f32.gmra.mxu2 %v9249_v3  ;;  %v623_v1 = vld [vmem:[#allocation2 + $0xc88] sm:$0xff] }
  0x7e   : > { %8702 = vmatpush.msra.mxu3 %v9149_v25  ;;  %v9283_v25 = vld [vmem:[#allocation2 + $0x250] sm:$0xff] }
  0x7f   : > { %784 = vmatmul.f32.gmra.mxu0 %v228_v6  ;;  %3381 = vmatmul.f32.gmra.mxu1 %v9254_v10  ;;  %v5429_v6 = vld [vmem:[#allocation2 + $0x288] sm:$0xff] }
  0x80   : > { %8703 = vmatpush.msra.mxu3 %v9155_v28  ;;  %v617_v28 = vld [vmem:[#allocation2 + $0xc58] sm:$0xff] }
  0x82   : > { %8704 = vmatpush.msra.mxu3 %v9161_v31  ;;  %v9289_v31 = vld [vmem:[#allocation2 + $0x158] sm:$0xff] }
  0x84   : > { %8705 = vmatpush.msra.mxu3 %v9167_v34  ;;  %v234_v34 = vld [vmem:[#allocation2 + $0x60] sm:$0xff] }
  0x85   : > { %1939 = vmatmul.f32.gmra.mxu3 %v613_v12  ;;  %5978 = vmatmul.f32.gmra.mxu2 %v9259_v13 }
  0x86   : > { %8706 = vmatpush.msra.mxu3 %v9173_v37  ;;  %v5425_v37 = vld [vmem:[#allocation2 + $0x268] sm:$0xff] }
  0x87   : > { %787 = vmatmul.f32.gmra.mxu0 %v229_v14  ;;  %3384 = vmatmul.f32.gmra.mxu1 %v9264_v15  ;;  %v239_v14 = vld [vmem:[#allocation2 + $0x88] sm:$0xff] }
  0x88   : > { %8707 = vmatpush.msra.mxu3 %v9179_v40  ;;  %v620_v40 = vld [vmem:[#allocation2 + $0xc70] sm:$0xff] }
  0x8a   : > { %8708 = vmatpush.msra.mxu3 %v9185_v43  ;;  %v2832_v43 = vld [vmem:[#allocation2 + $0x170] sm:$0xff] }
  0x8c   : > { %8709 = vmatpush.msra.mxu3 %v9189_v46  ;;  %v237_v46 = vld [vmem:[#allocation2 + $0x78] sm:$0xff] }
  0x8d   : > { %1942 = vmatmul.f32.gmra.mxu3 %v614_v16  ;;  %5981 = vmatmul.f32.gmra.mxu2 %v9269_v17 }
  0x8f   : > { %790 = vmatmul.f32.gmra.mxu0 %v230_v18  ;;  %3387 = vmatmul.f32.gmra.mxu1 %v9274_v19 }
  0x95   : > { %1945 = vmatmul.f32.gmra.mxu3 %v615_v20  ;;  %5984 = vmatmul.f32.gmra.mxu2 %v9277_v21  ;;  %v2835_v20 = vld [vmem:[#allocation2 + $0x188] sm:$0xff] }
  0x97   : > { %793 = vmatmul.f32.gmra.mxu0 %v231_v22  ;;  %3390 = vmatmul.f32.gmra.mxu1 %v9280_v23 }
  0x9d   : > { %1948 = vmatmul.f32.gmra.mxu3 %v616_v24  ;;  %5987 = vmatmul.f32.gmra.mxu2 %v9283_v25 }
  0x9f   : > { %796 = vmatmul.f32.gmra.mxu0 %v232_v26  ;;  %3393 = vmatmul.f32.gmra.mxu1 %v9286_v27 }
  0xa5   : > { %1951 = vmatmul.f32.gmra.mxu3 %v617_v28  ;;  %5990 = vmatmul.f32.gmra.mxu2 %v5423_v29  ;;  %v624_v29 = vld [vmem:[#allocation2 + $0xc90] sm:$0xff] }
  0xa7   : > { %799 = vmatmul.f32.gmra.mxu0 %v233_v30  ;;  %3396 = vmatmul.f32.gmra.mxu1 %v9289_v31  ;;  %v5430_v30 = vld [vmem:[#allocation2 + $0x290] sm:$0xff] }
  0xad   : > { %1954 = vmatmul.f32.gmra.mxu3 %v618_v32  ;;  %5993 = vmatmul.f32.gmra.mxu2 %v5424_v33  ;;  %v240_v33 = vld [vmem:[#allocation2 + $0x90] sm:$0xff] }
  0xaf   : > { %802 = vmatmul.f32.gmra.mxu0 %v234_v34  ;;  %3399 = vmatmul.f32.gmra.mxu1 %v2830_v35 }
  0xb5   : > { %1957 = vmatmul.f32.gmra.mxu3 %v619_v36  ;;  %5996 = vmatmul.f32.gmra.mxu2 %v5425_v37  ;;  %v2836_v36 = vld [vmem:[#allocation2 + $0x190] sm:$0xff] }
  0xb7   : > { %805 = vmatmul.f32.gmra.mxu0 %v235_v38  ;;  %3402 = vmatmul.f32.gmra.mxu1 %v2831_v39 }
  0xbd   : > { %1960 = vmatmul.f32.gmra.mxu3 %v620_v40  ;;  %5999 = vmatmul.f32.gmra.mxu2 %v5426_v41  ;;  %v625_v41 = vld [vmem:[#allocation2 + $0xc98] sm:$0xff] }
  0xbf   : > { %808 = vmatmul.f32.gmra.mxu0 %v236_v42  ;;  %3405 = vmatmul.f32.gmra.mxu1 %v2832_v43  ;;  %v5431_v42 = vld [vmem:[#allocation2 + $0x298] sm:$0xff] }
  0xc5   : > { %1963 = vmatmul.f32.gmra.mxu3 %v621_v44  ;;  %6002 = vmatmul.f32.gmra.mxu2 %v5427_v45  ;;  %v241_v44 = vld [vmem:[#allocation2 + $0x98] sm:$0xff] }
  0xc7   : > { %811 = vmatmul.f32.gmra.mxu0 %v237_v46  ;;  %3408 = vmatmul.f32.gmra.mxu1 %v2833_v47  ;;  %v2837_v47 = vld [vmem:[#allocation2 + $0x198] sm:$0xff] }
  0xcc   : > { %v767_v54 = vpop.f32.mrf.mxu0  ;;  %v3364_v60 = vpop.f32.mrf.mxu1 }
  0xcd   : > { %v2306_v58 = vadd.f32 %v9292_v49, %v767_v54  ;;  %1966 = vmatmul.f32.gmra.mxu3 %v622_v50  ;;  %6005 = vmatmul.f32.gmra.mxu2 %v5428_v52 }
  0xcf   : > { %v4900_v0 = vadd.f32 %v3364_v60, %v2306_v58  ;;  %814 = vmatmul.f32.gmra.mxu0 %v238_v56  ;;  %v9295_v4 = vpop.f32.mrf.mxu3  ;;  %3411 = vmatmul.f32.gmra.mxu1 %v2834_v62  ;;  %v626_v58 = vld [vmem:[#allocation2 + $0xca0] sm:$0xff] }
  0xd0   : > { %v5958_v7 = vpop.f32.mrf.mxu2  ;;  %v5432_v60 = vld [vmem:[#allocation2 + $0x2a0] sm:$0xff] }
  0xd1   : > { %v7494_v9 = vadd.f32 %v5958_v7, %v4900_v0  ;;  %v242_v0 = vld [vmem:[#allocation2 + $0xa0] sm:$0xff] }
  0xd3   : > { %8006 = vst [vmem:[%s9101_s18] sm:$0xff] %v7494_v9 }
  0xd4   : > { %v770_v12 = vpop.f32.mrf.mxu0  ;;  %v3367_v18 = vpop.f32.mrf.mxu1 }
  0xd5   : > { %v2307_v16 = vadd.f32 %v9292_v49, %v770_v12  ;;  %1969 = vmatmul.f32.gmra.mxu3 %v623_v1  ;;  %6008 = vmatmul.f32.gmra.mxu2 %v5429_v6  ;;  %v2838_v1 = vld [vmem:[#allocation2 + $0x1a0] sm:$0xff] }
  0xd7   : > { %v4901_v22 = vadd.f32 %v3367_v18, %v2307_v16  ;;  %817 = vmatmul.f32.gmra.mxu0 %v239_v14  ;;  %3414 = vmatmul.f32.gmra.mxu1 %v2835_v20  ;;  %v627_v18 = vld [vmem:[#allocation2 + $0xca8] sm:$0xff] }
  0xd8   : > { %v9299_v24 = vpop.f32.mrf.mxu3  ;;  %v5961_v26 = vpop.f32.mrf.mxu2  ;;  %v5433_v20 = vld [vmem:[#allocation2 + $0x2a8] sm:$0xff] }
  0xd9   : > { %v7495_v28 = vadd.f32 %v5961_v26, %v4901_v22  ;;  %v243_v26 = vld [vmem:[#allocation2 + $0xa8] sm:$0xff] }
  0xdb   : > { %8007 = vst [vmem:[%s9101_s18 + $0x8] sm:$0xff] %v7495_v28 }
  0xdc   : > { %v773_v32 = vpop.f32.mrf.mxu0  ;;  %v3370_v35 = vpop.f32.mrf.mxu1 }
  0xdd   : > { %v2308_v34 = vadd.f32 %v9292_v49, %v773_v32  ;;  %1972 = vmatmul.f32.gmra.mxu3 %v624_v29  ;;  %6011 = vmatmul.f32.gmra.mxu2 %v5430_v30  ;;  %v2839_v30 = vld [vmem:[#allocation2 + $0x1a8] sm:$0xff] }
  0xdf   : > { %v4902_v37 = vadd.f32 %v3370_v35, %v2308_v34  ;;  %820 = vmatmul.f32.gmra.mxu0 %v240_v33  ;;  %3417 = vmatmul.f32.gmra.mxu1 %v2836_v36  ;;  %v628_v36 = vld [vmem:[#allocation2 + $0xcb0] sm:$0xff] }
  0xe0   : > { %v9303_v38 = vpop.f32.mrf.mxu3  ;;  %v5964_v39 = vpop.f32.mrf.mxu2 }
  0xe1   : > { %v7496_v40 = vadd.f32 %v5964_v39, %v4902_v37  ;;  %v5434_v37 = vld [vmem:[#allocation2 + $0x2b0] sm:$0xff] }
  0xe3   : > { %8008 = vst [vmem:[%s9101_s18 + $0x10] sm:$0xff] %v7496_v40  ;;  %v244_v40 = vld [vmem:[#allocation2 + $0xb0] sm:$0xff] }
  0xe4   : > { %v776_v43 = vpop.f32.mrf.mxu0  ;;  %v3373_v46 = vpop.f32.mrf.mxu1 }
  0xe5   : > { %v2309_v45 = vadd.f32 %v9292_v49, %v776_v43  ;;  %1975 = vmatmul.f32.gmra.mxu3 %v625_v41  ;;  %6014 = vmatmul.f32.gmra.mxu2 %v5431_v42  ;;  %v2840_v43 = vld [vmem:[#allocation2 + $0x1b0] sm:$0xff] }
  0xe7   : > { %v4903_v50 = vadd.f32 %v3373_v46, %v2309_v45  ;;  %823 = vmatmul.f32.gmra.mxu0 %v241_v44  ;;  %3420 = vmatmul.f32.gmra.mxu1 %v2837_v47 }
  0xe8   : > { %v9307_v52 = vpop.f32.mrf.mxu3  ;;  %v5967_v54 = vpop.f32.mrf.mxu2 }
  0xe9   : > { %v7497_v56 = vadd.f32 %v5967_v54, %v4903_v50  ;;  %v629_v50 = vld [vmem:[#allocation2 + $0xcb8] sm:$0xff] }
  0xea   : > { %v5435_v54 = vld [vmem:[#allocation2 + $0x2b8] sm:$0xff] }
  0xeb   : > { %8009 = vst [vmem:[%s9101_s18 + $0x18] sm:$0xff] %v7497_v56 }
  0xec   : > { %v779_v62 = vpop.f32.mrf.mxu0  ;;  %v3376_v9 = vpop.f32.mrf.mxu1 }
  0xed   : > { %v2310_v7 = vadd.f32 %v9292_v49, %v779_v62  ;;  %1978 = vmatmul.f32.gmra.mxu3 %v626_v58  ;;  %6017 = vmatmul.f32.gmra.mxu2 %v5432_v60  ;;  %v245_v58 = vld [vmem:[#allocation2 + $0xb8] sm:$0xff] }
  0xef   : > { %v4904_v6 = vadd.f32 %v3376_v9, %v2310_v7  ;;  %826 = vmatmul.f32.gmra.mxu0 %v242_v0  ;;  %3423 = vmatmul.f32.gmra.mxu1 %v2838_v1  ;;  %v2841_v0 = vld [vmem:[#allocation2 + $0x1b8] sm:$0xff] }
  0xf0   : > { %v9311_v12 = vpop.f32.mrf.mxu3  ;;  %v5970_v14 = vpop.f32.mrf.mxu2 }
  0xf1   : > { %v7498_v16 = vadd.f32 %v5970_v14, %v4904_v6  ;;  %v630_v14 = vld [vmem:[#allocation2 + $0xcc0] sm:$0xff] }
  0xf3   : > { %8010 = vst [vmem:[%s9101_s18 + $0x20] sm:$0xff] %v7498_v16  ;;  %v5436_v16 = vld [vmem:[#allocation2 + $0x2c0] sm:$0xff] }
  0xf4   : > { %v782_v22 = vpop.f32.mrf.mxu0  ;;  %v3379_v29 = vpop.f32.mrf.mxu1 }
  0xf5   : > { %v2311_v28 = vadd.f32 %v9292_v49, %v782_v22  ;;  %1981 = vmatmul.f32.gmra.mxu3 %v627_v18  ;;  %6020 = vmatmul.f32.gmra.mxu2 %v5433_v20  ;;  %v246_v20 = vld [vmem:[#allocation2 + $0xc0] sm:$0xff] }
  0xf7   : > { %v4905_v32 = vadd.f32 %v3379_v29, %v2311_v28  ;;  %829 = vmatmul.f32.gmra.mxu0 %v243_v26  ;;  %3426 = vmatmul.f32.gmra.mxu1 %v2839_v30  ;;  %v2842_v28 = vld [vmem:[#allocation2 + $0x1c0] sm:$0xff] }
  0xf8   : > { %v9315_v33 = vpop.f32.mrf.mxu3  ;;  %v5973_v34 = vpop.f32.mrf.mxu2 }
  0xf9   : > { %v7499_v35 = vadd.f32 %v5973_v34, %v4905_v32 }
  0xfb   : > { %8011 = vst [vmem:[%s9101_s18 + $0x28] sm:$0xff] %v7499_v35  ;;  %v631_v35 = vld [vmem:[#allocation2 + $0xcc8] sm:$0xff] }
  0xfc   : > { %v785_v39 = vpop.f32.mrf.mxu0  ;;  %v3382_v42 = vpop.f32.mrf.mxu1 }
  0xfd   : > { %v2312_v41 = vadd.f32 %v9292_v49, %v785_v39  ;;  %1984 = vmatmul.f32.gmra.mxu3 %v628_v36  ;;  %6023 = vmatmul.f32.gmra.mxu2 %v5434_v37  ;;  %v5437_v36 = vld [vmem:[#allocation2 + $0x2c8] sm:$0xff] }
  0xfe   : > { %v247_v39 = vld [vmem:[#allocation2 + $0xc8] sm:$0xff] }
  0xff   : > { %v4906_v44 = vadd.f32 %v3382_v42, %v2312_v41  ;;  %832 = vmatmul.f32.gmra.mxu0 %v244_v40  ;;  %3429 = vmatmul.f32.gmra.mxu1 %v2840_v43  ;;  %v2843_v42 = vld [vmem:[#allocation2 + $0x1c8] sm:$0xff] }
 0x100   : > { %v9319_v45 = vpop.f32.mrf.mxu3  ;;  %v5976_v46 = vpop.f32.mrf.mxu2 }
 0x101   : > { %v7500_v47 = vadd.f32 %v5976_v46, %v4906_v44 }
 0x103   : > { %8012 = vst [vmem:[%s9101_s18 + $0x30] sm:$0xff] %v7500_v47 }
 0x104   : > { %v788_v56 = vpop.f32.mrf.mxu0  ;;  %v3385_v62 = vpop.f32.mrf.mxu1 }
 0x105   : > { %v2313_v60 = vadd.f32 %v9292_v49, %v788_v56  ;;  %1987 = vmatmul.f32.gmra.mxu3 %v629_v50  ;;  %6026 = vmatmul.f32.gmra.mxu2 %v5435_v54  ;;  %v632_v50 = vld [vmem:[#allocation2 + $0xcd0] sm:$0xff] }
 0x106   : > { %v5438_v54 = vld [vmem:[#allocation2 + $0x2d0] sm:$0xff] }
 0x107   : > { %v4907_v7 = vadd.f32 %v3385_v62, %v2313_v60  ;;  %835 = vmatmul.f32.gmra.mxu0 %v245_v58  ;;  %3432 = vmatmul.f32.gmra.mxu1 %v2841_v0  ;;  %v248_v58 = vld [vmem:[#allocation2 + $0xd0] sm:$0xff] }
 0x108   : > { %v9323_v9 = vpop.f32.mrf.mxu3  ;;  %v5979_v1 = vpop.f32.mrf.mxu2  ;;  %v2844_v0 = vld [vmem:[#allocation2 + $0x1d0] sm:$0xff] }
 0x109   : > { %v7501_v6 = vadd.f32 %v5979_v1, %v4907_v7 }
 0x10b   : > { %8013 = vst [vmem:[%s9101_s18 + $0x38] sm:$0xff] %v7501_v6 }
 0x10c   : > { %v791_v18 = vpop.f32.mrf.mxu0  ;;  %v3388_v26 = vpop.f32.mrf.mxu1 }
 0x10d   : > { %v2314_v22 = vadd.f32 %v9292_v49, %v791_v18  ;;  %1990 = vmatmul.f32.gmra.mxu3 %v630_v14  ;;  %6029 = vmatmul.f32.gmra.mxu2 %v5436_v16  ;;  %v633_v16 = vld [vmem:[#allocation2 + $0xcd8] sm:$0xff] }
 0x10e   : > { %v5439_v18 = vld [vmem:[#allocation2 + $0x2d8] sm:$0xff] }
 0x10f   : > { %v4908_v29 = vadd.f32 %v3388_v26, %v2314_v22  ;;  %838 = vmatmul.f32.gmra.mxu0 %v246_v20  ;;  %3435 = vmatmul.f32.gmra.mxu1 %v2842_v28  ;;  %v249_v22 = vld [vmem:[#allocation2 + $0xd8] sm:$0xff] }
 0x110   : > { %v9327_v30 = vpop.f32.mrf.mxu3  ;;  %v5982_v32 = vpop.f32.mrf.mxu2 }
 0x111   : > { %v7502_v34 = vadd.f32 %v5982_v32, %v4908_v29  ;;  %v2845_v29 = vld [vmem:[#allocation2 + $0x1d8] sm:$0xff] }
 0x113   : > { %8014 = vst [vmem:[%s9101_s18 + $0x40] sm:$0xff] %v7502_v34 }
 0x114   : > { %v794_v37 = vpop.f32.mrf.mxu0  ;;  %v3391_v41 = vpop.f32.mrf.mxu1 }
 0x115   : > { %v2315_v40 = vadd.f32 %v9292_v49, %v794_v37  ;;  %1993 = vmatmul.f32.gmra.mxu3 %v631_v35  ;;  %6032 = vmatmul.f32.gmra.mxu2 %v5437_v36  ;;  %v634_v37 = vld [vmem:[#allocation2 + $0xce0] sm:$0xff] }
 0x117   : > { %v4909_v43 = vadd.f32 %v3391_v41, %v2315_v40  ;;  %841 = vmatmul.f32.gmra.mxu0 %v247_v39  ;;  %3438 = vmatmul.f32.gmra.mxu1 %v2843_v42  ;;  %v5440_v39 = vld [vmem:[#allocation2 + $0x2e0] sm:$0xff] }
 0x118   : > { %v9331_v44 = vpop.f32.mrf.mxu3  ;;  %v5985_v46 = vpop.f32.mrf.mxu2  ;;  %v250_v41 = vld [vmem:[#allocation2 + $0xe0] sm:$0xff] }
 0x119   : > { %v7503_v47 = vadd.f32 %v5985_v46, %v4909_v43  ;;  %v2846_v46 = vld [vmem:[#allocation2 + $0x1e0] sm:$0xff] }
 0x11b   : > { %8015 = vst [vmem:[%s9101_s18 + $0x48] sm:$0xff] %v7503_v47 }
 0x11c   : > { %v797_v56 = vpop.f32.mrf.mxu0  ;;  %v3394_v62 = vpop.f32.mrf.mxu1 }
 0x11d   : > { %v2316_v60 = vadd.f32 %v9292_v49, %v797_v56  ;;  %1996 = vmatmul.f32.gmra.mxu3 %v632_v50  ;;  %6035 = vmatmul.f32.gmra.mxu2 %v5438_v54 }
 0x11f   : > { %v4910_v7 = vadd.f32 %v3394_v62, %v2316_v60  ;;  %844 = vmatmul.f32.gmra.mxu0 %v248_v58  ;;  %3441 = vmatmul.f32.gmra.mxu1 %v2844_v0  ;;  %v635_v58 = vld [vmem:[#allocation2 + $0xce8] sm:$0xff] }
 0x120   : > { %v9335_v1 = vpop.f32.mrf.mxu3  ;;  %v5988_v6 = vpop.f32.mrf.mxu2  ;;  %v5441_v60 = vld [vmem:[#allocation2 + $0x2e8] sm:$0xff] }
 0x121   : > { %v7504_v14 = vadd.f32 %v5988_v6, %v4910_v7  ;;  %v251_v0 = vld [vmem:[#allocation2 + $0xe8] sm:$0xff] }
 0x123   : > { %8016 = vst [vmem:[%s9101_s18 + $0x50] sm:$0xff] %v7504_v14  ;;  %v2847_v14 = vld [vmem:[#allocation2 + $0x1e8] sm:$0xff] }
 0x124   : > { %v800_v20 = vpop.f32.mrf.mxu0  ;;  %v3397_v28 = vpop.f32.mrf.mxu1 }
 0x125   : > { %v2317_v26 = vadd.f32 %v9292_v49, %v800_v20  ;;  %1999 = vmatmul.f32.gmra.mxu3 %v633_v16  ;;  %6038 = vmatmul.f32.gmra.mxu2 %v5439_v18 }
 0x127   : > { %v4911_v32 = vadd.f32 %v3397_v28, %v2317_v26  ;;  %847 = vmatmul.f32.gmra.mxu0 %v249_v22  ;;  %3444 = vmatmul.f32.gmra.mxu1 %v2845_v29  ;;  %v636_v26 = vld [vmem:[#allocation2 + $0xcf0] sm:$0xff] }
 0x128   : > { %v9339_v34 = vpop.f32.mrf.mxu3  ;;  %v5991_v35 = vpop.f32.mrf.mxu2  ;;  %v5442_v28 = vld [vmem:[#allocation2 + $0x2f0] sm:$0xff] }
 0x129   : > { %v7505_v36 = vadd.f32 %v5991_v35, %v4911_v32  ;;  %v252_v32 = vld [vmem:[#allocation2 + $0xf0] sm:$0xff] }
 0x12b   : > { %8017 = vst [vmem:[%s9101_s18 + $0x58] sm:$0xff] %v7505_v36 }
 0x12c   : > { %v803_v40 = vpop.f32.mrf.mxu0  ;;  %v3400_v43 = vpop.f32.mrf.mxu1 }
 0x12d   : > { %v2318_v42 = vadd.f32 %v9292_v49, %v803_v40  ;;  %2002 = vmatmul.f32.gmra.mxu3 %v634_v37  ;;  %6041 = vmatmul.f32.gmra.mxu2 %v5440_v39  ;;  %v2848_v37 = vld [vmem:[#allocation2 + $0x1f0] sm:$0xff] }
 0x12f   : > { %v4912_v47 = vadd.f32 %v3400_v43, %v2318_v42  ;;  %850 = vmatmul.f32.gmra.mxu0 %v250_v41  ;;  %3447 = vmatmul.f32.gmra.mxu1 %v2846_v46  ;;  %v637_v43 = vld [vmem:[#allocation2 + $0xcf8] sm:$0xff] }
 0x130   : > { %v9343_v50 = vpop.f32.mrf.mxu3  ;;  %v5994_v54 = vpop.f32.mrf.mxu2  ;;  %v5443_v46 = vld [vmem:[#allocation2 + $0x2f8] sm:$0xff] }
 0x131   : > { %v7506_v56 = vadd.f32 %v5994_v54, %v4912_v47  ;;  %v253_v54 = vld [vmem:[#allocation2 + $0xf8] sm:$0xff] }
 0x133   : > { %8018 = vst [vmem:[%s9101_s18 + $0x60] sm:$0xff] %v7506_v56 }
 0x134   : > { %v806_v62 = vpop.f32.mrf.mxu0  ;;  %v3403_v6 = vpop.f32.mrf.mxu1 }
 0x135   : > { %v2319_v7 = vadd.f32 %v9292_v49, %v806_v62  ;;  %2005 = vmatmul.f32.gmra.mxu3 %v635_v58  ;;  %6044 = vmatmul.f32.gmra.mxu2 %v5441_v60  ;;  %v2849_v60 = vld [vmem:[#allocation2 + $0x1f8] sm:$0xff] }
 0x137   : > { %v4913_v16 = vadd.f32 %v3403_v6, %v2319_v7  ;;  %853 = vmatmul.f32.gmra.mxu0 %v251_v0  ;;  %3450 = vmatmul.f32.gmra.mxu1 %v2847_v14  ;;  %v638_v14 = vld [vmem:[#allocation2 + $0xd00] sm:$0xff] }
 0x138   : > { %v9347_v18 = vpop.f32.mrf.mxu3  ;;  %v5997_v20 = vpop.f32.mrf.mxu2 }
 0x139   : > { %v7507_v22 = vadd.f32 %v5997_v20, %v4913_v16  ;;  %v5444_v16 = vld [vmem:[#allocation2 + $0x300] sm:$0xff] }
 0x13b   : > { %8019 = vst [vmem:[%s9101_s18 + $0x68] sm:$0xff] %v7507_v22 }
 0x13c   : > { %v809_v29 = vpop.f32.mrf.mxu0  ;;  %v3406_v36 = vpop.f32.mrf.mxu1 }
 0x13d   : > { %v2320_v35 = vadd.f32 %v9292_v49, %v809_v29  ;;  %2008 = vmatmul.f32.gmra.mxu3 %v636_v26  ;;  %6047 = vmatmul.f32.gmra.mxu2 %v5442_v28 }
 0x13f   : > { %v4914_v39 = vadd.f32 %v3406_v36, %v2320_v35  ;;  %856 = vmatmul.f32.gmra.mxu0 %v252_v32  ;;  %3453 = vmatmul.f32.gmra.mxu1 %v2848_v37  ;;  %v639_v36 = vld [vmem:[#allocation2 + $0xd08] sm:$0xff] }
 0x140   : > { %v9351_v40 = vpop.f32.mrf.mxu3  ;;  %v6000_v41 = vpop.f32.mrf.mxu2  ;;  %v5445_v37 = vld [vmem:[#allocation2 + $0x308] sm:$0xff] }
 0x141   : > { %v7508_v42 = vadd.f32 %v6000_v41, %v4914_v39 }
 0x143   : > { %8020 = vst [vmem:[%s9101_s18 + $0x70] sm:$0xff] %v7508_v42 }
 0x144   : > { %v812_v47 = vpop.f32.mrf.mxu0  ;;  %v3409_v58 = vpop.f32.mrf.mxu1 }
 0x145   : > { %v2321_v56 = vadd.f32 %v9292_v49, %v812_v47  ;;  %2011 = vmatmul.f32.gmra.mxu3 %v637_v43  ;;  %6050 = vmatmul.f32.gmra.mxu2 %v5443_v46  ;;  %v640_v47 = vld [vmem:[#allocation2 + $0xd10] sm:$0xff] }
 0x147   : > { %v4915_v62 = vadd.f32 %v3409_v58, %v2321_v56  ;;  %859 = vmatmul.f32.gmra.mxu0 %v253_v54  ;;  %3456 = vmatmul.f32.gmra.mxu1 %v2849_v60  ;;  %v5446_v54 = vld [vmem:[#allocation2 + $0x310] sm:$0xff] }
 0x148   : > { %v9355_v0 = vpop.f32.mrf.mxu3  ;;  %v6003_v7 = vpop.f32.mrf.mxu2 }
 0x149   : > { %v7509_v6 = vadd.f32 %v6003_v7, %v4915_v62 }
 0x14b   : > { %8021 = vst [vmem:[%s9101_s18 + $0x78] sm:$0xff] %v7509_v6  ;;  %v641_v6 = vld [vmem:[#allocation2 + $0xd18] sm:$0xff] }
 0x14c   : > { %v815_v20 = vpop.f32.mrf.mxu0  ;;  %v3412_v26 = vpop.f32.mrf.mxu1 }
 0x14d   : > { %v2322_v22 = vadd.f32 %v9292_v49, %v815_v20  ;;  %2014 = vmatmul.f32.gmra.mxu3 %v638_v14  ;;  %6053 = vmatmul.f32.gmra.mxu2 %v5444_v16  ;;  %v5447_v14 = vld [vmem:[#allocation2 + $0x318] sm:$0xff] }
 0x14f   : > { %v4916_v28 = vadd.f32 %v3412_v26, %v2322_v22  ;;  %862 = vmatmul.f32.gmra.mxu0 %v9196_v51  ;;  %3459 = vmatmul.f32.gmra.mxu1 %v9192_v48 }
 0x150   : > { %v9360_v29 = vpop.f32.mrf.mxu3  ;;  %v6006_v32 = vpop.f32.mrf.mxu2 }
 0x151   : > { %v7510_v35 = vadd.f32 %v6006_v32, %v4916_v28  ;;  %v642_v32 = vld [vmem:[#allocation2 + $0xd20] sm:$0xff] }
 0x153   : > { %8022 = vst [vmem:[%s9101_s18 + $0x80] sm:$0xff] %v7510_v35  ;;  %v5448_v35 = vld [vmem:[#allocation2 + $0x320] sm:$0xff] }
 0x154   : > { %v818_v39 = vpop.f32.mrf.mxu0  ;;  %v3415_v42 = vpop.f32.mrf.mxu1 }
 0x155   : > { %v2323_v41 = vadd.f32 %v9292_v49, %v818_v39  ;;  %2017 = vmatmul.f32.gmra.mxu3 %v639_v36  ;;  %6056 = vmatmul.f32.gmra.mxu2 %v5445_v37 }
 0x157   : > { %v4917_v43 = vadd.f32 %v3415_v42, %v2323_v41  ;;  %865 = vmatmul.f32.gmra.mxu0 %v9206_v55  ;;  %3462 = vmatmul.f32.gmra.mxu1 %v9201_v53 }
 0x158   : > { %v9366_v51 = vpop.f32.mrf.mxu3  ;;  %v6009_v46 = vpop.f32.mrf.mxu2 }
 0x159   : > { %v7511_v48 = vadd.f32 %v6009_v46, %v4917_v43  ;;  %v643_v43 = vld [vmem:[#allocation2 + $0xd28] sm:$0xff] }
 0x15a   : > { %v5449_v46 = vld [vmem:[#allocation2 + $0x328] sm:$0xff] }
 0x15b   : > { %8023 = vst [vmem:[%s9101_s18 + $0x88] sm:$0xff] %v7511_v48 }
 0x15c   : > { %v821_v56 = vpop.f32.mrf.mxu0  ;;  %v3418_v60 = vpop.f32.mrf.mxu1 }
 0x15d   : > { %v2324_v58 = vadd.f32 %v9292_v49, %v821_v56  ;;  %2020 = vmatmul.f32.gmra.mxu3 %v640_v47  ;;  %6059 = vmatmul.f32.gmra.mxu2 %v5446_v54 }
 0x15f   : > { %v4918_v62 = vadd.f32 %v3418_v60, %v2324_v58  ;;  %868 = vmatmul.f32.gmra.mxu0 %v9216_v59  ;;  %3465 = vmatmul.f32.gmra.mxu1 %v9211_v57  ;;  %v644_v60 = vld [vmem:[#allocation2 + $0xd30] sm:$0xff] }
 0x160   : > { %v9372_v55 = vpop.f32.mrf.mxu3  ;;  %v6012_v7 = vpop.f32.mrf.mxu2 }
 0x161   : > { %v7512_v53 = vadd.f32 %v6012_v7, %v4918_v62  ;;  %v5450_v62 = vld [vmem:[#allocation2 + $0x330] sm:$0xff] }
 0x163   : > { %8024 = vst [vmem:[%s9101_s18 + $0x90] sm:$0xff] %v7512_v53 }
 0x164   : > { %v824_v16 = vpop.f32.mrf.mxu0  ;;  %v3421_v22 = vpop.f32.mrf.mxu1 }
 0x165   : > { %v2325_v20 = vadd.f32 %v9292_v49, %v824_v16  ;;  %2023 = vmatmul.f32.gmra.mxu3 %v641_v6  ;;  %6062 = vmatmul.f32.gmra.mxu2 %v5447_v14 }
 0x167   : > { %v4919_v26 = vadd.f32 %v3421_v22, %v2325_v20  ;;  %871 = vmatmul.f32.gmra.mxu0 %v9226_v63  ;;  %3468 = vmatmul.f32.gmra.mxu1 %v9221_v61  ;;  %v645_v20 = vld [vmem:[#allocation2 + $0xd38] sm:$0xff] }
 0x168   : > { %v9378_v59 = vpop.f32.mrf.mxu3  ;;  %v6015_v28 = vpop.f32.mrf.mxu2  ;;  %v5451_v22 = vld [vmem:[#allocation2 + $0x338] sm:$0xff] }
 0x169   : > { %v7513_v57 = vadd.f32 %v6015_v28, %v4919_v26 }
 0x16b   : > { %8025 = vst [vmem:[%s9101_s18 + $0x98] sm:$0xff] %v7513_v57 }
 0x16c   : > { %v827_v36 = vpop.f32.mrf.mxu0  ;;  %v3424_v39 = vpop.f32.mrf.mxu1 }
 0x16d   : > { %v2326_v37 = vadd.f32 %v9292_v49, %v827_v36  ;;  %2026 = vmatmul.f32.gmra.mxu3 %v642_v32  ;;  %6065 = vmatmul.f32.gmra.mxu2 %v5448_v35  ;;  %v646_v36 = vld [vmem:[#allocation2 + $0xd40] sm:$0xff] }
 0x16f   : > { %v4920_v41 = vadd.f32 %v3424_v39, %v2326_v37  ;;  %874 = vmatmul.f32.gmra.mxu0 %v9234_v5  ;;  %3471 = vmatmul.f32.gmra.mxu1 %v9231_v2  ;;  %v5452_v37 = vld [vmem:[#allocation2 + $0x340] sm:$0xff] }
 0x170   : > { %v9384_v63 = vpop.f32.mrf.mxu3  ;;  %v6018_v42 = vpop.f32.mrf.mxu2 }
 0x171   : > { %v7514_v61 = vadd.f32 %v6018_v42, %v4920_v41 }
 0x173   : > { %8026 = vst [vmem:[%s9101_s18 + $0xa0] sm:$0xff] %v7514_v61 }
 0x174   : > { %v830_v48 = vpop.f32.mrf.mxu0  ;;  %v3427_v54 = vpop.f32.mrf.mxu1 }
 0x175   : > { %v2327_v47 = vadd.f32 %v9292_v49, %v830_v48  ;;  %2029 = vmatmul.f32.gmra.mxu3 %v643_v43  ;;  %6068 = vmatmul.f32.gmra.mxu2 %v5449_v46  ;;  %v647_v46 = vld [vmem:[#allocation2 + $0xd48] sm:$0xff] }
 0x176   : > { %v5453_v48 = vld [vmem:[#allocation2 + $0x348] sm:$0xff] }
 0x177   : > { %v4921_v56 = vadd.f32 %v3427_v54, %v2327_v47  ;;  %877 = vmatmul.f32.gmra.mxu0 %v9244_v11  ;;  %3474 = vmatmul.f32.gmra.mxu1 %v9239_v8 }
 0x178   : > { %v9390_v5 = vpop.f32.mrf.mxu3  ;;  %v6021_v58 = vpop.f32.mrf.mxu2 }
 0x179   : > { %v7515_v2 = vadd.f32 %v6021_v58, %v4921_v56 }
 0x17b   : > { %8027 = vst [vmem:[%s9101_s18 + $0xa8] sm:$0xff] %v7515_v2 }
 0x17c   : > { %v833_v7 = vpop.f32.mrf.mxu0  ;;  %v3430_v6 = vpop.f32.mrf.mxu1 }
 0x17d   : > { %v2328_v53 = vadd.f32 %v9292_v49, %v833_v7  ;;  %2032 = vmatmul.f32.gmra.mxu3 %v644_v60  ;;  %6071 = vmatmul.f32.gmra.mxu2 %v5450_v62  ;;  %v648_v60 = vld [vmem:[#allocation2 + $0xd50] sm:$0xff] }
 0x17e   : > { %v5454_v62 = vld [vmem:[#allocation2 + $0x350] sm:$0xff] }
 0x17f   : > { %v4922_v14 = vadd.f32 %v3430_v6, %v2328_v53  ;;  %880 = vmatmul.f32.gmra.mxu0 %v9254_v10  ;;  %3477 = vmatmul.f32.gmra.mxu1 %v9249_v3 }
 0x180   : > { %v9396_v11 = vpop.f32.mrf.mxu3  ;;  %v6024_v16 = vpop.f32.mrf.mxu2 }
 0x181   : > { %v7516_v8 = vadd.f32 %v6024_v16, %v4922_v14 }
 0x183   : > { %8028 = vst [vmem:[%s9101_s18 + $0xb0] sm:$0xff] %v7516_v8  ;;  %v649_v8 = vld [vmem:[#allocation2 + $0xd58] sm:$0xff] }
 0x184   : > { %v836_v26 = vpop.f32.mrf.mxu0  ;;  %v3433_v57 = vpop.f32.mrf.mxu1 }
 0x185   : > { %v2329_v28 = vadd.f32 %v9292_v49, %v836_v26  ;;  %2035 = vmatmul.f32.gmra.mxu3 %v645_v20  ;;  %6074 = vmatmul.f32.gmra.mxu2 %v5451_v22  ;;  %v5455_v20 = vld [vmem:[#allocation2 + $0x358] sm:$0xff] }
 0x187   : > { %v4923_v32 = vadd.f32 %v3433_v57, %v2329_v28  ;;  %883 = vmatmul.f32.gmra.mxu0 %v9264_v15  ;;  %3480 = vmatmul.f32.gmra.mxu1 %v9259_v13  ;;  %v2861_v57 = vld [vmem:[#allocation2 + $0x258] sm:$0xff] }
 0x188   : > { %v9402_v10 = vpop.f32.mrf.mxu3  ;;  %v6027_v35 = vpop.f32.mrf.mxu2 }
 0x189   : > { %v7517_v3 = vadd.f32 %v6027_v35, %v4923_v32 }
 0x18b   : > { %8029 = vst [vmem:[%s9101_s18 + $0xb8] sm:$0xff] %v7517_v3  ;;  %v650_v3 = vld [vmem:[#allocation2 + $0xd60] sm:$0xff] }
 0x18c   : > { %v839_v39 = vpop.f32.mrf.mxu0  ;;  %v3436_v42 = vpop.f32.mrf.mxu1 }
 0x18d   : > { %v2330_v41 = vadd.f32 %v9292_v49, %v839_v39  ;;  %2038 = vmatmul.f32.gmra.mxu3 %v646_v36  ;;  %6077 = vmatmul.f32.gmra.mxu2 %v5452_v37  ;;  %v5456_v36 = vld [vmem:[#allocation2 + $0x360] sm:$0xff] }
 0x18e   : > { %v266_v39 = vld [vmem:[#allocation2 + $0x160] sm:$0xff] }
 0x18f   : > { %v4924_v61 = vadd.f32 %v3436_v42, %v2330_v41  ;;  %886 = vmatmul.f32.gmra.mxu0 %v9274_v19  ;;  %3483 = vmatmul.f32.gmra.mxu1 %v9269_v17 }
 0x190   : > { %v9408_v15 = vpop.f32.mrf.mxu3  ;;  %v6030_v43 = vpop.f32.mrf.mxu2 }
 0x191   : > { %v7518_v13 = vadd.f32 %v6030_v43, %v4924_v61  ;;  %v2862_v61 = vld [vmem:[#allocation2 + $0x260] sm:$0xff] }
 0x193   : > { %8030 = vst [vmem:[%s9101_s18 + $0xc0] sm:$0xff] %v7518_v13 }
 0x194   : > { %v842_v47 = vpop.f32.mrf.mxu0  ;;  %v3439_v56 = vpop.f32.mrf.mxu1 }
 0x195   : > { %v2331_v54 = vadd.f32 %v9292_v49, %v842_v47  ;;  %2041 = vmatmul.f32.gmra.mxu3 %v647_v46  ;;  %6080 = vmatmul.f32.gmra.mxu2 %v5453_v48  ;;  %v651_v48 = vld [vmem:[#allocation2 + $0xd68] sm:$0xff] }
 0x196   : > { %v5457_v47 = vld [vmem:[#allocation2 + $0x368] sm:$0xff] }
 0x197   : > { %v4925_v58 = vadd.f32 %v3439_v56, %v2331_v54  ;;  %889 = vmatmul.f32.gmra.mxu0 %v9280_v23  ;;  %3486 = vmatmul.f32.gmra.mxu1 %v9277_v21  ;;  %v267_v56 = vld [vmem:[#allocation2 + $0x168] sm:$0xff] }
 0x198   : > { %v9414_v19 = vpop.f32.mrf.mxu3  ;;  %v6033_v2 = vpop.f32.mrf.mxu2 }
 0x199   : > { %v7519_v17 = vadd.f32 %v6033_v2, %v4925_v58 }
 0x19b   : > { %8031 = vst [vmem:[%s9101_s18 + $0xc8] sm:$0xff] %v7519_v17  ;;  %v2863_v17 = vld [vmem:[#allocation2 + $0x268] sm:$0xff] }
 0x19c   : > { %v845_v7 = vpop.f32.mrf.mxu0  ;;  %v3442_v6 = vpop.f32.mrf.mxu1 }
 0x19d   : > { %v2332_v53 = vadd.f32 %v9292_v49, %v845_v7  ;;  %2044 = vmatmul.f32.gmra.mxu3 %v648_v60  ;;  %6083 = vmatmul.f32.gmra.mxu2 %v5454_v62 }
 0x19f   : > { %v4926_v14 = vadd.f32 %v3442_v6, %v2332_v53  ;;  %892 = vmatmul.f32.gmra.mxu0 %v9286_v27  ;;  %3489 = vmatmul.f32.gmra.mxu1 %v9283_v25  ;;  %v652_v6 = vld [vmem:[#allocation2 + $0xd70] sm:$0xff] }
 0x1a0   : > { %v9420_v23 = vpop.f32.mrf.mxu3  ;;  %v6036_v16 = vpop.f32.mrf.mxu2 }
 0x1a1   : > { %v7520_v21 = vadd.f32 %v6036_v16, %v4926_v14  ;;  %v5458_v14 = vld [vmem:[#allocation2 + $0x370] sm:$0xff] }
 0x1a3   : > { %8032 = vst [vmem:[%s9101_s18 + $0xd0] sm:$0xff] %v7520_v21  ;;  %v268_v21 = vld [vmem:[#allocation2 + $0x170] sm:$0xff] }
 0x1a4   : > { %v848_v22 = vpop.f32.mrf.mxu0  ;;  %v3445_v28 = vpop.f32.mrf.mxu1 }
 0x1a5   : > { %v2333_v26 = vadd.f32 %v9292_v49, %v848_v22  ;;  %2047 = vmatmul.f32.gmra.mxu3 %v649_v8  ;;  %6086 = vmatmul.f32.gmra.mxu2 %v5455_v20  ;;  %v2864_v22 = vld [vmem:[#allocation2 + $0x270] sm:$0xff] }
 0x1a7   : > { %v4927_v32 = vadd.f32 %v3445_v28, %v2333_v26  ;;  %895 = vmatmul.f32.gmra.mxu0 %v9289_v31  ;;  %3492 = vmatmul.f32.gmra.mxu1 %v2861_v57 }
 0x1a8   : > { %v9426_v27 = vpop.f32.mrf.mxu3  ;;  %v6039_v35 = vpop.f32.mrf.mxu2 }
 0x1a9   : > { %v7521_v25 = vadd.f32 %v6039_v35, %v4927_v32  ;;  %v653_v35 = vld [vmem:[#allocation2 + $0xd78] sm:$0xff] }
 0x1ab   : > { %8033 = vst [vmem:[%s9101_s18 + $0xd8] sm:$0xff] %v7521_v25  ;;  %v5459_v25 = vld [vmem:[#allocation2 + $0x378] sm:$0xff] }
 0x1ac   : > { %v851_v37 = vpop.f32.mrf.mxu0  ;;  %v3448_v42 = vpop.f32.mrf.mxu1 }
 0x1ad   : > { %v2334_v41 = vadd.f32 %v9292_v49, %v851_v37  ;;  %2050 = vmatmul.f32.gmra.mxu3 %v650_v3  ;;  %6089 = vmatmul.f32.gmra.mxu2 %v5456_v36  ;;  %v269_v36 = vld [vmem:[#allocation2 + $0x178] sm:$0xff] }
 0x1af   : > { %v4928_v43 = vadd.f32 %v3448_v42, %v2334_v41  ;;  %898 = vmatmul.f32.gmra.mxu0 %v266_v39  ;;  %3495 = vmatmul.f32.gmra.mxu1 %v2862_v61  ;;  %v2865_v41 = vld [vmem:[#allocation2 + $0x278] sm:$0xff] }
 0x1b0   : > { %v9430_v31 = vpop.f32.mrf.mxu3  ;;  %v6042_v13 = vpop.f32.mrf.mxu2 }
 0x1b1   : > { %v7522_v46 = vadd.f32 %v6042_v13, %v4928_v43 }
 0x1b3   : > { %8034 = vst [vmem:[%s9101_s18 + $0xe0] sm:$0xff] %v7522_v46  ;;  %v654_v46 = vld [vmem:[#allocation2 + $0xd80] sm:$0xff] }
 0x1b4   : > { %v854_v54 = vpop.f32.mrf.mxu0  ;;  %v3451_v2 = vpop.f32.mrf.mxu1 }
 0x1b5   : > { %v2335_v58 = vadd.f32 %v9292_v49, %v854_v54  ;;  %2053 = vmatmul.f32.gmra.mxu3 %v651_v48  ;;  %6092 = vmatmul.f32.gmra.mxu2 %v5457_v47  ;;  %v5460_v48 = vld [vmem:[#allocation2 + $0x380] sm:$0xff] }
 0x1b6   : > { %v270_v54 = vld [vmem:[#allocation2 + $0x180] sm:$0xff] }
 0x1b7   : > { %v4929_v60 = vadd.f32 %v3451_v2, %v2335_v58  ;;  %901 = vmatmul.f32.gmra.mxu0 %v267_v56  ;;  %3498 = vmatmul.f32.gmra.mxu1 %v2863_v17  ;;  %v2866_v2 = vld [vmem:[#allocation2 + $0x280] sm:$0xff] }
 0x1b8   : > { %v9434_v62 = vpop.f32.mrf.mxu3  ;;  %v6045_v7 = vpop.f32.mrf.mxu2 }
 0x1b9   : > { %v7523_v53 = vadd.f32 %v6045_v7, %v4929_v60 }
 0x1bb   : > { %8035 = vst [vmem:[%s9101_s18 + $0xe8] sm:$0xff] %v7523_v53 }
 0x1bc   : > { %v857_v16 = vpop.f32.mrf.mxu0  ;;  %v3454_v20 = vpop.f32.mrf.mxu1 }
 0x1bd   : > { %v2336_v8 = vadd.f32 %v9292_v49, %v857_v16  ;;  %2056 = vmatmul.f32.gmra.mxu3 %v652_v6  ;;  %6095 = vmatmul.f32.gmra.mxu2 %v5458_v14  ;;  %v655_v6 = vld [vmem:[#allocation2 + $0xd88] sm:$0xff] }
 0x1be   : > { %v5461_v14 = vld [vmem:[#allocation2 + $0x388] sm:$0xff] }
 0x1bf   : > { %v4930_v26 = vadd.f32 %v3454_v20, %v2336_v8  ;;  %904 = vmatmul.f32.gmra.mxu0 %v268_v21  ;;  %3501 = vmatmul.f32.gmra.mxu1 %v2864_v22  ;;  %v271_v21 = vld [vmem:[#allocation2 + $0x188] sm:$0xff] }
 0x1c0   : > { %v9438_v28 = vpop.f32.mrf.mxu3  ;;  %v6048_v57 = vpop.f32.mrf.mxu2  ;;  %v2867_v22 = vld [vmem:[#allocation2 + $0x288] sm:$0xff] }
 0x1c1   : > { %v7524_v32 = vadd.f32 %v6048_v57, %v4930_v26 }
 0x1c3   : > { %8036 = vst [vmem:[%s9101_s18 + $0xf0] sm:$0xff] %v7524_v32 }
 0x1c4   : > { %v860_v3 = vpop.f32.mrf.mxu0  ;;  %v3457_v39 = vpop.f32.mrf.mxu1 }
 0x1c5   : > { %v2337_v37 = vadd.f32 %v9292_v49, %v860_v3  ;;  %2059 = vmatmul.f32.gmra.mxu3 %v653_v35  ;;  %6098 = vmatmul.f32.gmra.mxu2 %v5459_v25  ;;  %v656_v25 = vld [vmem:[#allocation2 + $0xd90] sm:$0xff] }
 0x1c6   : > { %v5462_v3 = vld [vmem:[#allocation2 + $0x390] sm:$0xff] }
 0x1c7   : > { %v4931_v42 = vadd.f32 %v3457_v39, %v2337_v37  ;;  %907 = vmatmul.f32.gmra.mxu0 %v269_v36  ;;  %3504 = vmatmul.f32.gmra.mxu1 %v2865_v41  ;;  %v272_v37 = vld [vmem:[#allocation2 + $0x190] sm:$0xff]  ;;  %v9453_v39 = vld [vmem:[#allocation7] ss:$0 sm:$0xff] }
 0x1c8   : > { %v9442_v61 = vpop.f32.mrf.mxu3  ;;  %v6051_v43 = vpop.f32.mrf.mxu2 }
 0x1c9   : > { %v7525_v13 = vadd.f32 %v6051_v43, %v4931_v42  ;;  %v2868_v42 = vld [vmem:[#allocation2 + $0x290] sm:$0xff] }
 0x1cb   : > { %8037 = vst [vmem:[%s9101_s18 + $0xf8] sm:$0xff] %v7525_v13 }
 0x1cc   : > { %v863_v47 = vpop.f32.mrf.mxu0  ;;  %v3460_v58 = vpop.f32.mrf.mxu1 }
 0x1cd   : > { %v2338_v56 = vadd.f32 %v9292_v49, %v863_v47  ;;  %2062 = vmatmul.f32.gmra.mxu3 %v654_v46  ;;  %6101 = vmatmul.f32.gmra.mxu2 %v5460_v48  ;;  %v657_v47 = vld [vmem:[#allocation2 + $0xd98] sm:$0xff] }
 0x1cf   : > { %v4932_v17 = vadd.f32 %v3460_v58, %v2338_v56  ;;  %910 = vmatmul.f32.gmra.mxu0 %v270_v54  ;;  %3507 = vmatmul.f32.gmra.mxu1 %v2866_v2  ;;  %v5463_v54 = vld [vmem:[#allocation2 + $0x398] sm:$0xff] }
 0x1d0   : > { %v9446_v60 = vpop.f32.mrf.mxu3  ;;  %v6054_v7 = vpop.f32.mrf.mxu2  ;;  %v273_v58 = vld [vmem:[#allocation2 + $0x198] sm:$0xff] }
 0x1d1   : > { %v7526_v53 = vadd.f32 %v6054_v7, %v4932_v17  ;;  %v2869_v7 = vld [vmem:[#allocation2 + $0x298] sm:$0xff] }
 0x1d3   : > { %8038 = vst [vmem:[%s9101_s18 + $0x100] sm:$0xff] %v7526_v53 }
 0x1d4   : > { %v866_v16 = vpop.f32.mrf.mxu0  ;;  %v3463_v20 = vpop.f32.mrf.mxu1 }
 0x1d5   : > { %v2339_v8 = vadd.f32 %v9292_v49, %v866_v16  ;;  %2065 = vmatmul.f32.gmra.mxu3 %v655_v6  ;;  %6104 = vmatmul.f32.gmra.mxu2 %v5461_v14 }
 0x1d7   : > { %v4933_v26 = vadd.f32 %v3463_v20, %v2339_v8  ;;  %913 = vmatmul.f32.gmra.mxu0 %v271_v21  ;;  %3510 = vmatmul.f32.gmra.mxu1 %v2867_v22  ;;  %v658_v21 = vld [vmem:[#allocation2 + $0xda0] sm:$0xff] }
 0x1d8   : > { %v9450_v57 = vpop.f32.mrf.mxu3  ;;  %v6057_v32 = vpop.f32.mrf.mxu2  ;;  %v5464_v8 = vld [vmem:[#allocation2 + $0x3a0] sm:$0xff] }
 0x1d9   : > { %v7527_v35 = vadd.f32 %v6057_v32, %v4933_v26  ;;  %v274_v22 = vld [vmem:[#allocation2 + $0x1a0] sm:$0xff] }
 0x1db   : > { %8039 = vst [vmem:[%s9101_s18 + $0x108] sm:$0xff] %v7527_v35  ;;  %v2870_v35 = vld [vmem:[#allocation2 + $0x2a0] sm:$0xff] }
 0x1dc   : > { %v869_v36 = vpop.f32.mrf.mxu0  ;;  %v3466_v41 = vpop.f32.mrf.mxu1 }
 0x1dd   : > { %v2340_v49 = vadd.f32 %v9453_v39, %v869_v36  ;;  %2068 = vmatmul.f32.gmra.mxu3 %v656_v25  ;;  %6107 = vmatmul.f32.gmra.mxu2 %v5462_v3 }
 0x1df   : > { %v4934_v43 = vadd.f32 %v3466_v41, %v2340_v49  ;;  %916 = vmatmul.f32.gmra.mxu0 %v272_v37  ;;  %3513 = vmatmul.f32.gmra.mxu1 %v2868_v42  ;;  %v659_v49 = vld [vmem:[#allocation2 + $0xda8] sm:$0xff] }
 0x1e0   : > { %v9456_v13 = vpop.f32.mrf.mxu3  ;;  %v6060_v46 = vpop.f32.mrf.mxu2  ;;  %v5465_v41 = vld [vmem:[#allocation2 + $0x3a8] sm:$0xff] }
 0x1e1   : > { %v7528_v48 = vadd.f32 %v6060_v46, %v4934_v43  ;;  %v275_v43 = vld [vmem:[#allocation2 + $0x1a8] sm:$0xff] }
 0x1e3   : > { %8040 = vst [vmem:[%s9101_s18 + $0x110] sm:$0xff] %v7528_v48 }
 0x1e4   : > { %v872_v56 = vpop.f32.mrf.mxu0  ;;  %v3469_v17 = vpop.f32.mrf.mxu1 }
 0x1e5   : > { %v2341_v2 = vadd.f32 %v9453_v39, %v872_v56  ;;  %2071 = vmatmul.f32.gmra.mxu3 %v657_v47  ;;  %6110 = vmatmul.f32.gmra.mxu2 %v5463_v54  ;;  %v2871_v47 = vld [vmem:[#allocation2 + $0x2a8] sm:$0xff] }
 0x1e7   : > { %v4935_v53 = vadd.f32 %v3469_v17, %v2341_v2  ;;  %919 = vmatmul.f32.gmra.mxu0 %v273_v58  ;;  %3516 = vmatmul.f32.gmra.mxu1 %v2869_v7  ;;  %v660_v17 = vld [vmem:[#allocation2 + $0xdb0] sm:$0xff] }
 0x1e8   : > { %v9460_v6 = vpop.f32.mrf.mxu3  ;;  %v6063_v14 = vpop.f32.mrf.mxu2  ;;  %v5466_v7 = vld [vmem:[#allocation2 + $0x3b0] sm:$0xff] }
 0x1e9   : > { %v7529_v16 = vadd.f32 %v6063_v14, %v4935_v53  ;;  %v276_v14 = vld [vmem:[#allocation2 + $0x1b0] sm:$0xff] }
 0x1eb   : > { %8041 = vst [vmem:[%s9101_s18 + $0x118] sm:$0xff] %v7529_v16 }
 0x1ec   : > { %v875_v20 = vpop.f32.mrf.mxu0  ;;  %v3472_v32 = vpop.f32.mrf.mxu1 }
 0x1ed   : > { %v2342_v26 = vadd.f32 %v9453_v39, %v875_v20  ;;  %2074 = vmatmul.f32.gmra.mxu3 %v658_v21  ;;  %6113 = vmatmul.f32.gmra.mxu2 %v5464_v8  ;;  %v2872_v8 = vld [vmem:[#allocation2 + $0x2b0] sm:$0xff] }
 0x1ef   : > { %v4936_v25 = vadd.f32 %v3472_v32, %v2342_v26  ;;  %922 = vmatmul.f32.gmra.mxu0 %v274_v22  ;;  %3519 = vmatmul.f32.gmra.mxu1 %v2870_v35  ;;  %v661_v35 = vld [vmem:[#allocation2 + $0xdb8] sm:$0xff] }
 0x1f0   : > { %v9464_v3 = vpop.f32.mrf.mxu3  ;;  %v6066_v36 = vpop.f32.mrf.mxu2 }
 0x1f1   : > { %v7530_v37 = vadd.f32 %v6066_v36, %v4936_v25  ;;  %v5467_v25 = vld [vmem:[#allocation2 + $0x3b8] sm:$0xff] }
 0x1f3   : > { %8042 = vst [vmem:[%s9101_s18 + $0x120] sm:$0xff] %v7530_v37  ;;  %v277_v37 = vld [vmem:[#allocation2 + $0x1b8] sm:$0xff] }
 0x1f4   : > { %v878_v42 = vpop.f32.mrf.mxu0  ;;  %v3475_v48 = vpop.f32.mrf.mxu1 }
 0x1f5   : > { %v2343_v46 = vadd.f32 %v9453_v39, %v878_v42  ;;  %2077 = vmatmul.f32.gmra.mxu3 %v659_v49  ;;  %6116 = vmatmul.f32.gmra.mxu2 %v5465_v41  ;;  %v2873_v42 = vld [vmem:[#allocation2 + $0x2b8] sm:$0xff] }
 0x1f7   : > { %v4937_v54 = vadd.f32 %v3475_v48, %v2343_v46  ;;  %925 = vmatmul.f32.gmra.mxu0 %v275_v43  ;;  %3522 = vmatmul.f32.gmra.mxu1 %v2871_v47 }
 0x1f8   : > { %v9468_v56 = vpop.f32.mrf.mxu3  ;;  %v6069_v58 = vpop.f32.mrf.mxu2 }
 0x1f9   : > { %v7531_v2 = vadd.f32 %v6069_v58, %v4937_v54  ;;  %v662_v54 = vld [vmem:[#allocation2 + $0xdc0] sm:$0xff] }
 0x1fa   : > { %v5468_v58 = vld [vmem:[#allocation2 + $0x3c0] sm:$0xff] }
 0x1fb   : > { %8043 = vst [vmem:[%s9101_s18 + $0x128] sm:$0xff] %v7531_v2 }
 0x1fc   : > { %v881_v53 = vpop.f32.mrf.mxu0  ;;  %v3478_v21 = vpop.f32.mrf.mxu1 }
 0x1fd   : > { %v2344_v16 = vadd.f32 %v9453_v39, %v881_v53  ;;  %2080 = vmatmul.f32.gmra.mxu3 %v660_v17  ;;  %6119 = vmatmul.f32.gmra.mxu2 %v5466_v7  ;;  %v278_v17 = vld [vmem:[#allocation2 + $0x1c0] sm:$0xff] }
 0x1ff   : > { %v4938_v20 = vadd.f32 %v3478_v21, %v2344_v16  ;;  %928 = vmatmul.f32.gmra.mxu0 %v276_v14  ;;  %3525 = vmatmul.f32.gmra.mxu1 %v2872_v8  ;;  %v2874_v14 = vld [vmem:[#allocation2 + $0x2c0] sm:$0xff] }
 0x200   : > { %v9472_v22 = vpop.f32.mrf.mxu3  ;;  %v6072_v26 = vpop.f32.mrf.mxu2 }
 0x201   : > { %v7532_v32 = vadd.f32 %v6072_v26, %v4938_v20  ;;  %v663_v26 = vld [vmem:[#allocation2 + $0xdc8] sm:$0xff] }
 0x203   : > { %8044 = vst [vmem:[%s9101_s18 + $0x130] sm:$0xff] %v7532_v32  ;;  %v5469_v32 = vld [vmem:[#allocation2 + $0x3c8] sm:$0xff] }
 0x204   : > { %v884_v36 = vpop.f32.mrf.mxu0  ;;  %v3481_v41 = vpop.f32.mrf.mxu1 }
 0x205   : > { %v2345_v49 = vadd.f32 %v9453_v39, %v884_v36  ;;  %2083 = vmatmul.f32.gmra.mxu3 %v661_v35  ;;  %6122 = vmatmul.f32.gmra.mxu2 %v5467_v25  ;;  %v279_v25 = vld [vmem:[#allocation2 + $0x1c8] sm:$0xff] }
 0x207   : > { %v4939_v43 = vadd.f32 %v3481_v41, %v2345_v49  ;;  %931 = vmatmul.f32.gmra.mxu0 %v277_v37  ;;  %3528 = vmatmul.f32.gmra.mxu1 %v2873_v42  ;;  %v2875_v49 = vld [vmem:[#allocation2 + $0x2c8] sm:$0xff] }
 0x208   : > { %v9476_v46 = vpop.f32.mrf.mxu3  ;;  %v6075_v48 = vpop.f32.mrf.mxu2 }
 0x209   : > { %v7533_v47 = vadd.f32 %v6075_v48, %v4939_v43 }
 0x20b   : > { %8045 = vst [vmem:[%s9101_s18 + $0x138] sm:$0xff] %v7533_v47  ;;  %v664_v47 = vld [vmem:[#allocation2 + $0xdd0] sm:$0xff] }
 0x20c   : > { %v887_v2 = vpop.f32.mrf.mxu0  ;;  %v3484_v53 = vpop.f32.mrf.mxu1 }
 0x20d   : > { %v2346_v7 = vadd.f32 %v9453_v39, %v887_v2  ;;  %2086 = vmatmul.f32.gmra.mxu3 %v662_v54  ;;  %6125 = vmatmul.f32.gmra.mxu2 %v5468_v58  ;;  %v5470_v54 = vld [vmem:[#allocation2 + $0x3d0] sm:$0xff] }
 0x20e   : > { %v280_v2 = vld [vmem:[#allocation2 + $0x1d0] sm:$0xff] }
 0x20f   : > { %v4940_v16 = vadd.f32 %v3484_v53, %v2346_v7  ;;  %934 = vmatmul.f32.gmra.mxu0 %v278_v17  ;;  %3531 = vmatmul.f32.gmra.mxu1 %v2874_v14  ;;  %v2876_v53 = vld [vmem:[#allocation2 + $0x2d0] sm:$0xff] }
 0x210   : > { %v9480_v21 = vpop.f32.mrf.mxu3  ;;  %v6078_v8 = vpop.f32.mrf.mxu2 }
 0x211   : > { %v7534_v20 = vadd.f32 %v6078_v8, %v4940_v16 }
 0x213   : > { %8046 = vst [vmem:[%s9101_s18 + $0x140] sm:$0xff] %v7534_v20 }
 0x214   : > { %v890_v35 = vpop.f32.mrf.mxu0  ;;  %v3487_v37 = vpop.f32.mrf.mxu1 }
 0x215   : > { %v2347_v36 = vadd.f32 %v9453_v39, %v890_v35  ;;  %2089 = vmatmul.f32.gmra.mxu3 %v663_v26  ;;  %6128 = vmatmul.f32.gmra.mxu2 %v5469_v32  ;;  %v665_v26 = vld [vmem:[#allocation2 + $0xdd8] sm:$0xff] }
 0x216   : > { %v5471_v32 = vld [vmem:[#allocation2 + $0x3d8] sm:$0xff] }
 0x217   : > { %v4941_v41 = vadd.f32 %v3487_v37, %v2347_v36  ;;  %937 = vmatmul.f32.gmra.mxu0 %v279_v25  ;;  %3534 = vmatmul.f32.gmra.mxu1 %v2875_v49  ;;  %v281_v25 = vld [vmem:[#allocation2 + $0x1d8] sm:$0xff] }
 0x218   : > { %v9484_v42 = vpop.f32.mrf.mxu3  ;;  %v6081_v43 = vpop.f32.mrf.mxu2  ;;  %v2877_v49 = vld [vmem:[#allocation2 + $0x2d8] sm:$0xff] }
 0x219   : > { %v7535_v48 = vadd.f32 %v6081_v43, %v4941_v41 }
 0x21b   : > { %8047 = vst [vmem:[%s9101_s18 + $0x148] sm:$0xff] %v7535_v48 }
 0x21c   : > { %v893_v58 = vpop.f32.mrf.mxu0  ;;  %v3490_v7 = vpop.f32.mrf.mxu1 }
 0x21d   : > { %v2348_v17 = vadd.f32 %v9453_v39, %v893_v58  ;;  %2092 = vmatmul.f32.gmra.mxu3 %v664_v47  ;;  %6131 = vmatmul.f32.gmra.mxu2 %v5470_v54  ;;  %v666_v54 = vld [vmem:[#allocation2 + $0xde0] sm:$0xff] }
 0x21e   : > { %v5472_v58 = vld [vmem:[#allocation2 + $0x3e0] sm:$0xff] }
 0x21f   : > { %v4942_v14 = vadd.f32 %v3490_v7, %v2348_v17  ;;  %940 = vmatmul.f32.gmra.mxu0 %v280_v2  ;;  %3537 = vmatmul.f32.gmra.mxu1 %v2876_v53  ;;  %v282_v17 = vld [vmem:[#allocation2 + $0x1e0] sm:$0xff] }
 0x220   : > { %v9488_v16 = vpop.f32.mrf.mxu3  ;;  %v6084_v8 = vpop.f32.mrf.mxu2 }
 0x221   : > { %v7536_v20 = vadd.f32 %v6084_v8, %v4942_v14  ;;  %v2878_v14 = vld [vmem:[#allocation2 + $0x2e0] sm:$0xff] }
 0x223   : > { %8048 = vst [vmem:[%s9101_s18 + $0x150] sm:$0xff] %v7536_v20 }
 0x224   : > { %v896_v35 = vpop.f32.mrf.mxu0  ;;  %v3493_v37 = vpop.f32.mrf.mxu1 }
 0x225   : > { %v2349_v36 = vadd.f32 %v9453_v39, %v896_v35  ;;  %2095 = vmatmul.f32.gmra.mxu3 %v665_v26  ;;  %6134 = vmatmul.f32.gmra.mxu2 %v5471_v32  ;;  %v667_v35 = vld [vmem:[#allocation2 + $0xde8] sm:$0xff] }
 0x227   : > { %v4943_v41 = vadd.f32 %v3493_v37, %v2349_v36  ;;  %943 = vmatmul.f32.gmra.mxu0 %v281_v25  ;;  %3540 = vmatmul.f32.gmra.mxu1 %v2877_v49  ;;  %v5473_v25 = vld [vmem:[#allocation2 + $0x3e8] sm:$0xff] }
 0x228   : > { %v9492_v43 = vpop.f32.mrf.mxu3  ;;  %v6087_v48 = vpop.f32.mrf.mxu2  ;;  %v283_v37 = vld [vmem:[#allocation2 + $0x1e8] sm:$0xff] }
 0x229   : > { %v7537_v47 = vadd.f32 %v6087_v48, %v4943_v41  ;;  %v2879_v48 = vld [vmem:[#allocation2 + $0x2e8] sm:$0xff] }
 0x22b   : > { %8049 = vst [vmem:[%s9101_s18 + $0x158] sm:$0xff] %v7537_v47 }
 0x22c   : > { %v899_v2 = vpop.f32.mrf.mxu0  ;;  %v3496_v53 = vpop.f32.mrf.mxu1 }
 0x22d   : > { %v2350_v7 = vadd.f32 %v9453_v39, %v899_v2  ;;  %2098 = vmatmul.f32.gmra.mxu3 %v666_v54  ;;  %6137 = vmatmul.f32.gmra.mxu2 %v5472_v58 }
 0x22f   : > { %v4944_v8 = vadd.f32 %v3496_v53, %v2350_v7  ;;  %946 = vmatmul.f32.gmra.mxu0 %v282_v17  ;;  %3543 = vmatmul.f32.gmra.mxu1 %v2878_v14  ;;  %v668_v17 = vld [vmem:[#allocation2 + $0xdf0] sm:$0xff] }
 0x230   : > { %v9496_v20 = vpop.f32.mrf.mxu3  ;;  %v6090_v26 = vpop.f32.mrf.mxu2  ;;  %v5474_v7 = vld [vmem:[#allocation2 + $0x3f0] sm:$0xff] }
 0x231   : > { %v7538_v32 = vadd.f32 %v6090_v26, %v4944_v8  ;;  %v284_v14 = vld [vmem:[#allocation2 + $0x1f0] sm:$0xff] }
 0x233   : > { %8050 = vst [vmem:[%s9101_s18 + $0x160] sm:$0xff] %v7538_v32  ;;  %v2880_v32 = vld [vmem:[#allocation2 + $0x2f0] sm:$0xff] }
 0x234   : > { %v902_v36 = vpop.f32.mrf.mxu0  ;;  %v3499_v41 = vpop.f32.mrf.mxu1 }
 0x235   : > { %v2351_v49 = vadd.f32 %v9453_v39, %v902_v36  ;;  %2101 = vmatmul.f32.gmra.mxu3 %v667_v35  ;;  %6140 = vmatmul.f32.gmra.mxu2 %v5473_v25 }
 0x237   : > { %v4945_v47 = vadd.f32 %v3499_v41, %v2351_v49  ;;  %949 = vmatmul.f32.gmra.mxu0 %v283_v37  ;;  %3546 = vmatmul.f32.gmra.mxu1 %v2879_v48  ;;  %v669_v49 = vld [vmem:[#allocation2 + $0xdf8] sm:$0xff] }
 0x238   : > { %v9500_v54 = vpop.f32.mrf.mxu3  ;;  %v6093_v58 = vpop.f32.mrf.mxu2  ;;  %v5475_v41 = vld [vmem:[#allocation2 + $0x3f8] sm:$0xff] }
 0x239   : > { %v7539_v2 = vadd.f32 %v6093_v58, %v4945_v47  ;;  %v285_v47 = vld [vmem:[#allocation2 + $0x1f8] sm:$0xff] }
 0x23b   : > { %8051 = vst [vmem:[%s9101_s18 + $0x168] sm:$0xff] %v7539_v2 }
 0x23c   : > { %v905_v53 = vpop.f32.mrf.mxu0  ;;  %v3502_v26 = vpop.f32.mrf.mxu1 }
 0x23d   : > { %v2352_v8 = vadd.f32 %v9453_v39, %v905_v53  ;;  %2104 = vmatmul.f32.gmra.mxu3 %v668_v17  ;;  %6143 = vmatmul.f32.gmra.mxu2 %v5474_v7  ;;  %v2881_v17 = vld [vmem:[#allocation2 + $0x2f8] sm:$0xff] }
 0x23f   : > { %v4946_v35 = vadd.f32 %v3502_v26, %v2352_v8  ;;  %952 = vmatmul.f32.gmra.mxu0 %v284_v14  ;;  %3549 = vmatmul.f32.gmra.mxu1 %v2880_v32  ;;  %v670_v26 = vld [vmem:[#allocation2 + $0xe00] sm:$0xff] }
 0x240   : > { %v9504_v25 = vpop.f32.mrf.mxu3  ;;  %v6096_v36 = vpop.f32.mrf.mxu2  ;;  %v5476_v32 = vld [vmem:[#allocation2 + $0x400] sm:$0xff] }
 0x241   : > { %v7540_v37 = vadd.f32 %v6096_v36, %v4946_v35  ;;  %v286_v36 = vld [vmem:[#allocation2 + $0x200] sm:$0xff] }
 0x243   : > { %8052 = vst [vmem:[%s9101_s18 + $0x170] sm:$0xff] %v7540_v37 }
 0x244   : > { %v908_v48 = vpop.f32.mrf.mxu0  ;;  %v3505_v2 = vpop.f32.mrf.mxu1 }
 0x245   : > { %v2353_v58 = vadd.f32 %v9453_v39, %v908_v48  ;;  %2107 = vmatmul.f32.gmra.mxu3 %v669_v49  ;;  %6146 = vmatmul.f32.gmra.mxu2 %v5475_v41  ;;  %v2882_v41 = vld [vmem:[#allocation2 + $0x300] sm:$0xff] }
 0x247   : > { %v4947_v7 = vadd.f32 %v3505_v2, %v2353_v58  ;;  %955 = vmatmul.f32.gmra.mxu0 %v285_v47  ;;  %3552 = vmatmul.f32.gmra.mxu1 %v2881_v17  ;;  %v671_v17 = vld [vmem:[#allocation2 + $0xe08] sm:$0xff] }
 0x248   : > { %v9508_v53 = vpop.f32.mrf.mxu3  ;;  %v6099_v14 = vpop.f32.mrf.mxu2 }
 0x249   : > { %11180 = vst [vmem:[#allocation20_spill] sm:$0xff] %v9508_v53  ;;  %v7541_v8 = vadd.f32 %v6099_v14, %v4947_v7  ;;  %v5477_v7 = vld [vmem:[#allocation2 + $0x408] sm:$0xff] }
 0x24b   : > { %8053 = vst [vmem:[%s9101_s18 + $0x178] sm:$0xff] %v7541_v8  ;;  %v287_v8 = vld [vmem:[#allocation2 + $0x208] sm:$0xff] }
 0x24c   : > { %v911_v35 = vpop.f32.mrf.mxu0  ;;  %v3508_v49 = vpop.f32.mrf.mxu1 }
 0x24d   : > { %v2354_v37 = vadd.f32 %v9453_v39, %v911_v35  ;;  %2110 = vmatmul.f32.gmra.mxu3 %v670_v26  ;;  %6149 = vmatmul.f32.gmra.mxu2 %v5476_v32  ;;  %v2883_v32 = vld [vmem:[#allocation2 + $0x308] sm:$0xff] }
 0x24f   : > { %v4948_v48 = vadd.f32 %v3508_v49, %v2354_v37  ;;  %958 = vmatmul.f32.gmra.mxu0 %v286_v36  ;;  %3555 = vmatmul.f32.gmra.mxu1 %v2882_v41  ;;  %v672_v41 = vld [vmem:[#allocation2 + $0xe10] sm:$0xff] }
 0x250   : > { %v9512_v47 = vpop.f32.mrf.mxu3  ;;  %v6102_v58 = vpop.f32.mrf.mxu2 }
 0x251   : > { %11181 = vst [vmem:[#allocation21_spill] sm:$0xff] %v9512_v47  ;;  %v7542_v2 = vadd.f32 %v6102_v58, %v4948_v48  ;;  %v5478_v48 = vld [vmem:[#allocation2 + $0x410] sm:$0xff] }
 0x253   : > { %8054 = vst [vmem:[%s9101_s18 + $0x180] sm:$0xff] %v7542_v2  ;;  %v288_v2 = vld [vmem:[#allocation2 + $0x210] sm:$0xff] }
 0x254   : > { %v914_v14 = vpop.f32.mrf.mxu0  ;;  %v3511_v26 = vpop.f32.mrf.mxu1 }
 0x255   : > { %v2355_v53 = vadd.f32 %v9453_v39, %v914_v14  ;;  %2113 = vmatmul.f32.gmra.mxu3 %v671_v17  ;;  %6152 = vmatmul.f32.gmra.mxu2 %v5477_v7  ;;  %v2884_v7 = vld [vmem:[#allocation2 + $0x310] sm:$0xff] }
 0x257   : > { %v4949_v35 = vadd.f32 %v3511_v26, %v2355_v53  ;;  %961 = vmatmul.f32.gmra.mxu0 %v287_v8  ;;  %3558 = vmatmul.f32.gmra.mxu1 %v2883_v32  ;;  %v673_v32 = vld [vmem:[#allocation2 + $0xe18] sm:$0xff] }
 0x258   : > { %v9516_v36 = vpop.f32.mrf.mxu3  ;;  %v6105_v37 = vpop.f32.mrf.mxu2 }
 0x259   : > { %11182 = vst [vmem:[#allocation22_spill] sm:$0xff] %v9516_v36  ;;  %v7543_v49 = vadd.f32 %v6105_v37, %v4949_v35  ;;  %v5479_v35 = vld [vmem:[#allocation2 + $0x418] sm:$0xff] }
 0x25b   : > { %8055 = vst [vmem:[%s9101_s18 + $0x188] sm:$0xff] %v7543_v49  ;;  %v289_v49 = vld [vmem:[#allocation2 + $0x218] sm:$0xff] }
 0x25c   : > { %v917_v58 = vpop.f32.mrf.mxu0  ;;  %v3514_v17 = vpop.f32.mrf.mxu1 }
 0x25d   : > { %v2356_v47 = vadd.f32 %v9453_v39, %v917_v58  ;;  %2116 = vmatmul.f32.gmra.mxu3 %v672_v41  ;;  %6155 = vmatmul.f32.gmra.mxu2 %v5478_v48  ;;  %v2885_v48 = vld [vmem:[#allocation2 + $0x318] sm:$0xff] }
 0x25f   : > { %v4950_v14 = vadd.f32 %v3514_v17, %v2356_v47  ;;  %964 = vmatmul.f32.gmra.mxu0 %v288_v2  ;;  %3561 = vmatmul.f32.gmra.mxu1 %v2884_v7  ;;  %v674_v7 = vld [vmem:[#allocation2 + $0xe20] sm:$0xff] }
 0x260   : > { %v9520_v53 = vpop.f32.mrf.mxu3  ;;  %v6108_v8 = vpop.f32.mrf.mxu2 }
 0x261   : > { %11183 = vst [vmem:[#allocation23_spill] sm:$0xff] %v9520_v53  ;;  %v7544_v26 = vadd.f32 %v6108_v8, %v4950_v14  ;;  %v5480_v14 = vld [vmem:[#allocation2 + $0x420] sm:$0xff] }
 0x263   : > { %8056 = vst [vmem:[%s9101_s18 + $0x190] sm:$0xff] %v7544_v26  ;;  %v290_v26 = vld [vmem:[#allocation2 + $0x220] sm:$0xff] }
 0x264   : > { %v920_v37 = vpop.f32.mrf.mxu0  ;;  %v3517_v41 = vpop.f32.mrf.mxu1 }
 0x265   : > { %v2357_v36 = vadd.f32 %v9453_v39, %v920_v37  ;;  %2119 = vmatmul.f32.gmra.mxu3 %v673_v32  ;;  %6158 = vmatmul.f32.gmra.mxu2 %v5479_v35  ;;  %v2886_v35 = vld [vmem:[#allocation2 + $0x320] sm:$0xff] }
 0x267   : > { %v4951_v58 = vadd.f32 %v3517_v41, %v2357_v36  ;;  %967 = vmatmul.f32.gmra.mxu0 %v289_v49  ;;  %3564 = vmatmul.f32.gmra.mxu1 %v2885_v48  ;;  %v675_v48 = vld [vmem:[#allocation2 + $0xe28] sm:$0xff] }
 0x268   : > { %v9524_v47 = vpop.f32.mrf.mxu3  ;;  %v6111_v2 = vpop.f32.mrf.mxu2 }
 0x269   : > { %11184 = vst [vmem:[#allocation24_spill] sm:$0xff] %v9524_v47  ;;  %v7545_v17 = vadd.f32 %v6111_v2, %v4951_v58  ;;  %v5481_v58 = vld [vmem:[#allocation2 + $0x428] sm:$0xff] }
 0x26b   : > { %8057 = vst [vmem:[%s9101_s18 + $0x198] sm:$0xff] %v7545_v17  ;;  %v291_v17 = vld [vmem:[#allocation2 + $0x228] sm:$0xff] }
 0x26c   : > { %v923_v8 = vpop.f32.mrf.mxu0  ;;  %v3520_v32 = vpop.f32.mrf.mxu1 }
 0x26d   : > { %v2358_v53 = vadd.f32 %v9453_v39, %v923_v8  ;;  %2122 = vmatmul.f32.gmra.mxu3 %v674_v7  ;;  %6161 = vmatmul.f32.gmra.mxu2 %v5480_v14  ;;  %v2887_v14 = vld [vmem:[#allocation2 + $0x328] sm:$0xff] }
 0x26f   : > { %v4952_v37 = vadd.f32 %v3520_v32, %v2358_v53  ;;  %970 = vmatmul.f32.gmra.mxu0 %v290_v26  ;;  %3567 = vmatmul.f32.gmra.mxu1 %v2886_v35  ;;  %v676_v35 = vld [vmem:[#allocation2 + $0xe30] sm:$0xff] }
 0x270   : > { %v9528_v36 = vpop.f32.mrf.mxu3  ;;  %v6114_v49 = vpop.f32.mrf.mxu2 }
 0x271   : > { %11185 = vst [vmem:[#allocation25_spill] sm:$0xff] %v9528_v36  ;;  %v7546_v41 = vadd.f32 %v6114_v49, %v4952_v37  ;;  %v5482_v37 = vld [vmem:[#allocation2 + $0x430] sm:$0xff] }
 0x273   : > { %8058 = vst [vmem:[%s9101_s18 + $0x1a0] sm:$0xff] %v7546_v41  ;;  %v292_v41 = vld [vmem:[#allocation2 + $0x230] sm:$0xff] }
 0x274   : > { %v926_v2 = vpop.f32.mrf.mxu0  ;;  %v3523_v7 = vpop.f32.mrf.mxu1 }
 0x275   : > { %v2359_v47 = vadd.f32 %v9453_v39, %v926_v2  ;;  %2125 = vmatmul.f32.gmra.mxu3 %v675_v48  ;;  %6164 = vmatmul.f32.gmra.mxu2 %v5481_v58  ;;  %v2888_v58 = vld [vmem:[#allocation2 + $0x330] sm:$0xff] }
 0x277   : > { %v4953_v8 = vadd.f32 %v3523_v7, %v2359_v47  ;;  %973 = vmatmul.f32.gmra.mxu0 %v291_v17  ;;  %3570 = vmatmul.f32.gmra.mxu1 %v2887_v14  ;;  %v677_v14 = vld [vmem:[#allocation2 + $0xe38] sm:$0xff] }
 0x278   : > { %v9532_v53 = vpop.f32.mrf.mxu3  ;;  %v6117_v26 = vpop.f32.mrf.mxu2 }
 0x279   : > { %11186 = vst [vmem:[#allocation26_spill] sm:$0xff] %v9532_v53  ;;  %v7547_v32 = vadd.f32 %v6117_v26, %v4953_v8  ;;  %v5483_v8 = vld [vmem:[#allocation2 + $0x438] sm:$0xff] }
 0x27b   : > { %8059 = vst [vmem:[%s9101_s18 + $0x1a8] sm:$0xff] %v7547_v32  ;;  %v293_v32 = vld [vmem:[#allocation2 + $0x238] sm:$0xff] }
 0x27c   : > { %v929_v49 = vpop.f32.mrf.mxu0  ;;  %v3526_v48 = vpop.f32.mrf.mxu1 }
 0x27d   : > { %v2360_v36 = vadd.f32 %v9453_v39, %v929_v49  ;;  %2128 = vmatmul.f32.gmra.mxu3 %v676_v35  ;;  %6167 = vmatmul.f32.gmra.mxu2 %v5482_v37  ;;  %v2889_v37 = vld [vmem:[#allocation2 + $0x338] sm:$0xff] }
 0x27f   : > { %v4954_v2 = vadd.f32 %v3526_v48, %v2360_v36  ;;  %976 = vmatmul.f32.gmra.mxu0 %v292_v41  ;;  %3573 = vmatmul.f32.gmra.mxu1 %v2888_v58  ;;  %v678_v58 = vld [vmem:[#allocation2 + $0xe40] sm:$0xff] }
 0x280   : > { %v9536_v47 = vpop.f32.mrf.mxu3  ;;  %v6120_v17 = vpop.f32.mrf.mxu2 }
 0x281   : > { %11187 = vst [vmem:[#allocation27_spill] sm:$0xff] %v9536_v47  ;;  %v7548_v7 = vadd.f32 %v6120_v17, %v4954_v2  ;;  %v5484_v2 = vld [vmem:[#allocation2 + $0x440] sm:$0xff] }
 0x283   : > { %8060 = vst [vmem:[%s9101_s18 + $0x1b0] sm:$0xff] %v7548_v7  ;;  %v294_v7 = vld [vmem:[#allocation2 + $0x240] sm:$0xff] }
 0x284   : > { %v932_v26 = vpop.f32.mrf.mxu0  ;;  %v3529_v35 = vpop.f32.mrf.mxu1 }
 0x285   : > { %v2361_v53 = vadd.f32 %v9453_v39, %v932_v26  ;;  %2131 = vmatmul.f32.gmra.mxu3 %v677_v14  ;;  %6170 = vmatmul.f32.gmra.mxu2 %v5483_v8  ;;  %v2890_v8 = vld [vmem:[#allocation2 + $0x340] sm:$0xff] }
 0x287   : > { %v4955_v49 = vadd.f32 %v3529_v35, %v2361_v53  ;;  %979 = vmatmul.f32.gmra.mxu0 %v293_v32  ;;  %3576 = vmatmul.f32.gmra.mxu1 %v2889_v37  ;;  %v679_v37 = vld [vmem:[#allocation2 + $0xe48] sm:$0xff] }
 0x288   : > { %v9540_v36 = vpop.f32.mrf.mxu3  ;;  %v6123_v41 = vpop.f32.mrf.mxu2 }
 0x289   : > { %11188 = vst [vmem:[#allocation28_spill] sm:$0xff] %v9540_v36  ;;  %v7549_v48 = vadd.f32 %v6123_v41, %v4955_v49  ;;  %v5485_v49 = vld [vmem:[#allocation2 + $0x448] sm:$0xff] }
 0x28b   : > { %8061 = vst [vmem:[%s9101_s18 + $0x1b8] sm:$0xff] %v7549_v48  ;;  %v295_v48 = vld [vmem:[#allocation2 + $0x248] sm:$0xff] }
 0x28c   : > { %v935_v17 = vpop.f32.mrf.mxu0  ;;  %v3532_v14 = vpop.f32.mrf.mxu1 }
 0x28d   : > { %v2362_v47 = vadd.f32 %v9453_v39, %v935_v17  ;;  %2134 = vmatmul.f32.gmra.mxu3 %v678_v58  ;;  %6173 = vmatmul.f32.gmra.mxu2 %v5484_v2  ;;  %v2891_v2 = vld [vmem:[#allocation2 + $0x348] sm:$0xff] }
 0x28f   : > { %v4956_v26 = vadd.f32 %v3532_v14, %v2362_v47  ;;  %982 = vmatmul.f32.gmra.mxu0 %v294_v7  ;;  %3579 = vmatmul.f32.gmra.mxu1 %v2890_v8  ;;  %v680_v8 = vld [vmem:[#allocation2 + $0xe50] sm:$0xff] }
 0x290   : > { %v9544_v53 = vpop.f32.mrf.mxu3  ;;  %v6126_v32 = vpop.f32.mrf.mxu2 }
 0x291   : > { %11189 = vst [vmem:[#allocation29_spill] sm:$0xff] %v9544_v53  ;;  %v7550_v35 = vadd.f32 %v6126_v32, %v4956_v26  ;;  %v5486_v26 = vld [vmem:[#allocation2 + $0x450] sm:$0xff] }
 0x293   : > { %8062 = vst [vmem:[%s9101_s18 + $0x1c0] sm:$0xff] %v7550_v35  ;;  %v296_v35 = vld [vmem:[#allocation2 + $0x250] sm:$0xff] }
 0x294   : > { %v938_v41 = vpop.f32.mrf.mxu0  ;;  %v3535_v58 = vpop.f32.mrf.mxu1 }
 0x295   : > { %v2363_v36 = vadd.f32 %v9453_v39, %v938_v41  ;;  %2137 = vmatmul.f32.gmra.mxu3 %v679_v37  ;;  %6176 = vmatmul.f32.gmra.mxu2 %v5485_v49  ;;  %v2892_v49 = vld [vmem:[#allocation2 + $0x350] sm:$0xff] }
 0x297   : > { %v4957_v17 = vadd.f32 %v3535_v58, %v2363_v36  ;;  %985 = vmatmul.f32.gmra.mxu0 %v295_v48  ;;  %3582 = vmatmul.f32.gmra.mxu1 %v2891_v2  ;;  %v681_v2 = vld [vmem:[#allocation2 + $0xe58] sm:$0xff] }
 0x298   : > { %v9548_v47 = vpop.f32.mrf.mxu3  ;;  %v6129_v7 = vpop.f32.mrf.mxu2 }
 0x299   : > { %11190 = vst [vmem:[#allocation30_spill] sm:$0xff] %v9548_v47  ;;  %v7551_v14 = vadd.f32 %v6129_v7, %v4957_v17  ;;  %v5487_v17 = vld [vmem:[#allocation2 + $0x458] sm:$0xff] }
 0x29b   : > { %8063 = vst [vmem:[%s9101_s18 + $0x1c8] sm:$0xff] %v7551_v14  ;;  %v297_v14 = vld [vmem:[#allocation2 + $0x258] sm:$0xff] }
 0x29c   : > { %v941_v32 = vpop.f32.mrf.mxu0  ;;  %v3538_v37 = vpop.f32.mrf.mxu1 }
 0x29d   : > { %v2364_v53 = vadd.f32 %v9453_v39, %v941_v32  ;;  %2140 = vmatmul.f32.gmra.mxu3 %v680_v8  ;;  %6179 = vmatmul.f32.gmra.mxu2 %v5486_v26  ;;  %v2893_v26 = vld [vmem:[#allocation2 + $0x358] sm:$0xff] }
 0x29f   : > { %v4958_v41 = vadd.f32 %v3538_v37, %v2364_v53  ;;  %988 = vmatmul.f32.gmra.mxu0 %v296_v35  ;;  %3585 = vmatmul.f32.gmra.mxu1 %v2892_v49  ;;  %v682_v49 = vld [vmem:[#allocation2 + $0xe60] sm:$0xff] }
 0x2a0   : > { %v9552_v36 = vpop.f32.mrf.mxu3  ;;  %v6132_v48 = vpop.f32.mrf.mxu2 }
 0x2a1   : > { %11191 = vst [vmem:[#allocation31_spill] sm:$0xff] %v9552_v36  ;;  %v7552_v58 = vadd.f32 %v6132_v48, %v4958_v41  ;;  %v5488_v41 = vld [vmem:[#allocation2 + $0x460] sm:$0xff] }
 0x2a3   : > { %8064 = vst [vmem:[%s9101_s18 + $0x1d0] sm:$0xff] %v7552_v58  ;;  %v298_v58 = vld [vmem:[#allocation2 + $0x260] sm:$0xff] }
 0x2a4   : > { %v944_v7 = vpop.f32.mrf.mxu0  ;;  %v3541_v8 = vpop.f32.mrf.mxu1 }
 0x2a5   : > { %v2365_v47 = vadd.f32 %v9453_v39, %v944_v7  ;;  %2143 = vmatmul.f32.gmra.mxu3 %v681_v2  ;;  %6182 = vmatmul.f32.gmra.mxu2 %v5487_v17  ;;  %v2894_v17 = vld [vmem:[#allocation2 + $0x360] sm:$0xff] }
 0x2a7   : > { %v4959_v32 = vadd.f32 %v3541_v8, %v2365_v47  ;;  %991 = vmatmul.f32.gmra.mxu0 %v297_v14  ;;  %3588 = vmatmul.f32.gmra.mxu1 %v2893_v26  ;;  %v683_v26 = vld [vmem:[#allocation2 + $0xe68] sm:$0xff] }
 0x2a8   : > { %v9556_v53 = vpop.f32.mrf.mxu3  ;;  %v6135_v35 = vpop.f32.mrf.mxu2 }
 0x2a9   : > { %11192 = vst [vmem:[#allocation32_spill] sm:$0xff] %v9556_v53  ;;  %v7553_v37 = vadd.f32 %v6135_v35, %v4959_v32  ;;  %v5489_v32 = vld [vmem:[#allocation2 + $0x468] sm:$0xff] }
 0x2ab   : > { %8065 = vst [vmem:[%s9101_s18 + $0x1d8] sm:$0xff] %v7553_v37  ;;  %v299_v37 = vld [vmem:[#allocation2 + $0x268] sm:$0xff] }
 0x2ac   : > { %v947_v48 = vpop.f32.mrf.mxu0  ;;  %v3544_v2 = vpop.f32.mrf.mxu1 }
 0x2ad   : > { %v2366_v36 = vadd.f32 %v9453_v39, %v947_v48  ;;  %2146 = vmatmul.f32.gmra.mxu3 %v682_v49  ;;  %6185 = vmatmul.f32.gmra.mxu2 %v5488_v41  ;;  %v2895_v41 = vld [vmem:[#allocation2 + $0x368] sm:$0xff] }
 0x2af   : > { %v4960_v7 = vadd.f32 %v3544_v2, %v2366_v36  ;;  %994 = vmatmul.f32.gmra.mxu0 %v298_v58  ;;  %3591 = vmatmul.f32.gmra.mxu1 %v2894_v17  ;;  %v684_v17 = vld [vmem:[#allocation2 + $0xe70] sm:$0xff] }
 0x2b0   : > { %v9560_v47 = vpop.f32.mrf.mxu3  ;;  %v6138_v14 = vpop.f32.mrf.mxu2 }
 0x2b1   : > { %11193 = vst [vmem:[#allocation33_spill] sm:$0xff] %v9560_v47  ;;  %v7554_v8 = vadd.f32 %v6138_v14, %v4960_v7  ;;  %v5490_v7 = vld [vmem:[#allocation2 + $0x470] sm:$0xff] }
 0x2b3   : > { %8066 = vst [vmem:[%s9101_s18 + $0x1e0] sm:$0xff] %v7554_v8  ;;  %v300_v8 = vld [vmem:[#allocation2 + $0x270] sm:$0xff] }
 0x2b4   : > { %v950_v35 = vpop.f32.mrf.mxu0  ;;  %v3547_v49 = vpop.f32.mrf.mxu1 }
 0x2b5   : > { %v2367_v53 = vadd.f32 %v9453_v39, %v950_v35  ;;  %2149 = vmatmul.f32.gmra.mxu3 %v683_v26  ;;  %6188 = vmatmul.f32.gmra.mxu2 %v5489_v32  ;;  %v2896_v32 = vld [vmem:[#allocation2 + $0x370] sm:$0xff] }
 0x2b7   : > { %v4961_v48 = vadd.f32 %v3547_v49, %v2367_v53  ;;  %997 = vmatmul.f32.gmra.mxu0 %v299_v37  ;;  %3594 = vmatmul.f32.gmra.mxu1 %v2895_v41  ;;  %v685_v41 = vld [vmem:[#allocation2 + $0xe78] sm:$0xff] }
 0x2b8   : > { %v9564_v36 = vpop.f32.mrf.mxu3  ;;  %v6141_v58 = vpop.f32.mrf.mxu2 }
 0x2b9   : > { %11194 = vst [vmem:[#allocation34_spill] sm:$0xff] %v9564_v36  ;;  %v7555_v2 = vadd.f32 %v6141_v58, %v4961_v48  ;;  %v5491_v48 = vld [vmem:[#allocation2 + $0x478] sm:$0xff] }
 0x2bb   : > { %8067 = vst [vmem:[%s9101_s18 + $0x1e8] sm:$0xff] %v7555_v2  ;;  %v301_v2 = vld [vmem:[#allocation2 + $0x278] sm:$0xff] }
 0x2bc   : > { %v953_v14 = vpop.f32.mrf.mxu0  ;;  %v3550_v26 = vpop.f32.mrf.mxu1 }
 0x2bd   : > { %v2368_v47 = vadd.f32 %v9453_v39, %v953_v14  ;;  %2152 = vmatmul.f32.gmra.mxu3 %v684_v17  ;;  %6191 = vmatmul.f32.gmra.mxu2 %v5490_v7  ;;  %v2897_v7 = vld [vmem:[#allocation2 + $0x378] sm:$0xff] }
 0x2bf   : > { %v4962_v35 = vadd.f32 %v3550_v26, %v2368_v47  ;;  %1000 = vmatmul.f32.gmra.mxu0 %v300_v8  ;;  %3597 = vmatmul.f32.gmra.mxu1 %v2896_v32  ;;  %v686_v32 = vld [vmem:[#allocation2 + $0xe80] sm:$0xff] }
 0x2c0   : > { %v9568_v53 = vpop.f32.mrf.mxu3  ;;  %v6144_v37 = vpop.f32.mrf.mxu2 }
 0x2c1   : > { %11195 = vst [vmem:[#allocation35_spill] sm:$0xff] %v9568_v53  ;;  %v7556_v49 = vadd.f32 %v6144_v37, %v4962_v35  ;;  %v5492_v35 = vld [vmem:[#allocation2 + $0x480] sm:$0xff] }
 0x2c3   : > { %8068 = vst [vmem:[%s9101_s18 + $0x1f0] sm:$0xff] %v7556_v49  ;;  %v302_v49 = vld [vmem:[#allocation2 + $0x280] sm:$0xff] }
 0x2c4   : > { %v956_v58 = vpop.f32.mrf.mxu0  ;;  %v3553_v17 = vpop.f32.mrf.mxu1 }
 0x2c5   : > { %v2369_v36 = vadd.f32 %v9453_v39, %v956_v58  ;;  %2155 = vmatmul.f32.gmra.mxu3 %v685_v41  ;;  %6194 = vmatmul.f32.gmra.mxu2 %v5491_v48  ;;  %v2898_v48 = vld [vmem:[#allocation2 + $0x380] sm:$0xff] }
 0x2c7   : > { %v4963_v14 = vadd.f32 %v3553_v17, %v2369_v36  ;;  %1003 = vmatmul.f32.gmra.mxu0 %v301_v2  ;;  %3600 = vmatmul.f32.gmra.mxu1 %v2897_v7  ;;  %v687_v7 = vld [vmem:[#allocation2 + $0xe88] sm:$0xff] }
 0x2c8   : > { %v9572_v47 = vpop.f32.mrf.mxu3  ;;  %v6147_v8 = vpop.f32.mrf.mxu2 }
 0x2c9   : > { %11196 = vst [vmem:[#allocation36_spill] sm:$0xff] %v9572_v47  ;;  %v7557_v26 = vadd.f32 %v6147_v8, %v4963_v14  ;;  %v5493_v14 = vld [vmem:[#allocation2 + $0x488] sm:$0xff] }
 0x2cb   : > { %8069 = vst [vmem:[%s9101_s18 + $0x1f8] sm:$0xff] %v7557_v26  ;;  %v303_v26 = vld [vmem:[#allocation2 + $0x288] sm:$0xff] }
 0x2cc   : > { %v959_v37 = vpop.f32.mrf.mxu0  ;;  %v3556_v41 = vpop.f32.mrf.mxu1 }
 0x2cd   : > { %v2370_v53 = vadd.f32 %v9453_v39, %v959_v37  ;;  %2158 = vmatmul.f32.gmra.mxu3 %v686_v32  ;;  %6197 = vmatmul.f32.gmra.mxu2 %v5492_v35  ;;  %v2899_v35 = vld [vmem:[#allocation2 + $0x388] sm:$0xff] }
 0x2cf   : > { %v4964_v58 = vadd.f32 %v3556_v41, %v2370_v53  ;;  %1006 = vmatmul.f32.gmra.mxu0 %v302_v49  ;;  %3603 = vmatmul.f32.gmra.mxu1 %v2898_v48  ;;  %v688_v48 = vld [vmem:[#allocation2 + $0xe90] sm:$0xff] }
 0x2d0   : > { %v9576_v36 = vpop.f32.mrf.mxu3  ;;  %v6150_v2 = vpop.f32.mrf.mxu2 }
 0x2d1   : > { %11197 = vst [vmem:[#allocation37_spill] sm:$0xff] %v9576_v36  ;;  %v7558_v17 = vadd.f32 %v6150_v2, %v4964_v58  ;;  %v5494_v58 = vld [vmem:[#allocation2 + $0x490] sm:$0xff]  ;;  %v9583_v36 = vld [vmem:[#allocation7] ss:$0 sm:$0xff] }
 0x2d3   : > { %8070 = vst [vmem:[%s9101_s18 + $0x200] sm:$0xff] %v7558_v17  ;;  %v304_v17 = vld [vmem:[#allocation2 + $0x290] sm:$0xff] }
 0x2d4   : > { %v962_v8 = vpop.f32.mrf.mxu0  ;;  %v3559_v32 = vpop.f32.mrf.mxu1 }
 0x2d5   : > { %v2371_v47 = vadd.f32 %v9453_v39, %v962_v8  ;;  %2161 = vmatmul.f32.gmra.mxu3 %v687_v7  ;;  %6200 = vmatmul.f32.gmra.mxu2 %v5493_v14 }
 0x2d7   : > { %v4965_v37 = vadd.f32 %v3559_v32, %v2371_v47  ;;  %1009 = vmatmul.f32.gmra.mxu0 %v303_v26  ;;  %3606 = vmatmul.f32.gmra.mxu1 %v2899_v35  ;;  %v2900_v47 = vld [vmem:[#allocation2 + $0x390] sm:$0xff]  ;;  %v689_v35 = vld [vmem:[#allocation2 + $0xe98] sm:$0xff] }
 0x2d8   : > { %v9580_v53 = vpop.f32.mrf.mxu3  ;;  %v6153_v49 = vpop.f32.mrf.mxu2 }
 0x2d9   : > { %11198 = vst [vmem:[#allocation38_spill] sm:$0xff] %v9580_v53  ;;  %v7559_v41 = vadd.f32 %v6153_v49, %v4965_v37  ;;  %v5495_v37 = vld [vmem:[#allocation2 + $0x498] sm:$0xff] }
 0x2db   : > { %8071 = vst [vmem:[%s9101_s18 + $0x208] sm:$0xff] %v7559_v41  ;;  %v305_v41 = vld [vmem:[#allocation2 + $0x298] sm:$0xff] }
 0x2dc   : > { %v965_v2 = vpop.f32.mrf.mxu0  ;;  %v3562_v7 = vpop.f32.mrf.mxu1 }
 0x2dd   : > { %v2372_v39 = vadd.f32 %v9583_v36, %v965_v2  ;;  %2164 = vmatmul.f32.gmra.mxu3 %v688_v48  ;;  %6203 = vmatmul.f32.gmra.mxu2 %v5494_v58  ;;  %v2901_v58 = vld [vmem:[#allocation2 + $0x398] sm:$0xff] }
 0x2df   : > { %v4966_v14 = vadd.f32 %v3562_v7, %v2372_v39  ;;  %1012 = vmatmul.f32.gmra.mxu0 %v304_v17  ;;  %3609 = vmatmul.f32.gmra.mxu1 %v2900_v47  ;;  %v690_v47 = vld [vmem:[#allocation2 + $0xea0] sm:$0xff] }
 0x2e0   : > { %v9586_v8 = vpop.f32.mrf.mxu3  ;;  %v6156_v26 = vpop.f32.mrf.mxu2 }
 0x2e1   : > { %11199 = vst [vmem:[#allocation39_spill] sm:$0xff] %v9586_v8  ;;  %v7560_v32 = vadd.f32 %v6156_v26, %v4966_v14  ;;  %v5496_v14 = vld [vmem:[#allocation2 + $0x4a0] sm:$0xff] }
 0x2e3   : > { %8072 = vst [vmem:[%s9101_s18 + $0x210] sm:$0xff] %v7560_v32  ;;  %v306_v32 = vld [vmem:[#allocation2 + $0x2a0] sm:$0xff] }
 0x2e4   : > { %v968_v49 = vpop.f32.mrf.mxu0  ;;  %v3565_v48 = vpop.f32.mrf.mxu1 }
 0x2e5   : > { %v2373_v53 = vadd.f32 %v9583_v36, %v968_v49  ;;  %2167 = vmatmul.f32.gmra.mxu3 %v689_v35  ;;  %6206 = vmatmul.f32.gmra.mxu2 %v5495_v37  ;;  %v2902_v37 = vld [vmem:[#allocation2 + $0x3a0] sm:$0xff] }
 0x2e7   : > { %v4967_v2 = vadd.f32 %v3565_v48, %v2373_v53  ;;  %1015 = vmatmul.f32.gmra.mxu0 %v305_v41  ;;  %3612 = vmatmul.f32.gmra.mxu1 %v2901_v58  ;;  %v691_v58 = vld [vmem:[#allocation2 + $0xea8] sm:$0xff] }
 0x2e8   : > { %v9590_v17 = vpop.f32.mrf.mxu3  ;;  %v6159_v39 = vpop.f32.mrf.mxu2 }
 0x2e9   : > { %11200 = vst [vmem:[#allocation40_spill] sm:$0xff] %v9590_v17  ;;  %v7561_v7 = vadd.f32 %v6159_v39, %v4967_v2  ;;  %v5497_v2 = vld [vmem:[#allocation2 + $0x4a8] sm:$0xff] }
 0x2eb   : > { %8073 = vst [vmem:[%s9101_s18 + $0x218] sm:$0xff] %v7561_v7  ;;  %v307_v7 = vld [vmem:[#allocation2 + $0x2a8] sm:$0xff] }
 0x2ec   : > { %v971_v26 = vpop.f32.mrf.mxu0  ;;  %v3568_v35 = vpop.f32.mrf.mxu1 }
 0x2ed   : > { %v2374_v8 = vadd.f32 %v9583_v36, %v971_v26  ;;  %2170 = vmatmul.f32.gmra.mxu3 %v690_v47  ;;  %6209 = vmatmul.f32.gmra.mxu2 %v5496_v14  ;;  %v2903_v14 = vld [vmem:[#allocation2 + $0x3a8] sm:$0xff] }
 0x2ef   : > { %v4968_v49 = vadd.f32 %v3568_v35, %v2374_v8  ;;  %1018 = vmatmul.f32.gmra.mxu0 %v306_v32  ;;  %3615 = vmatmul.f32.gmra.mxu1 %v2902_v37  ;;  %v692_v37 = vld [vmem:[#allocation2 + $0xeb0] sm:$0xff] }
 0x2f0   : > { %v9594_v53 = vpop.f32.mrf.mxu3  ;;  %v6162_v41 = vpop.f32.mrf.mxu2 }
 0x2f1   : > { %11201 = vst [vmem:[#allocation41_spill] sm:$0xff] %v9594_v53  ;;  %v7562_v48 = vadd.f32 %v6162_v41, %v4968_v49  ;;  %v5498_v49 = vld [vmem:[#allocation2 + $0x4b0] sm:$0xff] }
 0x2f3   : > { %8074 = vst [vmem:[%s9101_s18 + $0x220] sm:$0xff] %v7562_v48  ;;  %v308_v48 = vld [vmem:[#allocation2 + $0x2b0] sm:$0xff] }
 0x2f4   : > { %v974_v39 = vpop.f32.mrf.mxu0  ;;  %v3571_v47 = vpop.f32.mrf.mxu1 }
 0x2f5   : > { %v2375_v17 = vadd.f32 %v9583_v36, %v974_v39  ;;  %2173 = vmatmul.f32.gmra.mxu3 %v691_v58  ;;  %6212 = vmatmul.f32.gmra.mxu2 %v5497_v2  ;;  %v2904_v2 = vld [vmem:[#allocation2 + $0x3b0] sm:$0xff] }
 0x2f7   : > { %v4969_v26 = vadd.f32 %v3571_v47, %v2375_v17  ;;  %1021 = vmatmul.f32.gmra.mxu0 %v307_v7  ;;  %3618 = vmatmul.f32.gmra.mxu1 %v2903_v14  ;;  %v693_v14 = vld [vmem:[#allocation2 + $0xeb8] sm:$0xff] }
 0x2f8   : > { %v9598_v8 = vpop.f32.mrf.mxu3  ;;  %v6165_v32 = vpop.f32.mrf.mxu2 }
 0x2f9   : > { %11202 = vst [vmem:[#allocation42_spill] sm:$0xff] %v9598_v8  ;;  %v7563_v35 = vadd.f32 %v6165_v32, %v4969_v26  ;;  %v5499_v26 = vld [vmem:[#allocation2 + $0x4b8] sm:$0xff] }
 0x2fb   : > { %8075 = vst [vmem:[%s9101_s18 + $0x228] sm:$0xff] %v7563_v35  ;;  %v309_v35 = vld [vmem:[#allocation2 + $0x2b8] sm:$0xff] }
 0x2fc   : > { %v977_v41 = vpop.f32.mrf.mxu0  ;;  %v3574_v58 = vpop.f32.mrf.mxu1 }
 0x2fd   : > { %v2376_v53 = vadd.f32 %v9583_v36, %v977_v41  ;;  %2176 = vmatmul.f32.gmra.mxu3 %v692_v37  ;;  %6215 = vmatmul.f32.gmra.mxu2 %v5498_v49  ;;  %v2905_v49 = vld [vmem:[#allocation2 + $0x3b8] sm:$0xff] }
 0x2ff   : > { %v4970_v39 = vadd.f32 %v3574_v58, %v2376_v53  ;;  %1024 = vmatmul.f32.gmra.mxu0 %v308_v48  ;;  %3621 = vmatmul.f32.gmra.mxu1 %v2904_v2  ;;  %v694_v2 = vld [vmem:[#allocation2 + $0xec0] sm:$0xff] }
 0x300   : > { %v9602_v17 = vpop.f32.mrf.mxu3  ;;  %v6168_v7 = vpop.f32.mrf.mxu2 }
 0x301   : > { %11203 = vst [vmem:[#allocation43_spill] sm:$0xff] %v9602_v17  ;;  %v7564_v47 = vadd.f32 %v6168_v7, %v4970_v39  ;;  %v5500_v39 = vld [vmem:[#allocation2 + $0x4c0] sm:$0xff] }
 0x303   : > { %8076 = vst [vmem:[%s9101_s18 + $0x230] sm:$0xff] %v7564_v47  ;;  %v310_v47 = vld [vmem:[#allocation2 + $0x2c0] sm:$0xff] }
 0x304   : > { %v980_v32 = vpop.f32.mrf.mxu0  ;;  %v3577_v37 = vpop.f32.mrf.mxu1 }
 0x305   : > { %v2377_v8 = vadd.f32 %v9583_v36, %v980_v32  ;;  %2179 = vmatmul.f32.gmra.mxu3 %v693_v14  ;;  %6218 = vmatmul.f32.gmra.mxu2 %v5499_v26  ;;  %v2906_v26 = vld [vmem:[#allocation2 + $0x3c0] sm:$0xff] }
 0x307   : > { %v4971_v41 = vadd.f32 %v3577_v37, %v2377_v8  ;;  %1027 = vmatmul.f32.gmra.mxu0 %v309_v35  ;;  %3624 = vmatmul.f32.gmra.mxu1 %v2905_v49  ;;  %v695_v49 = vld [vmem:[#allocation2 + $0xec8] sm:$0xff] }
 0x308   : > { %v9606_v53 = vpop.f32.mrf.mxu3  ;;  %v6171_v48 = vpop.f32.mrf.mxu2 }
 0x309   : > { %11204 = vst [vmem:[#allocation44_spill] sm:$0xff] %v9606_v53  ;;  %v7565_v58 = vadd.f32 %v6171_v48, %v4971_v41  ;;  %v5501_v41 = vld [vmem:[#allocation2 + $0x4c8] sm:$0xff] }
 0x30b   : > { %8077 = vst [vmem:[%s9101_s18 + $0x238] sm:$0xff] %v7565_v58  ;;  %v311_v58 = vld [vmem:[#allocation2 + $0x2c8] sm:$0xff] }
 0x30c   : > { %v983_v7 = vpop.f32.mrf.mxu0  ;;  %v3580_v14 = vpop.f32.mrf.mxu1 }
 0x30d   : > { %v2378_v17 = vadd.f32 %v9583_v36, %v983_v7  ;;  %2182 = vmatmul.f32.gmra.mxu3 %v694_v2  ;;  %6221 = vmatmul.f32.gmra.mxu2 %v5500_v39  ;;  %v2907_v39 = vld [vmem:[#allocation2 + $0x3c8] sm:$0xff] }
 0x30f   : > { %v4972_v32 = vadd.f32 %v3580_v14, %v2378_v17  ;;  %1030 = vmatmul.f32.gmra.mxu0 %v310_v47  ;;  %3627 = vmatmul.f32.gmra.mxu1 %v2906_v26  ;;  %v696_v26 = vld [vmem:[#allocation2 + $0xed0] sm:$0xff] }
 0x310   : > { %v9610_v8 = vpop.f32.mrf.mxu3  ;;  %v6174_v35 = vpop.f32.mrf.mxu2 }
 0x311   : > { %11205 = vst [vmem:[#allocation45_spill] sm:$0xff] %v9610_v8  ;;  %v7566_v37 = vadd.f32 %v6174_v35, %v4972_v32  ;;  %v5502_v32 = vld [vmem:[#allocation2 + $0x4d0] sm:$0xff] }
 0x313   : > { %8078 = vst [vmem:[%s9101_s18 + $0x240] sm:$0xff] %v7566_v37  ;;  %v312_v37 = vld [vmem:[#allocation2 + $0x2d0] sm:$0xff] }
 0x314   : > { %v986_v48 = vpop.f32.mrf.mxu0  ;;  %v3583_v2 = vpop.f32.mrf.mxu1 }
 0x315   : > { %v2379_v53 = vadd.f32 %v9583_v36, %v986_v48  ;;  %2185 = vmatmul.f32.gmra.mxu3 %v695_v49  ;;  %6224 = vmatmul.f32.gmra.mxu2 %v5501_v41  ;;  %v2908_v41 = vld [vmem:[#allocation2 + $0x3d0] sm:$0xff] }
 0x317   : > { %v4973_v7 = vadd.f32 %v3583_v2, %v2379_v53  ;;  %1033 = vmatmul.f32.gmra.mxu0 %v311_v58  ;;  %3630 = vmatmul.f32.gmra.mxu1 %v2907_v39  ;;  %v697_v39 = vld [vmem:[#allocation2 + $0xed8] sm:$0xff] }
 0x318   : > { %v9614_v17 = vpop.f32.mrf.mxu3  ;;  %v6177_v47 = vpop.f32.mrf.mxu2 }
 0x319   : > { %11206 = vst [vmem:[#allocation46_spill] sm:$0xff] %v9614_v17  ;;  %v7567_v14 = vadd.f32 %v6177_v47, %v4973_v7  ;;  %v5503_v7 = vld [vmem:[#allocation2 + $0x4d8] sm:$0xff] }
 0x31b   : > { %8079 = vst [vmem:[%s9101_s18 + $0x248] sm:$0xff] %v7567_v14  ;;  %v313_v14 = vld [vmem:[#allocation2 + $0x2d8] sm:$0xff] }
 0x31c   : > { %v989_v35 = vpop.f32.mrf.mxu0  ;;  %v3586_v49 = vpop.f32.mrf.mxu1 }
 0x31d   : > { %v2380_v8 = vadd.f32 %v9583_v36, %v989_v35  ;;  %2188 = vmatmul.f32.gmra.mxu3 %v696_v26  ;;  %6227 = vmatmul.f32.gmra.mxu2 %v5502_v32  ;;  %v2909_v32 = vld [vmem:[#allocation2 + $0x3d8] sm:$0xff] }
 0x31f   : > { %v4974_v48 = vadd.f32 %v3586_v49, %v2380_v8  ;;  %1036 = vmatmul.f32.gmra.mxu0 %v312_v37  ;;  %3633 = vmatmul.f32.gmra.mxu1 %v2908_v41  ;;  %v698_v41 = vld [vmem:[#allocation2 + $0xee0] sm:$0xff] }
 0x320   : > { %v9618_v53 = vpop.f32.mrf.mxu3  ;;  %v6180_v58 = vpop.f32.mrf.mxu2 }
 0x321   : > { %11207 = vst [vmem:[#allocation47_spill] sm:$0xff] %v9618_v53  ;;  %v7568_v2 = vadd.f32 %v6180_v58, %v4974_v48  ;;  %v5504_v48 = vld [vmem:[#allocation2 + $0x4e0] sm:$0xff] }
 0x323   : > { %8080 = vst [vmem:[%s9101_s18 + $0x250] sm:$0xff] %v7568_v2  ;;  %v314_v2 = vld [vmem:[#allocation2 + $0x2e0] sm:$0xff] }
 0x324   : > { %v992_v47 = vpop.f32.mrf.mxu0  ;;  %v3589_v26 = vpop.f32.mrf.mxu1 }
 0x325   : > { %v2381_v17 = vadd.f32 %v9583_v36, %v992_v47  ;;  %2191 = vmatmul.f32.gmra.mxu3 %v697_v39  ;;  %6230 = vmatmul.f32.gmra.mxu2 %v5503_v7  ;;  %v2910_v7 = vld [vmem:[#allocation2 + $0x3e0] sm:$0xff] }
 0x327   : > { %v4975_v35 = vadd.f32 %v3589_v26, %v2381_v17  ;;  %1039 = vmatmul.f32.gmra.mxu0 %v313_v14  ;;  %3636 = vmatmul.f32.gmra.mxu1 %v2909_v32  ;;  %v699_v32 = vld [vmem:[#allocation2 + $0xee8] sm:$0xff] }
 0x328   : > { %v9622_v8 = vpop.f32.mrf.mxu3  ;;  %v6183_v37 = vpop.f32.mrf.mxu2 }
 0x329   : > { %11208 = vst [vmem:[#allocation48_spill] sm:$0xff] %v9622_v8  ;;  %v7569_v49 = vadd.f32 %v6183_v37, %v4975_v35  ;;  %v5505_v35 = vld [vmem:[#allocation2 + $0x4e8] sm:$0xff] }
 0x32b   : > { %8081 = vst [vmem:[%s9101_s18 + $0x258] sm:$0xff] %v7569_v49  ;;  %v315_v49 = vld [vmem:[#allocation2 + $0x2e8] sm:$0xff] }
 0x32c   : > { %v995_v58 = vpop.f32.mrf.mxu0  ;;  %v3592_v39 = vpop.f32.mrf.mxu1 }
 0x32d   : > { %v2382_v53 = vadd.f32 %v9583_v36, %v995_v58  ;;  %2194 = vmatmul.f32.gmra.mxu3 %v698_v41  ;;  %6233 = vmatmul.f32.gmra.mxu2 %v5504_v48  ;;  %v2911_v48 = vld [vmem:[#allocation2 + $0x3e8] sm:$0xff] }
 0x32f   : > { %v4976_v47 = vadd.f32 %v3592_v39, %v2382_v53  ;;  %1042 = vmatmul.f32.gmra.mxu0 %v314_v2  ;;  %3639 = vmatmul.f32.gmra.mxu1 %v2910_v7  ;;  %v700_v7 = vld [vmem:[#allocation2 + $0xef0] sm:$0xff] }
 0x330   : > { %v9626_v17 = vpop.f32.mrf.mxu3  ;;  %v6186_v14 = vpop.f32.mrf.mxu2 }
 0x331   : > { %11209 = vst [vmem:[#allocation49_spill] sm:$0xff] %v9626_v17  ;;  %v7570_v26 = vadd.f32 %v6186_v14, %v4976_v47  ;;  %v5506_v47 = vld [vmem:[#allocation2 + $0x4f0] sm:$0xff] }
 0x333   : > { %8082 = vst [vmem:[%s9101_s18 + $0x260] sm:$0xff] %v7570_v26  ;;  %v316_v26 = vld [vmem:[#allocation2 + $0x2f0] sm:$0xff] }
 0x334   : > { %v998_v37 = vpop.f32.mrf.mxu0  ;;  %v3595_v41 = vpop.f32.mrf.mxu1 }
 0x335   : > { %v2383_v8 = vadd.f32 %v9583_v36, %v998_v37  ;;  %2197 = vmatmul.f32.gmra.mxu3 %v699_v32  ;;  %6236 = vmatmul.f32.gmra.mxu2 %v5505_v35  ;;  %v2912_v35 = vld [vmem:[#allocation2 + $0x3f0] sm:$0xff] }
 0x337   : > { %v4977_v58 = vadd.f32 %v3595_v41, %v2383_v8  ;;  %1045 = vmatmul.f32.gmra.mxu0 %v315_v49  ;;  %3642 = vmatmul.f32.gmra.mxu1 %v2911_v48  ;;  %v701_v48 = vld [vmem:[#allocation2 + $0xef8] sm:$0xff] }
 0x338   : > { %v9630_v53 = vpop.f32.mrf.mxu3  ;;  %v6189_v2 = vpop.f32.mrf.mxu2 }
 0x339   : > { %11210 = vst [vmem:[#allocation50_spill] sm:$0xff] %v9630_v53  ;;  %v7571_v39 = vadd.f32 %v6189_v2, %v4977_v58  ;;  %v5507_v58 = vld [vmem:[#allocation2 + $0x4f8] sm:$0xff] }
 0x33b   : > { %8083 = vst [vmem:[%s9101_s18 + $0x268] sm:$0xff] %v7571_v39  ;;  %v317_v39 = vld [vmem:[#allocation2 + $0x2f8] sm:$0xff] }
 0x33c   : > { %v1001_v14 = vpop.f32.mrf.mxu0  ;;  %v3598_v32 = vpop.f32.mrf.mxu1 }
 0x33d   : > { %v2384_v17 = vadd.f32 %v9583_v36, %v1001_v14  ;;  %2200 = vmatmul.f32.gmra.mxu3 %v700_v7  ;;  %6239 = vmatmul.f32.gmra.mxu2 %v5506_v47  ;;  %v2913_v47 = vld [vmem:[#allocation2 + $0x3f8] sm:$0xff] }
 0x33f   : > { %v4978_v37 = vadd.f32 %v3598_v32, %v2384_v17  ;;  %1048 = vmatmul.f32.gmra.mxu0 %v316_v26  ;;  %3645 = vmatmul.f32.gmra.mxu1 %v2912_v35  ;;  %v702_v35 = vld [vmem:[#allocation2 + $0xf00] sm:$0xff] }
 0x340   : > { %v9634_v8 = vpop.f32.mrf.mxu3  ;;  %v6192_v49 = vpop.f32.mrf.mxu2 }
 0x341   : > { %11211 = vst [vmem:[#allocation51_spill] sm:$0xff] %v9634_v8  ;;  %v7572_v41 = vadd.f32 %v6192_v49, %v4978_v37  ;;  %v5508_v37 = vld [vmem:[#allocation2 + $0x500] sm:$0xff] }
 0x343   : > { %8084 = vst [vmem:[%s9101_s18 + $0x270] sm:$0xff] %v7572_v41  ;;  %v318_v41 = vld [vmem:[#allocation2 + $0x300] sm:$0xff] }
 0x344   : > { %v1004_v2 = vpop.f32.mrf.mxu0  ;;  %v3601_v7 = vpop.f32.mrf.mxu1 }
 0x345   : > { %v2385_v53 = vadd.f32 %v9583_v36, %v1004_v2  ;;  %2203 = vmatmul.f32.gmra.mxu3 %v701_v48  ;;  %6242 = vmatmul.f32.gmra.mxu2 %v5507_v58  ;;  %v2914_v58 = vld [vmem:[#allocation2 + $0x400] sm:$0xff] }
 0x347   : > { %v4979_v14 = vadd.f32 %v3601_v7, %v2385_v53  ;;  %1051 = vmatmul.f32.gmra.mxu0 %v317_v39  ;;  %3648 = vmatmul.f32.gmra.mxu1 %v2913_v47  ;;  %v703_v47 = vld [vmem:[#allocation2 + $0xf08] sm:$0xff] }
 0x348   : > { %v9638_v17 = vpop.f32.mrf.mxu3  ;;  %v6195_v26 = vpop.f32.mrf.mxu2 }
 0x349   : > { %11212 = vst [vmem:[#allocation52_spill] sm:$0xff] %v9638_v17  ;;  %v7573_v32 = vadd.f32 %v6195_v26, %v4979_v14  ;;  %v5509_v14 = vld [vmem:[#allocation2 + $0x508] sm:$0xff] }
 0x34b   : > { %8085 = vst [vmem:[%s9101_s18 + $0x278] sm:$0xff] %v7573_v32  ;;  %v319_v32 = vld [vmem:[#allocation2 + $0x308] sm:$0xff] }
 0x34c   : > { %v1007_v49 = vpop.f32.mrf.mxu0  ;;  %v3604_v48 = vpop.f32.mrf.mxu1 }
 0x34d   : > { %v2386_v8 = vadd.f32 %v9583_v36, %v1007_v49  ;;  %2206 = vmatmul.f32.gmra.mxu3 %v702_v35  ;;  %6245 = vmatmul.f32.gmra.mxu2 %v5508_v37  ;;  %v2915_v37 = vld [vmem:[#allocation2 + $0x408] sm:$0xff] }
 0x34f   : > { %v4980_v2 = vadd.f32 %v3604_v48, %v2386_v8  ;;  %1054 = vmatmul.f32.gmra.mxu0 %v318_v41  ;;  %3651 = vmatmul.f32.gmra.mxu1 %v2914_v58  ;;  %v704_v58 = vld [vmem:[#allocation2 + $0xf10] sm:$0xff] }
 0x350   : > { %v9642_v53 = vpop.f32.mrf.mxu3  ;;  %v6198_v39 = vpop.f32.mrf.mxu2 }
 0x351   : > { %11213 = vst [vmem:[#allocation53_spill] sm:$0xff] %v9642_v53  ;;  %v7574_v7 = vadd.f32 %v6198_v39, %v4980_v2  ;;  %v5510_v2 = vld [vmem:[#allocation2 + $0x510] sm:$0xff] }
 0x353   : > { %8086 = vst [vmem:[%s9101_s18 + $0x280] sm:$0xff] %v7574_v7  ;;  %v320_v7 = vld [vmem:[#allocation2 + $0x310] sm:$0xff] }
 0x354   : > { %v1010_v26 = vpop.f32.mrf.mxu0  ;;  %v3607_v35 = vpop.f32.mrf.mxu1 }
 0x355   : > { %v2387_v17 = vadd.f32 %v9583_v36, %v1010_v26  ;;  %2209 = vmatmul.f32.gmra.mxu3 %v703_v47  ;;  %6248 = vmatmul.f32.gmra.mxu2 %v5509_v14  ;;  %v2916_v14 = vld [vmem:[#allocation2 + $0x410] sm:$0xff] }
 0x357   : > { %v4981_v49 = vadd.f32 %v3607_v35, %v2387_v17  ;;  %1057 = vmatmul.f32.gmra.mxu0 %v319_v32  ;;  %3654 = vmatmul.f32.gmra.mxu1 %v2915_v37  ;;  %v705_v37 = vld [vmem:[#allocation2 + $0xf18] sm:$0xff] }
 0x358   : > { %v9646_v8 = vpop.f32.mrf.mxu3  ;;  %v6201_v41 = vpop.f32.mrf.mxu2 }
 0x359   : > { %11214 = vst [vmem:[#allocation54_spill] sm:$0xff] %v9646_v8  ;;  %v7575_v48 = vadd.f32 %v6201_v41, %v4981_v49  ;;  %v5511_v49 = vld [vmem:[#allocation2 + $0x518] sm:$0xff] }
 0x35b   : > { %8087 = vst [vmem:[%s9101_s18 + $0x288] sm:$0xff] %v7575_v48  ;;  %v321_v48 = vld [vmem:[#allocation2 + $0x318] sm:$0xff] }
 0x35c   : > { %v1013_v39 = vpop.f32.mrf.mxu0  ;;  %v3610_v47 = vpop.f32.mrf.mxu1 }
 0x35d   : > { %v2388_v53 = vadd.f32 %v9583_v36, %v1013_v39  ;;  %2212 = vmatmul.f32.gmra.mxu3 %v704_v58  ;;  %6251 = vmatmul.f32.gmra.mxu2 %v5510_v2  ;;  %v2917_v2 = vld [vmem:[#allocation2 + $0x418] sm:$0xff] }
 0x35f   : > { %v4982_v26 = vadd.f32 %v3610_v47, %v2388_v53  ;;  %1060 = vmatmul.f32.gmra.mxu0 %v320_v7  ;;  %3657 = vmatmul.f32.gmra.mxu1 %v2916_v14  ;;  %v706_v14 = vld [vmem:[#allocation2 + $0xf20] sm:$0xff] }
 0x360   : > { %v9650_v17 = vpop.f32.mrf.mxu3  ;;  %v6204_v32 = vpop.f32.mrf.mxu2 }
 0x361   : > { %11215 = vst [vmem:[#allocation55_spill] sm:$0xff] %v9650_v17  ;;  %v7576_v35 = vadd.f32 %v6204_v32, %v4982_v26  ;;  %v5512_v26 = vld [vmem:[#allocation2 + $0x520] sm:$0xff] }
 0x363   : > { %8088 = vst [vmem:[%s9101_s18 + $0x290] sm:$0xff] %v7576_v35  ;;  %v322_v35 = vld [vmem:[#allocation2 + $0x320] sm:$0xff] }
 0x364   : > { %v1016_v41 = vpop.f32.mrf.mxu0  ;;  %v3613_v58 = vpop.f32.mrf.mxu1 }
 0x365   : > { %v2389_v8 = vadd.f32 %v9583_v36, %v1016_v41  ;;  %2215 = vmatmul.f32.gmra.mxu3 %v705_v37  ;;  %6254 = vmatmul.f32.gmra.mxu2 %v5511_v49  ;;  %v2918_v49 = vld [vmem:[#allocation2 + $0x420] sm:$0xff] }
 0x367   : > { %v4983_v39 = vadd.f32 %v3613_v58, %v2389_v8  ;;  %1063 = vmatmul.f32.gmra.mxu0 %v321_v48  ;;  %3660 = vmatmul.f32.gmra.mxu1 %v2917_v2  ;;  %v707_v2 = vld [vmem:[#allocation2 + $0xf28] sm:$0xff] }
 0x368   : > { %v9654_v53 = vpop.f32.mrf.mxu3  ;;  %v6207_v7 = vpop.f32.mrf.mxu2 }
 0x369   : > { %11216 = vst [vmem:[#allocation56_spill] sm:$0xff] %v9654_v53  ;;  %v7577_v47 = vadd.f32 %v6207_v7, %v4983_v39  ;;  %v5513_v39 = vld [vmem:[#allocation2 + $0x528] sm:$0xff] }
 0x36b   : > { %8089 = vst [vmem:[%s9101_s18 + $0x298] sm:$0xff] %v7577_v47  ;;  %v323_v47 = vld [vmem:[#allocation2 + $0x328] sm:$0xff] }
 0x36c   : > { %v1019_v32 = vpop.f32.mrf.mxu0  ;;  %v3616_v37 = vpop.f32.mrf.mxu1 }
 0x36d   : > { %v2390_v17 = vadd.f32 %v9583_v36, %v1019_v32  ;;  %2218 = vmatmul.f32.gmra.mxu3 %v706_v14  ;;  %6257 = vmatmul.f32.gmra.mxu2 %v5512_v26  ;;  %v2919_v26 = vld [vmem:[#allocation2 + $0x428] sm:$0xff] }
 0x36f   : > { %v4984_v41 = vadd.f32 %v3616_v37, %v2390_v17  ;;  %1066 = vmatmul.f32.gmra.mxu0 %v322_v35  ;;  %3663 = vmatmul.f32.gmra.mxu1 %v2918_v49  ;;  %v708_v49 = vld [vmem:[#allocation2 + $0xf30] sm:$0xff] }
 0x370   : > { %v9658_v8 = vpop.f32.mrf.mxu3  ;;  %v6210_v48 = vpop.f32.mrf.mxu2 }
 0x371   : > { %11217 = vst [vmem:[#allocation57_spill] sm:$0xff] %v9658_v8  ;;  %v7578_v58 = vadd.f32 %v6210_v48, %v4984_v41  ;;  %v5514_v41 = vld [vmem:[#allocation2 + $0x530] sm:$0xff] }
 0x373   : > { %8090 = vst [vmem:[%s9101_s18 + $0x2a0] sm:$0xff] %v7578_v58  ;;  %v324_v58 = vld [vmem:[#allocation2 + $0x330] sm:$0xff] }
 0x374   : > { %v1022_v7 = vpop.f32.mrf.mxu0  ;;  %v3619_v14 = vpop.f32.mrf.mxu1 }
 0x375   : > { %v2391_v53 = vadd.f32 %v9583_v36, %v1022_v7  ;;  %2221 = vmatmul.f32.gmra.mxu3 %v707_v2  ;;  %6260 = vmatmul.f32.gmra.mxu2 %v5513_v39  ;;  %v2920_v39 = vld [vmem:[#allocation2 + $0x430] sm:$0xff] }
 0x377   : > { %v4985_v32 = vadd.f32 %v3619_v14, %v2391_v53  ;;  %1069 = vmatmul.f32.gmra.mxu0 %v323_v47  ;;  %3666 = vmatmul.f32.gmra.mxu1 %v2919_v26  ;;  %v709_v26 = vld [vmem:[#allocation2 + $0xf38] sm:$0xff] }
 0x378   : > { %v9662_v17 = vpop.f32.mrf.mxu3  ;;  %v6213_v35 = vpop.f32.mrf.mxu2 }
 0x379   : > { %11218 = vst [vmem:[#allocation58_spill] sm:$0xff] %v9662_v17  ;;  %v7579_v37 = vadd.f32 %v6213_v35, %v4985_v32  ;;  %v5515_v32 = vld [vmem:[#allocation2 + $0x538] sm:$0xff] }
 0x37b   : > { %8091 = vst [vmem:[%s9101_s18 + $0x2a8] sm:$0xff] %v7579_v37  ;;  %v325_v37 = vld [vmem:[#allocation2 + $0x338] sm:$0xff] }
 0x37c   : > { %v1025_v48 = vpop.f32.mrf.mxu0  ;;  %v3622_v2 = vpop.f32.mrf.mxu1 }
 0x37d   : > { %v2392_v8 = vadd.f32 %v9583_v36, %v1025_v48  ;;  %2224 = vmatmul.f32.gmra.mxu3 %v708_v49  ;;  %6263 = vmatmul.f32.gmra.mxu2 %v5514_v41  ;;  %v2921_v41 = vld [vmem:[#allocation2 + $0x438] sm:$0xff] }
 0x37f   : > { %v4986_v7 = vadd.f32 %v3622_v2, %v2392_v8  ;;  %1072 = vmatmul.f32.gmra.mxu0 %v324_v58  ;;  %3669 = vmatmul.f32.gmra.mxu1 %v2920_v39  ;;  %v710_v39 = vld [vmem:[#allocation2 + $0xf40] sm:$0xff] }
 0x380   : > { %v9666_v53 = vpop.f32.mrf.mxu3  ;;  %v6216_v47 = vpop.f32.mrf.mxu2 }
 0x381   : > { %11219 = vst [vmem:[#allocation59_spill] sm:$0xff] %v9666_v53  ;;  %v7580_v14 = vadd.f32 %v6216_v47, %v4986_v7  ;;  %v5516_v7 = vld [vmem:[#allocation2 + $0x540] sm:$0xff] }
 0x383   : > { %8092 = vst [vmem:[%s9101_s18 + $0x2b0] sm:$0xff] %v7580_v14  ;;  %v326_v14 = vld [vmem:[#allocation2 + $0x340] sm:$0xff] }
 0x384   : > { %v1028_v35 = vpop.f32.mrf.mxu0  ;;  %v3625_v49 = vpop.f32.mrf.mxu1 }
 0x385   : > { %v2393_v17 = vadd.f32 %v9583_v36, %v1028_v35  ;;  %2227 = vmatmul.f32.gmra.mxu3 %v709_v26  ;;  %6266 = vmatmul.f32.gmra.mxu2 %v5515_v32  ;;  %v2922_v32 = vld [vmem:[#allocation2 + $0x440] sm:$0xff] }
 0x387   : > { %v4987_v48 = vadd.f32 %v3625_v49, %v2393_v17  ;;  %1075 = vmatmul.f32.gmra.mxu0 %v325_v37  ;;  %3672 = vmatmul.f32.gmra.mxu1 %v2921_v41  ;;  %v711_v41 = vld [vmem:[#allocation2 + $0xf48] sm:$0xff] }
 0x388   : > { %v9670_v8 = vpop.f32.mrf.mxu3  ;;  %v6219_v58 = vpop.f32.mrf.mxu2 }
 0x389   : > { %11220 = vst [vmem:[#allocation60_spill] sm:$0xff] %v9670_v8  ;;  %v7581_v2 = vadd.f32 %v6219_v58, %v4987_v48  ;;  %v5517_v48 = vld [vmem:[#allocation2 + $0x548] sm:$0xff] }
 0x38b   : > { %8093 = vst [vmem:[%s9101_s18 + $0x2b8] sm:$0xff] %v7581_v2  ;;  %v327_v2 = vld [vmem:[#allocation2 + $0x348] sm:$0xff] }
 0x38c   : > { %v1031_v47 = vpop.f32.mrf.mxu0  ;;  %v3628_v26 = vpop.f32.mrf.mxu1 }
 0x38d   : > { %v2394_v53 = vadd.f32 %v9583_v36, %v1031_v47  ;;  %2230 = vmatmul.f32.gmra.mxu3 %v710_v39  ;;  %6269 = vmatmul.f32.gmra.mxu2 %v5516_v7  ;;  %v2923_v7 = vld [vmem:[#allocation2 + $0x448] sm:$0xff] }
 0x38f   : > { %v4988_v35 = vadd.f32 %v3628_v26, %v2394_v53  ;;  %1078 = vmatmul.f32.gmra.mxu0 %v326_v14  ;;  %3675 = vmatmul.f32.gmra.mxu1 %v2922_v32  ;;  %v712_v32 = vld [vmem:[#allocation2 + $0xf50] sm:$0xff] }
 0x390   : > { %v9674_v17 = vpop.f32.mrf.mxu3  ;;  %v6222_v37 = vpop.f32.mrf.mxu2 }
 0x391   : > { %11221 = vst [vmem:[#allocation61_spill] sm:$0xff] %v9674_v17  ;;  %v7582_v49 = vadd.f32 %v6222_v37, %v4988_v35  ;;  %v5518_v35 = vld [vmem:[#allocation2 + $0x550] sm:$0xff] }
 0x393   : > { %8094 = vst [vmem:[%s9101_s18 + $0x2c0] sm:$0xff] %v7582_v49  ;;  %v328_v49 = vld [vmem:[#allocation2 + $0x350] sm:$0xff] }
 0x394   : > { %v1034_v58 = vpop.f32.mrf.mxu0  ;;  %v3631_v39 = vpop.f32.mrf.mxu1 }
 0x395   : > { %v2395_v8 = vadd.f32 %v9583_v36, %v1034_v58  ;;  %2233 = vmatmul.f32.gmra.mxu3 %v711_v41  ;;  %6272 = vmatmul.f32.gmra.mxu2 %v5517_v48  ;;  %v2924_v48 = vld [vmem:[#allocation2 + $0x450] sm:$0xff] }
 0x397   : > { %v4989_v47 = vadd.f32 %v3631_v39, %v2395_v8  ;;  %1081 = vmatmul.f32.gmra.mxu0 %v327_v2  ;;  %3678 = vmatmul.f32.gmra.mxu1 %v2923_v7  ;;  %v713_v7 = vld [vmem:[#allocation2 + $0xf58] sm:$0xff] }
 0x398   : > { %v9678_v53 = vpop.f32.mrf.mxu3  ;;  %v6225_v14 = vpop.f32.mrf.mxu2 }
 0x399   : > { %11222 = vst [vmem:[#allocation62_spill] sm:$0xff] %v9678_v53  ;;  %v7583_v26 = vadd.f32 %v6225_v14, %v4989_v47  ;;  %v5519_v47 = vld [vmem:[#allocation2 + $0x558] sm:$0xff] }
 0x39b   : > { %8095 = vst [vmem:[%s9101_s18 + $0x2c8] sm:$0xff] %v7583_v26  ;;  %v329_v26 = vld [vmem:[#allocation2 + $0x358] sm:$0xff] }
 0x39c   : > { %v1037_v37 = vpop.f32.mrf.mxu0  ;;  %v3634_v41 = vpop.f32.mrf.mxu1 }
 0x39d   : > { %v2396_v17 = vadd.f32 %v9583_v36, %v1037_v37  ;;  %2236 = vmatmul.f32.gmra.mxu3 %v712_v32  ;;  %6275 = vmatmul.f32.gmra.mxu2 %v5518_v35  ;;  %v2925_v35 = vld [vmem:[#allocation2 + $0x458] sm:$0xff] }
 0x39f   : > { %v4990_v58 = vadd.f32 %v3634_v41, %v2396_v17  ;;  %1084 = vmatmul.f32.gmra.mxu0 %v328_v49  ;;  %3681 = vmatmul.f32.gmra.mxu1 %v2924_v48  ;;  %v714_v48 = vld [vmem:[#allocation2 + $0xf60] sm:$0xff] }
 0x3a0   : > { %v9682_v8 = vpop.f32.mrf.mxu3  ;;  %v6228_v2 = vpop.f32.mrf.mxu2 }
 0x3a1   : > { %11223 = vst [vmem:[#allocation63_spill] sm:$0xff] %v9682_v8  ;;  %v7584_v39 = vadd.f32 %v6228_v2, %v4990_v58  ;;  %v5520_v58 = vld [vmem:[#allocation2 + $0x560] sm:$0xff] }
 0x3a3   : > { %8096 = vst [vmem:[%s9101_s18 + $0x2d0] sm:$0xff] %v7584_v39  ;;  %v330_v39 = vld [vmem:[#allocation2 + $0x360] sm:$0xff] }
 0x3a4   : > { %v1040_v14 = vpop.f32.mrf.mxu0  ;;  %v3637_v32 = vpop.f32.mrf.mxu1 }
 0x3a5   : > { %v2397_v53 = vadd.f32 %v9583_v36, %v1040_v14  ;;  %2239 = vmatmul.f32.gmra.mxu3 %v713_v7  ;;  %6278 = vmatmul.f32.gmra.mxu2 %v5519_v47  ;;  %v2926_v47 = vld [vmem:[#allocation2 + $0x460] sm:$0xff] }
 0x3a7   : > { %v4991_v37 = vadd.f32 %v3637_v32, %v2397_v53  ;;  %1087 = vmatmul.f32.gmra.mxu0 %v329_v26  ;;  %3684 = vmatmul.f32.gmra.mxu1 %v2925_v35  ;;  %v715_v35 = vld [vmem:[#allocation2 + $0xf68] sm:$0xff] }
 0x3a8   : > { %v9686_v17 = vpop.f32.mrf.mxu3  ;;  %v6231_v49 = vpop.f32.mrf.mxu2 }
 0x3a9   : > { %11224 = vst [vmem:[#allocation64_spill] sm:$0xff] %v9686_v17  ;;  %v7585_v41 = vadd.f32 %v6231_v49, %v4991_v37  ;;  %v5521_v37 = vld [vmem:[#allocation2 + $0x568] sm:$0xff] }
 0x3ab   : > { %8097 = vst [vmem:[%s9101_s18 + $0x2d8] sm:$0xff] %v7585_v41  ;;  %v331_v41 = vld [vmem:[#allocation2 + $0x368] sm:$0xff] }
 0x3ac   : > { %v1043_v2 = vpop.f32.mrf.mxu0  ;;  %v3640_v7 = vpop.f32.mrf.mxu1 }
 0x3ad   : > { %v2398_v8 = vadd.f32 %v9583_v36, %v1043_v2  ;;  %2242 = vmatmul.f32.gmra.mxu3 %v714_v48  ;;  %6281 = vmatmul.f32.gmra.mxu2 %v5520_v58  ;;  %v2927_v58 = vld [vmem:[#allocation2 + $0x468] sm:$0xff] }
 0x3af   : > { %v4992_v14 = vadd.f32 %v3640_v7, %v2398_v8  ;;  %1090 = vmatmul.f32.gmra.mxu0 %v330_v39  ;;  %3687 = vmatmul.f32.gmra.mxu1 %v2926_v47  ;;  %v716_v47 = vld [vmem:[#allocation2 + $0xf70] sm:$0xff] }
 0x3b0   : > { %v9690_v53 = vpop.f32.mrf.mxu3  ;;  %v6234_v26 = vpop.f32.mrf.mxu2 }
 0x3b1   : > { %11225 = vst [vmem:[#allocation65_spill] sm:$0xff] %v9690_v53  ;;  %v7586_v32 = vadd.f32 %v6234_v26, %v4992_v14  ;;  %v5522_v14 = vld [vmem:[#allocation2 + $0x570] sm:$0xff] }
 0x3b3   : > { %8098 = vst [vmem:[%s9101_s18 + $0x2e0] sm:$0xff] %v7586_v32  ;;  %v332_v32 = vld [vmem:[#allocation2 + $0x370] sm:$0xff] }
 0x3b4   : > { %v1046_v49 = vpop.f32.mrf.mxu0  ;;  %v3643_v48 = vpop.f32.mrf.mxu1 }
 0x3b5   : > { %v2399_v17 = vadd.f32 %v9583_v36, %v1046_v49  ;;  %2245 = vmatmul.f32.gmra.mxu3 %v715_v35  ;;  %6284 = vmatmul.f32.gmra.mxu2 %v5521_v37  ;;  %v2928_v37 = vld [vmem:[#allocation2 + $0x470] sm:$0xff] }
 0x3b7   : > { %v4993_v2 = vadd.f32 %v3643_v48, %v2399_v17  ;;  %1093 = vmatmul.f32.gmra.mxu0 %v331_v41  ;;  %3690 = vmatmul.f32.gmra.mxu1 %v2927_v58  ;;  %v717_v58 = vld [vmem:[#allocation2 + $0xf78] sm:$0xff] }
 0x3b8   : > { %v9694_v8 = vpop.f32.mrf.mxu3  ;;  %v6237_v39 = vpop.f32.mrf.mxu2 }
 0x3b9   : > { %11226 = vst [vmem:[#allocation66_spill] sm:$0xff] %v9694_v8  ;;  %v7587_v7 = vadd.f32 %v6237_v39, %v4993_v2  ;;  %v5523_v2 = vld [vmem:[#allocation2 + $0x578] sm:$0xff] }
 0x3bb   : > { %8099 = vst [vmem:[%s9101_s18 + $0x2e8] sm:$0xff] %v7587_v7  ;;  %v333_v7 = vld [vmem:[#allocation2 + $0x378] sm:$0xff] }
 0x3bc   : > { %v1049_v26 = vpop.f32.mrf.mxu0  ;;  %v3646_v35 = vpop.f32.mrf.mxu1 }
 0x3bd   : > { %v2400_v53 = vadd.f32 %v9583_v36, %v1049_v26  ;;  %2248 = vmatmul.f32.gmra.mxu3 %v716_v47  ;;  %6287 = vmatmul.f32.gmra.mxu2 %v5522_v14  ;;  %v2929_v14 = vld [vmem:[#allocation2 + $0x478] sm:$0xff] }
 0x3bf   : > { %v4994_v49 = vadd.f32 %v3646_v35, %v2400_v53  ;;  %1096 = vmatmul.f32.gmra.mxu0 %v332_v32  ;;  %3693 = vmatmul.f32.gmra.mxu1 %v2928_v37  ;;  %v718_v37 = vld [vmem:[#allocation2 + $0xf80] sm:$0xff] }
 0x3c0   : > { %v9698_v17 = vpop.f32.mrf.mxu3  ;;  %v6240_v41 = vpop.f32.mrf.mxu2 }
 0x3c1   : > { %11227 = vst [vmem:[#allocation67_spill] sm:$0xff] %v9698_v17  ;;  %v7588_v48 = vadd.f32 %v6240_v41, %v4994_v49  ;;  %v5524_v49 = vld [vmem:[#allocation2 + $0x580] sm:$0xff] }
 0x3c3   : > { %8100 = vst [vmem:[%s9101_s18 + $0x2f0] sm:$0xff] %v7588_v48  ;;  %v334_v48 = vld [vmem:[#allocation2 + $0x380] sm:$0xff] }
 0x3c4   : > { %v1052_v39 = vpop.f32.mrf.mxu0  ;;  %v3649_v47 = vpop.f32.mrf.mxu1 }
 0x3c5   : > { %v2401_v8 = vadd.f32 %v9583_v36, %v1052_v39  ;;  %2251 = vmatmul.f32.gmra.mxu3 %v717_v58  ;;  %6290 = vmatmul.f32.gmra.mxu2 %v5523_v2  ;;  %v2930_v2 = vld [vmem:[#allocation2 + $0x480] sm:$0xff] }
 0x3c7   : > { %v4995_v26 = vadd.f32 %v3649_v47, %v2401_v8  ;;  %1099 = vmatmul.f32.gmra.mxu0 %v333_v7  ;;  %3696 = vmatmul.f32.gmra.mxu1 %v2929_v14  ;;  %v719_v14 = vld [vmem:[#allocation2 + $0xf88] sm:$0xff] }
 0x3c8   : > { %v9702_v53 = vpop.f32.mrf.mxu3  ;;  %v6243_v32 = vpop.f32.mrf.mxu2 }
 0x3c9   : > { %11228 = vst [vmem:[#allocation68_spill] sm:$0xff] %v9702_v53  ;;  %v7589_v35 = vadd.f32 %v6243_v32, %v4995_v26  ;;  %v5525_v26 = vld [vmem:[#allocation2 + $0x588] sm:$0xff] }
 0x3cb   : > { %8101 = vst [vmem:[%s9101_s18 + $0x2f8] sm:$0xff] %v7589_v35  ;;  %v335_v35 = vld [vmem:[#allocation2 + $0x388] sm:$0xff] }
 0x3cc   : > { %v1055_v41 = vpop.f32.mrf.mxu0  ;;  %v3652_v58 = vpop.f32.mrf.mxu1 }
 0x3cd   : > { %v2402_v17 = vadd.f32 %v9583_v36, %v1055_v41  ;;  %2254 = vmatmul.f32.gmra.mxu3 %v718_v37  ;;  %6293 = vmatmul.f32.gmra.mxu2 %v5524_v49  ;;  %v2931_v49 = vld [vmem:[#allocation2 + $0x488] sm:$0xff] }
 0x3cf   : > { %v4996_v39 = vadd.f32 %v3652_v58, %v2402_v17  ;;  %1102 = vmatmul.f32.gmra.mxu0 %v334_v48  ;;  %3699 = vmatmul.f32.gmra.mxu1 %v2930_v2  ;;  %v720_v2 = vld [vmem:[#allocation2 + $0xf90] sm:$0xff] }
 0x3d0   : > { %v9706_v8 = vpop.f32.mrf.mxu3  ;;  %v6246_v7 = vpop.f32.mrf.mxu2 }
 0x3d1   : > { %11229 = vst [vmem:[#allocation69_spill] sm:$0xff] %v9706_v8  ;;  %v7590_v47 = vadd.f32 %v6246_v7, %v4996_v39  ;;  %v5526_v39 = vld [vmem:[#allocation2 + $0x590] sm:$0xff]  ;;  %v9713_v8 = vld [vmem:[#allocation7] ss:$0 sm:$0xff] }
 0x3d3   : > { %8102 = vst [vmem:[%s9101_s18 + $0x300] sm:$0xff] %v7590_v47  ;;  %v336_v47 = vld [vmem:[#allocation2 + $0x390] sm:$0xff] }
 0x3d4   : > { %v1058_v32 = vpop.f32.mrf.mxu0  ;;  %v3655_v37 = vpop.f32.mrf.mxu1 }
 0x3d5   : > { %v2403_v53 = vadd.f32 %v9583_v36, %v1058_v32  ;;  %2257 = vmatmul.f32.gmra.mxu3 %v719_v14  ;;  %6296 = vmatmul.f32.gmra.mxu2 %v5525_v26 }
 0x3d7   : > { %v4997_v41 = vadd.f32 %v3655_v37, %v2403_v53  ;;  %1105 = vmatmul.f32.gmra.mxu0 %v335_v35  ;;  %3702 = vmatmul.f32.gmra.mxu1 %v2931_v49  ;;  %v2932_v53 = vld [vmem:[#allocation2 + $0x490] sm:$0xff]  ;;  %v721_v49 = vld [vmem:[#allocation2 + $0xf98] sm:$0xff] }
 0x3d8   : > { %v9710_v17 = vpop.f32.mrf.mxu3  ;;  %v6249_v48 = vpop.f32.mrf.mxu2 }
 0x3d9   : > { %11230 = vst [vmem:[#allocation70_spill] sm:$0xff] %v9710_v17  ;;  %v7591_v58 = vadd.f32 %v6249_v48, %v4997_v41  ;;  %v5527_v41 = vld [vmem:[#allocation2 + $0x598] sm:$0xff] }
 0x3db   : > { %8103 = vst [vmem:[%s9101_s18 + $0x308] sm:$0xff] %v7591_v58  ;;  %v337_v58 = vld [vmem:[#allocation2 + $0x398] sm:$0xff] }
 0x3dc   : > { %v1061_v7 = vpop.f32.mrf.mxu0  ;;  %v3658_v14 = vpop.f32.mrf.mxu1 }
 0x3dd   : > { %v2404_v36 = vadd.f32 %v9713_v8, %v1061_v7  ;;  %2260 = vmatmul.f32.gmra.mxu3 %v720_v2  ;;  %6299 = vmatmul.f32.gmra.mxu2 %v5526_v39  ;;  %v2933_v39 = vld [vmem:[#allocation2 + $0x498] sm:$0xff] }
 0x3df   : > { %v4998_v26 = vadd.f32 %v3658_v14, %v2404_v36  ;;  %1108 = vmatmul.f32.gmra.mxu0 %v336_v47  ;;  %3705 = vmatmul.f32.gmra.mxu1 %v2932_v53  ;;  %v722_v53 = vld [vmem:[#allocation2 + $0xfa0] sm:$0xff] }
 0x3e0   : > { %v9716_v32 = vpop.f32.mrf.mxu3  ;;  %v6252_v35 = vpop.f32.mrf.mxu2 }
 0x3e1   : > { %11231 = vst [vmem:[#allocation71_spill] sm:$0xff] %v9716_v32  ;;  %v7592_v37 = vadd.f32 %v6252_v35, %v4998_v26  ;;  %v5528_v26 = vld [vmem:[#allocation2 + $0x5a0] sm:$0xff] }
 0x3e3   : > { %8104 = vst [vmem:[%s9101_s18 + $0x310] sm:$0xff] %v7592_v37  ;;  %v338_v37 = vld [vmem:[#allocation2 + $0x3a0] sm:$0xff] }
 0x3e4   : > { %v1064_v48 = vpop.f32.mrf.mxu0  ;;  %v3661_v2 = vpop.f32.mrf.mxu1 }
 0x3e5   : > { %v2405_v17 = vadd.f32 %v9713_v8, %v1064_v48  ;;  %2263 = vmatmul.f32.gmra.mxu3 %v721_v49  ;;  %6302 = vmatmul.f32.gmra.mxu2 %v5527_v41  ;;  %v2934_v41 = vld [vmem:[#allocation2 + $0x4a0] sm:$0xff] }
 0x3e7   : > { %v4999_v7 = vadd.f32 %v3661_v2, %v2405_v17  ;;  %1111 = vmatmul.f32.gmra.mxu0 %v337_v58  ;;  %3708 = vmatmul.f32.gmra.mxu1 %v2933_v39  ;;  %v723_v39 = vld [vmem:[#allocation2 + $0xfa8] sm:$0xff] }
 0x3e8   : > { %v9720_v47 = vpop.f32.mrf.mxu3  ;;  %v6255_v36 = vpop.f32.mrf.mxu2 }
 0x3e9   : > { %11232 = vst [vmem:[#allocation72_spill] sm:$0xff] %v9720_v47  ;;  %v7593_v14 = vadd.f32 %v6255_v36, %v4999_v7  ;;  %v5529_v7 = vld [vmem:[#allocation2 + $0x5a8] sm:$0xff] }
 0x3eb   : > { %8105 = vst [vmem:[%s9101_s18 + $0x318] sm:$0xff] %v7593_v14  ;;  %v339_v14 = vld [vmem:[#allocation2 + $0x3a8] sm:$0xff] }
 0x3ec   : > { %v1067_v35 = vpop.f32.mrf.mxu0  ;;  %v3664_v49 = vpop.f32.mrf.mxu1 }
 0x3ed   : > { %v2406_v32 = vadd.f32 %v9713_v8, %v1067_v35  ;;  %2266 = vmatmul.f32.gmra.mxu3 %v722_v53  ;;  %6305 = vmatmul.f32.gmra.mxu2 %v5528_v26  ;;  %v2935_v26 = vld [vmem:[#allocation2 + $0x4a8] sm:$0xff] }
 0x3ef   : > { %v5000_v48 = vadd.f32 %v3664_v49, %v2406_v32  ;;  %1114 = vmatmul.f32.gmra.mxu0 %v338_v37  ;;  %3711 = vmatmul.f32.gmra.mxu1 %v2934_v41  ;;  %v724_v41 = vld [vmem:[#allocation2 + $0xfb0] sm:$0xff] }
 0x3f0   : > { %v9724_v17 = vpop.f32.mrf.mxu3  ;;  %v6258_v58 = vpop.f32.mrf.mxu2 }
 0x3f1   : > { %11233 = vst [vmem:[#allocation73_spill] sm:$0xff] %v9724_v17  ;;  %v7594_v2 = vadd.f32 %v6258_v58, %v5000_v48  ;;  %v5530_v48 = vld [vmem:[#allocation2 + $0x5b0] sm:$0xff] }
 0x3f3   : > { %8106 = vst [vmem:[%s9101_s18 + $0x320] sm:$0xff] %v7594_v2  ;;  %v340_v2 = vld [vmem:[#allocation2 + $0x3b0] sm:$0xff] }
 0x3f4   : > { %v1070_v36 = vpop.f32.mrf.mxu0  ;;  %v3667_v53 = vpop.f32.mrf.mxu1 }
 0x3f5   : > { %v2407_v47 = vadd.f32 %v9713_v8, %v1070_v36  ;;  %2269 = vmatmul.f32.gmra.mxu3 %v723_v39  ;;  %6308 = vmatmul.f32.gmra.mxu2 %v5529_v7  ;;  %v2936_v7 = vld [vmem:[#allocation2 + $0x4b0] sm:$0xff] }
 0x3f7   : > { %v5001_v35 = vadd.f32 %v3667_v53, %v2407_v47  ;;  %1117 = vmatmul.f32.gmra.mxu0 %v339_v14  ;;  %3714 = vmatmul.f32.gmra.mxu1 %v2935_v26  ;;  %v725_v26 = vld [vmem:[#allocation2 + $0xfb8] sm:$0xff] }
 0x3f8   : > { %v9728_v32 = vpop.f32.mrf.mxu3  ;;  %v6261_v37 = vpop.f32.mrf.mxu2 }
 0x3f9   : > { %11234 = vst [vmem:[#allocation74_spill] sm:$0xff] %v9728_v32  ;;  %v7595_v49 = vadd.f32 %v6261_v37, %v5001_v35  ;;  %v5531_v35 = vld [vmem:[#allocation2 + $0x5b8] sm:$0xff] }
 0x3fb   : > { %8107 = vst [vmem:[%s9101_s18 + $0x328] sm:$0xff] %v7595_v49  ;;  %v341_v49 = vld [vmem:[#allocation2 + $0x3b8] sm:$0xff] }
 0x3fc   : > { %v1073_v58 = vpop.f32.mrf.mxu0  ;;  %v3670_v39 = vpop.f32.mrf.mxu1 }
 0x3fd   : > { %v2408_v17 = vadd.f32 %v9713_v8, %v1073_v58  ;;  %2272 = vmatmul.f32.gmra.mxu3 %v724_v41  ;;  %6311 = vmatmul.f32.gmra.mxu2 %v5530_v48  ;;  %v2937_v48 = vld [vmem:[#allocation2 + $0x4b8] sm:$0xff] }
 0x3ff   : > { %v5002_v36 = vadd.f32 %v3670_v39, %v2408_v17  ;;  %1120 = vmatmul.f32.gmra.mxu0 %v340_v2  ;;  %3717 = vmatmul.f32.gmra.mxu1 %v2936_v7  ;;  %v726_v7 = vld [vmem:[#allocation2 + $0xfc0] sm:$0xff] }
 0x400   : > { %v9732_v47 = vpop.f32.mrf.mxu3  ;;  %v6264_v14 = vpop.f32.mrf.mxu2 }
 0x401   : > { %11235 = vst [vmem:[#allocation75_spill] sm:$0xff] %v9732_v47  ;;  %v7596_v53 = vadd.f32 %v6264_v14, %v5002_v36  ;;  %v5532_v36 = vld [vmem:[#allocation2 + $0x5c0] sm:$0xff] }
 0x403   : > { %8108 = vst [vmem:[%s9101_s18 + $0x330] sm:$0xff] %v7596_v53  ;;  %v342_v53 = vld [vmem:[#allocation2 + $0x3c0] sm:$0xff] }
 0x404   : > { %v1076_v37 = vpop.f32.mrf.mxu0  ;;  %v3673_v41 = vpop.f32.mrf.mxu1 }
 0x405   : > { %v2409_v32 = vadd.f32 %v9713_v8, %v1076_v37  ;;  %2275 = vmatmul.f32.gmra.mxu3 %v725_v26  ;;  %6314 = vmatmul.f32.gmra.mxu2 %v5531_v35  ;;  %v2938_v35 = vld [vmem:[#allocation2 + $0x4c0] sm:$0xff] }
 0x407   : > { %v5003_v58 = vadd.f32 %v3673_v41, %v2409_v32  ;;  %1123 = vmatmul.f32.gmra.mxu0 %v341_v49  ;;  %3720 = vmatmul.f32.gmra.mxu1 %v2937_v48  ;;  %v727_v48 = vld [vmem:[#allocation2 + $0xfc8] sm:$0xff] }
 0x408   : > { %v9736_v17 = vpop.f32.mrf.mxu3  ;;  %v6267_v2 = vpop.f32.mrf.mxu2 }
 0x409   : > { %11236 = vst [vmem:[#allocation76_spill] sm:$0xff] %v9736_v17  ;;  %v7597_v39 = vadd.f32 %v6267_v2, %v5003_v58  ;;  %v5533_v58 = vld [vmem:[#allocation2 + $0x5c8] sm:$0xff] }
 0x40b   : > { %8109 = vst [vmem:[%s9101_s18 + $0x338] sm:$0xff] %v7597_v39  ;;  %v343_v39 = vld [vmem:[#allocation2 + $0x3c8] sm:$0xff] }
 0x40c   : > { %v1079_v14 = vpop.f32.mrf.mxu0  ;;  %v3676_v26 = vpop.f32.mrf.mxu1 }
 0x40d   : > { %v2410_v47 = vadd.f32 %v9713_v8, %v1079_v14  ;;  %2278 = vmatmul.f32.gmra.mxu3 %v726_v7  ;;  %6317 = vmatmul.f32.gmra.mxu2 %v5532_v36  ;;  %v2939_v36 = vld [vmem:[#allocation2 + $0x4c8] sm:$0xff] }
 0x40f   : > { %v5004_v37 = vadd.f32 %v3676_v26, %v2410_v47  ;;  %1126 = vmatmul.f32.gmra.mxu0 %v342_v53  ;;  %3723 = vmatmul.f32.gmra.mxu1 %v2938_v35  ;;  %v728_v35 = vld [vmem:[#allocation2 + $0xfd0] sm:$0xff] }
 0x410   : > { %v9740_v32 = vpop.f32.mrf.mxu3  ;;  %v6270_v49 = vpop.f32.mrf.mxu2 }
 0x411   : > { %11237 = vst [vmem:[#allocation77_spill] sm:$0xff] %v9740_v32  ;;  %v7598_v41 = vadd.f32 %v6270_v49, %v5004_v37  ;;  %v5534_v37 = vld [vmem:[#allocation2 + $0x5d0] sm:$0xff] }
 0x413   : > { %8110 = vst [vmem:[%s9101_s18 + $0x340] sm:$0xff] %v7598_v41  ;;  %v344_v41 = vld [vmem:[#allocation2 + $0x3d0] sm:$0xff] }
 0x414   : > { %v1082_v2 = vpop.f32.mrf.mxu0  ;;  %v3679_v7 = vpop.f32.mrf.mxu1 }
 0x415   : > { %v2411_v17 = vadd.f32 %v9713_v8, %v1082_v2  ;;  %2281 = vmatmul.f32.gmra.mxu3 %v727_v48  ;;  %6320 = vmatmul.f32.gmra.mxu2 %v5533_v58  ;;  %v2940_v58 = vld [vmem:[#allocation2 + $0x4d0] sm:$0xff] }
 0x417   : > { %v5005_v14 = vadd.f32 %v3679_v7, %v2411_v17  ;;  %1129 = vmatmul.f32.gmra.mxu0 %v343_v39  ;;  %3726 = vmatmul.f32.gmra.mxu1 %v2939_v36  ;;  %v729_v36 = vld [vmem:[#allocation2 + $0xfd8] sm:$0xff] }
 0x418   : > { %v9744_v47 = vpop.f32.mrf.mxu3  ;;  %v6273_v53 = vpop.f32.mrf.mxu2 }
 0x419   : > { %11238 = vst [vmem:[#allocation78_spill] sm:$0xff] %v9744_v47  ;;  %v7599_v26 = vadd.f32 %v6273_v53, %v5005_v14  ;;  %v5535_v14 = vld [vmem:[#allocation2 + $0x5d8] sm:$0xff] }
 0x41b   : > { %8111 = vst [vmem:[%s9101_s18 + $0x348] sm:$0xff] %v7599_v26  ;;  %v345_v26 = vld [vmem:[#allocation2 + $0x3d8] sm:$0xff] }
 0x41c   : > { %v1085_v49 = vpop.f32.mrf.mxu0  ;;  %v3682_v48 = vpop.f32.mrf.mxu1 }
 0x41d   : > { %v2412_v32 = vadd.f32 %v9713_v8, %v1085_v49  ;;  %2284 = vmatmul.f32.gmra.mxu3 %v728_v35  ;;  %6323 = vmatmul.f32.gmra.mxu2 %v5534_v37  ;;  %v2941_v37 = vld [vmem:[#allocation2 + $0x4d8] sm:$0xff] }
 0x41f   : > { %v5006_v2 = vadd.f32 %v3682_v48, %v2412_v32  ;;  %1132 = vmatmul.f32.gmra.mxu0 %v344_v41  ;;  %3729 = vmatmul.f32.gmra.mxu1 %v2940_v58  ;;  %v730_v58 = vld [vmem:[#allocation2 + $0xfe0] sm:$0xff] }
 0x420   : > { %v9748_v17 = vpop.f32.mrf.mxu3  ;;  %v6276_v39 = vpop.f32.mrf.mxu2 }
 0x421   : > { %11239 = vst [vmem:[#allocation79_spill] sm:$0xff] %v9748_v17  ;;  %v7600_v7 = vadd.f32 %v6276_v39, %v5006_v2  ;;  %v5536_v2 = vld [vmem:[#allocation2 + $0x5e0] sm:$0xff] }
 0x423   : > { %8112 = vst [vmem:[%s9101_s18 + $0x350] sm:$0xff] %v7600_v7  ;;  %v346_v7 = vld [vmem:[#allocation2 + $0x3e0] sm:$0xff] }
 0x424   : > { %v1088_v53 = vpop.f32.mrf.mxu0  ;;  %v3685_v35 = vpop.f32.mrf.mxu1 }
 0x425   : > { %v2413_v47 = vadd.f32 %v9713_v8, %v1088_v53  ;;  %2287 = vmatmul.f32.gmra.mxu3 %v729_v36  ;;  %6326 = vmatmul.f32.gmra.mxu2 %v5535_v14  ;;  %v2942_v14 = vld [vmem:[#allocation2 + $0x4e0] sm:$0xff] }
 0x427   : > { %v5007_v49 = vadd.f32 %v3685_v35, %v2413_v47  ;;  %1135 = vmatmul.f32.gmra.mxu0 %v345_v26  ;;  %3732 = vmatmul.f32.gmra.mxu1 %v2941_v37  ;;  %v731_v37 = vld [vmem:[#allocation2 + $0xfe8] sm:$0xff] }
 0x428   : > { %v9752_v32 = vpop.f32.mrf.mxu3  ;;  %v6279_v41 = vpop.f32.mrf.mxu2 }
 0x429   : > { %11240 = vst [vmem:[#allocation80_spill] sm:$0xff] %v9752_v32  ;;  %v7601_v48 = vadd.f32 %v6279_v41, %v5007_v49  ;;  %v5537_v49 = vld [vmem:[#allocation2 + $0x5e8] sm:$0xff] }
 0x42b   : > { %8113 = vst [vmem:[%s9101_s18 + $0x358] sm:$0xff] %v7601_v48  ;;  %v347_v48 = vld [vmem:[#allocation2 + $0x3e8] sm:$0xff] }
 0x42c   : > { %v1091_v39 = vpop.f32.mrf.mxu0  ;;  %v3688_v36 = vpop.f32.mrf.mxu1 }
 0x42d   : > { %v2414_v17 = vadd.f32 %v9713_v8, %v1091_v39  ;;  %2290 = vmatmul.f32.gmra.mxu3 %v730_v58  ;;  %6329 = vmatmul.f32.gmra.mxu2 %v5536_v2  ;;  %v2943_v2 = vld [vmem:[#allocation2 + $0x4e8] sm:$0xff] }
 0x42f   : > { %v5008_v53 = vadd.f32 %v3688_v36, %v2414_v17  ;;  %1138 = vmatmul.f32.gmra.mxu0 %v346_v7  ;;  %3735 = vmatmul.f32.gmra.mxu1 %v2942_v14  ;;  %v732_v14 = vld [vmem:[#allocation2 + $0xff0] sm:$0xff] }
 0x430   : > { %v9756_v47 = vpop.f32.mrf.mxu3  ;;  %v6282_v26 = vpop.f32.mrf.mxu2 }
 0x431   : > { %11241 = vst [vmem:[#allocation81_spill] sm:$0xff] %v9756_v47  ;;  %v7602_v35 = vadd.f32 %v6282_v26, %v5008_v53  ;;  %v5538_v53 = vld [vmem:[#allocation2 + $0x5f0] sm:$0xff] }
 0x433   : > { %8114 = vst [vmem:[%s9101_s18 + $0x360] sm:$0xff] %v7602_v35  ;;  %v348_v35 = vld [vmem:[#allocation2 + $0x3f0] sm:$0xff] }
 0x434   : > { %v1094_v41 = vpop.f32.mrf.mxu0  ;;  %v3691_v58 = vpop.f32.mrf.mxu1 }
 0x435   : > { %v2415_v32 = vadd.f32 %v9713_v8, %v1094_v41  ;;  %2293 = vmatmul.f32.gmra.mxu3 %v731_v37  ;;  %6332 = vmatmul.f32.gmra.mxu2 %v5537_v49  ;;  %v2944_v49 = vld [vmem:[#allocation2 + $0x4f0] sm:$0xff] }
 0x437   : > { %v5009_v39 = vadd.f32 %v3691_v58, %v2415_v32  ;;  %1141 = vmatmul.f32.gmra.mxu0 %v347_v48  ;;  %3738 = vmatmul.f32.gmra.mxu1 %v2943_v2  ;;  %v733_v2 = vld [vmem:[#allocation2 + $0xff8] sm:$0xff] }
 0x438   : > { %v9760_v17 = vpop.f32.mrf.mxu3  ;;  %v6285_v7 = vpop.f32.mrf.mxu2 }
 0x439   : > { %11242 = vst [vmem:[#allocation82_spill] sm:$0xff] %v9760_v17  ;;  %v7603_v36 = vadd.f32 %v6285_v7, %v5009_v39  ;;  %v5539_v39 = vld [vmem:[#allocation2 + $0x5f8] sm:$0xff] }
 0x43b   : > { %8115 = vst [vmem:[%s9101_s18 + $0x368] sm:$0xff] %v7603_v36  ;;  %v349_v36 = vld [vmem:[#allocation2 + $0x3f8] sm:$0xff] }
 0x43c   : > { %v1097_v26 = vpop.f32.mrf.mxu0  ;;  %v3694_v37 = vpop.f32.mrf.mxu1 }
 0x43d   : > { %v2416_v47 = vadd.f32 %v9713_v8, %v1097_v26  ;;  %2296 = vmatmul.f32.gmra.mxu3 %v732_v14  ;;  %6335 = vmatmul.f32.gmra.mxu2 %v5538_v53  ;;  %v2945_v53 = vld [vmem:[#allocation2 + $0x4f8] sm:$0xff] }
 0x43f   : > { %v5010_v41 = vadd.f32 %v3694_v37, %v2416_v47  ;;  %1144 = vmatmul.f32.gmra.mxu0 %v348_v35  ;;  %3741 = vmatmul.f32.gmra.mxu1 %v2944_v49  ;;  %v3202_v49 = vld [vmem:[#allocation2 + $0xd00] sm:$0xff] }
 0x440   : > { %v9764_v32 = vpop.f32.mrf.mxu3  ;;  %v6288_v48 = vpop.f32.mrf.mxu2 }
 0x441   : > { %11243 = vst [vmem:[#allocation83_spill] sm:$0xff] %v9764_v32  ;;  %v7604_v58 = vadd.f32 %v6288_v48, %v5010_v41  ;;  %v5540_v41 = vld [vmem:[#allocation2 + $0x600] sm:$0xff] }
 0x443   : > { %8116 = vst [vmem:[%s9101_s18 + $0x370] sm:$0xff] %v7604_v58  ;;  %v350_v58 = vld [vmem:[#allocation2 + $0x400] sm:$0xff] }
 0x444   : > { %v1100_v7 = vpop.f32.mrf.mxu0  ;;  %v3697_v14 = vpop.f32.mrf.mxu1 }
 0x445   : > { %v2417_v17 = vadd.f32 %v9713_v8, %v1100_v7  ;;  %2299 = vmatmul.f32.gmra.mxu3 %v733_v2  ;;  %6338 = vmatmul.f32.gmra.mxu2 %v5539_v39  ;;  %v2946_v39 = vld [vmem:[#allocation2 + $0x500] sm:$0xff] }
 0x447   : > { %v5011_v26 = vadd.f32 %v3697_v14, %v2417_v17  ;;  %1147 = vmatmul.f32.gmra.mxu0 %v349_v36  ;;  %3744 = vmatmul.f32.gmra.mxu1 %v2945_v53  ;;  %v3203_v53 = vld [vmem:[#allocation2 + $0xd08] sm:$0xff] }
 0x448   : > { %v9768_v47 = vpop.f32.mrf.mxu3  ;;  %v6291_v35 = vpop.f32.mrf.mxu2 }
 0x449   : > { %11244 = vst [vmem:[#allocation84_spill] sm:$0xff] %v9768_v47  ;;  %v7605_v37 = vadd.f32 %v6291_v35, %v5011_v26  ;;  %v5541_v26 = vld [vmem:[#allocation2 + $0x608] sm:$0xff] }
 0x44b   : > { %8117 = vst [vmem:[%s9101_s18 + $0x378] sm:$0xff] %v7605_v37  ;;  %v351_v37 = vld [vmem:[#allocation2 + $0x408] sm:$0xff] }
 0x44c   : > { %v1103_v48 = vpop.f32.mrf.mxu0  ;;  %v3700_v2 = vpop.f32.mrf.mxu1 }
 0x44d   : > { %v2418_v32 = vadd.f32 %v9713_v8, %v1103_v48  ;;  %4515 = vmatmul.f32.vlgmr.msrb.gmra.mxu3 %v3202_v49  ;;  %6341 = vmatmul.f32.gmra.mxu2 %v5540_v41  ;;  %v2947_v41 = vld [vmem:[#allocation2 + $0x508] sm:$0xff] }
 0x44f   : > { %v5012_v7 = vadd.f32 %v3700_v2, %v2418_v32  ;;  %1150 = vmatmul.f32.gmra.mxu0 %v350_v58  ;;  %3747 = vmatmul.f32.gmra.mxu1 %v2946_v39  ;;  %v3204_v39 = vld [vmem:[#allocation2 + $0xd10] sm:$0xff] }
 0x450   : > { %v9772_v17 = vpop.f32.mrf.mxu3  ;;  %v6294_v36 = vpop.f32.mrf.mxu2 }
 0x451   : > { %11245 = vst [vmem:[#allocation85_spill] sm:$0xff] %v9772_v17  ;;  %v7606_v14 = vadd.f32 %v6294_v36, %v5012_v7  ;;  %v5542_v7 = vld [vmem:[#allocation2 + $0x610] sm:$0xff] }
 0x453   : > { %8118 = vst [vmem:[%s9101_s18 + $0x380] sm:$0xff] %v7606_v14  ;;  %v352_v14 = vld [vmem:[#allocation2 + $0x410] sm:$0xff] }
 0x454   : > { %v1106_v35 = vpop.f32.mrf.mxu0  ;;  %v3703_v49 = vpop.f32.mrf.mxu1 }
 0x455   : > { %v2419_v47 = vadd.f32 %v9713_v8, %v1106_v35  ;;  %4518 = vmatmul.f32.gmra.mxu3 %v3203_v53  ;;  %6344 = vmatmul.f32.gmra.mxu2 %v5541_v26  ;;  %v2948_v26 = vld [vmem:[#allocation2 + $0x510] sm:$0xff] }
 0x457   : > { %v5013_v48 = vadd.f32 %v3703_v49, %v2419_v47  ;;  %1153 = vmatmul.f32.gmra.mxu0 %v351_v37  ;;  %3750 = vmatmul.f32.gmra.mxu1 %v2947_v41  ;;  %v3205_v41 = vld [vmem:[#allocation2 + $0xd18] sm:$0xff] }
 0x458   : > { %v9776_v32 = vpop.f32.mrf.mxu3  ;;  %v6297_v58 = vpop.f32.mrf.mxu2 }
 0x459   : > { %11246 = vst [vmem:[#allocation86_spill] sm:$0xff] %v9776_v32  ;;  %v7607_v2 = vadd.f32 %v6297_v58, %v5013_v48  ;;  %v5543_v48 = vld [vmem:[#allocation2 + $0x618] sm:$0xff] }
 0x45b   : > { %8119 = vst [vmem:[%s9101_s18 + $0x388] sm:$0xff] %v7607_v2  ;;  %v353_v2 = vld [vmem:[#allocation2 + $0x418] sm:$0xff] }
 0x45c   : > { %v1109_v36 = vpop.f32.mrf.mxu0  ;;  %v3706_v53 = vpop.f32.mrf.mxu1 }
 0x45d   : > { %v2420_v17 = vadd.f32 %v9713_v8, %v1109_v36  ;;  %4521 = vmatmul.f32.gmra.mxu3 %v3204_v39  ;;  %6347 = vmatmul.f32.gmra.mxu2 %v5542_v7  ;;  %v2949_v7 = vld [vmem:[#allocation2 + $0x518] sm:$0xff] }
 0x45f   : > { %v5014_v35 = vadd.f32 %v3706_v53, %v2420_v17  ;;  %1156 = vmatmul.f32.gmra.mxu0 %v352_v14  ;;  %3753 = vmatmul.f32.gmra.mxu1 %v2948_v26  ;;  %v3206_v26 = vld [vmem:[#allocation2 + $0xd20] sm:$0xff] }
 0x460   : > { %v9780_v47 = vpop.f32.mrf.mxu3  ;;  %v6300_v37 = vpop.f32.mrf.mxu2 }
 0x461   : > { %11247 = vst [vmem:[#allocation87_spill] sm:$0xff] %v9780_v47  ;;  %v7608_v49 = vadd.f32 %v6300_v37, %v5014_v35  ;;  %v5544_v35 = vld [vmem:[#allocation2 + $0x620] sm:$0xff] }
 0x463   : > { %8120 = vst [vmem:[%s9101_s18 + $0x390] sm:$0xff] %v7608_v49  ;;  %v354_v49 = vld [vmem:[#allocation2 + $0x420] sm:$0xff] }
 0x464   : > { %v1112_v58 = vpop.f32.mrf.mxu0  ;;  %v3709_v39 = vpop.f32.mrf.mxu1 }
 0x465   : > { %v2421_v32 = vadd.f32 %v9713_v8, %v1112_v58  ;;  %4524 = vmatmul.f32.gmra.mxu3 %v3205_v41  ;;  %6350 = vmatmul.f32.gmra.mxu2 %v5543_v48  ;;  %v2950_v48 = vld [vmem:[#allocation2 + $0x520] sm:$0xff] }
 0x467   : > { %v5015_v36 = vadd.f32 %v3709_v39, %v2421_v32  ;;  %1159 = vmatmul.f32.gmra.mxu0 %v353_v2  ;;  %3756 = vmatmul.f32.gmra.mxu1 %v2949_v7  ;;  %v3207_v7 = vld [vmem:[#allocation2 + $0xd28] sm:$0xff] }
 0x468   : > { %v9784_v17 = vpop.f32.mrf.mxu3  ;;  %v6303_v14 = vpop.f32.mrf.mxu2 }
 0x469   : > { %11248 = vst [vmem:[#allocation88_spill] sm:$0xff] %v9784_v17  ;;  %v7609_v53 = vadd.f32 %v6303_v14, %v5015_v36  ;;  %v5545_v36 = vld [vmem:[#allocation2 + $0x628] sm:$0xff] }
 0x46b   : > { %8121 = vst [vmem:[%s9101_s18 + $0x398] sm:$0xff] %v7609_v53  ;;  %v355_v53 = vld [vmem:[#allocation2 + $0x428] sm:$0xff] }
 0x46c   : > { %v1115_v37 = vpop.f32.mrf.mxu0  ;;  %v3712_v41 = vpop.f32.mrf.mxu1 }
 0x46d   : > { %v2422_v47 = vadd.f32 %v9713_v8, %v1115_v37  ;;  %4527 = vmatmul.f32.gmra.mxu3 %v3206_v26  ;;  %6353 = vmatmul.f32.gmra.mxu2 %v5544_v35  ;;  %v2951_v35 = vld [vmem:[#allocation2 + $0x528] sm:$0xff] }
 0x46f   : > { %v5016_v58 = vadd.f32 %v3712_v41, %v2422_v47  ;;  %1162 = vmatmul.f32.gmra.mxu0 %v354_v49  ;;  %3759 = vmatmul.f32.gmra.mxu1 %v2950_v48  ;;  %v3208_v48 = vld [vmem:[#allocation2 + $0xd30] sm:$0xff] }
 0x470   : > { %v9788_v32 = vpop.f32.mrf.mxu3  ;;  %v6306_v2 = vpop.f32.mrf.mxu2 }
 0x471   : > { %11249 = vst [vmem:[#allocation89_spill] sm:$0xff] %v9788_v32  ;;  %v7610_v39 = vadd.f32 %v6306_v2, %v5016_v58  ;;  %v5546_v58 = vld [vmem:[#allocation2 + $0x630] sm:$0xff] }
 0x473   : > { %8122 = vst [vmem:[%s9101_s18 + $0x3a0] sm:$0xff] %v7610_v39  ;;  %v356_v39 = vld [vmem:[#allocation2 + $0x430] sm:$0xff] }
 0x474   : > { %v1118_v14 = vpop.f32.mrf.mxu0  ;;  %v3715_v26 = vpop.f32.mrf.mxu1 }
 0x475   : > { %v2423_v17 = vadd.f32 %v9713_v8, %v1118_v14  ;;  %4530 = vmatmul.f32.gmra.mxu3 %v3207_v7  ;;  %6356 = vmatmul.f32.gmra.mxu2 %v5545_v36  ;;  %v2952_v36 = vld [vmem:[#allocation2 + $0x530] sm:$0xff] }
 0x477   : > { %v5017_v37 = vadd.f32 %v3715_v26, %v2423_v17  ;;  %1165 = vmatmul.f32.gmra.mxu0 %v355_v53  ;;  %3762 = vmatmul.f32.gmra.mxu1 %v2951_v35  ;;  %v3209_v35 = vld [vmem:[#allocation2 + $0xd38] sm:$0xff] }
 0x478   : > { %v9792_v47 = vpop.f32.mrf.mxu3  ;;  %v6309_v49 = vpop.f32.mrf.mxu2 }
 0x479   : > { %11250 = vst [vmem:[#allocation90_spill] sm:$0xff] %v9792_v47  ;;  %v7611_v41 = vadd.f32 %v6309_v49, %v5017_v37  ;;  %v5547_v37 = vld [vmem:[#allocation2 + $0x638] sm:$0xff] }
 0x47b   : > { %8123 = vst [vmem:[%s9101_s18 + $0x3a8] sm:$0xff] %v7611_v41  ;;  %v357_v41 = vld [vmem:[#allocation2 + $0x438] sm:$0xff] }
 0x47c   : > { %v1121_v2 = vpop.f32.mrf.mxu0  ;;  %v3718_v7 = vpop.f32.mrf.mxu1 }
 0x47d   : > { %v2424_v32 = vadd.f32 %v9713_v8, %v1121_v2  ;;  %4533 = vmatmul.f32.gmra.mxu3 %v3208_v48  ;;  %6359 = vmatmul.f32.gmra.mxu2 %v5546_v58  ;;  %v2953_v58 = vld [vmem:[#allocation2 + $0x538] sm:$0xff] }
 0x47f   : > { %v5018_v14 = vadd.f32 %v3718_v7, %v2424_v32  ;;  %1168 = vmatmul.f32.gmra.mxu0 %v356_v39  ;;  %3765 = vmatmul.f32.gmra.mxu1 %v2952_v36  ;;  %v3210_v36 = vld [vmem:[#allocation2 + $0xd40] sm:$0xff] }
 0x480   : > { %v9796_v17 = vpop.f32.mrf.mxu3  ;;  %v6312_v53 = vpop.f32.mrf.mxu2 }
 0x481   : > { %11251 = vst [vmem:[#allocation91_spill] sm:$0xff] %v9796_v17  ;;  %v7612_v26 = vadd.f32 %v6312_v53, %v5018_v14  ;;  %v5548_v14 = vld [vmem:[#allocation2 + $0x640] sm:$0xff] }
 0x483   : > { %8124 = vst [vmem:[%s9101_s18 + $0x3b0] sm:$0xff] %v7612_v26  ;;  %v358_v26 = vld [vmem:[#allocation2 + $0x440] sm:$0xff] }
 0x484   : > { %v1124_v49 = vpop.f32.mrf.mxu0  ;;  %v3721_v48 = vpop.f32.mrf.mxu1 }
 0x485   : > { %v2425_v47 = vadd.f32 %v9713_v8, %v1124_v49  ;;  %4536 = vmatmul.f32.gmra.mxu3 %v3209_v35  ;;  %6362 = vmatmul.f32.gmra.mxu2 %v5547_v37  ;;  %v2954_v37 = vld [vmem:[#allocation2 + $0x540] sm:$0xff] }
 0x487   : > { %v5019_v2 = vadd.f32 %v3721_v48, %v2425_v47  ;;  %1171 = vmatmul.f32.gmra.mxu0 %v357_v41  ;;  %3768 = vmatmul.f32.gmra.mxu1 %v2953_v58  ;;  %v3211_v58 = vld [vmem:[#allocation2 + $0xd48] sm:$0xff] }
 0x488   : > { %v9800_v32 = vpop.f32.mrf.mxu3  ;;  %v6315_v39 = vpop.f32.mrf.mxu2 }
 0x489   : > { %11252 = vst [vmem:[#allocation92_spill] sm:$0xff] %v9800_v32  ;;  %v7613_v7 = vadd.f32 %v6315_v39, %v5019_v2  ;;  %v5549_v2 = vld [vmem:[#allocation2 + $0x648] sm:$0xff] }
 0x48b   : > { %8125 = vst [vmem:[%s9101_s18 + $0x3b8] sm:$0xff] %v7613_v7  ;;  %v359_v7 = vld [vmem:[#allocation2 + $0x448] sm:$0xff] }
 0x48c   : > { %v1127_v53 = vpop.f32.mrf.mxu0  ;;  %v3724_v35 = vpop.f32.mrf.mxu1 }
 0x48d   : > { %v2426_v17 = vadd.f32 %v9713_v8, %v1127_v53  ;;  %4539 = vmatmul.f32.gmra.mxu3 %v3210_v36  ;;  %6365 = vmatmul.f32.gmra.mxu2 %v5548_v14  ;;  %v2955_v14 = vld [vmem:[#allocation2 + $0x548] sm:$0xff] }
 0x48f   : > { %v5020_v49 = vadd.f32 %v3724_v35, %v2426_v17  ;;  %1174 = vmatmul.f32.gmra.mxu0 %v358_v26  ;;  %3771 = vmatmul.f32.gmra.mxu1 %v2954_v37  ;;  %v3212_v37 = vld [vmem:[#allocation2 + $0xd50] sm:$0xff] }
 0x490   : > { %v9804_v47 = vpop.f32.mrf.mxu3  ;;  %v6318_v41 = vpop.f32.mrf.mxu2 }
 0x491   : > { %11253 = vst [vmem:[#allocation93_spill] sm:$0xff] %v9804_v47  ;;  %v7614_v48 = vadd.f32 %v6318_v41, %v5020_v49  ;;  %v5550_v49 = vld [vmem:[#allocation2 + $0x650] sm:$0xff] }
 0x493   : > { %8126 = vst [vmem:[%s9101_s18 + $0x3c0] sm:$0xff] %v7614_v48  ;;  %v360_v48 = vld [vmem:[#allocation2 + $0x450] sm:$0xff] }
 0x494   : > { %v1130_v39 = vpop.f32.mrf.mxu0  ;;  %v3727_v36 = vpop.f32.mrf.mxu1 }
 0x495   : > { %v2427_v32 = vadd.f32 %v9713_v8, %v1130_v39  ;;  %4542 = vmatmul.f32.gmra.mxu3 %v3211_v58  ;;  %6368 = vmatmul.f32.gmra.mxu2 %v5549_v2  ;;  %v2956_v2 = vld [vmem:[#allocation2 + $0x550] sm:$0xff] }
 0x497   : > { %v5021_v53 = vadd.f32 %v3727_v36, %v2427_v32  ;;  %1177 = vmatmul.f32.gmra.mxu0 %v359_v7  ;;  %3774 = vmatmul.f32.gmra.mxu1 %v2955_v14  ;;  %v3213_v14 = vld [vmem:[#allocation2 + $0xd58] sm:$0xff] }
 0x498   : > { %v9808_v17 = vpop.f32.mrf.mxu3  ;;  %v6321_v26 = vpop.f32.mrf.mxu2 }
 0x499   : > { %11254 = vst [vmem:[#allocation94_spill] sm:$0xff] %v9808_v17  ;;  %v7615_v35 = vadd.f32 %v6321_v26, %v5021_v53  ;;  %v5551_v53 = vld [vmem:[#allocation2 + $0x658] sm:$0xff] }
 0x49b   : > { %8127 = vst [vmem:[%s9101_s18 + $0x3c8] sm:$0xff] %v7615_v35  ;;  %v361_v35 = vld [vmem:[#allocation2 + $0x458] sm:$0xff] }
 0x49c   : > { %v1133_v41 = vpop.f32.mrf.mxu0  ;;  %v3730_v58 = vpop.f32.mrf.mxu1 }
 0x49d   : > { %v2428_v47 = vadd.f32 %v9713_v8, %v1133_v41  ;;  %4545 = vmatmul.f32.gmra.mxu3 %v3212_v37  ;;  %6371 = vmatmul.f32.gmra.mxu2 %v5550_v49  ;;  %v2957_v49 = vld [vmem:[#allocation2 + $0x558] sm:$0xff] }
 0x49f   : > { %v5022_v39 = vadd.f32 %v3730_v58, %v2428_v47  ;;  %1180 = vmatmul.f32.gmra.mxu0 %v360_v48  ;;  %3777 = vmatmul.f32.gmra.mxu1 %v2956_v2  ;;  %v3214_v2 = vld [vmem:[#allocation2 + $0xd60] sm:$0xff] }
 0x4a0   : > { %v9812_v32 = vpop.f32.mrf.mxu3  ;;  %v6324_v7 = vpop.f32.mrf.mxu2 }
 0x4a1   : > { %11255 = vst [vmem:[#allocation95_spill] sm:$0xff] %v9812_v32  ;;  %v7616_v36 = vadd.f32 %v6324_v7, %v5022_v39  ;;  %v5552_v39 = vld [vmem:[#allocation2 + $0x660] sm:$0xff] }
 0x4a3   : > { %8128 = vst [vmem:[%s9101_s18 + $0x3d0] sm:$0xff] %v7616_v36  ;;  %v362_v36 = vld [vmem:[#allocation2 + $0x460] sm:$0xff] }
 0x4a4   : > { %v1136_v26 = vpop.f32.mrf.mxu0  ;;  %v3733_v37 = vpop.f32.mrf.mxu1 }
 0x4a5   : > { %v2429_v17 = vadd.f32 %v9713_v8, %v1136_v26  ;;  %4548 = vmatmul.f32.gmra.mxu3 %v3213_v14  ;;  %6374 = vmatmul.f32.gmra.mxu2 %v5551_v53  ;;  %v2958_v53 = vld [vmem:[#allocation2 + $0x560] sm:$0xff] }
 0x4a7   : > { %v5023_v41 = vadd.f32 %v3733_v37, %v2429_v17  ;;  %1183 = vmatmul.f32.gmra.mxu0 %v361_v35  ;;  %3780 = vmatmul.f32.gmra.mxu1 %v2957_v49  ;;  %v3215_v49 = vld [vmem:[#allocation2 + $0xd68] sm:$0xff] }
 0x4a8   : > { %v9816_v47 = vpop.f32.mrf.mxu3  ;;  %v6327_v48 = vpop.f32.mrf.mxu2 }
 0x4a9   : > { %11256 = vst [vmem:[#allocation96_spill] sm:$0xff] %v9816_v47  ;;  %v7617_v58 = vadd.f32 %v6327_v48, %v5023_v41  ;;  %v5553_v41 = vld [vmem:[#allocation2 + $0x668] sm:$0xff] }
 0x4ab   : > { %8129 = vst [vmem:[%s9101_s18 + $0x3d8] sm:$0xff] %v7617_v58  ;;  %v363_v58 = vld [vmem:[#allocation2 + $0x468] sm:$0xff] }
 0x4ac   : > { %v1139_v7 = vpop.f32.mrf.mxu0  ;;  %v3736_v14 = vpop.f32.mrf.mxu1 }
 0x4ad   : > { %v2430_v32 = vadd.f32 %v9713_v8, %v1139_v7  ;;  %4551 = vmatmul.f32.gmra.mxu3 %v3214_v2  ;;  %6377 = vmatmul.f32.gmra.mxu2 %v5552_v39  ;;  %v2959_v39 = vld [vmem:[#allocation2 + $0x568] sm:$0xff] }
 0x4af   : > { %v5024_v26 = vadd.f32 %v3736_v14, %v2430_v32  ;;  %1186 = vmatmul.f32.gmra.mxu0 %v362_v36  ;;  %3783 = vmatmul.f32.gmra.mxu1 %v2958_v53  ;;  %v3216_v53 = vld [vmem:[#allocation2 + $0xd70] sm:$0xff] }
 0x4b0   : > { %v9820_v17 = vpop.f32.mrf.mxu3  ;;  %v6330_v35 = vpop.f32.mrf.mxu2 }
 0x4b1   : > { %11257 = vst [vmem:[#allocation97_spill] sm:$0xff] %v9820_v17  ;;  %v7618_v37 = vadd.f32 %v6330_v35, %v5024_v26  ;;  %v5554_v26 = vld [vmem:[#allocation2 + $0x670] sm:$0xff] }
 0x4b3   : > { %8130 = vst [vmem:[%s9101_s18 + $0x3e0] sm:$0xff] %v7618_v37  ;;  %v364_v37 = vld [vmem:[#allocation2 + $0x470] sm:$0xff] }
 0x4b4   : > { %v1142_v48 = vpop.f32.mrf.mxu0  ;;  %v3739_v2 = vpop.f32.mrf.mxu1 }
 0x4b5   : > { %v2431_v47 = vadd.f32 %v9713_v8, %v1142_v48  ;;  %4554 = vmatmul.f32.gmra.mxu3 %v3215_v49  ;;  %6380 = vmatmul.f32.gmra.mxu2 %v5553_v41  ;;  %v2960_v41 = vld [vmem:[#allocation2 + $0x570] sm:$0xff] }
 0x4b7   : > { %v5025_v7 = vadd.f32 %v3739_v2, %v2431_v47  ;;  %1189 = vmatmul.f32.gmra.mxu0 %v363_v58  ;;  %3786 = vmatmul.f32.gmra.mxu1 %v2959_v39  ;;  %v3217_v39 = vld [vmem:[#allocation2 + $0xd78] sm:$0xff] }
 0x4b8   : > { %v9824_v32 = vpop.f32.mrf.mxu3  ;;  %v6333_v36 = vpop.f32.mrf.mxu2 }
 0x4b9   : > { %11258 = vst [vmem:[#allocation98_spill] sm:$0xff] %v9824_v32  ;;  %v7619_v14 = vadd.f32 %v6333_v36, %v5025_v7  ;;  %v5555_v7 = vld [vmem:[#allocation2 + $0x678] sm:$0xff] }
 0x4bb   : > { %8131 = vst [vmem:[%s9101_s18 + $0x3e8] sm:$0xff] %v7619_v14  ;;  %v365_v14 = vld [vmem:[#allocation2 + $0x478] sm:$0xff] }
 0x4bc   : > { %v1145_v35 = vpop.f32.mrf.mxu0  ;;  %v3742_v49 = vpop.f32.mrf.mxu1 }
 0x4bd   : > { %v2432_v17 = vadd.f32 %v9713_v8, %v1145_v35  ;;  %4557 = vmatmul.f32.gmra.mxu3 %v3216_v53  ;;  %6383 = vmatmul.f32.gmra.mxu2 %v5554_v26  ;;  %v2961_v26 = vld [vmem:[#allocation2 + $0x578] sm:$0xff] }
 0x4bf   : > { %v5026_v48 = vadd.f32 %v3742_v49, %v2432_v17  ;;  %1192 = vmatmul.f32.gmra.mxu0 %v364_v37  ;;  %3789 = vmatmul.f32.gmra.mxu1 %v2960_v41  ;;  %v3218_v41 = vld [vmem:[#allocation2 + $0xd80] sm:$0xff] }
 0x4c0   : > { %v9828_v47 = vpop.f32.mrf.mxu3  ;;  %v6336_v58 = vpop.f32.mrf.mxu2 }
 0x4c1   : > { %11259 = vst [vmem:[#allocation99_spill] sm:$0xff] %v9828_v47  ;;  %v7620_v2 = vadd.f32 %v6336_v58, %v5026_v48  ;;  %v5556_v48 = vld [vmem:[#allocation2 + $0x680] sm:$0xff] }
 0x4c3   : > { %8132 = vst [vmem:[%s9101_s18 + $0x3f0] sm:$0xff] %v7620_v2  ;;  %v366_v2 = vld [vmem:[#allocation2 + $0x480] sm:$0xff] }
 0x4c4   : > { %v1148_v36 = vpop.f32.mrf.mxu0  ;;  %v3745_v53 = vpop.f32.mrf.mxu1 }
 0x4c5   : > { %v2433_v32 = vadd.f32 %v9713_v8, %v1148_v36  ;;  %4560 = vmatmul.f32.gmra.mxu3 %v3217_v39  ;;  %6386 = vmatmul.f32.gmra.mxu2 %v5555_v7  ;;  %v2962_v7 = vld [vmem:[#allocation2 + $0x580] sm:$0xff] }
 0x4c7   : > { %v5027_v35 = vadd.f32 %v3745_v53, %v2433_v32  ;;  %1195 = vmatmul.f32.gmra.mxu0 %v365_v14  ;;  %3792 = vmatmul.f32.gmra.mxu1 %v2961_v26  ;;  %v2690_v32 = vadd.f32 %v9713_v8, %v9295_v4  ;;  %v2963_v4 = vld [vmem:[#allocation2 + $0x588] sm:$0xff] }
 0x4c8   : > { %v9832_v17 = vpop.f32.mrf.mxu3  ;;  %v6339_v37 = vpop.f32.mrf.mxu2 }
 0x4c9   : > { %11260 = vst [vmem:[#allocation100_spill] sm:$0xff] %v9832_v17  ;;  %v7621_v49 = vadd.f32 %v6339_v37, %v5027_v35  ;;  %v3219_v37 = vld [vmem:[#allocation2 + $0xd88] sm:$0xff] }
 0x4cb   : > { %8133 = vst [vmem:[%s9101_s18 + $0x3f8] sm:$0xff] %v7621_v49  ;;  %v5557_v49 = vld [vmem:[#allocation2 + $0x688] sm:$0xff] }
 0x4cc   : > { %v1151_v58 = vpop.f32.mrf.mxu0  ;;  %v3748_v39 = vpop.f32.mrf.mxu1 }
 0x4cd   : > { %v2434_v47 = vadd.f32 %v9713_v8, %v1151_v58  ;;  %4563 = vmatmul.f32.gmra.mxu3 %v3218_v41  ;;  %6389 = vmatmul.f32.gmra.mxu2 %v5556_v48  ;;  %v367_v58 = vld [vmem:[#allocation2 + $0x488] sm:$0xff] }
 0x4cf   : > { %v5028_v36 = vadd.f32 %v3748_v39, %v2434_v47  ;;  %1198 = vmatmul.f32.gmra.mxu0 %v366_v2  ;;  %3795 = vmatmul.f32.gmra.mxu1 %v2962_v7  ;;  %v2691_v47 = vadd.f32 %v9713_v8, %v9299_v24 }
 0x4d0   : > { %v4516_v14 = vpop.f32.mrf.mxu3  ;;  %v6342_v53 = vpop.f32.mrf.mxu2 }
 0x4d1   : > { %v9838_v26 = vadd.f32 %v4516_v14, %v2690_v32  ;;  %v7622_v35 = vadd.f32 %v6342_v53, %v5028_v36  ;;  %v3220_v14 = vld [vmem:[#allocation2 + $0xd90] sm:$0xff] }
 0x4d2   : > { %v5558_v53 = vld [vmem:[#allocation2 + $0x690] sm:$0xff] }
 0x4d3   : > { %8134 = vst [vmem:[%s9101_s18 + $0x400] sm:$0xff] %v7622_v35 }
 0x4d4   : > { %v1154_v17 = vpop.f32.mrf.mxu0  ;;  %v3751_v48 = vpop.f32.mrf.mxu1 }
 0x4d5   : > { %v2435_v41 = vadd.f32 %v9713_v8, %v1154_v17  ;;  %4566 = vmatmul.f32.gmra.mxu3 %v3219_v37  ;;  %6392 = vmatmul.f32.gmra.mxu2 %v5557_v49  ;;  %v368_v17 = vld [vmem:[#allocation2 + $0x490] sm:$0xff]  ;;  %v9847_v37 = vld [vmem:[#allocation7] ss:$0 sm:$0xff] }
 0x4d6   : > { %v2964_v8 = vld [vmem:[#allocation2 + $0x590] sm:$0xff] }
 0x4d7   : > { %v5029_v2 = vadd.f32 %v3751_v48, %v2435_v41  ;;  %1201 = vmatmul.f32.gmra.mxu0 %v367_v58  ;;  %3798 = vmatmul.f32.gmra.mxu1 %v2963_v4  ;;  %v2692_v58 = vadd.f32 %v9847_v37, %v9303_v38  ;;  %v2965_v38 = vld [vmem:[#allocation2 + $0x598] sm:$0xff] }
 0x4d8   : > { %v4519_v39 = vpop.f32.mrf.mxu3  ;;  %v6345_v7 = vpop.f32.mrf.mxu2 }
 0x4d9   : > { %v9844_v32 = vadd.f32 %v4519_v39, %v2691_v47  ;;  %v7623_v36 = vadd.f32 %v6345_v7, %v5029_v2  ;;  %v3221_v39 = vld [vmem:[#allocation2 + $0xd98] sm:$0xff] }
 0x4da   : > { %v5559_v7 = vld [vmem:[#allocation2 + $0x698] sm:$0xff] }
 0x4db   : > { %8135 = vst [vmem:[%s9101_s18 + $0x408] sm:$0xff] %v7623_v36 }
 0x4dc   : > { %v1157_v35 = vpop.f32.mrf.mxu0  ;;  %v3754_v24 = vpop.f32.mrf.mxu1 }
 0x4dd   : > { %v2436_v49 = vadd.f32 %v9847_v37, %v1157_v35  ;;  %4569 = vmatmul.f32.gmra.mxu3 %v3220_v14  ;;  %6395 = vmatmul.f32.gmra.mxu2 %v5558_v53  ;;  %v369_v35 = vld [vmem:[#allocation2 + $0x498] sm:$0xff] }
 0x4df   : > { %v5030_v41 = vadd.f32 %v3754_v24, %v2436_v49  ;;  %1204 = vmatmul.f32.gmra.mxu0 %v368_v17  ;;  %3801 = vmatmul.f32.gmra.mxu1 %v2964_v8  ;;  %v2693_v17 = vadd.f32 %v9847_v37, %v9307_v52  ;;  %v2966_v52 = vld [vmem:[#allocation2 + $0x5a0] sm:$0xff] }
 0x4e0   : > { %v4522_v48 = vpop.f32.mrf.mxu3  ;;  %v6348_v4 = vpop.f32.mrf.mxu2 }
 0x4e1   : > { %v9852_v47 = vadd.f32 %v4522_v48, %v2692_v58  ;;  %v7624_v2 = vadd.f32 %v6348_v4, %v5030_v41  ;;  %v3222_v48 = vld [vmem:[#allocation2 + $0xda0] sm:$0xff] }
 0x4e2   : > { %v5560_v4 = vld [vmem:[#allocation2 + $0x6a0] sm:$0xff] }
 0x4e3   : > { %8136 = vst [vmem:[%s9101_s18 + $0x410] sm:$0xff] %v7624_v2 }
 0x4e4   : > { %v1160_v36 = vpop.f32.mrf.mxu0  ;;  %v3757_v53 = vpop.f32.mrf.mxu1 }
 0x4e5   : > { %v2437_v14 = vadd.f32 %v9847_v37, %v1160_v36  ;;  %4572 = vmatmul.f32.gmra.mxu3 %v3221_v39  ;;  %6398 = vmatmul.f32.gmra.mxu2 %v5559_v7  ;;  %v370_v36 = vld [vmem:[#allocation2 + $0x4a0] sm:$0xff] }
 0x4e7   : > { %v5031_v49 = vadd.f32 %v3757_v53, %v2437_v14  ;;  %1207 = vmatmul.f32.gmra.mxu0 %v369_v35  ;;  %3804 = vmatmul.f32.gmra.mxu1 %v2965_v38  ;;  %v2694_v35 = vadd.f32 %v9847_v37, %v9311_v12  ;;  %v2967_v12 = vld [vmem:[#allocation2 + $0x5a8] sm:$0xff] }
 0x4e8   : > { %v4525_v24 = vpop.f32.mrf.mxu3  ;;  %v6351_v8 = vpop.f32.mrf.mxu2 }
 0x4e9   : > { %v9858_v58 = vadd.f32 %v4525_v24, %v2693_v17  ;;  %v7625_v41 = vadd.f32 %v6351_v8, %v5031_v49  ;;  %v3223_v24 = vld [vmem:[#allocation2 + $0xda8] sm:$0xff] }
 0x4ea   : > { %v5561_v8 = vld [vmem:[#allocation2 + $0x6a8] sm:$0xff] }
 0x4eb   : > { %8137 = vst [vmem:[%s9101_s18 + $0x418] sm:$0xff] %v7625_v41 }
 0x4ec   : > { %v1163_v2 = vpop.f32.mrf.mxu0  ;;  %v3760_v7 = vpop.f32.mrf.mxu1 }
 0x4ed   : > { %v2438_v39 = vadd.f32 %v9847_v37, %v1163_v2  ;;  %4575 = vmatmul.f32.gmra.mxu3 %v3222_v48  ;;  %6401 = vmatmul.f32.gmra.mxu2 %v5560_v4  ;;  %v371_v2 = vld [vmem:[#allocation2 + $0x4a8] sm:$0xff] }
 0x4ef   : > { %v5032_v14 = vadd.f32 %v3760_v7, %v2438_v39  ;;  %1210 = vmatmul.f32.gmra.mxu0 %v370_v36  ;;  %3807 = vmatmul.f32.gmra.mxu1 %v2966_v52  ;;  %v2695_v36 = vadd.f32 %v9847_v37, %v9315_v33  ;;  %v2968_v33 = vld [vmem:[#allocation2 + $0x5b0] sm:$0xff] }
 0x4f0   : > { %v4528_v53 = vpop.f32.mrf.mxu3  ;;  %v6354_v38 = vpop.f32.mrf.mxu2 }
 0x4f1   : > { %v9864_v17 = vadd.f32 %v4528_v53, %v2694_v35  ;;  %v7626_v49 = vadd.f32 %v6354_v38, %v5032_v14  ;;  %v3224_v53 = vld [vmem:[#allocation2 + $0xdb0] sm:$0xff] }
 0x4f2   : > { %v5562_v38 = vld [vmem:[#allocation2 + $0x6b0] sm:$0xff] }
 0x4f3   : > { %8138 = vst [vmem:[%s9101_s18 + $0x420] sm:$0xff] %v7626_v49 }
 0x4f4   : > { %v1166_v41 = vpop.f32.mrf.mxu0  ;;  %v3763_v4 = vpop.f32.mrf.mxu1 }
 0x4f5   : > { %v2439_v48 = vadd.f32 %v9847_v37, %v1166_v41  ;;  %4578 = vmatmul.f32.gmra.mxu3 %v3223_v24  ;;  %6404 = vmatmul.f32.gmra.mxu2 %v5561_v8  ;;  %v372_v41 = vld [vmem:[#allocation2 + $0x4b0] sm:$0xff] }
 0x4f7   : > { %v5033_v39 = vadd.f32 %v3763_v4, %v2439_v48  ;;  %1213 = vmatmul.f32.gmra.mxu0 %v371_v2  ;;  %3810 = vmatmul.f32.gmra.mxu1 %v2967_v12  ;;  %v2696_v2 = vadd.f32 %v9847_v37, %v9319_v45  ;;  %v2969_v45 = vld [vmem:[#allocation2 + $0x5b8] sm:$0xff] }
 0x4f8   : > { %v4531_v7 = vpop.f32.mrf.mxu3  ;;  %v6357_v52 = vpop.f32.mrf.mxu2 }
 0x4f9   : > { %v9870_v35 = vadd.f32 %v4531_v7, %v2695_v36  ;;  %v7627_v14 = vadd.f32 %v6357_v52, %v5033_v39  ;;  %v3225_v7 = vld [vmem:[#allocation2 + $0xdb8] sm:$0xff] }
 0x4fa   : > { %v5563_v52 = vld [vmem:[#allocation2 + $0x6b8] sm:$0xff] }
 0x4fb   : > { %8139 = vst [vmem:[%s9101_s18 + $0x428] sm:$0xff] %v7627_v14 }
 0x4fc   : > { %v1169_v49 = vpop.f32.mrf.mxu0  ;;  %v3766_v8 = vpop.f32.mrf.mxu1 }
 0x4fd   : > { %v2440_v24 = vadd.f32 %v9847_v37, %v1169_v49  ;;  %4581 = vmatmul.f32.gmra.mxu3 %v3224_v53  ;;  %6407 = vmatmul.f32.gmra.mxu2 %v5562_v38  ;;  %v373_v49 = vld [vmem:[#allocation2 + $0x4b8] sm:$0xff] }
 0x4ff   : > { %v5034_v48 = vadd.f32 %v3766_v8, %v2440_v24  ;;  %1216 = vmatmul.f32.gmra.mxu0 %v372_v41  ;;  %3813 = vmatmul.f32.gmra.mxu1 %v2968_v33  ;;  %v2697_v41 = vadd.f32 %v9847_v37, %v9323_v9  ;;  %v2970_v9 = vld [vmem:[#allocation2 + $0x5c0] sm:$0xff] }
 0x500   : > { %v4534_v4 = vpop.f32.mrf.mxu3  ;;  %v6360_v12 = vpop.f32.mrf.mxu2 }
 0x501   : > { %v9876_v36 = vadd.f32 %v4534_v4, %v2696_v2  ;;  %v7628_v39 = vadd.f32 %v6360_v12, %v5034_v48  ;;  %v3226_v4 = vld [vmem:[#allocation2 + $0xdc0] sm:$0xff] }
 0x502   : > { %v5564_v12 = vld [vmem:[#allocation2 + $0x6c0] sm:$0xff] }
 0x503   : > { %8140 = vst [vmem:[%s9101_s18 + $0x430] sm:$0xff] %v7628_v39 }
 0x504   : > { %v1172_v14 = vpop.f32.mrf.mxu0  ;;  %v3769_v38 = vpop.f32.mrf.mxu1 }
 0x505   : > { %v2441_v53 = vadd.f32 %v9847_v37, %v1172_v14  ;;  %4584 = vmatmul.f32.gmra.mxu3 %v3225_v7  ;;  %6410 = vmatmul.f32.gmra.mxu2 %v5563_v52  ;;  %v374_v14 = vld [vmem:[#allocation2 + $0x4c0] sm:$0xff] }
 0x507   : > { %v5035_v24 = vadd.f32 %v3769_v38, %v2441_v53  ;;  %1219 = vmatmul.f32.gmra.mxu0 %v373_v49  ;;  %3816 = vmatmul.f32.gmra.mxu1 %v2969_v45  ;;  %v2698_v49 = vadd.f32 %v9847_v37, %v9327_v30  ;;  %v2971_v30 = vld [vmem:[#allocation2 + $0x5c8] sm:$0xff] }
 0x508   : > { %v4537_v8 = vpop.f32.mrf.mxu3  ;;  %v6363_v33 = vpop.f32.mrf.mxu2 }
 0x509   : > { %v9882_v2 = vadd.f32 %v4537_v8, %v2697_v41  ;;  %v7629_v48 = vadd.f32 %v6363_v33, %v5035_v24  ;;  %v3227_v8 = vld [vmem:[#allocation2 + $0xdc8] sm:$0xff] }
 0x50a   : > { %v5565_v33 = vld [vmem:[#allocation2 + $0x6c8] sm:$0xff] }
 0x50b   : > { %8141 = vst [vmem:[%s9101_s18 + $0x438] sm:$0xff] %v7629_v48 }
 0x50c   : > { %v1175_v39 = vpop.f32.mrf.mxu0  ;;  %v3772_v52 = vpop.f32.mrf.mxu1 }
 0x50d   : > { %v2442_v7 = vadd.f32 %v9847_v37, %v1175_v39  ;;  %4587 = vmatmul.f32.gmra.mxu3 %v3226_v4  ;;  %6413 = vmatmul.f32.gmra.mxu2 %v5564_v12  ;;  %v375_v39 = vld [vmem:[#allocation2 + $0x4c8] sm:$0xff] }
 0x50f   : > { %v5036_v53 = vadd.f32 %v3772_v52, %v2442_v7  ;;  %1222 = vmatmul.f32.gmra.mxu0 %v374_v14  ;;  %3819 = vmatmul.f32.gmra.mxu1 %v2970_v9  ;;  %v2699_v14 = vadd.f32 %v9847_v37, %v9331_v44  ;;  %v2972_v44 = vld [vmem:[#allocation2 + $0x5d0] sm:$0xff] }
 0x510   : > { %v4540_v38 = vpop.f32.mrf.mxu3  ;;  %v6366_v45 = vpop.f32.mrf.mxu2 }
 0x511   : > { %v9888_v41 = vadd.f32 %v4540_v38, %v2698_v49  ;;  %v7630_v24 = vadd.f32 %v6366_v45, %v5036_v53  ;;  %v3228_v38 = vld [vmem:[#allocation2 + $0xdd0] sm:$0xff] }
 0x512   : > { %v5566_v45 = vld [vmem:[#allocation2 + $0x6d0] sm:$0xff] }
 0x513   : > { %8142 = vst [vmem:[%s9101_s18 + $0x440] sm:$0xff] %v7630_v24 }
 0x514   : > { %v1178_v48 = vpop.f32.mrf.mxu0  ;;  %v3775_v12 = vpop.f32.mrf.mxu1 }
 0x515   : > { %v2443_v4 = vadd.f32 %v9847_v37, %v1178_v48  ;;  %4590 = vmatmul.f32.gmra.mxu3 %v3227_v8  ;;  %6416 = vmatmul.f32.gmra.mxu2 %v5565_v33  ;;  %v376_v48 = vld [vmem:[#allocation2 + $0x4d0] sm:$0xff] }
 0x517   : > { %v5037_v7 = vadd.f32 %v3775_v12, %v2443_v4  ;;  %1225 = vmatmul.f32.gmra.mxu0 %v375_v39  ;;  %3822 = vmatmul.f32.gmra.mxu1 %v2971_v30  ;;  %v2700_v39 = vadd.f32 %v9847_v37, %v9335_v1  ;;  %v2973_v1 = vld [vmem:[#allocation2 + $0x5d8] sm:$0xff] }
 0x518   : > { %v4543_v52 = vpop.f32.mrf.mxu3  ;;  %v6369_v9 = vpop.f32.mrf.mxu2 }
 0x519   : > { %v9894_v49 = vadd.f32 %v4543_v52, %v2699_v14  ;;  %v7631_v53 = vadd.f32 %v6369_v9, %v5037_v7  ;;  %v3229_v52 = vld [vmem:[#allocation2 + $0xdd8] sm:$0xff] }
 0x51a   : > { %v5567_v9 = vld [vmem:[#allocation2 + $0x6d8] sm:$0xff] }
 0x51b   : > { %8143 = vst [vmem:[%s9101_s18 + $0x448] sm:$0xff] %v7631_v53 }
 0x51c   : > { %v1181_v24 = vpop.f32.mrf.mxu0  ;;  %v3778_v33 = vpop.f32.mrf.mxu1 }
 0x51d   : > { %v2444_v8 = vadd.f32 %v9847_v37, %v1181_v24  ;;  %4593 = vmatmul.f32.gmra.mxu3 %v3228_v38  ;;  %6419 = vmatmul.f32.gmra.mxu2 %v5566_v45  ;;  %v377_v24 = vld [vmem:[#allocation2 + $0x4d8] sm:$0xff] }
 0x51f   : > { %v5038_v4 = vadd.f32 %v3778_v33, %v2444_v8  ;;  %1228 = vmatmul.f32.gmra.mxu0 %v376_v48  ;;  %3825 = vmatmul.f32.gmra.mxu1 %v2972_v44  ;;  %v2701_v48 = vadd.f32 %v9847_v37, %v9339_v34  ;;  %v2974_v34 = vld [vmem:[#allocation2 + $0x5e0] sm:$0xff] }
 0x520   : > { %v4546_v12 = vpop.f32.mrf.mxu3  ;;  %v6372_v30 = vpop.f32.mrf.mxu2 }
 0x521   : > { %v9900_v14 = vadd.f32 %v4546_v12, %v2700_v39  ;;  %v7632_v7 = vadd.f32 %v6372_v30, %v5038_v4  ;;  %v3230_v12 = vld [vmem:[#allocation2 + $0xde0] sm:$0xff] }
 0x522   : > { %v5568_v30 = vld [vmem:[#allocation2 + $0x6e0] sm:$0xff] }
 0x523   : > { %8144 = vst [vmem:[%s9101_s18 + $0x450] sm:$0xff] %v7632_v7 }
 0x524   : > { %v1184_v53 = vpop.f32.mrf.mxu0  ;;  %v3781_v45 = vpop.f32.mrf.mxu1 }
 0x525   : > { %v2445_v38 = vadd.f32 %v9847_v37, %v1184_v53  ;;  %4596 = vmatmul.f32.gmra.mxu3 %v3229_v52  ;;  %6422 = vmatmul.f32.gmra.mxu2 %v5567_v9  ;;  %v378_v53 = vld [vmem:[#allocation2 + $0x4e0] sm:$0xff] }
 0x527   : > { %v5039_v8 = vadd.f32 %v3781_v45, %v2445_v38  ;;  %1231 = vmatmul.f32.gmra.mxu0 %v377_v24  ;;  %3828 = vmatmul.f32.gmra.mxu1 %v2973_v1  ;;  %v2702_v24 = vadd.f32 %v9847_v37, %v9343_v50  ;;  %v2975_v50 = vld [vmem:[#allocation2 + $0x5e8] sm:$0xff] }
 0x528   : > { %v4549_v33 = vpop.f32.mrf.mxu3  ;;  %v6375_v44 = vpop.f32.mrf.mxu2 }
 0x529   : > { %v9906_v39 = vadd.f32 %v4549_v33, %v2701_v48  ;;  %v7633_v4 = vadd.f32 %v6375_v44, %v5039_v8  ;;  %v3231_v33 = vld [vmem:[#allocation2 + $0xde8] sm:$0xff] }
 0x52a   : > { %v5569_v44 = vld [vmem:[#allocation2 + $0x6e8] sm:$0xff] }
 0x52b   : > { %8145 = vst [vmem:[%s9101_s18 + $0x458] sm:$0xff] %v7633_v4 }
 0x52c   : > { %v1187_v7 = vpop.f32.mrf.mxu0  ;;  %v3784_v9 = vpop.f32.mrf.mxu1 }
 0x52d   : > { %v2446_v52 = vadd.f32 %v9847_v37, %v1187_v7  ;;  %4599 = vmatmul.f32.gmra.mxu3 %v3230_v12  ;;  %6425 = vmatmul.f32.gmra.mxu2 %v5568_v30  ;;  %v379_v7 = vld [vmem:[#allocation2 + $0x4e8] sm:$0xff] }
 0x52f   : > { %v5040_v38 = vadd.f32 %v3784_v9, %v2446_v52  ;;  %1234 = vmatmul.f32.gmra.mxu0 %v378_v53  ;;  %3831 = vmatmul.f32.gmra.mxu1 %v2974_v34  ;;  %v2703_v53 = vadd.f32 %v9847_v37, %v9347_v18  ;;  %v2976_v18 = vld [vmem:[#allocation2 + $0x5f0] sm:$0xff] }
 0x530   : > { %v4552_v45 = vpop.f32.mrf.mxu3  ;;  %v6378_v1 = vpop.f32.mrf.mxu2 }
 0x531   : > { %v9912_v48 = vadd.f32 %v4552_v45, %v2702_v24  ;;  %v7634_v8 = vadd.f32 %v6378_v1, %v5040_v38  ;;  %v3232_v45 = vld [vmem:[#allocation2 + $0xdf0] sm:$0xff] }
 0x532   : > { %v5570_v1 = vld [vmem:[#allocation2 + $0x6f0] sm:$0xff] }
 0x533   : > { %8146 = vst [vmem:[%s9101_s18 + $0x460] sm:$0xff] %v7634_v8 }
 0x534   : > { %v1190_v4 = vpop.f32.mrf.mxu0  ;;  %v3787_v30 = vpop.f32.mrf.mxu1 }
 0x535   : > { %v2447_v12 = vadd.f32 %v9847_v37, %v1190_v4  ;;  %4602 = vmatmul.f32.gmra.mxu3 %v3231_v33  ;;  %6428 = vmatmul.f32.gmra.mxu2 %v5569_v44  ;;  %v380_v4 = vld [vmem:[#allocation2 + $0x4f0] sm:$0xff] }
 0x537   : > { %v5041_v52 = vadd.f32 %v3787_v30, %v2447_v12  ;;  %1237 = vmatmul.f32.gmra.mxu0 %v379_v7  ;;  %3834 = vmatmul.f32.gmra.mxu1 %v2975_v50  ;;  %v2704_v7 = vadd.f32 %v9847_v37, %v9351_v40  ;;  %v2977_v40 = vld [vmem:[#allocation2 + $0x5f8] sm:$0xff] }
 0x538   : > { %v4555_v9 = vpop.f32.mrf.mxu3  ;;  %v6381_v34 = vpop.f32.mrf.mxu2 }
 0x539   : > { %v9918_v24 = vadd.f32 %v4555_v9, %v2703_v53  ;;  %v7635_v38 = vadd.f32 %v6381_v34, %v5041_v52  ;;  %v3233_v9 = vld [vmem:[#allocation2 + $0xdf8] sm:$0xff] }
 0x53a   : > { %v5571_v34 = vld [vmem:[#allocation2 + $0x6f8] sm:$0xff] }
 0x53b   : > { %8147 = vst [vmem:[%s9101_s18 + $0x468] sm:$0xff] %v7635_v38 }
 0x53c   : > { %v1193_v8 = vpop.f32.mrf.mxu0  ;;  %v3790_v44 = vpop.f32.mrf.mxu1 }
 0x53d   : > { %v2448_v33 = vadd.f32 %v9847_v37, %v1193_v8  ;;  %4605 = vmatmul.f32.gmra.mxu3 %v3232_v45  ;;  %6431 = vmatmul.f32.gmra.mxu2 %v5570_v1  ;;  %v381_v8 = vld [vmem:[#allocation2 + $0x4f8] sm:$0xff] }
 0x53f   : > { %v5042_v12 = vadd.f32 %v3790_v44, %v2448_v33  ;;  %1240 = vmatmul.f32.gmra.mxu0 %v380_v4  ;;  %3837 = vmatmul.f32.gmra.mxu1 %v2976_v18  ;;  %v2705_v4 = vadd.f32 %v9847_v37, %v9355_v0  ;;  %v2978_v0 = vld [vmem:[#allocation2 + $0x600] sm:$0xff] }
 0x540   : > { %v4558_v30 = vpop.f32.mrf.mxu3  ;;  %v6384_v50 = vpop.f32.mrf.mxu2 }
 0x541   : > { %v9924_v53 = vadd.f32 %v4558_v30, %v2704_v7  ;;  %v7636_v52 = vadd.f32 %v6384_v50, %v5042_v12  ;;  %v3234_v30 = vld [vmem:[#allocation2 + $0xe00] sm:$0xff] }
 0x542   : > { %v5572_v50 = vld [vmem:[#allocation2 + $0x700] sm:$0xff] }
 0x543   : > { %8148 = vst [vmem:[%s9101_s18 + $0x470] sm:$0xff] %v7636_v52 }
 0x544   : > { %v1196_v38 = vpop.f32.mrf.mxu0  ;;  %v3793_v1 = vpop.f32.mrf.mxu1 }
 0x545   : > { %v2449_v45 = vadd.f32 %v9847_v37, %v1196_v38  ;;  %4608 = vmatmul.f32.gmra.mxu3 %v3233_v9  ;;  %6434 = vmatmul.f32.gmra.mxu2 %v5571_v34  ;;  %v382_v38 = vld [vmem:[#allocation2 + $0x500] sm:$0xff] }
 0x547   : > { %v5043_v33 = vadd.f32 %v3793_v1, %v2449_v45  ;;  %1243 = vmatmul.f32.gmra.mxu0 %v381_v8  ;;  %3840 = vmatmul.f32.gmra.mxu1 %v2977_v40  ;;  %v2706_v8 = vadd.f32 %v9847_v37, %v9360_v29  ;;  %v2979_v29 = vld [vmem:[#allocation2 + $0x608] sm:$0xff] }
 0x548   : > { %v4561_v44 = vpop.f32.mrf.mxu3  ;;  %v6387_v18 = vpop.f32.mrf.mxu2 }
 0x549   : > { %v9930_v7 = vadd.f32 %v4561_v44, %v2705_v4  ;;  %v7637_v12 = vadd.f32 %v6387_v18, %v5043_v33  ;;  %v3235_v44 = vld [vmem:[#allocation2 + $0xe08] sm:$0xff] }
 0x54a   : > { %v5573_v18 = vld [vmem:[#allocation2 + $0x708] sm:$0xff] }
 0x54b   : > { %8149 = vst [vmem:[%s9101_s18 + $0x478] sm:$0xff] %v7637_v12 }
 0x54c   : > { %v1199_v52 = vpop.f32.mrf.mxu0  ;;  %v3796_v34 = vpop.f32.mrf.mxu1 }
 0x54d   : > { %v2450_v9 = vadd.f32 %v9847_v37, %v1199_v52  ;;  %4611 = vmatmul.f32.gmra.mxu3 %v3234_v30  ;;  %6437 = vmatmul.f32.gmra.mxu2 %v5572_v50  ;;  %v383_v52 = vld [vmem:[#allocation2 + $0x508] sm:$0xff] }
 0x54f   : > { %v5044_v45 = vadd.f32 %v3796_v34, %v2450_v9  ;;  %1246 = vmatmul.f32.gmra.mxu0 %v382_v38  ;;  %3843 = vmatmul.f32.gmra.mxu1 %v2978_v0  ;;  %v2707_v38 = vadd.f32 %v9847_v37, %v9366_v51  ;;  %v2980_v51 = vld [vmem:[#allocation2 + $0x610] sm:$0xff] }
 0x550   : > { %v4564_v1 = vpop.f32.mrf.mxu3  ;;  %v6390_v40 = vpop.f32.mrf.mxu2 }
 0x551   : > { %v9936_v4 = vadd.f32 %v4564_v1, %v2706_v8  ;;  %v7638_v33 = vadd.f32 %v6390_v40, %v5044_v45  ;;  %v3236_v1 = vld [vmem:[#allocation2 + $0xe10] sm:$0xff] }
 0x552   : > { %v5574_v40 = vld [vmem:[#allocation2 + $0x710] sm:$0xff] }
 0x553   : > { %8150 = vst [vmem:[%s9101_s18 + $0x480] sm:$0xff] %v7638_v33 }
 0x554   : > { %v1202_v12 = vpop.f32.mrf.mxu0  ;;  %v3799_v50 = vpop.f32.mrf.mxu1 }
 0x555   : > { %v2451_v30 = vadd.f32 %v9847_v37, %v1202_v12  ;;  %4614 = vmatmul.f32.gmra.mxu3 %v3235_v44  ;;  %6440 = vmatmul.f32.gmra.mxu2 %v5573_v18  ;;  %v384_v12 = vld [vmem:[#allocation2 + $0x510] sm:$0xff] }
 0x557   : > { %v5045_v9 = vadd.f32 %v3799_v50, %v2451_v30  ;;  %1249 = vmatmul.f32.gmra.mxu0 %v383_v52  ;;  %3846 = vmatmul.f32.gmra.mxu1 %v2979_v29  ;;  %v2708_v52 = vadd.f32 %v9847_v37, %v9372_v55  ;;  %v2981_v55 = vld [vmem:[#allocation2 + $0x618] sm:$0xff] }
 0x558   : > { %v4567_v34 = vpop.f32.mrf.mxu3  ;;  %v6393_v0 = vpop.f32.mrf.mxu2 }
 0x559   : > { %v9942_v8 = vadd.f32 %v4567_v34, %v2707_v38  ;;  %v7639_v45 = vadd.f32 %v6393_v0, %v5045_v9  ;;  %v3237_v34 = vld [vmem:[#allocation2 + $0xe18] sm:$0xff] }
 0x55a   : > { %v5575_v0 = vld [vmem:[#allocation2 + $0x718] sm:$0xff] }
 0x55b   : > { %8151 = vst [vmem:[%s9101_s18 + $0x488] sm:$0xff] %v7639_v45 }
 0x55c   : > { %v1205_v33 = vpop.f32.mrf.mxu0  ;;  %v3802_v18 = vpop.f32.mrf.mxu1 }
 0x55d   : > { %v2452_v44 = vadd.f32 %v9847_v37, %v1205_v33  ;;  %4617 = vmatmul.f32.gmra.mxu3 %v3236_v1  ;;  %6443 = vmatmul.f32.gmra.mxu2 %v5574_v40  ;;  %v385_v33 = vld [vmem:[#allocation2 + $0x518] sm:$0xff] }
 0x55f   : > { %v5046_v30 = vadd.f32 %v3802_v18, %v2452_v44  ;;  %1252 = vmatmul.f32.gmra.mxu0 %v384_v12  ;;  %3849 = vmatmul.f32.gmra.mxu1 %v2980_v51  ;;  %v2709_v12 = vadd.f32 %v9847_v37, %v9378_v59  ;;  %v2982_v59 = vld [vmem:[#allocation2 + $0x620] sm:$0xff] }
 0x560   : > { %v4570_v50 = vpop.f32.mrf.mxu3  ;;  %v6396_v29 = vpop.f32.mrf.mxu2 }
 0x561   : > { %v9948_v38 = vadd.f32 %v4570_v50, %v2708_v52  ;;  %v7640_v9 = vadd.f32 %v6396_v29, %v5046_v30  ;;  %v3238_v50 = vld [vmem:[#allocation2 + $0xe20] sm:$0xff] }
 0x562   : > { %v5576_v29 = vld [vmem:[#allocation2 + $0x720] sm:$0xff] }
 0x563   : > { %8152 = vst [vmem:[%s9101_s18 + $0x490] sm:$0xff] %v7640_v9 }
 0x564   : > { %v1208_v45 = vpop.f32.mrf.mxu0  ;;  %v3805_v40 = vpop.f32.mrf.mxu1 }
 0x565   : > { %v2453_v1 = vadd.f32 %v9847_v37, %v1208_v45  ;;  %4620 = vmatmul.f32.gmra.mxu3 %v3237_v34  ;;  %6446 = vmatmul.f32.gmra.mxu2 %v5575_v0  ;;  %v386_v45 = vld [vmem:[#allocation2 + $0x520] sm:$0xff] }
 0x567   : > { %v5047_v44 = vadd.f32 %v3805_v40, %v2453_v1  ;;  %1255 = vmatmul.f32.gmra.mxu0 %v385_v33  ;;  %3852 = vmatmul.f32.gmra.mxu1 %v2981_v55  ;;  %v2710_v33 = vadd.f32 %v9847_v37, %v9384_v63  ;;  %v2983_v63 = vld [vmem:[#allocation2 + $0x628] sm:$0xff] }
 0x568   : > { %v4573_v18 = vpop.f32.mrf.mxu3  ;;  %v6399_v51 = vpop.f32.mrf.mxu2 }
 0x569   : > { %v9954_v52 = vadd.f32 %v4573_v18, %v2709_v12  ;;  %v7641_v30 = vadd.f32 %v6399_v51, %v5047_v44  ;;  %v3239_v18 = vld [vmem:[#allocation2 + $0xe28] sm:$0xff] }
 0x56a   : > { %v5577_v51 = vld [vmem:[#allocation2 + $0x728] sm:$0xff] }
 0x56b   : > { %8153 = vst [vmem:[%s9101_s18 + $0x498] sm:$0xff] %v7641_v30 }
 0x56c   : > { %v1211_v9 = vpop.f32.mrf.mxu0  ;;  %v3808_v0 = vpop.f32.mrf.mxu1 }
 0x56d   : > { %v2454_v34 = vadd.f32 %v9847_v37, %v1211_v9  ;;  %4623 = vmatmul.f32.gmra.mxu3 %v3238_v50  ;;  %6449 = vmatmul.f32.gmra.mxu2 %v5576_v29  ;;  %v387_v9 = vld [vmem:[#allocation2 + $0x528] sm:$0xff] }
 0x56f   : > { %v5048_v1 = vadd.f32 %v3808_v0, %v2454_v34  ;;  %1258 = vmatmul.f32.gmra.mxu0 %v386_v45  ;;  %3855 = vmatmul.f32.gmra.mxu1 %v2982_v59  ;;  %v2711_v45 = vadd.f32 %v9847_v37, %v9390_v5  ;;  %v2984_v5 = vld [vmem:[#allocation2 + $0x630] sm:$0xff] }
 0x570   : > { %v4576_v40 = vpop.f32.mrf.mxu3  ;;  %v6402_v55 = vpop.f32.mrf.mxu2 }
 0x571   : > { %v9960_v12 = vadd.f32 %v4576_v40, %v2710_v33  ;;  %v7642_v44 = vadd.f32 %v6402_v55, %v5048_v1  ;;  %v3240_v40 = vld [vmem:[#allocation2 + $0xe30] sm:$0xff] }
 0x572   : > { %v5578_v55 = vld [vmem:[#allocation2 + $0x730] sm:$0xff] }
 0x573   : > { %8154 = vst [vmem:[%s9101_s18 + $0x4a0] sm:$0xff] %v7642_v44 }
 0x574   : > { %v1214_v30 = vpop.f32.mrf.mxu0  ;;  %v3811_v29 = vpop.f32.mrf.mxu1 }
 0x575   : > { %v2455_v50 = vadd.f32 %v9847_v37, %v1214_v30  ;;  %4626 = vmatmul.f32.gmra.mxu3 %v3239_v18  ;;  %6452 = vmatmul.f32.gmra.mxu2 %v5577_v51  ;;  %v388_v30 = vld [vmem:[#allocation2 + $0x530] sm:$0xff] }
 0x577   : > { %v5049_v34 = vadd.f32 %v3811_v29, %v2455_v50  ;;  %1261 = vmatmul.f32.gmra.mxu0 %v387_v9  ;;  %3858 = vmatmul.f32.gmra.mxu1 %v2983_v63  ;;  %v2712_v9 = vadd.f32 %v9847_v37, %v9396_v11  ;;  %v2985_v11 = vld [vmem:[#allocation2 + $0x638] sm:$0xff] }
 0x578   : > { %v4579_v0 = vpop.f32.mrf.mxu3  ;;  %v6405_v59 = vpop.f32.mrf.mxu2 }
 0x579   : > { %v9966_v33 = vadd.f32 %v4579_v0, %v2711_v45  ;;  %v7643_v1 = vadd.f32 %v6405_v59, %v5049_v34  ;;  %v3241_v0 = vld [vmem:[#allocation2 + $0xe38] sm:$0xff] }
 0x57a   : > { %v5579_v59 = vld [vmem:[#allocation2 + $0x738] sm:$0xff] }
 0x57b   : > { %8155 = vst [vmem:[%s9101_s18 + $0x4a8] sm:$0xff] %v7643_v1 }
 0x57c   : > { %v1217_v44 = vpop.f32.mrf.mxu0  ;;  %v3814_v51 = vpop.f32.mrf.mxu1 }
 0x57d   : > { %v2456_v18 = vadd.f32 %v9847_v37, %v1217_v44  ;;  %4629 = vmatmul.f32.gmra.mxu3 %v3240_v40  ;;  %6455 = vmatmul.f32.gmra.mxu2 %v5578_v55  ;;  %v389_v44 = vld [vmem:[#allocation2 + $0x538] sm:$0xff] }
 0x57f   : > { %v5050_v50 = vadd.f32 %v3814_v51, %v2456_v18  ;;  %1264 = vmatmul.f32.gmra.mxu0 %v388_v30  ;;  %3861 = vmatmul.f32.gmra.mxu1 %v2984_v5  ;;  %v2713_v30 = vadd.f32 %v9847_v37, %v9402_v10  ;;  %v2986_v10 = vld [vmem:[#allocation2 + $0x640] sm:$0xff] }
 0x580   : > { %v4582_v29 = vpop.f32.mrf.mxu3  ;;  %v6408_v63 = vpop.f32.mrf.mxu2 }
 0x581   : > { %v9972_v45 = vadd.f32 %v4582_v29, %v2712_v9  ;;  %v7644_v34 = vadd.f32 %v6408_v63, %v5050_v50  ;;  %v3242_v29 = vld [vmem:[#allocation2 + $0xe40] sm:$0xff] }
 0x582   : > { %v5580_v63 = vld [vmem:[#allocation2 + $0x740] sm:$0xff] }
 0x583   : > { %8156 = vst [vmem:[%s9101_s18 + $0x4b0] sm:$0xff] %v7644_v34 }
 0x584   : > { %v1220_v1 = vpop.f32.mrf.mxu0  ;;  %v3817_v55 = vpop.f32.mrf.mxu1 }
 0x585   : > { %v2457_v40 = vadd.f32 %v9847_v37, %v1220_v1  ;;  %4632 = vmatmul.f32.gmra.mxu3 %v3241_v0  ;;  %6458 = vmatmul.f32.gmra.mxu2 %v5579_v59  ;;  %v390_v1 = vld [vmem:[#allocation2 + $0x540] sm:$0xff] }
 0x587   : > { %v5051_v18 = vadd.f32 %v3817_v55, %v2457_v40  ;;  %1267 = vmatmul.f32.gmra.mxu0 %v389_v44  ;;  %3864 = vmatmul.f32.gmra.mxu1 %v2985_v11  ;;  %v2714_v44 = vadd.f32 %v9847_v37, %v9408_v15  ;;  %v2987_v15 = vld [vmem:[#allocation2 + $0x648] sm:$0xff] }
 0x588   : > { %v4585_v51 = vpop.f32.mrf.mxu3  ;;  %v6411_v5 = vpop.f32.mrf.mxu2 }
 0x589   : > { %v9978_v9 = vadd.f32 %v4585_v51, %v2713_v30  ;;  %v7645_v50 = vadd.f32 %v6411_v5, %v5051_v18  ;;  %v3243_v51 = vld [vmem:[#allocation2 + $0xe48] sm:$0xff] }
 0x58a   : > { %v5581_v5 = vld [vmem:[#allocation2 + $0x748] sm:$0xff] }
 0x58b   : > { %8157 = vst [vmem:[%s9101_s18 + $0x4b8] sm:$0xff] %v7645_v50 }
 0x58c   : > { %v1223_v34 = vpop.f32.mrf.mxu0  ;;  %v3820_v59 = vpop.f32.mrf.mxu1 }
 0x58d   : > { %v2458_v0 = vadd.f32 %v9847_v37, %v1223_v34  ;;  %4635 = vmatmul.f32.gmra.mxu3 %v3242_v29  ;;  %6461 = vmatmul.f32.gmra.mxu2 %v5580_v63  ;;  %v391_v34 = vld [vmem:[#allocation2 + $0x548] sm:$0xff] }
 0x58f   : > { %v5052_v40 = vadd.f32 %v3820_v59, %v2458_v0  ;;  %1270 = vmatmul.f32.gmra.mxu0 %v390_v1  ;;  %3867 = vmatmul.f32.gmra.mxu1 %v2986_v10  ;;  %v2715_v1 = vadd.f32 %v9847_v37, %v9414_v19  ;;  %v2988_v19 = vld [vmem:[#allocation2 + $0x650] sm:$0xff] }
 0x590   : > { %v4588_v55 = vpop.f32.mrf.mxu3  ;;  %v6414_v11 = vpop.f32.mrf.mxu2 }
 0x591   : > { %v9984_v30 = vadd.f32 %v4588_v55, %v2714_v44  ;;  %v7646_v18 = vadd.f32 %v6414_v11, %v5052_v40  ;;  %v3244_v55 = vld [vmem:[#allocation2 + $0xe50] sm:$0xff] }
 0x592   : > { %v5582_v11 = vld [vmem:[#allocation2 + $0x750] sm:$0xff] }
 0x593   : > { %8158 = vst [vmem:[%s9101_s18 + $0x4c0] sm:$0xff] %v7646_v18 }
 0x594   : > { %v1226_v50 = vpop.f32.mrf.mxu0  ;;  %v3823_v63 = vpop.f32.mrf.mxu1 }
 0x595   : > { %v2459_v29 = vadd.f32 %v9847_v37, %v1226_v50  ;;  %4638 = vmatmul.f32.gmra.mxu3 %v3243_v51  ;;  %6464 = vmatmul.f32.gmra.mxu2 %v5581_v5  ;;  %v392_v50 = vld [vmem:[#allocation2 + $0x550] sm:$0xff] }
 0x597   : > { %v5053_v0 = vadd.f32 %v3823_v63, %v2459_v29  ;;  %1273 = vmatmul.f32.gmra.mxu0 %v391_v34  ;;  %3870 = vmatmul.f32.gmra.mxu1 %v2987_v15  ;;  %v2716_v34 = vadd.f32 %v9847_v37, %v9420_v23  ;;  %v2989_v23 = vld [vmem:[#allocation2 + $0x658] sm:$0xff] }
 0x598   : > { %v4591_v59 = vpop.f32.mrf.mxu3  ;;  %v6417_v10 = vpop.f32.mrf.mxu2 }
 0x599   : > { %v9990_v44 = vadd.f32 %v4591_v59, %v2715_v1  ;;  %v7647_v40 = vadd.f32 %v6417_v10, %v5053_v0  ;;  %v3245_v59 = vld [vmem:[#allocation2 + $0xe58] sm:$0xff] }
 0x59a   : > { %v5583_v10 = vld [vmem:[#allocation2 + $0x758] sm:$0xff] }
 0x59b   : > { %8159 = vst [vmem:[%s9101_s18 + $0x4c8] sm:$0xff] %v7647_v40 }
 0x59c   : > { %v1229_v18 = vpop.f32.mrf.mxu0  ;;  %v3826_v5 = vpop.f32.mrf.mxu1 }
 0x59d   : > { %v2460_v51 = vadd.f32 %v9847_v37, %v1229_v18  ;;  %4641 = vmatmul.f32.gmra.mxu3 %v3244_v55  ;;  %6467 = vmatmul.f32.gmra.mxu2 %v5582_v11  ;;  %v393_v18 = vld [vmem:[#allocation2 + $0x558] sm:$0xff] }
 0x59f   : > { %v5054_v29 = vadd.f32 %v3826_v5, %v2460_v51  ;;  %1276 = vmatmul.f32.gmra.mxu0 %v392_v50  ;;  %3873 = vmatmul.f32.gmra.mxu1 %v2988_v19  ;;  %v2717_v50 = vadd.f32 %v9847_v37, %v9426_v27  ;;  %v2990_v27 = vld [vmem:[#allocation2 + $0x660] sm:$0xff] }
 0x5a0   : > { %v4594_v63 = vpop.f32.mrf.mxu3  ;;  %v6420_v15 = vpop.f32.mrf.mxu2 }
 0x5a1   : > { %v9996_v1 = vadd.f32 %v4594_v63, %v2716_v34  ;;  %v7648_v0 = vadd.f32 %v6420_v15, %v5054_v29  ;;  %v3246_v63 = vld [vmem:[#allocation2 + $0xe60] sm:$0xff] }
 0x5a2   : > { %v5584_v15 = vld [vmem:[#allocation2 + $0x760] sm:$0xff] }
 0x5a3   : > { %8160 = vst [vmem:[%s9101_s18 + $0x4d0] sm:$0xff] %v7648_v0 }
 0x5a4   : > { %v1232_v40 = vpop.f32.mrf.mxu0  ;;  %v3829_v11 = vpop.f32.mrf.mxu1 }
 0x5a5   : > { %v2461_v55 = vadd.f32 %v9847_v37, %v1232_v40  ;;  %4644 = vmatmul.f32.gmra.mxu3 %v3245_v59  ;;  %6470 = vmatmul.f32.gmra.mxu2 %v5583_v10  ;;  %v394_v40 = vld [vmem:[#allocation2 + $0x560] sm:$0xff] }
 0x5a7   : > { %v5055_v51 = vadd.f32 %v3829_v11, %v2461_v55  ;;  %1279 = vmatmul.f32.gmra.mxu0 %v393_v18  ;;  %3876 = vmatmul.f32.gmra.mxu1 %v2989_v23  ;;  %v2718_v18 = vadd.f32 %v9847_v37, %v9430_v31  ;;  %v2991_v31 = vld [vmem:[#allocation2 + $0x668] sm:$0xff] }
 0x5a8   : > { %v4597_v5 = vpop.f32.mrf.mxu3  ;;  %v6423_v19 = vpop.f32.mrf.mxu2 }
 0x5a9   : > { %v10002_v34 = vadd.f32 %v4597_v5, %v2717_v50  ;;  %v7649_v29 = vadd.f32 %v6423_v19, %v5055_v51  ;;  %v3247_v5 = vld [vmem:[#allocation2 + $0xe68] sm:$0xff] }
 0x5aa   : > { %v5585_v19 = vld [vmem:[#allocation2 + $0x768] sm:$0xff] }
 0x5ab   : > { %8161 = vst [vmem:[%s9101_s18 + $0x4d8] sm:$0xff] %v7649_v29 }
 0x5ac   : > { %v1235_v0 = vpop.f32.mrf.mxu0  ;;  %v3832_v10 = vpop.f32.mrf.mxu1 }
 0x5ad   : > { %v2462_v59 = vadd.f32 %v9847_v37, %v1235_v0  ;;  %4647 = vmatmul.f32.gmra.mxu3 %v3246_v63  ;;  %6473 = vmatmul.f32.gmra.mxu2 %v5584_v15  ;;  %v395_v0 = vld [vmem:[#allocation2 + $0x568] sm:$0xff] }
 0x5af   : > { %v5056_v55 = vadd.f32 %v3832_v10, %v2462_v59  ;;  %1282 = vmatmul.f32.gmra.mxu0 %v394_v40  ;;  %3879 = vmatmul.f32.gmra.mxu1 %v2990_v27  ;;  %v2719_v40 = vadd.f32 %v9847_v37, %v9434_v62  ;;  %v2992_v62 = vld [vmem:[#allocation2 + $0x670] sm:$0xff] }
 0x5b0   : > { %v4600_v11 = vpop.f32.mrf.mxu3  ;;  %v6426_v23 = vpop.f32.mrf.mxu2 }
 0x5b1   : > { %v10008_v50 = vadd.f32 %v4600_v11, %v2718_v18  ;;  %v7650_v51 = vadd.f32 %v6426_v23, %v5056_v55  ;;  %v3248_v11 = vld [vmem:[#allocation2 + $0xe70] sm:$0xff] }
 0x5b2   : > { %v5586_v23 = vld [vmem:[#allocation2 + $0x770] sm:$0xff] }
 0x5b3   : > { %8162 = vst [vmem:[%s9101_s18 + $0x4e0] sm:$0xff] %v7650_v51 }
 0x5b4   : > { %v1238_v29 = vpop.f32.mrf.mxu0  ;;  %v3835_v15 = vpop.f32.mrf.mxu1 }
 0x5b5   : > { %v2463_v63 = vadd.f32 %v9847_v37, %v1238_v29  ;;  %4650 = vmatmul.f32.gmra.mxu3 %v3247_v5  ;;  %6476 = vmatmul.f32.gmra.mxu2 %v5585_v19  ;;  %v396_v29 = vld [vmem:[#allocation2 + $0x570] sm:$0xff] }
 0x5b7   : > { %v5057_v59 = vadd.f32 %v3835_v15, %v2463_v63  ;;  %1285 = vmatmul.f32.gmra.mxu0 %v395_v0  ;;  %3882 = vmatmul.f32.gmra.mxu1 %v2991_v31  ;;  %v2720_v0 = vadd.f32 %v9847_v37, %v9438_v28 }
 0x5b8   : > { %v4603_v10 = vpop.f32.mrf.mxu3  ;;  %v6429_v27 = vpop.f32.mrf.mxu2 }
 0x5b9   : > { %v10014_v18 = vadd.f32 %v4603_v10, %v2719_v40  ;;  %v7651_v55 = vadd.f32 %v6429_v27, %v5057_v59  ;;  %v3249_v10 = vld [vmem:[#allocation2 + $0xe78] sm:$0xff] }
 0x5ba   : > { %v5587_v27 = vld [vmem:[#allocation2 + $0x778] sm:$0xff] }
 0x5bb   : > { %8163 = vst [vmem:[%s9101_s18 + $0x4e8] sm:$0xff] %v7651_v55 }
 0x5bc   : > { %v1241_v51 = vpop.f32.mrf.mxu0  ;;  %v3838_v19 = vpop.f32.mrf.mxu1 }
 0x5bd   : > { %v2464_v5 = vadd.f32 %v9847_v37, %v1241_v51  ;;  %4653 = vmatmul.f32.gmra.mxu3 %v3248_v11  ;;  %6479 = vmatmul.f32.gmra.mxu2 %v5586_v23  ;;  %v397_v51 = vld [vmem:[#allocation2 + $0x578] sm:$0xff]  ;;  %v10023_v11 = vld [vmem:[#allocation7] ss:$0 sm:$0xff] }
 0x5be   : > { %v2993_v37 = vld [vmem:[#allocation2 + $0x678] sm:$0xff] }
 0x5bf   : > { %v5058_v63 = vadd.f32 %v3838_v19, %v2464_v5  ;;  %1288 = vmatmul.f32.gmra.mxu0 %v396_v29  ;;  %3885 = vmatmul.f32.gmra.mxu1 %v2992_v62  ;;  %v2721_v29 = vadd.f32 %v10023_v11, %v9442_v61  ;;  %v2994_v61 = vld [vmem:[#allocation2 + $0x680] sm:$0xff] }
 0x5c0   : > { %v4606_v15 = vpop.f32.mrf.mxu3  ;;  %v6432_v31 = vpop.f32.mrf.mxu2 }
 0x5c1   : > { %v10020_v40 = vadd.f32 %v4606_v15, %v2720_v0  ;;  %v7652_v59 = vadd.f32 %v6432_v31, %v5058_v63  ;;  %v3250_v15 = vld [vmem:[#allocation2 + $0xe80] sm:$0xff] }
 0x5c2   : > { %v5588_v31 = vld [vmem:[#allocation2 + $0x780] sm:$0xff] }
 0x5c3   : > { %8164 = vst [vmem:[%s9101_s18 + $0x4f0] sm:$0xff] %v7652_v59 }
 0x5c4   : > { %v1244_v55 = vpop.f32.mrf.mxu0  ;;  %v3841_v28 = vpop.f32.mrf.mxu1 }
 0x5c5   : > { %v2465_v23 = vadd.f32 %v10023_v11, %v1244_v55  ;;  %4656 = vmatmul.f32.gmra.mxu3 %v3249_v10  ;;  %6482 = vmatmul.f32.gmra.mxu2 %v5587_v27  ;;  %v398_v55 = vld [vmem:[#allocation2 + $0x580] sm:$0xff] }
 0x5c7   : > { %v5059_v5 = vadd.f32 %v3841_v28, %v2465_v23  ;;  %1291 = vmatmul.f32.gmra.mxu0 %v397_v51  ;;  %3888 = vmatmul.f32.gmra.mxu1 %v2993_v37  ;;  %v2722_v51 = vadd.f32 %v10023_v11, %v9446_v60  ;;  %v2995_v60 = vld [vmem:[#allocation2 + $0x688] sm:$0xff] }
 0x5c8   : > { %v4609_v19 = vpop.f32.mrf.mxu3  ;;  %v6435_v62 = vpop.f32.mrf.mxu2 }
 0x5c9   : > { %v10028_v0 = vadd.f32 %v4609_v19, %v2721_v29  ;;  %v7653_v63 = vadd.f32 %v6435_v62, %v5059_v5  ;;  %v3251_v19 = vld [vmem:[#allocation2 + $0xe88] sm:$0xff] }
 0x5ca   : > { %v5589_v62 = vld [vmem:[#allocation2 + $0x788] sm:$0xff] }
 0x5cb   : > { %8165 = vst [vmem:[%s9101_s18 + $0x4f8] sm:$0xff] %v7653_v63 }
 0x5cc   : > { %v1247_v59 = vpop.f32.mrf.mxu0  ;;  %v3844_v27 = vpop.f32.mrf.mxu1 }
 0x5cd   : > { %v2466_v10 = vadd.f32 %v10023_v11, %v1247_v59  ;;  %4659 = vmatmul.f32.gmra.mxu3 %v3250_v15  ;;  %6485 = vmatmul.f32.gmra.mxu2 %v5588_v31  ;;  %v399_v59 = vld [vmem:[#allocation2 + $0x588] sm:$0xff] }
 0x5cf   : > { %v5060_v23 = vadd.f32 %v3844_v27, %v2466_v10  ;;  %1294 = vmatmul.f32.gmra.mxu0 %v398_v55  ;;  %3891 = vmatmul.f32.gmra.mxu1 %v2994_v61  ;;  %v2723_v55 = vadd.f32 %v10023_v11, %v9450_v57  ;;  %v2996_v57 = vld [vmem:[#allocation2 + $0x690] sm:$0xff] }
 0x5d0   : > { %v4612_v28 = vpop.f32.mrf.mxu3  ;;  %v6438_v37 = vpop.f32.mrf.mxu2 }
 0x5d1   : > { %v10034_v29 = vadd.f32 %v4612_v28, %v2722_v51  ;;  %v7654_v5 = vadd.f32 %v6438_v37, %v5060_v23  ;;  %v3252_v28 = vld [vmem:[#allocation2 + $0xe90] sm:$0xff] }
 0x5d2   : > { %v5590_v37 = vld [vmem:[#allocation2 + $0x790] sm:$0xff] }
 0x5d3   : > { %8166 = vst [vmem:[%s9101_s18 + $0x500] sm:$0xff] %v7654_v5 }
 0x5d4   : > { %v1250_v63 = vpop.f32.mrf.mxu0  ;;  %v3847_v31 = vpop.f32.mrf.mxu1 }
 0x5d5   : > { %v2467_v15 = vadd.f32 %v10023_v11, %v1250_v63  ;;  %4662 = vmatmul.f32.gmra.mxu3 %v3251_v19  ;;  %6488 = vmatmul.f32.gmra.mxu2 %v5589_v62  ;;  %v400_v63 = vld [vmem:[#allocation2 + $0x590] sm:$0xff] }
 0x5d7   : > { %v5061_v10 = vadd.f32 %v3847_v31, %v2467_v15  ;;  %1297 = vmatmul.f32.gmra.mxu0 %v399_v59  ;;  %3894 = vmatmul.f32.gmra.mxu1 %v2995_v60  ;;  %v2724_v59 = vadd.f32 %v10023_v11, %v9456_v13  ;;  %v2997_v13 = vld [vmem:[#allocation2 + $0x698] sm:$0xff] }
 0x5d8   : > { %v4615_v27 = vpop.f32.mrf.mxu3  ;;  %v6441_v61 = vpop.f32.mrf.mxu2 }
 0x5d9   : > { %v10040_v51 = vadd.f32 %v4615_v27, %v2723_v55  ;;  %v7655_v23 = vadd.f32 %v6441_v61, %v5061_v10  ;;  %v3253_v27 = vld [vmem:[#allocation2 + $0xe98] sm:$0xff] }
 0x5da   : > { %v5591_v61 = vld [vmem:[#allocation2 + $0x798] sm:$0xff] }
 0x5db   : > { %8167 = vst [vmem:[%s9101_s18 + $0x508] sm:$0xff] %v7655_v23 }
 0x5dc   : > { %v1253_v5 = vpop.f32.mrf.mxu0  ;;  %v3850_v62 = vpop.f32.mrf.mxu1 }
 0x5dd   : > { %v2468_v19 = vadd.f32 %v10023_v11, %v1253_v5  ;;  %4665 = vmatmul.f32.gmra.mxu3 %v3252_v28  ;;  %6491 = vmatmul.f32.gmra.mxu2 %v5590_v37  ;;  %v401_v5 = vld [vmem:[#allocation2 + $0x598] sm:$0xff] }
 0x5df   : > { %v5062_v15 = vadd.f32 %v3850_v62, %v2468_v19  ;;  %1300 = vmatmul.f32.gmra.mxu0 %v400_v63  ;;  %3897 = vmatmul.f32.gmra.mxu1 %v2996_v57  ;;  %v2725_v63 = vadd.f32 %v10023_v11, %v9460_v6  ;;  %v2998_v6 = vld [vmem:[#allocation2 + $0x6a0] sm:$0xff] }
 0x5e0   : > { %v4618_v31 = vpop.f32.mrf.mxu3  ;;  %v6444_v60 = vpop.f32.mrf.mxu2 }
 0x5e1   : > { %v10046_v55 = vadd.f32 %v4618_v31, %v2724_v59  ;;  %v7656_v10 = vadd.f32 %v6444_v60, %v5062_v15  ;;  %v3254_v31 = vld [vmem:[#allocation2 + $0xea0] sm:$0xff] }
 0x5e2   : > { %v5592_v60 = vld [vmem:[#allocation2 + $0x7a0] sm:$0xff] }
 0x5e3   : > { %8168 = vst [vmem:[%s9101_s18 + $0x510] sm:$0xff] %v7656_v10 }
 0x5e4   : > { %v1256_v23 = vpop.f32.mrf.mxu0  ;;  %v3853_v37 = vpop.f32.mrf.mxu1 }
 0x5e5   : > { %v2469_v28 = vadd.f32 %v10023_v11, %v1256_v23  ;;  %4668 = vmatmul.f32.gmra.mxu3 %v3253_v27  ;;  %6494 = vmatmul.f32.gmra.mxu2 %v5591_v61  ;;  %v402_v23 = vld [vmem:[#allocation2 + $0x5a0] sm:$0xff] }
 0x5e7   : > { %v5063_v19 = vadd.f32 %v3853_v37, %v2469_v28  ;;  %1303 = vmatmul.f32.gmra.mxu0 %v401_v5  ;;  %3900 = vmatmul.f32.gmra.mxu1 %v2997_v13  ;;  %v2726_v5 = vadd.f32 %v10023_v11, %v9464_v3  ;;  %v2999_v3 = vld [vmem:[#allocation2 + $0x6a8] sm:$0xff] }
 0x5e8   : > { %v4621_v62 = vpop.f32.mrf.mxu3  ;;  %v6447_v57 = vpop.f32.mrf.mxu2 }
 0x5e9   : > { %v10052_v59 = vadd.f32 %v4621_v62, %v2725_v63  ;;  %v7657_v15 = vadd.f32 %v6447_v57, %v5063_v19  ;;  %v3255_v62 = vld [vmem:[#allocation2 + $0xea8] sm:$0xff] }
 0x5ea   : > { %v5593_v57 = vld [vmem:[#allocation2 + $0x7a8] sm:$0xff] }
 0x5eb   : > { %8169 = vst [vmem:[%s9101_s18 + $0x518] sm:$0xff] %v7657_v15 }
 0x5ec   : > { %v1259_v10 = vpop.f32.mrf.mxu0  ;;  %v3856_v61 = vpop.f32.mrf.mxu1 }
 0x5ed   : > { %v2470_v27 = vadd.f32 %v10023_v11, %v1259_v10  ;;  %4671 = vmatmul.f32.gmra.mxu3 %v3254_v31  ;;  %6497 = vmatmul.f32.gmra.mxu2 %v5592_v60  ;;  %v403_v10 = vld [vmem:[#allocation2 + $0x5a8] sm:$0xff] }
 0x5ef   : > { %v5064_v28 = vadd.f32 %v3856_v61, %v2470_v27  ;;  %1306 = vmatmul.f32.gmra.mxu0 %v402_v23  ;;  %3903 = vmatmul.f32.gmra.mxu1 %v2998_v6  ;;  %v2727_v23 = vadd.f32 %v10023_v11, %v9468_v56  ;;  %v3000_v56 = vld [vmem:[#allocation2 + $0x6b0] sm:$0xff] }
 0x5f0   : > { %v4624_v37 = vpop.f32.mrf.mxu3  ;;  %v6450_v13 = vpop.f32.mrf.mxu2 }
 0x5f1   : > { %v10058_v63 = vadd.f32 %v4624_v37, %v2726_v5  ;;  %v7658_v19 = vadd.f32 %v6450_v13, %v5064_v28  ;;  %v3256_v37 = vld [vmem:[#allocation2 + $0xeb0] sm:$0xff] }
 0x5f2   : > { %v5594_v13 = vld [vmem:[#allocation2 + $0x7b0] sm:$0xff] }
 0x5f3   : > { %8170 = vst [vmem:[%s9101_s18 + $0x520] sm:$0xff] %v7658_v19 }
 0x5f4   : > { %v1262_v15 = vpop.f32.mrf.mxu0  ;;  %v3859_v60 = vpop.f32.mrf.mxu1 }
 0x5f5   : > { %v2471_v31 = vadd.f32 %v10023_v11, %v1262_v15  ;;  %4674 = vmatmul.f32.gmra.mxu3 %v3255_v62  ;;  %6500 = vmatmul.f32.gmra.mxu2 %v5593_v57  ;;  %v404_v15 = vld [vmem:[#allocation2 + $0x5b0] sm:$0xff] }
 0x5f7   : > { %v5065_v27 = vadd.f32 %v3859_v60, %v2471_v31  ;;  %1309 = vmatmul.f32.gmra.mxu0 %v403_v10  ;;  %3906 = vmatmul.f32.gmra.mxu1 %v2999_v3  ;;  %v2728_v10 = vadd.f32 %v10023_v11, %v9472_v22  ;;  %v3001_v22 = vld [vmem:[#allocation2 + $0x6b8] sm:$0xff] }
 0x5f8   : > { %v4627_v61 = vpop.f32.mrf.mxu3  ;;  %v6453_v6 = vpop.f32.mrf.mxu2 }
 0x5f9   : > { %v10064_v5 = vadd.f32 %v4627_v61, %v2727_v23  ;;  %v7659_v28 = vadd.f32 %v6453_v6, %v5065_v27  ;;  %v3257_v61 = vld [vmem:[#allocation2 + $0xeb8] sm:$0xff] }
 0x5fa   : > { %v5595_v6 = vld [vmem:[#allocation2 + $0x7b8] sm:$0xff] }
 0x5fb   : > { %8171 = vst [vmem:[%s9101_s18 + $0x528] sm:$0xff] %v7659_v28 }
 0x5fc   : > { %v1265_v19 = vpop.f32.mrf.mxu0  ;;  %v3862_v57 = vpop.f32.mrf.mxu1 }
 0x5fd   : > { %v2472_v62 = vadd.f32 %v10023_v11, %v1265_v19  ;;  %4677 = vmatmul.f32.gmra.mxu3 %v3256_v37  ;;  %6503 = vmatmul.f32.gmra.mxu2 %v5594_v13  ;;  %v405_v19 = vld [vmem:[#allocation2 + $0x5b8] sm:$0xff] }
 0x5ff   : > { %v5066_v31 = vadd.f32 %v3862_v57, %v2472_v62  ;;  %1312 = vmatmul.f32.gmra.mxu0 %v404_v15  ;;  %3909 = vmatmul.f32.gmra.mxu1 %v3000_v56  ;;  %v2729_v15 = vadd.f32 %v10023_v11, %v9476_v46  ;;  %v3002_v46 = vld [vmem:[#allocation2 + $0x6c0] sm:$0xff] }
 0x600   : > { %v4630_v60 = vpop.f32.mrf.mxu3  ;;  %v6456_v3 = vpop.f32.mrf.mxu2 }
 0x601   : > { %v10070_v23 = vadd.f32 %v4630_v60, %v2728_v10  ;;  %v7660_v27 = vadd.f32 %v6456_v3, %v5066_v31  ;;  %v3258_v60 = vld [vmem:[#allocation2 + $0xec0] sm:$0xff] }
 0x602   : > { %v5596_v3 = vld [vmem:[#allocation2 + $0x7c0] sm:$0xff] }
 0x603   : > { %8172 = vst [vmem:[%s9101_s18 + $0x530] sm:$0xff] %v7660_v27 }
 0x604   : > { %v1268_v28 = vpop.f32.mrf.mxu0  ;;  %v3865_v13 = vpop.f32.mrf.mxu1 }
 0x605   : > { %v2473_v37 = vadd.f32 %v10023_v11, %v1268_v28  ;;  %4680 = vmatmul.f32.gmra.mxu3 %v3257_v61  ;;  %6506 = vmatmul.f32.gmra.mxu2 %v5595_v6  ;;  %v406_v28 = vld [vmem:[#allocation2 + $0x5c0] sm:$0xff] }
 0x607   : > { %v5067_v62 = vadd.f32 %v3865_v13, %v2473_v37  ;;  %1315 = vmatmul.f32.gmra.mxu0 %v405_v19  ;;  %3912 = vmatmul.f32.gmra.mxu1 %v3001_v22  ;;  %v2730_v19 = vadd.f32 %v10023_v11, %v9480_v21  ;;  %v3003_v21 = vld [vmem:[#allocation2 + $0x6c8] sm:$0xff] }
 0x608   : > { %v4633_v57 = vpop.f32.mrf.mxu3  ;;  %v6459_v56 = vpop.f32.mrf.mxu2 }
 0x609   : > { %v10076_v10 = vadd.f32 %v4633_v57, %v2729_v15  ;;  %v7661_v31 = vadd.f32 %v6459_v56, %v5067_v62  ;;  %v3259_v57 = vld [vmem:[#allocation2 + $0xec8] sm:$0xff] }
 0x60a   : > { %v5597_v56 = vld [vmem:[#allocation2 + $0x7c8] sm:$0xff] }
 0x60b   : > { %8173 = vst [vmem:[%s9101_s18 + $0x538] sm:$0xff] %v7661_v31 }
 0x60c   : > { %v1271_v27 = vpop.f32.mrf.mxu0  ;;  %v3868_v6 = vpop.f32.mrf.mxu1 }
 0x60d   : > { %v2474_v61 = vadd.f32 %v10023_v11, %v1271_v27  ;;  %4683 = vmatmul.f32.gmra.mxu3 %v3258_v60  ;;  %6509 = vmatmul.f32.gmra.mxu2 %v5596_v3  ;;  %v407_v27 = vld [vmem:[#allocation2 + $0x5c8] sm:$0xff] }
 0x60f   : > { %v5068_v37 = vadd.f32 %v3868_v6, %v2474_v61  ;;  %1318 = vmatmul.f32.gmra.mxu0 %v406_v28  ;;  %3915 = vmatmul.f32.gmra.mxu1 %v3002_v46  ;;  %v2731_v28 = vadd.f32 %v10023_v11, %v9484_v42  ;;  %v3004_v42 = vld [vmem:[#allocation2 + $0x6d0] sm:$0xff] }
 0x610   : > { %v4636_v13 = vpop.f32.mrf.mxu3  ;;  %v6462_v22 = vpop.f32.mrf.mxu2 }
 0x611   : > { %v10082_v15 = vadd.f32 %v4636_v13, %v2730_v19  ;;  %v7662_v62 = vadd.f32 %v6462_v22, %v5068_v37  ;;  %v3260_v13 = vld [vmem:[#allocation2 + $0xed0] sm:$0xff] }
 0x612   : > { %v5598_v22 = vld [vmem:[#allocation2 + $0x7d0] sm:$0xff] }
 0x613   : > { %8174 = vst [vmem:[%s9101_s18 + $0x540] sm:$0xff] %v7662_v62 }
 0x614   : > { %v1274_v31 = vpop.f32.mrf.mxu0  ;;  %v3871_v3 = vpop.f32.mrf.mxu1 }
 0x615   : > { %v2475_v60 = vadd.f32 %v10023_v11, %v1274_v31  ;;  %4686 = vmatmul.f32.gmra.mxu3 %v3259_v57  ;;  %6512 = vmatmul.f32.gmra.mxu2 %v5597_v56  ;;  %v408_v31 = vld [vmem:[#allocation2 + $0x5d0] sm:$0xff] }
 0x617   : > { %v5069_v61 = vadd.f32 %v3871_v3, %v2475_v60  ;;  %1321 = vmatmul.f32.gmra.mxu0 %v407_v27  ;;  %3918 = vmatmul.f32.gmra.mxu1 %v3003_v21  ;;  %v2732_v27 = vadd.f32 %v10023_v11, %v9488_v16  ;;  %v3005_v16 = vld [vmem:[#allocation2 + $0x6d8] sm:$0xff] }
 0x618   : > { %v4639_v6 = vpop.f32.mrf.mxu3  ;;  %v6465_v46 = vpop.f32.mrf.mxu2 }
 0x619   : > { %v10088_v19 = vadd.f32 %v4639_v6, %v2731_v28  ;;  %v7663_v37 = vadd.f32 %v6465_v46, %v5069_v61  ;;  %v3261_v6 = vld [vmem:[#allocation2 + $0xed8] sm:$0xff] }
 0x61a   : > { %v5599_v46 = vld [vmem:[#allocation2 + $0x7d8] sm:$0xff] }
 0x61b   : > { %8175 = vst [vmem:[%s9101_s18 + $0x548] sm:$0xff] %v7663_v37 }
 0x61c   : > { %v1277_v62 = vpop.f32.mrf.mxu0  ;;  %v3874_v56 = vpop.f32.mrf.mxu1 }
 0x61d   : > { %v2476_v57 = vadd.f32 %v10023_v11, %v1277_v62  ;;  %4689 = vmatmul.f32.gmra.mxu3 %v3260_v13  ;;  %6515 = vmatmul.f32.gmra.mxu2 %v5598_v22  ;;  %v409_v62 = vld [vmem:[#allocation2 + $0x5d8] sm:$0xff] }
 0x61f   : > { %v5070_v60 = vadd.f32 %v3874_v56, %v2476_v57  ;;  %1324 = vmatmul.f32.gmra.mxu0 %v408_v31  ;;  %3921 = vmatmul.f32.gmra.mxu1 %v3004_v42  ;;  %v2733_v31 = vadd.f32 %v10023_v11, %v9492_v43  ;;  %v3006_v43 = vld [vmem:[#allocation2 + $0x6e0] sm:$0xff] }
 0x620   : > { %v4642_v3 = vpop.f32.mrf.mxu3  ;;  %v6468_v21 = vpop.f32.mrf.mxu2 }
 0x621   : > { %v10094_v28 = vadd.f32 %v4642_v3, %v2732_v27  ;;  %v7664_v61 = vadd.f32 %v6468_v21, %v5070_v60  ;;  %v3262_v3 = vld [vmem:[#allocation2 + $0xee0] sm:$0xff] }
 0x622   : > { %v5600_v21 = vld [vmem:[#allocation2 + $0x7e0] sm:$0xff] }
 0x623   : > { %8176 = vst [vmem:[%s9101_s18 + $0x550] sm:$0xff] %v7664_v61 }
 0x624   : > { %v1280_v37 = vpop.f32.mrf.mxu0  ;;  %v3877_v22 = vpop.f32.mrf.mxu1 }
 0x625   : > { %v2477_v13 = vadd.f32 %v10023_v11, %v1280_v37  ;;  %4692 = vmatmul.f32.gmra.mxu3 %v3261_v6  ;;  %6518 = vmatmul.f32.gmra.mxu2 %v5599_v46  ;;  %v410_v37 = vld [vmem:[#allocation2 + $0x5e0] sm:$0xff] }
 0x627   : > { %v5071_v57 = vadd.f32 %v3877_v22, %v2477_v13  ;;  %1327 = vmatmul.f32.gmra.mxu0 %v409_v62  ;;  %3924 = vmatmul.f32.gmra.mxu1 %v3005_v16  ;;  %v2734_v62 = vadd.f32 %v10023_v11, %v9496_v20  ;;  %v3007_v20 = vld [vmem:[#allocation2 + $0x6e8] sm:$0xff] }
 0x628   : > { %v4645_v56 = vpop.f32.mrf.mxu3  ;;  %v6471_v42 = vpop.f32.mrf.mxu2 }
 0x629   : > { %v10100_v27 = vadd.f32 %v4645_v56, %v2733_v31  ;;  %v7665_v60 = vadd.f32 %v6471_v42, %v5071_v57  ;;  %v3263_v56 = vld [vmem:[#allocation2 + $0xee8] sm:$0xff] }
 0x62a   : > { %v5601_v42 = vld [vmem:[#allocation2 + $0x7e8] sm:$0xff] }
 0x62b   : > { %8177 = vst [vmem:[%s9101_s18 + $0x558] sm:$0xff] %v7665_v60 }
 0x62c   : > { %v1283_v61 = vpop.f32.mrf.mxu0  ;;  %v3880_v46 = vpop.f32.mrf.mxu1 }
 0x62d   : > { %v2478_v6 = vadd.f32 %v10023_v11, %v1283_v61  ;;  %4695 = vmatmul.f32.gmra.mxu3 %v3262_v3  ;;  %6521 = vmatmul.f32.gmra.mxu2 %v5600_v21  ;;  %v411_v61 = vld [vmem:[#allocation2 + $0x5e8] sm:$0xff] }
 0x62f   : > { %v5072_v13 = vadd.f32 %v3880_v46, %v2478_v6  ;;  %1330 = vmatmul.f32.gmra.mxu0 %v410_v37  ;;  %3927 = vmatmul.f32.gmra.mxu1 %v3006_v43  ;;  %v2735_v37 = vadd.f32 %v10023_v11, %v9500_v54  ;;  %v3008_v54 = vld [vmem:[#allocation2 + $0x6f0] sm:$0xff] }
 0x630   : > { %v4648_v22 = vpop.f32.mrf.mxu3  ;;  %v6474_v16 = vpop.f32.mrf.mxu2 }
 0x631   : > { %v10106_v31 = vadd.f32 %v4648_v22, %v2734_v62  ;;  %v7666_v57 = vadd.f32 %v6474_v16, %v5072_v13  ;;  %v3264_v22 = vld [vmem:[#allocation2 + $0xef0] sm:$0xff] }
 0x632   : > { %v5602_v16 = vld [vmem:[#allocation2 + $0x7f0] sm:$0xff] }
 0x633   : > { %8178 = vst [vmem:[%s9101_s18 + $0x560] sm:$0xff] %v7666_v57 }
 0x634   : > { %v1286_v60 = vpop.f32.mrf.mxu0  ;;  %v3883_v21 = vpop.f32.mrf.mxu1 }
 0x635   : > { %v2479_v3 = vadd.f32 %v10023_v11, %v1286_v60  ;;  %4698 = vmatmul.f32.gmra.mxu3 %v3263_v56  ;;  %6524 = vmatmul.f32.gmra.mxu2 %v5601_v42  ;;  %v412_v60 = vld [vmem:[#allocation2 + $0x5f0] sm:$0xff] }
 0x637   : > { %v5073_v6 = vadd.f32 %v3883_v21, %v2479_v3  ;;  %1333 = vmatmul.f32.gmra.mxu0 %v411_v61  ;;  %3930 = vmatmul.f32.gmra.mxu1 %v3007_v20  ;;  %v2736_v61 = vadd.f32 %v10023_v11, %v9504_v25  ;;  %v3009_v25 = vld [vmem:[#allocation2 + $0x6f8] sm:$0xff] }
 0x638   : > { %v4651_v46 = vpop.f32.mrf.mxu3  ;;  %v6477_v43 = vpop.f32.mrf.mxu2 }
 0x639   : > { %v10112_v62 = vadd.f32 %v4651_v46, %v2735_v37  ;;  %v7667_v13 = vadd.f32 %v6477_v43, %v5073_v6  ;;  %v3265_v46 = vld [vmem:[#allocation2 + $0xef8] sm:$0xff] }
 0x63a   : > { %v5603_v43 = vld [vmem:[#allocation2 + $0x7f8] sm:$0xff] }
 0x63b   : > { %8179 = vst [vmem:[%s9101_s18 + $0x568] sm:$0xff] %v7667_v13 }
 0x63c   : > { %v1289_v57 = vpop.f32.mrf.mxu0  ;;  %v3886_v42 = vpop.f32.mrf.mxu1 }
 0x63d   : > { %v2480_v56 = vadd.f32 %v10023_v11, %v1289_v57  ;;  %4701 = vmatmul.f32.gmra.mxu3 %v3264_v22  ;;  %6527 = vmatmul.f32.gmra.mxu2 %v5602_v16  ;;  %v413_v57 = vld [vmem:[#allocation2 + $0x5f8] sm:$0xff] }
 0x63f   : > { %v5074_v3 = vadd.f32 %v3886_v42, %v2480_v56  ;;  %1336 = vmatmul.f32.gmra.mxu0 %v412_v60  ;;  %3933 = vmatmul.f32.gmra.mxu1 %v3008_v54  ;;  %v11262_v56 = vld [vmem:[#allocation20_spill] sm:$0xff] }
 0x640   : > { %v4654_v21 = vpop.f32.mrf.mxu3  ;;  %v6480_v20 = vpop.f32.mrf.mxu2  ;;  %v2737_v60 = vadd.f32 %v10023_v11, %v11262_v56  ;;  %v3010_v56 = vld [vmem:[#allocation2 + $0x700] sm:$0xff] }
 0x641   : > { %v10118_v37 = vadd.f32 %v4654_v21, %v2736_v61  ;;  %v7668_v6 = vadd.f32 %v6480_v20, %v5074_v3  ;;  %v3266_v20 = vld [vmem:[#allocation2 + $0xf00] sm:$0xff] }
 0x643   : > { %11261 = vst [vmem:[#allocation101_spill] sm:$0xff] %v10118_v37 }
 0x644   : > { %8180 = vst [vmem:[%s9101_s18 + $0x570] sm:$0xff] %v7668_v6  ;;  %v1292_v13 = vpop.f32.mrf.mxu0  ;;  %v3889_v16 = vpop.f32.mrf.mxu1  ;;  %v5604_v6 = vld [vmem:[#allocation2 + $0x800] sm:$0xff] }
 0x645   : > { %v2481_v22 = vadd.f32 %v10023_v11, %v1292_v13  ;;  %4704 = vmatmul.f32.gmra.mxu3 %v3265_v46  ;;  %6530 = vmatmul.f32.gmra.mxu2 %v5603_v43  ;;  %v414_v13 = vld [vmem:[#allocation2 + $0x600] sm:$0xff] }
 0x647   : > { %v5075_v42 = vadd.f32 %v3889_v16, %v2481_v22  ;;  %1339 = vmatmul.f32.gmra.mxu0 %v413_v57  ;;  %3936 = vmatmul.f32.gmra.mxu1 %v3009_v25  ;;  %v11264_v22 = vld [vmem:[#allocation21_spill] sm:$0xff] }
 0x648   : > { %v4657_v54 = vpop.f32.mrf.mxu3  ;;  %v6483_v61 = vpop.f32.mrf.mxu2  ;;  %v2738_v57 = vadd.f32 %v10023_v11, %v11264_v22  ;;  %v3011_v22 = vld [vmem:[#allocation2 + $0x708] sm:$0xff] }
 0x649   : > { %v10124_v3 = vadd.f32 %v4657_v54, %v2737_v60  ;;  %v7669_v21 = vadd.f32 %v6483_v61, %v5075_v42  ;;  %v3267_v61 = vld [vmem:[#allocation2 + $0xf08] sm:$0xff] }
 0x64b   : > { %11263 = vst [vmem:[#allocation20_spill] sm:$0xff] %v10124_v3 }
 0x64c   : > { %8181 = vst [vmem:[%s9101_s18 + $0x578] sm:$0xff] %v7669_v21  ;;  %v1295_v37 = vpop.f32.mrf.mxu0  ;;  %v3892_v43 = vpop.f32.mrf.mxu1  ;;  %v5605_v21 = vld [vmem:[#allocation2 + $0x808] sm:$0xff] }
 0x64d   : > { %v2482_v46 = vadd.f32 %v10023_v11, %v1295_v37  ;;  %4707 = vmatmul.f32.gmra.mxu3 %v3266_v20  ;;  %6533 = vmatmul.f32.gmra.mxu2 %v5604_v6  ;;  %v415_v37 = vld [vmem:[#allocation2 + $0x608] sm:$0xff] }
 0x64f   : > { %v5076_v16 = vadd.f32 %v3892_v43, %v2482_v46  ;;  %1342 = vmatmul.f32.gmra.mxu0 %v414_v13  ;;  %3939 = vmatmul.f32.gmra.mxu1 %v3010_v56  ;;  %v11266_v46 = vld [vmem:[#allocation22_spill] sm:$0xff] }
 0x650   : > { %v4660_v25 = vpop.f32.mrf.mxu3  ;;  %v6486_v60 = vpop.f32.mrf.mxu2  ;;  %v2739_v13 = vadd.f32 %v10023_v11, %v11266_v46  ;;  %v3012_v46 = vld [vmem:[#allocation2 + $0x710] sm:$0xff] }
 0x651   : > { %v10130_v42 = vadd.f32 %v4660_v25, %v2738_v57  ;;  %v7670_v54 = vadd.f32 %v6486_v60, %v5076_v16  ;;  %v3268_v60 = vld [vmem:[#allocation2 + $0xf10] sm:$0xff] }
 0x653   : > { %11265 = vst [vmem:[#allocation21_spill] sm:$0xff] %v10130_v42 }
 0x654   : > { %8182 = vst [vmem:[%s9101_s18 + $0x580] sm:$0xff] %v7670_v54  ;;  %v1298_v3 = vpop.f32.mrf.mxu0  ;;  %v3895_v6 = vpop.f32.mrf.mxu1  ;;  %v5606_v54 = vld [vmem:[#allocation2 + $0x810] sm:$0xff] }
 0x655   : > { %v2483_v20 = vadd.f32 %v10023_v11, %v1298_v3  ;;  %4710 = vmatmul.f32.gmra.mxu3 %v3267_v61  ;;  %6536 = vmatmul.f32.gmra.mxu2 %v5605_v21  ;;  %v416_v3 = vld [vmem:[#allocation2 + $0x610] sm:$0xff] }
 0x657   : > { %v5077_v43 = vadd.f32 %v3895_v6, %v2483_v20  ;;  %1345 = vmatmul.f32.gmra.mxu0 %v415_v37  ;;  %3942 = vmatmul.f32.gmra.mxu1 %v3011_v22  ;;  %v11268_v20 = vld [vmem:[#allocation23_spill] sm:$0xff] }
 0x658   : > { %v4663_v56 = vpop.f32.mrf.mxu3  ;;  %v6489_v57 = vpop.f32.mrf.mxu2  ;;  %v2740_v37 = vadd.f32 %v10023_v11, %v11268_v20  ;;  %v3013_v20 = vld [vmem:[#allocation2 + $0x718] sm:$0xff] }
 0x659   : > { %v10136_v16 = vadd.f32 %v4663_v56, %v2739_v13  ;;  %v7671_v25 = vadd.f32 %v6489_v57, %v5077_v43  ;;  %v3269_v57 = vld [vmem:[#allocation2 + $0xf18] sm:$0xff] }
 0x65b   : > { %11267 = vst [vmem:[#allocation22_spill] sm:$0xff] %v10136_v16 }
 0x65c   : > { %8183 = vst [vmem:[%s9101_s18 + $0x588] sm:$0xff] %v7671_v25  ;;  %v1301_v42 = vpop.f32.mrf.mxu0  ;;  %v3898_v21 = vpop.f32.mrf.mxu1  ;;  %v5607_v25 = vld [vmem:[#allocation2 + $0x818] sm:$0xff] }
 0x65d   : > { %v2484_v61 = vadd.f32 %v10023_v11, %v1301_v42  ;;  %4713 = vmatmul.f32.gmra.mxu3 %v3268_v60  ;;  %6539 = vmatmul.f32.gmra.mxu2 %v5606_v54  ;;  %v417_v42 = vld [vmem:[#allocation2 + $0x618] sm:$0xff] }
 0x65f   : > { %v5078_v6 = vadd.f32 %v3898_v21, %v2484_v61  ;;  %1348 = vmatmul.f32.gmra.mxu0 %v416_v3  ;;  %3945 = vmatmul.f32.gmra.mxu1 %v3012_v46  ;;  %v11270_v61 = vld [vmem:[#allocation24_spill] sm:$0xff] }
 0x660   : > { %v4666_v22 = vpop.f32.mrf.mxu3  ;;  %v6492_v13 = vpop.f32.mrf.mxu2  ;;  %v2741_v3 = vadd.f32 %v10023_v11, %v11270_v61  ;;  %v3014_v61 = vld [vmem:[#allocation2 + $0x720] sm:$0xff] }
 0x661   : > { %v10142_v43 = vadd.f32 %v4666_v22, %v2740_v37  ;;  %v7672_v56 = vadd.f32 %v6492_v13, %v5078_v6  ;;  %v3270_v13 = vld [vmem:[#allocation2 + $0xf20] sm:$0xff] }
 0x663   : > { %11269 = vst [vmem:[#allocation23_spill] sm:$0xff] %v10142_v43 }
 0x664   : > { %8184 = vst [vmem:[%s9101_s18 + $0x590] sm:$0xff] %v7672_v56  ;;  %v1304_v16 = vpop.f32.mrf.mxu0  ;;  %v3901_v54 = vpop.f32.mrf.mxu1  ;;  %v5608_v56 = vld [vmem:[#allocation2 + $0x820] sm:$0xff] }
 0x665   : > { %v2485_v60 = vadd.f32 %v10023_v11, %v1304_v16  ;;  %4716 = vmatmul.f32.gmra.mxu3 %v3269_v57  ;;  %6542 = vmatmul.f32.gmra.mxu2 %v5607_v25  ;;  %v418_v16 = vld [vmem:[#allocation2 + $0x620] sm:$0xff] }
 0x667   : > { %v5079_v21 = vadd.f32 %v3901_v54, %v2485_v60  ;;  %1351 = vmatmul.f32.gmra.mxu0 %v417_v42  ;;  %3948 = vmatmul.f32.gmra.mxu1 %v3013_v20  ;;  %v11272_v60 = vld [vmem:[#allocation25_spill] sm:$0xff] }
 0x668   : > { %v4669_v46 = vpop.f32.mrf.mxu3  ;;  %v6495_v37 = vpop.f32.mrf.mxu2  ;;  %v2742_v42 = vadd.f32 %v10023_v11, %v11272_v60  ;;  %v3015_v60 = vld [vmem:[#allocation2 + $0x728] sm:$0xff] }
 0x669   : > { %v10148_v6 = vadd.f32 %v4669_v46, %v2741_v3  ;;  %v7673_v22 = vadd.f32 %v6495_v37, %v5079_v21  ;;  %v3271_v37 = vld [vmem:[#allocation2 + $0xf28] sm:$0xff] }
 0x66b   : > { %11271 = vst [vmem:[#allocation24_spill] sm:$0xff] %v10148_v6 }
 0x66c   : > { %8185 = vst [vmem:[%s9101_s18 + $0x598] sm:$0xff] %v7673_v22  ;;  %v1307_v43 = vpop.f32.mrf.mxu0  ;;  %v3904_v25 = vpop.f32.mrf.mxu1  ;;  %v5609_v22 = vld [vmem:[#allocation2 + $0x828] sm:$0xff] }
 0x66d   : > { %v2486_v57 = vadd.f32 %v10023_v11, %v1307_v43  ;;  %4719 = vmatmul.f32.gmra.mxu3 %v3270_v13  ;;  %6545 = vmatmul.f32.gmra.mxu2 %v5608_v56  ;;  %v419_v43 = vld [vmem:[#allocation2 + $0x628] sm:$0xff] }
 0x66f   : > { %v5080_v54 = vadd.f32 %v3904_v25, %v2486_v57  ;;  %1354 = vmatmul.f32.gmra.mxu0 %v418_v16  ;;  %3951 = vmatmul.f32.gmra.mxu1 %v3014_v61  ;;  %v11274_v57 = vld [vmem:[#allocation26_spill] sm:$0xff] }
 0x670   : > { %v4672_v20 = vpop.f32.mrf.mxu3  ;;  %v6498_v3 = vpop.f32.mrf.mxu2  ;;  %v2743_v16 = vadd.f32 %v10023_v11, %v11274_v57  ;;  %v3016_v57 = vld [vmem:[#allocation2 + $0x730] sm:$0xff] }
 0x671   : > { %v10154_v21 = vadd.f32 %v4672_v20, %v2742_v42  ;;  %v7674_v46 = vadd.f32 %v6498_v3, %v5080_v54  ;;  %v3272_v3 = vld [vmem:[#allocation2 + $0xf30] sm:$0xff] }
 0x673   : > { %11273 = vst [vmem:[#allocation25_spill] sm:$0xff] %v10154_v21 }
 0x674   : > { %8186 = vst [vmem:[%s9101_s18 + $0x5a0] sm:$0xff] %v7674_v46  ;;  %v1310_v6 = vpop.f32.mrf.mxu0  ;;  %v3907_v56 = vpop.f32.mrf.mxu1  ;;  %v5610_v46 = vld [vmem:[#allocation2 + $0x830] sm:$0xff] }
 0x675   : > { %v2487_v13 = vadd.f32 %v10023_v11, %v1310_v6  ;;  %4722 = vmatmul.f32.gmra.mxu3 %v3271_v37  ;;  %6548 = vmatmul.f32.gmra.mxu2 %v5609_v22  ;;  %v420_v6 = vld [vmem:[#allocation2 + $0x630] sm:$0xff] }
 0x677   : > { %v5081_v25 = vadd.f32 %v3907_v56, %v2487_v13  ;;  %1357 = vmatmul.f32.gmra.mxu0 %v419_v43  ;;  %3954 = vmatmul.f32.gmra.mxu1 %v3015_v60  ;;  %v11276_v13 = vld [vmem:[#allocation27_spill] sm:$0xff] }
 0x678   : > { %v4675_v61 = vpop.f32.mrf.mxu3  ;;  %v6501_v42 = vpop.f32.mrf.mxu2  ;;  %v2744_v43 = vadd.f32 %v10023_v11, %v11276_v13  ;;  %v3017_v13 = vld [vmem:[#allocation2 + $0x738] sm:$0xff] }
 0x679   : > { %v10160_v54 = vadd.f32 %v4675_v61, %v2743_v16  ;;  %v7675_v20 = vadd.f32 %v6501_v42, %v5081_v25  ;;  %v3273_v42 = vld [vmem:[#allocation2 + $0xf38] sm:$0xff] }
 0x67b   : > { %11275 = vst [vmem:[#allocation26_spill] sm:$0xff] %v10160_v54 }
 0x67c   : > { %8187 = vst [vmem:[%s9101_s18 + $0x5a8] sm:$0xff] %v7675_v20  ;;  %v1313_v21 = vpop.f32.mrf.mxu0  ;;  %v3910_v22 = vpop.f32.mrf.mxu1  ;;  %v5611_v20 = vld [vmem:[#allocation2 + $0x838] sm:$0xff] }
 0x67d   : > { %v2488_v37 = vadd.f32 %v10023_v11, %v1313_v21  ;;  %4725 = vmatmul.f32.gmra.mxu3 %v3272_v3  ;;  %6551 = vmatmul.f32.gmra.mxu2 %v5610_v46  ;;  %v421_v21 = vld [vmem:[#allocation2 + $0x638] sm:$0xff] }
 0x67f   : > { %v5082_v56 = vadd.f32 %v3910_v22, %v2488_v37  ;;  %1360 = vmatmul.f32.gmra.mxu0 %v420_v6  ;;  %3957 = vmatmul.f32.gmra.mxu1 %v3016_v57  ;;  %v11278_v37 = vld [vmem:[#allocation28_spill] sm:$0xff] }
 0x680   : > { %v4678_v60 = vpop.f32.mrf.mxu3  ;;  %v6504_v16 = vpop.f32.mrf.mxu2  ;;  %v2745_v6 = vadd.f32 %v10023_v11, %v11278_v37  ;;  %v3018_v37 = vld [vmem:[#allocation2 + $0x740] sm:$0xff] }
 0x681   : > { %v10166_v25 = vadd.f32 %v4678_v60, %v2744_v43  ;;  %v7676_v61 = vadd.f32 %v6504_v16, %v5082_v56  ;;  %v3274_v16 = vld [vmem:[#allocation2 + $0xf40] sm:$0xff] }
 0x683   : > { %11277 = vst [vmem:[#allocation27_spill] sm:$0xff] %v10166_v25 }
 0x684   : > { %8188 = vst [vmem:[%s9101_s18 + $0x5b0] sm:$0xff] %v7676_v61  ;;  %v1316_v54 = vpop.f32.mrf.mxu0  ;;  %v3913_v46 = vpop.f32.mrf.mxu1  ;;  %v5612_v61 = vld [vmem:[#allocation2 + $0x840] sm:$0xff] }
 0x685   : > { %v2489_v3 = vadd.f32 %v10023_v11, %v1316_v54  ;;  %4728 = vmatmul.f32.gmra.mxu3 %v3273_v42  ;;  %6554 = vmatmul.f32.gmra.mxu2 %v5611_v20  ;;  %v422_v54 = vld [vmem:[#allocation2 + $0x640] sm:$0xff] }
 0x687   : > { %v5083_v22 = vadd.f32 %v3913_v46, %v2489_v3  ;;  %1363 = vmatmul.f32.gmra.mxu0 %v421_v21  ;;  %3960 = vmatmul.f32.gmra.mxu1 %v3017_v13  ;;  %v11280_v3 = vld [vmem:[#allocation29_spill] sm:$0xff] }
 0x688   : > { %v4681_v57 = vpop.f32.mrf.mxu3  ;;  %v6507_v43 = vpop.f32.mrf.mxu2  ;;  %v2746_v21 = vadd.f32 %v10023_v11, %v11280_v3  ;;  %v3019_v3 = vld [vmem:[#allocation2 + $0x748] sm:$0xff] }
 0x689   : > { %v10172_v56 = vadd.f32 %v4681_v57, %v2745_v6  ;;  %v7677_v60 = vadd.f32 %v6507_v43, %v5083_v22  ;;  %v3275_v43 = vld [vmem:[#allocation2 + $0xf48] sm:$0xff] }
 0x68b   : > { %11279 = vst [vmem:[#allocation28_spill] sm:$0xff] %v10172_v56 }
 0x68c   : > { %8189 = vst [vmem:[%s9101_s18 + $0x5b8] sm:$0xff] %v7677_v60  ;;  %v1319_v25 = vpop.f32.mrf.mxu0  ;;  %v3916_v20 = vpop.f32.mrf.mxu1  ;;  %v5613_v60 = vld [vmem:[#allocation2 + $0x848] sm:$0xff] }
 0x68d   : > { %v2490_v42 = vadd.f32 %v10023_v11, %v1319_v25  ;;  %4731 = vmatmul.f32.gmra.mxu3 %v3274_v16  ;;  %6557 = vmatmul.f32.gmra.mxu2 %v5612_v61  ;;  %v423_v25 = vld [vmem:[#allocation2 + $0x648] sm:$0xff] }
 0x68f   : > { %v5084_v46 = vadd.f32 %v3916_v20, %v2490_v42  ;;  %1366 = vmatmul.f32.gmra.mxu0 %v422_v54  ;;  %3963 = vmatmul.f32.gmra.mxu1 %v3018_v37  ;;  %v11282_v42 = vld [vmem:[#allocation30_spill] sm:$0xff] }
 0x690   : > { %v4684_v13 = vpop.f32.mrf.mxu3  ;;  %v6510_v6 = vpop.f32.mrf.mxu2  ;;  %v2747_v54 = vadd.f32 %v10023_v11, %v11282_v42  ;;  %v3020_v42 = vld [vmem:[#allocation2 + $0x750] sm:$0xff] }
 0x691   : > { %v10178_v22 = vadd.f32 %v4684_v13, %v2746_v21  ;;  %v7678_v57 = vadd.f32 %v6510_v6, %v5084_v46  ;;  %v3276_v6 = vld [vmem:[#allocation2 + $0xf50] sm:$0xff] }
 0x693   : > { %11281 = vst [vmem:[#allocation29_spill] sm:$0xff] %v10178_v22 }
 0x694   : > { %8190 = vst [vmem:[%s9101_s18 + $0x5c0] sm:$0xff] %v7678_v57  ;;  %v1322_v56 = vpop.f32.mrf.mxu0  ;;  %v3919_v61 = vpop.f32.mrf.mxu1  ;;  %v5614_v57 = vld [vmem:[#allocation2 + $0x850] sm:$0xff] }
 0x695   : > { %v2491_v16 = vadd.f32 %v10023_v11, %v1322_v56  ;;  %4734 = vmatmul.f32.gmra.mxu3 %v3275_v43  ;;  %6560 = vmatmul.f32.gmra.mxu2 %v5613_v60  ;;  %v424_v56 = vld [vmem:[#allocation2 + $0x650] sm:$0xff] }
 0x697   : > { %v5085_v20 = vadd.f32 %v3919_v61, %v2491_v16  ;;  %1369 = vmatmul.f32.gmra.mxu0 %v423_v25  ;;  %3966 = vmatmul.f32.gmra.mxu1 %v3019_v3  ;;  %v11284_v16 = vld [vmem:[#allocation31_spill] sm:$0xff] }
 0x698   : > { %v4687_v37 = vpop.f32.mrf.mxu3  ;;  %v6513_v21 = vpop.f32.mrf.mxu2  ;;  %v2748_v25 = vadd.f32 %v10023_v11, %v11284_v16  ;;  %v3021_v16 = vld [vmem:[#allocation2 + $0x758] sm:$0xff] }
 0x699   : > { %v10184_v46 = vadd.f32 %v4687_v37, %v2747_v54  ;;  %v7679_v13 = vadd.f32 %v6513_v21, %v5085_v20  ;;  %v3277_v21 = vld [vmem:[#allocation2 + $0xf58] sm:$0xff] }
 0x69b   : > { %11283 = vst [vmem:[#allocation30_spill] sm:$0xff] %v10184_v46 }
 0x69c   : > { %8191 = vst [vmem:[%s9101_s18 + $0x5c8] sm:$0xff] %v7679_v13  ;;  %v1325_v22 = vpop.f32.mrf.mxu0  ;;  %v3922_v60 = vpop.f32.mrf.mxu1  ;;  %v5615_v13 = vld [vmem:[#allocation2 + $0x858] sm:$0xff] }
 0x69d   : > { %v2492_v43 = vadd.f32 %v10023_v11, %v1325_v22  ;;  %4737 = vmatmul.f32.gmra.mxu3 %v3276_v6  ;;  %6563 = vmatmul.f32.gmra.mxu2 %v5614_v57  ;;  %v425_v22 = vld [vmem:[#allocation2 + $0x658] sm:$0xff] }
 0x69f   : > { %v5086_v61 = vadd.f32 %v3922_v60, %v2492_v43  ;;  %1372 = vmatmul.f32.gmra.mxu0 %v424_v56  ;;  %3969 = vmatmul.f32.gmra.mxu1 %v3020_v42  ;;  %v11286_v43 = vld [vmem:[#allocation32_spill] sm:$0xff] }
 0x6a0   : > { %v4690_v3 = vpop.f32.mrf.mxu3  ;;  %v6516_v54 = vpop.f32.mrf.mxu2  ;;  %v2749_v56 = vadd.f32 %v10023_v11, %v11286_v43 }
 0x6a1   : > { %v10190_v20 = vadd.f32 %v4690_v3, %v2748_v25  ;;  %v7680_v37 = vadd.f32 %v6516_v54, %v5086_v61  ;;  %v3278_v54 = vld [vmem:[#allocation2 + $0xf60] sm:$0xff] }
 0x6a3   : > { %11285 = vst [vmem:[#allocation31_spill] sm:$0xff] %v10190_v20 }
 0x6a4   : > { %8192 = vst [vmem:[%s9101_s18 + $0x5d0] sm:$0xff] %v7680_v37  ;;  %v1328_v46 = vpop.f32.mrf.mxu0  ;;  %v3925_v57 = vpop.f32.mrf.mxu1  ;;  %v5616_v37 = vld [vmem:[#allocation2 + $0x860] sm:$0xff] }
 0x6a5   : > { %v2493_v6 = vadd.f32 %v10023_v11, %v1328_v46  ;;  %4740 = vmatmul.f32.gmra.mxu3 %v3277_v21  ;;  %6566 = vmatmul.f32.gmra.mxu2 %v5615_v13  ;;  %v426_v46 = vld [vmem:[#allocation2 + $0x660] sm:$0xff] }
 0x6a6   : > { %v10199_v21 = vld [vmem:[#allocation7] ss:$0 sm:$0xff] }
 0x6a7   : > { %v5087_v60 = vadd.f32 %v3925_v57, %v2493_v6  ;;  %1375 = vmatmul.f32.gmra.mxu0 %v425_v22  ;;  %3972 = vmatmul.f32.gmra.mxu1 %v3021_v16  ;;  %v3022_v22 = vld [vmem:[#allocation2 + $0x760] sm:$0xff]  ;;  %v11288_v6 = vld [vmem:[#allocation33_spill] sm:$0xff] }
 0x6a8   : > { %v4693_v42 = vpop.f32.mrf.mxu3  ;;  %v6519_v25 = vpop.f32.mrf.mxu2  ;;  %v2750_v57 = vadd.f32 %v10199_v21, %v11288_v6  ;;  %v3023_v6 = vld [vmem:[#allocation2 + $0x768] sm:$0xff] }
 0x6a9   : > { %v10196_v61 = vadd.f32 %v4693_v42, %v2749_v56  ;;  %v7681_v3 = vadd.f32 %v6519_v25, %v5087_v60  ;;  %v3279_v25 = vld [vmem:[#allocation2 + $0xf68] sm:$0xff] }
 0x6ab   : > { %11287 = vst [vmem:[#allocation32_spill] sm:$0xff] %v10196_v61 }
 0x6ac   : > { %8193 = vst [vmem:[%s9101_s18 + $0x5d8] sm:$0xff] %v7681_v3  ;;  %v1331_v20 = vpop.f32.mrf.mxu0  ;;  %v3928_v11 = vpop.f32.mrf.mxu1  ;;  %v5617_v3 = vld [vmem:[#allocation2 + $0x868] sm:$0xff] }
 0x6ad   : > { %v2494_v13 = vadd.f32 %v10199_v21, %v1331_v20  ;;  %4743 = vmatmul.f32.gmra.mxu3 %v3278_v54  ;;  %6569 = vmatmul.f32.gmra.mxu2 %v5616_v37  ;;  %v427_v20 = vld [vmem:[#allocation2 + $0x668] sm:$0xff] }
 0x6af   : > { %v5088_v16 = vadd.f32 %v3928_v11, %v2494_v13  ;;  %1378 = vmatmul.f32.gmra.mxu0 %v426_v46  ;;  %3975 = vmatmul.f32.gmra.mxu1 %v3022_v22  ;;  %v11290_v13 = vld [vmem:[#allocation34_spill] sm:$0xff] }
 0x6b0   : > { %v4696_v43 = vpop.f32.mrf.mxu3  ;;  %v6522_v56 = vpop.f32.mrf.mxu2  ;;  %v2751_v46 = vadd.f32 %v10199_v21, %v11290_v13  ;;  %v3024_v13 = vld [vmem:[#allocation2 + $0x770] sm:$0xff] }
 0x6b1   : > { %v10204_v60 = vadd.f32 %v4696_v43, %v2750_v57  ;;  %v7682_v42 = vadd.f32 %v6522_v56, %v5088_v16  ;;  %v3280_v56 = vld [vmem:[#allocation2 + $0xf70] sm:$0xff] }
 0x6b3   : > { %11289 = vst [vmem:[#allocation33_spill] sm:$0xff] %v10204_v60 }
 0x6b4   : > { %8194 = vst [vmem:[%s9101_s18 + $0x5e0] sm:$0xff] %v7682_v42  ;;  %v1334_v61 = vpop.f32.mrf.mxu0  ;;  %v3931_v37 = vpop.f32.mrf.mxu1  ;;  %v5618_v42 = vld [vmem:[#allocation2 + $0x870] sm:$0xff] }
 0x6b5   : > { %v2495_v54 = vadd.f32 %v10199_v21, %v1334_v61  ;;  %4746 = vmatmul.f32.gmra.mxu3 %v3279_v25  ;;  %6572 = vmatmul.f32.gmra.mxu2 %v5617_v3  ;;  %v428_v61 = vld [vmem:[#allocation2 + $0x670] sm:$0xff] }
 0x6b7   : > { %v5089_v11 = vadd.f32 %v3931_v37, %v2495_v54  ;;  %1381 = vmatmul.f32.gmra.mxu0 %v427_v20  ;;  %3978 = vmatmul.f32.gmra.mxu1 %v3023_v6  ;;  %v11292_v54 = vld [vmem:[#allocation35_spill] sm:$0xff] }
 0x6b8   : > { %v4699_v22 = vpop.f32.mrf.mxu3  ;;  %v6525_v57 = vpop.f32.mrf.mxu2  ;;  %v2752_v20 = vadd.f32 %v10199_v21, %v11292_v54  ;;  %v3025_v54 = vld [vmem:[#allocation2 + $0x778] sm:$0xff] }
 0x6b9   : > { %v10210_v16 = vadd.f32 %v4699_v22, %v2751_v46  ;;  %v7683_v43 = vadd.f32 %v6525_v57, %v5089_v11  ;;  %v3281_v57 = vld [vmem:[#allocation2 + $0xf78] sm:$0xff] }
 0x6bb   : > { %11291 = vst [vmem:[#allocation34_spill] sm:$0xff] %v10210_v16 }
 0x6bc   : > { %8195 = vst [vmem:[%s9101_s18 + $0x5e8] sm:$0xff] %v7683_v43  ;;  %v1337_v60 = vpop.f32.mrf.mxu0  ;;  %v3934_v3 = vpop.f32.mrf.mxu1  ;;  %v5619_v43 = vld [vmem:[#allocation2 + $0x878] sm:$0xff] }
 0x6bd   : > { %v2496_v25 = vadd.f32 %v10199_v21, %v1337_v60  ;;  %4749 = vmatmul.f32.gmra.mxu3 %v3280_v56  ;;  %6575 = vmatmul.f32.gmra.mxu2 %v5618_v42  ;;  %v429_v60 = vld [vmem:[#allocation2 + $0x678] sm:$0xff] }
 0x6bf   : > { %v5090_v37 = vadd.f32 %v3934_v3, %v2496_v25  ;;  %1384 = vmatmul.f32.gmra.mxu0 %v428_v61  ;;  %3981 = vmatmul.f32.gmra.mxu1 %v3024_v13  ;;  %v11294_v25 = vld [vmem:[#allocation36_spill] sm:$0xff] }
 0x6c0   : > { %v4702_v6 = vpop.f32.mrf.mxu3  ;;  %v6528_v46 = vpop.f32.mrf.mxu2  ;;  %v2753_v61 = vadd.f32 %v10199_v21, %v11294_v25  ;;  %v3026_v25 = vld [vmem:[#allocation2 + $0x780] sm:$0xff] }
 0x6c1   : > { %v10216_v11 = vadd.f32 %v4702_v6, %v2752_v20  ;;  %v7684_v22 = vadd.f32 %v6528_v46, %v5090_v37  ;;  %v3282_v46 = vld [vmem:[#allocation2 + $0xf80] sm:$0xff] }
 0x6c3   : > { %11293 = vst [vmem:[#allocation35_spill] sm:$0xff] %v10216_v11 }
 0x6c4   : > { %8196 = vst [vmem:[%s9101_s18 + $0x5f0] sm:$0xff] %v7684_v22  ;;  %v1340_v16 = vpop.f32.mrf.mxu0  ;;  %v3937_v42 = vpop.f32.mrf.mxu1  ;;  %v5620_v22 = vld [vmem:[#allocation2 + $0x880] sm:$0xff] }
 0x6c5   : > { %v2497_v56 = vadd.f32 %v10199_v21, %v1340_v16  ;;  %4752 = vmatmul.f32.gmra.mxu3 %v3281_v57  ;;  %6578 = vmatmul.f32.gmra.mxu2 %v5619_v43  ;;  %v430_v16 = vld [vmem:[#allocation2 + $0x680] sm:$0xff] }
 0x6c7   : > { %v5091_v3 = vadd.f32 %v3937_v42, %v2497_v56  ;;  %1387 = vmatmul.f32.gmra.mxu0 %v429_v60  ;;  %3984 = vmatmul.f32.gmra.mxu1 %v3025_v54  ;;  %v11296_v56 = vld [vmem:[#allocation37_spill] sm:$0xff] }
 0x6c8   : > { %v4705_v13 = vpop.f32.mrf.mxu3  ;;  %v6531_v20 = vpop.f32.mrf.mxu2  ;;  %v2754_v60 = vadd.f32 %v10199_v21, %v11296_v56  ;;  %v3027_v56 = vld [vmem:[#allocation2 + $0x788] sm:$0xff] }
 0x6c9   : > { %v10222_v37 = vadd.f32 %v4705_v13, %v2753_v61  ;;  %v7685_v6 = vadd.f32 %v6531_v20, %v5091_v3  ;;  %v3283_v20 = vld [vmem:[#allocation2 + $0xf88] sm:$0xff] }
 0x6cb   : > { %11295 = vst [vmem:[#allocation36_spill] sm:$0xff] %v10222_v37 }
 0x6cc   : > { %8197 = vst [vmem:[%s9101_s18 + $0x5f8] sm:$0xff] %v7685_v6  ;;  %v1343_v11 = vpop.f32.mrf.mxu0  ;;  %v3940_v43 = vpop.f32.mrf.mxu1  ;;  %v5621_v6 = vld [vmem:[#allocation2 + $0x888] sm:$0xff] }
 0x6cd   : > { %v2498_v57 = vadd.f32 %v10199_v21, %v1343_v11  ;;  %4755 = vmatmul.f32.gmra.mxu3 %v3282_v46  ;;  %6581 = vmatmul.f32.gmra.mxu2 %v5620_v22  ;;  %v431_v11 = vld [vmem:[#allocation2 + $0x688] sm:$0xff] }
 0x6cf   : > { %v5092_v42 = vadd.f32 %v3940_v43, %v2498_v57  ;;  %1390 = vmatmul.f32.gmra.mxu0 %v430_v16  ;;  %3987 = vmatmul.f32.gmra.mxu1 %v3026_v25  ;;  %v11298_v57 = vld [vmem:[#allocation38_spill] sm:$0xff] }
 0x6d0   : > { %v4708_v54 = vpop.f32.mrf.mxu3  ;;  %v6534_v61 = vpop.f32.mrf.mxu2  ;;  %v2755_v16 = vadd.f32 %v10199_v21, %v11298_v57  ;;  %v3028_v57 = vld [vmem:[#allocation2 + $0x790] sm:$0xff] }
 0x6d1   : > { %v10228_v3 = vadd.f32 %v4708_v54, %v2754_v60  ;;  %v7686_v13 = vadd.f32 %v6534_v61, %v5092_v42  ;;  %v3284_v61 = vld [vmem:[#allocation2 + $0xf90] sm:$0xff] }
 0x6d3   : > { %11297 = vst [vmem:[#allocation37_spill] sm:$0xff] %v10228_v3 }
 0x6d4   : > { %8198 = vst [vmem:[%s9101_s18 + $0x600] sm:$0xff] %v7686_v13  ;;  %v1346_v37 = vpop.f32.mrf.mxu0  ;;  %v3943_v22 = vpop.f32.mrf.mxu1  ;;  %v5622_v13 = vld [vmem:[#allocation2 + $0x890] sm:$0xff] }
 0x6d5   : > { %v2499_v46 = vadd.f32 %v10199_v21, %v1346_v37  ;;  %4758 = vmatmul.f32.gmra.mxu3 %v3283_v20  ;;  %6584 = vmatmul.f32.gmra.mxu2 %v5621_v6  ;;  %v432_v37 = vld [vmem:[#allocation2 + $0x690] sm:$0xff] }
 0x6d7   : > { %v5093_v43 = vadd.f32 %v3943_v22, %v2499_v46  ;;  %1393 = vmatmul.f32.gmra.mxu0 %v431_v11  ;;  %3990 = vmatmul.f32.gmra.mxu1 %v3027_v56  ;;  %v11300_v46 = vld [vmem:[#allocation39_spill] sm:$0xff] }
 0x6d8   : > { %v4711_v25 = vpop.f32.mrf.mxu3  ;;  %v6537_v60 = vpop.f32.mrf.mxu2  ;;  %v2756_v11 = vadd.f32 %v10199_v21, %v11300_v46  ;;  %v3029_v46 = vld [vmem:[#allocation2 + $0x798] sm:$0xff] }
 0x6d9   : > { %v10234_v42 = vadd.f32 %v4711_v25, %v2755_v16  ;;  %v7687_v54 = vadd.f32 %v6537_v60, %v5093_v43  ;;  %v3285_v60 = vld [vmem:[#allocation2 + $0xf98] sm:$0xff] }
 0x6db   : > { %11299 = vst [vmem:[#allocation38_spill] sm:$0xff] %v10234_v42 }
 0x6dc   : > { %8199 = vst [vmem:[%s9101_s18 + $0x608] sm:$0xff] %v7687_v54  ;;  %v1349_v3 = vpop.f32.mrf.mxu0  ;;  %v3946_v6 = vpop.f32.mrf.mxu1  ;;  %v5623_v54 = vld [vmem:[#allocation2 + $0x898] sm:$0xff] }
 0x6dd   : > { %v2500_v20 = vadd.f32 %v10199_v21, %v1349_v3  ;;  %4761 = vmatmul.f32.gmra.mxu3 %v3284_v61  ;;  %6587 = vmatmul.f32.gmra.mxu2 %v5622_v13  ;;  %v433_v3 = vld [vmem:[#allocation2 + $0x698] sm:$0xff] }
 0x6df   : > { %v5094_v22 = vadd.f32 %v3946_v6, %v2500_v20  ;;  %1396 = vmatmul.f32.gmra.mxu0 %v432_v37  ;;  %3993 = vmatmul.f32.gmra.mxu1 %v3028_v57  ;;  %v11302_v20 = vld [vmem:[#allocation40_spill] sm:$0xff] }
 0x6e0   : > { %v4714_v56 = vpop.f32.mrf.mxu3  ;;  %v6540_v16 = vpop.f32.mrf.mxu2  ;;  %v2757_v37 = vadd.f32 %v10199_v21, %v11302_v20  ;;  %v3030_v20 = vld [vmem:[#allocation2 + $0x7a0] sm:$0xff] }
 0x6e1   : > { %v10240_v43 = vadd.f32 %v4714_v56, %v2756_v11  ;;  %v7688_v25 = vadd.f32 %v6540_v16, %v5094_v22  ;;  %v3286_v16 = vld [vmem:[#allocation2 + $0xfa0] sm:$0xff] }
 0x6e3   : > { %11301 = vst [vmem:[#allocation39_spill] sm:$0xff] %v10240_v43 }
 0x6e4   : > { %8200 = vst [vmem:[%s9101_s18 + $0x610] sm:$0xff] %v7688_v25  ;;  %v1352_v42 = vpop.f32.mrf.mxu0  ;;  %v3949_v13 = vpop.f32.mrf.mxu1  ;;  %v5624_v25 = vld [vmem:[#allocation2 + $0x8a0] sm:$0xff] }
 0x6e5   : > { %v2501_v61 = vadd.f32 %v10199_v21, %v1352_v42  ;;  %4764 = vmatmul.f32.gmra.mxu3 %v3285_v60  ;;  %6590 = vmatmul.f32.gmra.mxu2 %v5623_v54  ;;  %v434_v42 = vld [vmem:[#allocation2 + $0x6a0] sm:$0xff] }
 0x6e7   : > { %v5095_v6 = vadd.f32 %v3949_v13, %v2501_v61  ;;  %1399 = vmatmul.f32.gmra.mxu0 %v433_v3  ;;  %3996 = vmatmul.f32.gmra.mxu1 %v3029_v46  ;;  %v11304_v61 = vld [vmem:[#allocation41_spill] sm:$0xff] }
 0x6e8   : > { %v4717_v57 = vpop.f32.mrf.mxu3  ;;  %v6543_v11 = vpop.f32.mrf.mxu2  ;;  %v2758_v3 = vadd.f32 %v10199_v21, %v11304_v61  ;;  %v3031_v61 = vld [vmem:[#allocation2 + $0x7a8] sm:$0xff] }
 0x6e9   : > { %v10246_v22 = vadd.f32 %v4717_v57, %v2757_v37  ;;  %v7689_v56 = vadd.f32 %v6543_v11, %v5095_v6  ;;  %v3287_v11 = vld [vmem:[#allocation2 + $0xfa8] sm:$0xff] }
 0x6eb   : > { %11303 = vst [vmem:[#allocation40_spill] sm:$0xff] %v10246_v22 }
 0x6ec   : > { %8201 = vst [vmem:[%s9101_s18 + $0x618] sm:$0xff] %v7689_v56  ;;  %v1355_v43 = vpop.f32.mrf.mxu0  ;;  %v3952_v54 = vpop.f32.mrf.mxu1  ;;  %v5625_v56 = vld [vmem:[#allocation2 + $0x8a8] sm:$0xff] }
 0x6ed   : > { %v2502_v60 = vadd.f32 %v10199_v21, %v1355_v43  ;;  %4767 = vmatmul.f32.gmra.mxu3 %v3286_v16  ;;  %6593 = vmatmul.f32.gmra.mxu2 %v5624_v25  ;;  %v435_v43 = vld [vmem:[#allocation2 + $0x6a8] sm:$0xff] }
 0x6ef   : > { %v5096_v13 = vadd.f32 %v3952_v54, %v2502_v60  ;;  %1402 = vmatmul.f32.gmra.mxu0 %v434_v42  ;;  %3999 = vmatmul.f32.gmra.mxu1 %v3030_v20  ;;  %v11306_v60 = vld [vmem:[#allocation42_spill] sm:$0xff] }
 0x6f0   : > { %v4720_v46 = vpop.f32.mrf.mxu3  ;;  %v6546_v37 = vpop.f32.mrf.mxu2  ;;  %v2759_v42 = vadd.f32 %v10199_v21, %v11306_v60  ;;  %v3032_v60 = vld [vmem:[#allocation2 + $0x7b0] sm:$0xff] }
 0x6f1   : > { %v10252_v6 = vadd.f32 %v4720_v46, %v2758_v3  ;;  %v7690_v57 = vadd.f32 %v6546_v37, %v5096_v13  ;;  %v3288_v37 = vld [vmem:[#allocation2 + $0xfb0] sm:$0xff] }
 0x6f3   : > { %11305 = vst [vmem:[#allocation41_spill] sm:$0xff] %v10252_v6 }
 0x6f4   : > { %8202 = vst [vmem:[%s9101_s18 + $0x620] sm:$0xff] %v7690_v57  ;;  %v1358_v22 = vpop.f32.mrf.mxu0  ;;  %v3955_v25 = vpop.f32.mrf.mxu1  ;;  %v5626_v57 = vld [vmem:[#allocation2 + $0x8b0] sm:$0xff] }
 0x6f5   : > { %v2503_v16 = vadd.f32 %v10199_v21, %v1358_v22  ;;  %4770 = vmatmul.f32.gmra.mxu3 %v3287_v11  ;;  %6596 = vmatmul.f32.gmra.mxu2 %v5625_v56  ;;  %v436_v22 = vld [vmem:[#allocation2 + $0x6b0] sm:$0xff] }
 0x6f7   : > { %v5097_v54 = vadd.f32 %v3955_v25, %v2503_v16  ;;  %1405 = vmatmul.f32.gmra.mxu0 %v435_v43  ;;  %4002 = vmatmul.f32.gmra.mxu1 %v3031_v61  ;;  %v11308_v16 = vld [vmem:[#allocation43_spill] sm:$0xff] }
 0x6f8   : > { %v4723_v20 = vpop.f32.mrf.mxu3  ;;  %v6549_v3 = vpop.f32.mrf.mxu2  ;;  %v2760_v43 = vadd.f32 %v10199_v21, %v11308_v16  ;;  %v3033_v16 = vld [vmem:[#allocation2 + $0x7b8] sm:$0xff] }
 0x6f9   : > { %v10258_v13 = vadd.f32 %v4723_v20, %v2759_v42  ;;  %v7691_v46 = vadd.f32 %v6549_v3, %v5097_v54  ;;  %v3289_v3 = vld [vmem:[#allocation2 + $0xfb8] sm:$0xff] }
 0x6fb   : > { %11307 = vst [vmem:[#allocation42_spill] sm:$0xff] %v10258_v13 }
 0x6fc   : > { %8203 = vst [vmem:[%s9101_s18 + $0x628] sm:$0xff] %v7691_v46  ;;  %v1361_v6 = vpop.f32.mrf.mxu0  ;;  %v3958_v56 = vpop.f32.mrf.mxu1  ;;  %v5627_v46 = vld [vmem:[#allocation2 + $0x8b8] sm:$0xff] }
 0x6fd   : > { %v2504_v11 = vadd.f32 %v10199_v21, %v1361_v6  ;;  %4773 = vmatmul.f32.gmra.mxu3 %v3288_v37  ;;  %6599 = vmatmul.f32.gmra.mxu2 %v5626_v57  ;;  %v437_v6 = vld [vmem:[#allocation2 + $0x6b8] sm:$0xff] }
 0x6ff   : > { %v5098_v25 = vadd.f32 %v3958_v56, %v2504_v11  ;;  %1408 = vmatmul.f32.gmra.mxu0 %v436_v22  ;;  %4005 = vmatmul.f32.gmra.mxu1 %v3032_v60  ;;  %v11310_v11 = vld [vmem:[#allocation44_spill] sm:$0xff] }
 0x700   : > { %v4726_v61 = vpop.f32.mrf.mxu3  ;;  %v6552_v42 = vpop.f32.mrf.mxu2  ;;  %v2761_v22 = vadd.f32 %v10199_v21, %v11310_v11  ;;  %v3034_v11 = vld [vmem:[#allocation2 + $0x7c0] sm:$0xff] }
 0x701   : > { %v10264_v54 = vadd.f32 %v4726_v61, %v2760_v43  ;;  %v7692_v20 = vadd.f32 %v6552_v42, %v5098_v25  ;;  %v3290_v42 = vld [vmem:[#allocation2 + $0xfc0] sm:$0xff] }
 0x703   : > { %11309 = vst [vmem:[#allocation43_spill] sm:$0xff] %v10264_v54 }
 0x704   : > { %8204 = vst [vmem:[%s9101_s18 + $0x630] sm:$0xff] %v7692_v20  ;;  %v1364_v13 = vpop.f32.mrf.mxu0  ;;  %v3961_v57 = vpop.f32.mrf.mxu1  ;;  %v5628_v20 = vld [vmem:[#allocation2 + $0x8c0] sm:$0xff] }
 0x705   : > { %v2505_v37 = vadd.f32 %v10199_v21, %v1364_v13  ;;  %4776 = vmatmul.f32.gmra.mxu3 %v3289_v3  ;;  %6602 = vmatmul.f32.gmra.mxu2 %v5627_v46  ;;  %v438_v13 = vld [vmem:[#allocation2 + $0x6c0] sm:$0xff] }
 0x707   : > { %v5099_v56 = vadd.f32 %v3961_v57, %v2505_v37  ;;  %1411 = vmatmul.f32.gmra.mxu0 %v437_v6  ;;  %4008 = vmatmul.f32.gmra.mxu1 %v3033_v16  ;;  %v11312_v37 = vld [vmem:[#allocation45_spill] sm:$0xff] }
 0x708   : > { %v4729_v60 = vpop.f32.mrf.mxu3  ;;  %v6555_v43 = vpop.f32.mrf.mxu2  ;;  %v2762_v6 = vadd.f32 %v10199_v21, %v11312_v37  ;;  %v3035_v37 = vld [vmem:[#allocation2 + $0x7c8] sm:$0xff] }
 0x709   : > { %v10270_v25 = vadd.f32 %v4729_v60, %v2761_v22  ;;  %v7693_v61 = vadd.f32 %v6555_v43, %v5099_v56  ;;  %v3291_v43 = vld [vmem:[#allocation2 + $0xfc8] sm:$0xff] }
 0x70b   : > { %11311 = vst [vmem:[#allocation44_spill] sm:$0xff] %v10270_v25 }
 0x70c   : > { %8205 = vst [vmem:[%s9101_s18 + $0x638] sm:$0xff] %v7693_v61  ;;  %v1367_v54 = vpop.f32.mrf.mxu0  ;;  %v3964_v46 = vpop.f32.mrf.mxu1  ;;  %v5629_v61 = vld [vmem:[#allocation2 + $0x8c8] sm:$0xff] }
 0x70d   : > { %v2506_v3 = vadd.f32 %v10199_v21, %v1367_v54  ;;  %4779 = vmatmul.f32.gmra.mxu3 %v3290_v42  ;;  %6605 = vmatmul.f32.gmra.mxu2 %v5628_v20  ;;  %v439_v54 = vld [vmem:[#allocation2 + $0x6c8] sm:$0xff] }
 0x70f   : > { %v5100_v57 = vadd.f32 %v3964_v46, %v2506_v3  ;;  %1414 = vmatmul.f32.gmra.mxu0 %v438_v13  ;;  %4011 = vmatmul.f32.gmra.mxu1 %v3034_v11  ;;  %v11314_v3 = vld [vmem:[#allocation46_spill] sm:$0xff] }
 0x710   : > { %v4732_v16 = vpop.f32.mrf.mxu3  ;;  %v6558_v22 = vpop.f32.mrf.mxu2  ;;  %v2763_v13 = vadd.f32 %v10199_v21, %v11314_v3  ;;  %v3036_v3 = vld [vmem:[#allocation2 + $0x7d0] sm:$0xff] }
 0x711   : > { %v10276_v56 = vadd.f32 %v4732_v16, %v2762_v6  ;;  %v7694_v60 = vadd.f32 %v6558_v22, %v5100_v57  ;;  %v3292_v22 = vld [vmem:[#allocation2 + $0xfd0] sm:$0xff] }
 0x713   : > { %11313 = vst [vmem:[#allocation45_spill] sm:$0xff] %v10276_v56 }
 0x714   : > { %8206 = vst [vmem:[%s9101_s18 + $0x640] sm:$0xff] %v7694_v60  ;;  %v1370_v25 = vpop.f32.mrf.mxu0  ;;  %v3967_v20 = vpop.f32.mrf.mxu1  ;;  %v5630_v60 = vld [vmem:[#allocation2 + $0x8d0] sm:$0xff] }
 0x715   : > { %v2507_v42 = vadd.f32 %v10199_v21, %v1370_v25  ;;  %4782 = vmatmul.f32.gmra.mxu3 %v3291_v43  ;;  %6608 = vmatmul.f32.gmra.mxu2 %v5629_v61  ;;  %v440_v25 = vld [vmem:[#allocation2 + $0x6d0] sm:$0xff] }
 0x717   : > { %v5101_v46 = vadd.f32 %v3967_v20, %v2507_v42  ;;  %1417 = vmatmul.f32.gmra.mxu0 %v439_v54  ;;  %4014 = vmatmul.f32.gmra.mxu1 %v3035_v37  ;;  %v11316_v42 = vld [vmem:[#allocation47_spill] sm:$0xff] }
 0x718   : > { %v4735_v11 = vpop.f32.mrf.mxu3  ;;  %v6561_v6 = vpop.f32.mrf.mxu2  ;;  %v2764_v54 = vadd.f32 %v10199_v21, %v11316_v42  ;;  %v3037_v42 = vld [vmem:[#allocation2 + $0x7d8] sm:$0xff] }
 0x719   : > { %v10282_v57 = vadd.f32 %v4735_v11, %v2763_v13  ;;  %v7695_v16 = vadd.f32 %v6561_v6, %v5101_v46  ;;  %v3293_v6 = vld [vmem:[#allocation2 + $0xfd8] sm:$0xff] }
 0x71b   : > { %11315 = vst [vmem:[#allocation46_spill] sm:$0xff] %v10282_v57 }
 0x71c   : > { %8207 = vst [vmem:[%s9101_s18 + $0x648] sm:$0xff] %v7695_v16  ;;  %v1373_v56 = vpop.f32.mrf.mxu0  ;;  %v3970_v61 = vpop.f32.mrf.mxu1  ;;  %v5631_v16 = vld [vmem:[#allocation2 + $0x8d8] sm:$0xff] }
 0x71d   : > { %v2508_v43 = vadd.f32 %v10199_v21, %v1373_v56  ;;  %4785 = vmatmul.f32.gmra.mxu3 %v3292_v22  ;;  %6611 = vmatmul.f32.gmra.mxu2 %v5630_v60  ;;  %v441_v56 = vld [vmem:[#allocation2 + $0x6d8] sm:$0xff] }
 0x71f   : > { %v5102_v20 = vadd.f32 %v3970_v61, %v2508_v43  ;;  %1420 = vmatmul.f32.gmra.mxu0 %v440_v25  ;;  %4017 = vmatmul.f32.gmra.mxu1 %v3036_v3  ;;  %v11318_v43 = vld [vmem:[#allocation48_spill] sm:$0xff] }
 0x720   : > { %v4738_v37 = vpop.f32.mrf.mxu3  ;;  %v6564_v13 = vpop.f32.mrf.mxu2  ;;  %v2765_v25 = vadd.f32 %v10199_v21, %v11318_v43  ;;  %v3038_v43 = vld [vmem:[#allocation2 + $0x7e0] sm:$0xff] }
 0x721   : > { %v10288_v46 = vadd.f32 %v4738_v37, %v2764_v54  ;;  %v7696_v11 = vadd.f32 %v6564_v13, %v5102_v20  ;;  %v3294_v13 = vld [vmem:[#allocation2 + $0xfe0] sm:$0xff] }
 0x723   : > { %11317 = vst [vmem:[#allocation47_spill] sm:$0xff] %v10288_v46 }
 0x724   : > { %8208 = vst [vmem:[%s9101_s18 + $0x650] sm:$0xff] %v7696_v11  ;;  %v1376_v57 = vpop.f32.mrf.mxu0  ;;  %v3973_v60 = vpop.f32.mrf.mxu1  ;;  %v5632_v11 = vld [vmem:[#allocation2 + $0x8e0] sm:$0xff] }
 0x725   : > { %v2509_v22 = vadd.f32 %v10199_v21, %v1376_v57  ;;  %4788 = vmatmul.f32.gmra.mxu3 %v3293_v6  ;;  %6614 = vmatmul.f32.gmra.mxu2 %v5631_v16  ;;  %v442_v57 = vld [vmem:[#allocation2 + $0x6e0] sm:$0xff] }
 0x727   : > { %v5103_v61 = vadd.f32 %v3973_v60, %v2509_v22  ;;  %1423 = vmatmul.f32.gmra.mxu0 %v441_v56  ;;  %4020 = vmatmul.f32.gmra.mxu1 %v3037_v42  ;;  %v11320_v22 = vld [vmem:[#allocation49_spill] sm:$0xff] }
 0x728   : > { %v4741_v3 = vpop.f32.mrf.mxu3  ;;  %v6567_v54 = vpop.f32.mrf.mxu2  ;;  %v2766_v56 = vadd.f32 %v10199_v21, %v11320_v22  ;;  %v3039_v22 = vld [vmem:[#allocation2 + $0x7e8] sm:$0xff] }
 0x729   : > { %v10294_v20 = vadd.f32 %v4741_v3, %v2765_v25  ;;  %v7697_v37 = vadd.f32 %v6567_v54, %v5103_v61  ;;  %v3295_v54 = vld [vmem:[#allocation2 + $0xfe8] sm:$0xff] }
 0x72b   : > { %11319 = vst [vmem:[#allocation48_spill] sm:$0xff] %v10294_v20 }
 0x72c   : > { %8209 = vst [vmem:[%s9101_s18 + $0x658] sm:$0xff] %v7697_v37  ;;  %v1379_v46 = vpop.f32.mrf.mxu0  ;;  %v3976_v16 = vpop.f32.mrf.mxu1  ;;  %v5633_v37 = vld [vmem:[#allocation2 + $0x8e8] sm:$0xff] }
 0x72d   : > { %v2510_v6 = vadd.f32 %v10199_v21, %v1379_v46  ;;  %4791 = vmatmul.f32.gmra.mxu3 %v3294_v13  ;;  %6617 = vmatmul.f32.gmra.mxu2 %v5632_v11  ;;  %v443_v46 = vld [vmem:[#allocation2 + $0x6e8] sm:$0xff] }
 0x72f   : > { %v5104_v60 = vadd.f32 %v3976_v16, %v2510_v6  ;;  %1426 = vmatmul.f32.gmra.mxu0 %v442_v57  ;;  %4023 = vmatmul.f32.gmra.mxu1 %v3038_v43  ;;  %v11322_v6 = vld [vmem:[#allocation50_spill] sm:$0xff] }
 0x730   : > { %v4744_v42 = vpop.f32.mrf.mxu3  ;;  %v6570_v25 = vpop.f32.mrf.mxu2  ;;  %v2767_v57 = vadd.f32 %v10199_v21, %v11322_v6  ;;  %v3040_v6 = vld [vmem:[#allocation2 + $0x7f0] sm:$0xff] }
 0x731   : > { %v10300_v61 = vadd.f32 %v4744_v42, %v2766_v56  ;;  %v7698_v3 = vadd.f32 %v6570_v25, %v5104_v60  ;;  %v3296_v25 = vld [vmem:[#allocation2 + $0xff0] sm:$0xff] }
 0x733   : > { %11321 = vst [vmem:[#allocation49_spill] sm:$0xff] %v10300_v61 }
 0x734   : > { %8210 = vst [vmem:[%s9101_s18 + $0x660] sm:$0xff] %v7698_v3  ;;  %v1382_v20 = vpop.f32.mrf.mxu0  ;;  %v3979_v11 = vpop.f32.mrf.mxu1  ;;  %v5634_v3 = vld [vmem:[#allocation2 + $0x8f0] sm:$0xff] }
 0x735   : > { %v2511_v13 = vadd.f32 %v10199_v21, %v1382_v20  ;;  %4794 = vmatmul.f32.gmra.mxu3 %v3295_v54  ;;  %6620 = vmatmul.f32.gmra.mxu2 %v5633_v37  ;;  %v444_v20 = vld [vmem:[#allocation2 + $0x6f0] sm:$0xff] }
 0x737   : > { %v5105_v16 = vadd.f32 %v3979_v11, %v2511_v13  ;;  %1429 = vmatmul.f32.gmra.mxu0 %v443_v46  ;;  %4026 = vmatmul.f32.gmra.mxu1 %v3039_v22  ;;  %v11324_v13 = vld [vmem:[#allocation51_spill] sm:$0xff] }
 0x738   : > { %v4747_v43 = vpop.f32.mrf.mxu3  ;;  %v6573_v56 = vpop.f32.mrf.mxu2  ;;  %v2768_v46 = vadd.f32 %v10199_v21, %v11324_v13  ;;  %v3041_v13 = vld [vmem:[#allocation2 + $0x7f8] sm:$0xff] }
 0x739   : > { %v10306_v60 = vadd.f32 %v4747_v43, %v2767_v57  ;;  %v7699_v42 = vadd.f32 %v6573_v56, %v5105_v16  ;;  %v3297_v56 = vld [vmem:[#allocation2 + $0xff8] sm:$0xff] }
 0x73b   : > { %11323 = vst [vmem:[#allocation50_spill] sm:$0xff] %v10306_v60 }
 0x73c   : > { %8211 = vst [vmem:[%s9101_s18 + $0x668] sm:$0xff] %v7699_v42  ;;  %v1385_v61 = vpop.f32.mrf.mxu0  ;;  %v3982_v37 = vpop.f32.mrf.mxu1  ;;  %v5635_v42 = vld [vmem:[#allocation2 + $0x8f8] sm:$0xff] }
 0x73d   : > { %v2512_v54 = vadd.f32 %v10199_v21, %v1385_v61  ;;  %4797 = vmatmul.f32.gmra.mxu3 %v3296_v25  ;;  %6623 = vmatmul.f32.gmra.mxu2 %v5634_v3  ;;  %v445_v61 = vld [vmem:[#allocation2 + $0x6f8] sm:$0xff] }
 0x73f   : > { %v5106_v11 = vadd.f32 %v3982_v37, %v2512_v54  ;;  %1432 = vmatmul.f32.gmra.mxu0 %v444_v20  ;;  %4029 = vmatmul.f32.gmra.mxu1 %v3040_v6  ;;  %v11326_v54 = vld [vmem:[#allocation52_spill] sm:$0xff] }
 0x740   : > { %v4750_v22 = vpop.f32.mrf.mxu3  ;;  %v6576_v57 = vpop.f32.mrf.mxu2  ;;  %v2769_v20 = vadd.f32 %v10199_v21, %v11326_v54  ;;  %v3042_v54 = vld [vmem:[#allocation2 + $0x800] sm:$0xff] }
 0x741   : > { %v10312_v16 = vadd.f32 %v4750_v22, %v2768_v46  ;;  %v7700_v43 = vadd.f32 %v6576_v57, %v5106_v11  ;;  %v3298_v57 = vld [vmem:[#allocation2 + $0x1000] sm:$0xff] }
 0x743   : > { %11325 = vst [vmem:[#allocation51_spill] sm:$0xff] %v10312_v16 }
 0x744   : > { %8212 = vst [vmem:[%s9101_s18 + $0x670] sm:$0xff] %v7700_v43  ;;  %v1388_v60 = vpop.f32.mrf.mxu0  ;;  %v3985_v3 = vpop.f32.mrf.mxu1  ;;  %v5636_v43 = vld [vmem:[#allocation2 + $0x900] sm:$0xff] }
 0x745   : > { %v2513_v25 = vadd.f32 %v10199_v21, %v1388_v60  ;;  %4800 = vmatmul.f32.gmra.mxu3 %v3297_v56  ;;  %6626 = vmatmul.f32.gmra.mxu2 %v5635_v42  ;;  %v446_v60 = vld [vmem:[#allocation2 + $0x700] sm:$0xff] }
 0x747   : > { %v5107_v37 = vadd.f32 %v3985_v3, %v2513_v25  ;;  %1435 = vmatmul.f32.gmra.mxu0 %v445_v61  ;;  %4032 = vmatmul.f32.gmra.mxu1 %v3041_v13  ;;  %v11328_v25 = vld [vmem:[#allocation53_spill] sm:$0xff] }
 0x748   : > { %v4753_v6 = vpop.f32.mrf.mxu3  ;;  %v6579_v46 = vpop.f32.mrf.mxu2  ;;  %v2770_v61 = vadd.f32 %v10199_v21, %v11328_v25  ;;  %v3043_v25 = vld [vmem:[#allocation2 + $0x808] sm:$0xff] }
 0x749   : > { %v10318_v11 = vadd.f32 %v4753_v6, %v2769_v20  ;;  %v7701_v22 = vadd.f32 %v6579_v46, %v5107_v37  ;;  %v3299_v46 = vld [vmem:[#allocation2 + $0x1008] sm:$0xff] }
 0x74b   : > { %11327 = vst [vmem:[#allocation52_spill] sm:$0xff] %v10318_v11 }
 0x74c   : > { %8213 = vst [vmem:[%s9101_s18 + $0x678] sm:$0xff] %v7701_v22  ;;  %v1391_v16 = vpop.f32.mrf.mxu0  ;;  %v3988_v42 = vpop.f32.mrf.mxu1  ;;  %v5637_v22 = vld [vmem:[#allocation2 + $0x908] sm:$0xff] }
 0x74d   : > { %v2514_v56 = vadd.f32 %v10199_v21, %v1391_v16  ;;  %4803 = vmatmul.f32.gmra.mxu3 %v3298_v57  ;;  %6629 = vmatmul.f32.gmra.mxu2 %v5636_v43  ;;  %v447_v16 = vld [vmem:[#allocation2 + $0x708] sm:$0xff] }
 0x74f   : > { %v5108_v3 = vadd.f32 %v3988_v42, %v2514_v56  ;;  %1438 = vmatmul.f32.gmra.mxu0 %v446_v60  ;;  %4035 = vmatmul.f32.gmra.mxu1 %v3042_v54  ;;  %v11330_v56 = vld [vmem:[#allocation54_spill] sm:$0xff] }
 0x750   : > { %v4756_v13 = vpop.f32.mrf.mxu3  ;;  %v6582_v20 = vpop.f32.mrf.mxu2  ;;  %v2771_v60 = vadd.f32 %v10199_v21, %v11330_v56  ;;  %v3044_v56 = vld [vmem:[#allocation2 + $0x810] sm:$0xff] }
 0x751   : > { %v10324_v37 = vadd.f32 %v4756_v13, %v2770_v61  ;;  %v7702_v6 = vadd.f32 %v6582_v20, %v5108_v3  ;;  %v3300_v20 = vld [vmem:[#allocation2 + $0x1010] sm:$0xff] }
 0x753   : > { %11329 = vst [vmem:[#allocation53_spill] sm:$0xff] %v10324_v37 }
 0x754   : > { %8214 = vst [vmem:[%s9101_s18 + $0x680] sm:$0xff] %v7702_v6  ;;  %v1394_v11 = vpop.f32.mrf.mxu0  ;;  %v3991_v43 = vpop.f32.mrf.mxu1  ;;  %v5638_v6 = vld [vmem:[#allocation2 + $0x910] sm:$0xff] }
 0x755   : > { %v2515_v57 = vadd.f32 %v10199_v21, %v1394_v11  ;;  %4806 = vmatmul.f32.gmra.mxu3 %v3299_v46  ;;  %6632 = vmatmul.f32.gmra.mxu2 %v5637_v22  ;;  %v448_v11 = vld [vmem:[#allocation2 + $0x710] sm:$0xff] }
 0x757   : > { %v5109_v42 = vadd.f32 %v3991_v43, %v2515_v57  ;;  %1441 = vmatmul.f32.gmra.mxu0 %v447_v16  ;;  %4038 = vmatmul.f32.gmra.mxu1 %v3043_v25  ;;  %v11332_v57 = vld [vmem:[#allocation55_spill] sm:$0xff] }
 0x758   : > { %v4759_v54 = vpop.f32.mrf.mxu3  ;;  %v6585_v61 = vpop.f32.mrf.mxu2  ;;  %v2772_v16 = vadd.f32 %v10199_v21, %v11332_v57  ;;  %v3045_v57 = vld [vmem:[#allocation2 + $0x818] sm:$0xff] }
 0x759   : > { %v10330_v3 = vadd.f32 %v4759_v54, %v2771_v60  ;;  %v7703_v13 = vadd.f32 %v6585_v61, %v5109_v42  ;;  %v3301_v61 = vld [vmem:[#allocation2 + $0x1018] sm:$0xff] }
 0x75b   : > { %11331 = vst [vmem:[#allocation54_spill] sm:$0xff] %v10330_v3 }
 0x75c   : > { %8215 = vst [vmem:[%s9101_s18 + $0x688] sm:$0xff] %v7703_v13  ;;  %v1397_v37 = vpop.f32.mrf.mxu0  ;;  %v3994_v22 = vpop.f32.mrf.mxu1  ;;  %v5639_v13 = vld [vmem:[#allocation2 + $0x918] sm:$0xff] }
 0x75d   : > { %v2516_v46 = vadd.f32 %v10199_v21, %v1397_v37  ;;  %4809 = vmatmul.f32.gmra.mxu3 %v3300_v20  ;;  %6635 = vmatmul.f32.gmra.mxu2 %v5638_v6  ;;  %v449_v37 = vld [vmem:[#allocation2 + $0x718] sm:$0xff] }
 0x75f   : > { %v5110_v43 = vadd.f32 %v3994_v22, %v2516_v46  ;;  %1444 = vmatmul.f32.gmra.mxu0 %v448_v11  ;;  %4041 = vmatmul.f32.gmra.mxu1 %v3044_v56  ;;  %v11334_v46 = vld [vmem:[#allocation56_spill] sm:$0xff] }
 0x760   : > { %v4762_v25 = vpop.f32.mrf.mxu3  ;;  %v6588_v60 = vpop.f32.mrf.mxu2  ;;  %v2773_v11 = vadd.f32 %v10199_v21, %v11334_v46  ;;  %v3046_v46 = vld [vmem:[#allocation2 + $0x820] sm:$0xff] }
 0x761   : > { %v10336_v42 = vadd.f32 %v4762_v25, %v2772_v16  ;;  %v7704_v54 = vadd.f32 %v6588_v60, %v5110_v43  ;;  %v3302_v60 = vld [vmem:[#allocation2 + $0x1020] sm:$0xff] }
 0x763   : > { %11333 = vst [vmem:[#allocation55_spill] sm:$0xff] %v10336_v42 }
 0x764   : > { %8216 = vst [vmem:[%s9101_s18 + $0x690] sm:$0xff] %v7704_v54  ;;  %v1400_v3 = vpop.f32.mrf.mxu0  ;;  %v3997_v6 = vpop.f32.mrf.mxu1  ;;  %v5640_v54 = vld [vmem:[#allocation2 + $0x920] sm:$0xff] }
 0x765   : > { %v2517_v20 = vadd.f32 %v10199_v21, %v1400_v3  ;;  %4812 = vmatmul.f32.gmra.mxu3 %v3301_v61  ;;  %6638 = vmatmul.f32.gmra.mxu2 %v5639_v13  ;;  %v450_v3 = vld [vmem:[#allocation2 + $0x720] sm:$0xff] }
 0x767   : > { %v5111_v22 = vadd.f32 %v3997_v6, %v2517_v20  ;;  %1447 = vmatmul.f32.gmra.mxu0 %v449_v37  ;;  %4044 = vmatmul.f32.gmra.mxu1 %v3045_v57  ;;  %v11336_v20 = vld [vmem:[#allocation57_spill] sm:$0xff] }
 0x768   : > { %v4765_v56 = vpop.f32.mrf.mxu3  ;;  %v6591_v16 = vpop.f32.mrf.mxu2  ;;  %v2774_v37 = vadd.f32 %v10199_v21, %v11336_v20  ;;  %v3047_v20 = vld [vmem:[#allocation2 + $0x828] sm:$0xff] }
 0x769   : > { %v10342_v43 = vadd.f32 %v4765_v56, %v2773_v11  ;;  %v7705_v25 = vadd.f32 %v6591_v16, %v5111_v22  ;;  %v3303_v16 = vld [vmem:[#allocation2 + $0x1028] sm:$0xff] }
 0x76b   : > { %11335 = vst [vmem:[#allocation56_spill] sm:$0xff] %v10342_v43 }
 0x76c   : > { %8217 = vst [vmem:[%s9101_s18 + $0x698] sm:$0xff] %v7705_v25  ;;  %v1403_v42 = vpop.f32.mrf.mxu0  ;;  %v4000_v13 = vpop.f32.mrf.mxu1  ;;  %v5641_v25 = vld [vmem:[#allocation2 + $0x928] sm:$0xff] }
 0x76d   : > { %v2518_v61 = vadd.f32 %v10199_v21, %v1403_v42  ;;  %4815 = vmatmul.f32.gmra.mxu3 %v3302_v60  ;;  %6641 = vmatmul.f32.gmra.mxu2 %v5640_v54  ;;  %v451_v42 = vld [vmem:[#allocation2 + $0x728] sm:$0xff] }
 0x76f   : > { %v5112_v6 = vadd.f32 %v4000_v13, %v2518_v61  ;;  %1450 = vmatmul.f32.gmra.mxu0 %v450_v3  ;;  %4047 = vmatmul.f32.gmra.mxu1 %v3046_v46  ;;  %v11338_v61 = vld [vmem:[#allocation58_spill] sm:$0xff] }
 0x770   : > { %v4768_v57 = vpop.f32.mrf.mxu3  ;;  %v6594_v11 = vpop.f32.mrf.mxu2  ;;  %v2775_v3 = vadd.f32 %v10199_v21, %v11338_v61  ;;  %v3048_v61 = vld [vmem:[#allocation2 + $0x830] sm:$0xff] }
 0x771   : > { %v10348_v22 = vadd.f32 %v4768_v57, %v2774_v37  ;;  %v7706_v56 = vadd.f32 %v6594_v11, %v5112_v6  ;;  %v3304_v11 = vld [vmem:[#allocation2 + $0x1030] sm:$0xff] }
 0x773   : > { %11337 = vst [vmem:[#allocation57_spill] sm:$0xff] %v10348_v22 }
 0x774   : > { %8218 = vst [vmem:[%s9101_s18 + $0x6a0] sm:$0xff] %v7706_v56  ;;  %v1406_v43 = vpop.f32.mrf.mxu0  ;;  %v4003_v54 = vpop.f32.mrf.mxu1  ;;  %v5642_v56 = vld [vmem:[#allocation2 + $0x930] sm:$0xff] }
 0x775   : > { %v2519_v60 = vadd.f32 %v10199_v21, %v1406_v43  ;;  %4818 = vmatmul.f32.gmra.mxu3 %v3303_v16  ;;  %6644 = vmatmul.f32.gmra.mxu2 %v5641_v25  ;;  %v452_v43 = vld [vmem:[#allocation2 + $0x730] sm:$0xff] }
 0x777   : > { %v5113_v13 = vadd.f32 %v4003_v54, %v2519_v60  ;;  %1453 = vmatmul.f32.gmra.mxu0 %v451_v42  ;;  %4050 = vmatmul.f32.gmra.mxu1 %v3047_v20  ;;  %v11340_v60 = vld [vmem:[#allocation59_spill] sm:$0xff] }
 0x778   : > { %v4771_v46 = vpop.f32.mrf.mxu3  ;;  %v6597_v37 = vpop.f32.mrf.mxu2  ;;  %v2776_v42 = vadd.f32 %v10199_v21, %v11340_v60  ;;  %v3049_v60 = vld [vmem:[#allocation2 + $0x838] sm:$0xff] }
 0x779   : > { %v10354_v6 = vadd.f32 %v4771_v46, %v2775_v3  ;;  %v7707_v57 = vadd.f32 %v6597_v37, %v5113_v13  ;;  %v3305_v37 = vld [vmem:[#allocation2 + $0x1038] sm:$0xff] }
 0x77b   : > { %11339 = vst [vmem:[#allocation58_spill] sm:$0xff] %v10354_v6 }
 0x77c   : > { %8219 = vst [vmem:[%s9101_s18 + $0x6a8] sm:$0xff] %v7707_v57  ;;  %v1409_v22 = vpop.f32.mrf.mxu0  ;;  %v4006_v25 = vpop.f32.mrf.mxu1  ;;  %v5643_v57 = vld [vmem:[#allocation2 + $0x938] sm:$0xff] }
 0x77d   : > { %v2520_v16 = vadd.f32 %v10199_v21, %v1409_v22  ;;  %4821 = vmatmul.f32.gmra.mxu3 %v3304_v11  ;;  %6647 = vmatmul.f32.gmra.mxu2 %v5642_v56  ;;  %v453_v22 = vld [vmem:[#allocation2 + $0x738] sm:$0xff] }
 0x77f   : > { %v5114_v54 = vadd.f32 %v4006_v25, %v2520_v16  ;;  %1456 = vmatmul.f32.gmra.mxu0 %v452_v43  ;;  %4053 = vmatmul.f32.gmra.mxu1 %v3048_v61  ;;  %v11342_v16 = vld [vmem:[#allocation60_spill] sm:$0xff] }
 0x780   : > { %v4774_v20 = vpop.f32.mrf.mxu3  ;;  %v6600_v3 = vpop.f32.mrf.mxu2  ;;  %v2777_v43 = vadd.f32 %v10199_v21, %v11342_v16  ;;  %v3050_v16 = vld [vmem:[#allocation2 + $0x840] sm:$0xff] }
 0x781   : > { %v10360_v13 = vadd.f32 %v4774_v20, %v2776_v42  ;;  %v7708_v46 = vadd.f32 %v6600_v3, %v5114_v54  ;;  %v3306_v3 = vld [vmem:[#allocation2 + $0x1040] sm:$0xff] }
 0x783   : > { %11341 = vst [vmem:[#allocation59_spill] sm:$0xff] %v10360_v13 }
 0x784   : > { %8220 = vst [vmem:[%s9101_s18 + $0x6b0] sm:$0xff] %v7708_v46  ;;  %v1412_v6 = vpop.f32.mrf.mxu0  ;;  %v4009_v56 = vpop.f32.mrf.mxu1  ;;  %v5644_v46 = vld [vmem:[#allocation2 + $0x940] sm:$0xff] }
 0x785   : > { %v2521_v11 = vadd.f32 %v10199_v21, %v1412_v6  ;;  %4824 = vmatmul.f32.gmra.mxu3 %v3305_v37  ;;  %6650 = vmatmul.f32.gmra.mxu2 %v5643_v57  ;;  %v454_v6 = vld [vmem:[#allocation2 + $0x740] sm:$0xff] }
 0x787   : > { %v5115_v25 = vadd.f32 %v4009_v56, %v2521_v11  ;;  %1459 = vmatmul.f32.gmra.mxu0 %v453_v22  ;;  %4056 = vmatmul.f32.gmra.mxu1 %v3049_v60  ;;  %v11344_v11 = vld [vmem:[#allocation61_spill] sm:$0xff] }
 0x788   : > { %v4777_v61 = vpop.f32.mrf.mxu3  ;;  %v6603_v42 = vpop.f32.mrf.mxu2  ;;  %v2778_v22 = vadd.f32 %v10199_v21, %v11344_v11 }
 0x789   : > { %v10366_v54 = vadd.f32 %v4777_v61, %v2777_v43  ;;  %v7709_v20 = vadd.f32 %v6603_v42, %v5115_v25  ;;  %v3307_v42 = vld [vmem:[#allocation2 + $0x1048] sm:$0xff] }
 0x78b   : > { %11343 = vst [vmem:[#allocation60_spill] sm:$0xff] %v10366_v54 }
 0x78c   : > { %8221 = vst [vmem:[%s9101_s18 + $0x6b8] sm:$0xff] %v7709_v20  ;;  %v1415_v13 = vpop.f32.mrf.mxu0  ;;  %v4012_v57 = vpop.f32.mrf.mxu1  ;;  %v5645_v20 = vld [vmem:[#allocation2 + $0x948] sm:$0xff] }
 0x78d   : > { %v2522_v37 = vadd.f32 %v10199_v21, %v1415_v13  ;;  %4827 = vmatmul.f32.gmra.mxu3 %v3306_v3  ;;  %6653 = vmatmul.f32.gmra.mxu2 %v5644_v46  ;;  %v455_v13 = vld [vmem:[#allocation2 + $0x748] sm:$0xff]  ;;  %v10375_v3 = vld [vmem:[#allocation7] ss:$0 sm:$0xff] }
 0x78f   : > { %v5116_v56 = vadd.f32 %v4012_v57, %v2522_v37  ;;  %1462 = vmatmul.f32.gmra.mxu0 %v454_v6  ;;  %4059 = vmatmul.f32.gmra.mxu1 %v3050_v16  ;;  %v3051_v6 = vld [vmem:[#allocation2 + $0x848] sm:$0xff]  ;;  %v11346_v37 = vld [vmem:[#allocation62_spill] sm:$0xff] }
 0x790   : > { %v4780_v60 = vpop.f32.mrf.mxu3  ;;  %v6606_v43 = vpop.f32.mrf.mxu2  ;;  %v2779_v57 = vadd.f32 %v10375_v3, %v11346_v37  ;;  %v3052_v37 = vld [vmem:[#allocation2 + $0x850] sm:$0xff] }
 0x791   : > { %v10372_v25 = vadd.f32 %v4780_v60, %v2778_v22  ;;  %v7710_v61 = vadd.f32 %v6606_v43, %v5116_v56  ;;  %v3308_v43 = vld [vmem:[#allocation2 + $0x1050] sm:$0xff] }
 0x793   : > { %11345 = vst [vmem:[#allocation61_spill] sm:$0xff] %v10372_v25 }
 0x794   : > { %8222 = vst [vmem:[%s9101_s18 + $0x6c0] sm:$0xff] %v7710_v61  ;;  %v1418_v54 = vpop.f32.mrf.mxu0  ;;  %v4015_v21 = vpop.f32.mrf.mxu1  ;;  %v5646_v61 = vld [vmem:[#allocation2 + $0x950] sm:$0xff] }
 0x795   : > { %v2523_v46 = vadd.f32 %v10375_v3, %v1418_v54  ;;  %4830 = vmatmul.f32.gmra.mxu3 %v3307_v42  ;;  %6656 = vmatmul.f32.gmra.mxu2 %v5645_v20  ;;  %v456_v54 = vld [vmem:[#allocation2 + $0x750] sm:$0xff] }
 0x797   : > { %v5117_v16 = vadd.f32 %v4015_v21, %v2523_v46  ;;  %1465 = vmatmul.f32.gmra.mxu0 %v455_v13  ;;  %4062 = vmatmul.f32.gmra.mxu1 %v3051_v6  ;;  %v11348_v46 = vld [vmem:[#allocation63_spill] sm:$0xff] }
 0x798   : > { %v4783_v11 = vpop.f32.mrf.mxu3  ;;  %v6609_v22 = vpop.f32.mrf.mxu2  ;;  %v2780_v13 = vadd.f32 %v10375_v3, %v11348_v46  ;;  %v3053_v46 = vld [vmem:[#allocation2 + $0x858] sm:$0xff] }
 0x799   : > { %v10380_v56 = vadd.f32 %v4783_v11, %v2779_v57  ;;  %v7711_v60 = vadd.f32 %v6609_v22, %v5117_v16  ;;  %v3309_v22 = vld [vmem:[#allocation2 + $0x1058] sm:$0xff] }
 0x79b   : > { %11347 = vst [vmem:[#allocation62_spill] sm:$0xff] %v10380_v56 }
 0x79c   : > { %8223 = vst [vmem:[%s9101_s18 + $0x6c8] sm:$0xff] %v7711_v60  ;;  %v1421_v25 = vpop.f32.mrf.mxu0  ;;  %v4018_v20 = vpop.f32.mrf.mxu1  ;;  %v5647_v60 = vld [vmem:[#allocation2 + $0x958] sm:$0xff] }
 0x79d   : > { %v2524_v42 = vadd.f32 %v10375_v3, %v1421_v25  ;;  %4833 = vmatmul.f32.gmra.mxu3 %v3308_v43  ;;  %6659 = vmatmul.f32.gmra.mxu2 %v5646_v61  ;;  %v457_v25 = vld [vmem:[#allocation2 + $0x758] sm:$0xff] }
 0x79f   : > { %v5118_v21 = vadd.f32 %v4018_v20, %v2524_v42  ;;  %1468 = vmatmul.f32.gmra.mxu0 %v456_v54  ;;  %4065 = vmatmul.f32.gmra.mxu1 %v3052_v37  ;;  %v11350_v42 = vld [vmem:[#allocation64_spill] sm:$0xff] }
 0x7a0   : > { %v4786_v6 = vpop.f32.mrf.mxu3  ;;  %v6612_v57 = vpop.f32.mrf.mxu2  ;;  %v2781_v54 = vadd.f32 %v10375_v3, %v11350_v42  ;;  %v3054_v42 = vld [vmem:[#allocation2 + $0x860] sm:$0xff] }
 0x7a1   : > { %v10386_v16 = vadd.f32 %v4786_v6, %v2780_v13  ;;  %v7712_v11 = vadd.f32 %v6612_v57, %v5118_v21  ;;  %v3310_v57 = vld [vmem:[#allocation2 + $0x1060] sm:$0xff] }
 0x7a3   : > { %11349 = vst [vmem:[#allocation63_spill] sm:$0xff] %v10386_v16 }
 0x7a4   : > { %8224 = vst [vmem:[%s9101_s18 + $0x6d0] sm:$0xff] %v7712_v11  ;;  %v1424_v56 = vpop.f32.mrf.mxu0  ;;  %v4021_v61 = vpop.f32.mrf.mxu1  ;;  %v5648_v11 = vld [vmem:[#allocation2 + $0x960] sm:$0xff] }
 0x7a5   : > { %v2525_v43 = vadd.f32 %v10375_v3, %v1424_v56  ;;  %4836 = vmatmul.f32.gmra.mxu3 %v3309_v22  ;;  %6662 = vmatmul.f32.gmra.mxu2 %v5647_v60  ;;  %v458_v56 = vld [vmem:[#allocation2 + $0x760] sm:$0xff] }
 0x7a7   : > { %v5119_v20 = vadd.f32 %v4021_v61, %v2525_v43  ;;  %1471 = vmatmul.f32.gmra.mxu0 %v457_v25  ;;  %4068 = vmatmul.f32.gmra.mxu1 %v3053_v46  ;;  %v11352_v43 = vld [vmem:[#allocation65_spill] sm:$0xff] }
 0x7a8   : > { %v4789_v37 = vpop.f32.mrf.mxu3  ;;  %v6615_v13 = vpop.f32.mrf.mxu2  ;;  %v2782_v25 = vadd.f32 %v10375_v3, %v11352_v43  ;;  %v3055_v43 = vld [vmem:[#allocation2 + $0x868] sm:$0xff] }
 0x7a9   : > { %v10392_v21 = vadd.f32 %v4789_v37, %v2781_v54  ;;  %v7713_v6 = vadd.f32 %v6615_v13, %v5119_v20  ;;  %v3311_v13 = vld [vmem:[#allocation2 + $0x1068] sm:$0xff] }
 0x7ab   : > { %11351 = vst [vmem:[#allocation64_spill] sm:$0xff] %v10392_v21 }
 0x7ac   : > { %8225 = vst [vmem:[%s9101_s18 + $0x6d8] sm:$0xff] %v7713_v6  ;;  %v1427_v16 = vpop.f32.mrf.mxu0  ;;  %v4024_v60 = vpop.f32.mrf.mxu1  ;;  %v5649_v6 = vld [vmem:[#allocation2 + $0x968] sm:$0xff] }
 0x7ad   : > { %v2526_v22 = vadd.f32 %v10375_v3, %v1427_v16  ;;  %4839 = vmatmul.f32.gmra.mxu3 %v3310_v57  ;;  %6665 = vmatmul.f32.gmra.mxu2 %v5648_v11  ;;  %v459_v16 = vld [vmem:[#allocation2 + $0x768] sm:$0xff] }
 0x7af   : > { %v5120_v61 = vadd.f32 %v4024_v60, %v2526_v22  ;;  %1474 = vmatmul.f32.gmra.mxu0 %v458_v56  ;;  %4071 = vmatmul.f32.gmra.mxu1 %v3054_v42  ;;  %v11354_v22 = vld [vmem:[#allocation66_spill] sm:$0xff] }
 0x7b0   : > { %v4792_v46 = vpop.f32.mrf.mxu3  ;;  %v6618_v54 = vpop.f32.mrf.mxu2  ;;  %v2783_v56 = vadd.f32 %v10375_v3, %v11354_v22  ;;  %v3056_v22 = vld [vmem:[#allocation2 + $0x870] sm:$0xff] }
 0x7b1   : > { %v10398_v20 = vadd.f32 %v4792_v46, %v2782_v25  ;;  %v7714_v37 = vadd.f32 %v6618_v54, %v5120_v61  ;;  %v3312_v54 = vld [vmem:[#allocation2 + $0x1070] sm:$0xff] }
 0x7b3   : > { %11353 = vst [vmem:[#allocation65_spill] sm:$0xff] %v10398_v20 }
 0x7b4   : > { %8226 = vst [vmem:[%s9101_s18 + $0x6e0] sm:$0xff] %v7714_v37  ;;  %v1430_v21 = vpop.f32.mrf.mxu0  ;;  %v4027_v11 = vpop.f32.mrf.mxu1  ;;  %v5650_v37 = vld [vmem:[#allocation2 + $0x970] sm:$0xff] }
 0x7b5   : > { %v2527_v57 = vadd.f32 %v10375_v3, %v1430_v21  ;;  %4842 = vmatmul.f32.gmra.mxu3 %v3311_v13  ;;  %6668 = vmatmul.f32.gmra.mxu2 %v5649_v6  ;;  %v460_v21 = vld [vmem:[#allocation2 + $0x770] sm:$0xff] }
 0x7b7   : > { %v5121_v60 = vadd.f32 %v4027_v11, %v2527_v57  ;;  %1477 = vmatmul.f32.gmra.mxu0 %v459_v16  ;;  %4074 = vmatmul.f32.gmra.mxu1 %v3055_v43  ;;  %v11356_v57 = vld [vmem:[#allocation67_spill] sm:$0xff] }
 0x7b8   : > { %v4795_v42 = vpop.f32.mrf.mxu3  ;;  %v6621_v25 = vpop.f32.mrf.mxu2  ;;  %v2784_v16 = vadd.f32 %v10375_v3, %v11356_v57  ;;  %v3057_v57 = vld [vmem:[#allocation2 + $0x878] sm:$0xff] }
 0x7b9   : > { %v10404_v61 = vadd.f32 %v4795_v42, %v2783_v56  ;;  %v7715_v46 = vadd.f32 %v6621_v25, %v5121_v60  ;;  %v3313_v25 = vld [vmem:[#allocation2 + $0x1078] sm:$0xff] }
 0x7bb   : > { %11355 = vst [vmem:[#allocation66_spill] sm:$0xff] %v10404_v61 }
 0x7bc   : > { %8227 = vst [vmem:[%s9101_s18 + $0x6e8] sm:$0xff] %v7715_v46  ;;  %v1433_v20 = vpop.f32.mrf.mxu0  ;;  %v4030_v6 = vpop.f32.mrf.mxu1  ;;  %v5651_v46 = vld [vmem:[#allocation2 + $0x978] sm:$0xff] }
 0x7bd   : > { %v2528_v13 = vadd.f32 %v10375_v3, %v1433_v20  ;;  %4845 = vmatmul.f32.gmra.mxu3 %v3312_v54  ;;  %6671 = vmatmul.f32.gmra.mxu2 %v5650_v37  ;;  %v461_v20 = vld [vmem:[#allocation2 + $0x778] sm:$0xff] }
 0x7bf   : > { %v5122_v11 = vadd.f32 %v4030_v6, %v2528_v13  ;;  %1480 = vmatmul.f32.gmra.mxu0 %v460_v21  ;;  %4077 = vmatmul.f32.gmra.mxu1 %v3056_v22  ;;  %v11358_v13 = vld [vmem:[#allocation68_spill] sm:$0xff] }
 0x7c0   : > { %v4798_v43 = vpop.f32.mrf.mxu3  ;;  %v6624_v56 = vpop.f32.mrf.mxu2  ;;  %v2785_v21 = vadd.f32 %v10375_v3, %v11358_v13  ;;  %v3058_v13 = vld [vmem:[#allocation2 + $0x880] sm:$0xff] }
 0x7c1   : > { %v10410_v60 = vadd.f32 %v4798_v43, %v2784_v16  ;;  %v7716_v42 = vadd.f32 %v6624_v56, %v5122_v11  ;;  %v3314_v56 = vld [vmem:[#allocation2 + $0x1080] sm:$0xff] }
 0x7c3   : > { %11357 = vst [vmem:[#allocation67_spill] sm:$0xff] %v10410_v60 }
 0x7c4   : > { %8228 = vst [vmem:[%s9101_s18 + $0x6f0] sm:$0xff] %v7716_v42  ;;  %v1436_v61 = vpop.f32.mrf.mxu0  ;;  %v4033_v37 = vpop.f32.mrf.mxu1  ;;  %v5652_v42 = vld [vmem:[#allocation2 + $0x980] sm:$0xff] }
 0x7c5   : > { %v2529_v54 = vadd.f32 %v10375_v3, %v1436_v61  ;;  %4848 = vmatmul.f32.gmra.mxu3 %v3313_v25  ;;  %6674 = vmatmul.f32.gmra.mxu2 %v5651_v46  ;;  %v462_v61 = vld [vmem:[#allocation2 + $0x780] sm:$0xff] }
 0x7c7   : > { %v5123_v6 = vadd.f32 %v4033_v37, %v2529_v54  ;;  %1483 = vmatmul.f32.gmra.mxu0 %v461_v20  ;;  %4080 = vmatmul.f32.gmra.mxu1 %v3057_v57  ;;  %v11360_v54 = vld [vmem:[#allocation69_spill] sm:$0xff] }
 0x7c8   : > { %v4801_v22 = vpop.f32.mrf.mxu3  ;;  %v6627_v16 = vpop.f32.mrf.mxu2  ;;  %v2786_v20 = vadd.f32 %v10375_v3, %v11360_v54  ;;  %v3059_v54 = vld [vmem:[#allocation2 + $0x888] sm:$0xff] }
 0x7c9   : > { %v10416_v11 = vadd.f32 %v4801_v22, %v2785_v21  ;;  %v7717_v43 = vadd.f32 %v6627_v16, %v5123_v6  ;;  %v3315_v16 = vld [vmem:[#allocation2 + $0x1088] sm:$0xff] }
 0x7cb   : > { %11359 = vst [vmem:[#allocation68_spill] sm:$0xff] %v10416_v11 }
 0x7cc   : > { %8229 = vst [vmem:[%s9101_s18 + $0x6f8] sm:$0xff] %v7717_v43  ;;  %v1439_v60 = vpop.f32.mrf.mxu0  ;;  %v4036_v46 = vpop.f32.mrf.mxu1  ;;  %v5653_v43 = vld [vmem:[#allocation2 + $0x988] sm:$0xff] }
 0x7cd   : > { %v2530_v25 = vadd.f32 %v10375_v3, %v1439_v60  ;;  %4851 = vmatmul.f32.gmra.mxu3 %v3314_v56  ;;  %6677 = vmatmul.f32.gmra.mxu2 %v5652_v42  ;;  %v463_v60 = vld [vmem:[#allocation2 + $0x788] sm:$0xff] }
 0x7cf   : > { %v5124_v37 = vadd.f32 %v4036_v46, %v2530_v25  ;;  %1486 = vmatmul.f32.gmra.mxu0 %v462_v61  ;;  %4083 = vmatmul.f32.gmra.mxu1 %v3058_v13  ;;  %v11362_v25 = vld [vmem:[#allocation70_spill] sm:$0xff] }
 0x7d0   : > { %v4804_v57 = vpop.f32.mrf.mxu3  ;;  %v6630_v21 = vpop.f32.mrf.mxu2  ;;  %v2787_v61 = vadd.f32 %v10375_v3, %v11362_v25  ;;  %v3060_v25 = vld [vmem:[#allocation2 + $0x890] sm:$0xff] }
 0x7d1   : > { %v10422_v6 = vadd.f32 %v4804_v57, %v2786_v20  ;;  %v7718_v22 = vadd.f32 %v6630_v21, %v5124_v37  ;;  %v3316_v21 = vld [vmem:[#allocation2 + $0x1090] sm:$0xff] }
 0x7d3   : > { %11361 = vst [vmem:[#allocation69_spill] sm:$0xff] %v10422_v6 }
 0x7d4   : > { %8230 = vst [vmem:[%s9101_s18 + $0x700] sm:$0xff] %v7718_v22  ;;  %v1442_v11 = vpop.f32.mrf.mxu0  ;;  %v4039_v42 = vpop.f32.mrf.mxu1  ;;  %v5654_v22 = vld [vmem:[#allocation2 + $0x990] sm:$0xff] }
 0x7d5   : > { %v2531_v56 = vadd.f32 %v10375_v3, %v1442_v11  ;;  %4854 = vmatmul.f32.gmra.mxu3 %v3315_v16  ;;  %6680 = vmatmul.f32.gmra.mxu2 %v5653_v43  ;;  %v464_v11 = vld [vmem:[#allocation2 + $0x790] sm:$0xff] }
 0x7d7   : > { %v5125_v46 = vadd.f32 %v4039_v42, %v2531_v56  ;;  %1489 = vmatmul.f32.gmra.mxu0 %v463_v60  ;;  %4086 = vmatmul.f32.gmra.mxu1 %v3059_v54  ;;  %v11364_v56 = vld [vmem:[#allocation71_spill] sm:$0xff] }
 0x7d8   : > { %v4807_v13 = vpop.f32.mrf.mxu3  ;;  %v6633_v20 = vpop.f32.mrf.mxu2  ;;  %v2788_v60 = vadd.f32 %v10375_v3, %v11364_v56  ;;  %v3061_v56 = vld [vmem:[#allocation2 + $0x898] sm:$0xff] }
 0x7d9   : > { %v10428_v37 = vadd.f32 %v4807_v13, %v2787_v61  ;;  %v7719_v57 = vadd.f32 %v6633_v20, %v5125_v46  ;;  %v3317_v20 = vld [vmem:[#allocation2 + $0x1098] sm:$0xff] }
 0x7db   : > { %11363 = vst [vmem:[#allocation70_spill] sm:$0xff] %v10428_v37 }
 0x7dc   : > { %8231 = vst [vmem:[%s9101_s18 + $0x708] sm:$0xff] %v7719_v57  ;;  %v1445_v6 = vpop.f32.mrf.mxu0  ;;  %v4042_v43 = vpop.f32.mrf.mxu1  ;;  %v5655_v57 = vld [vmem:[#allocation2 + $0x998] sm:$0xff] }
 0x7dd   : > { %v2532_v16 = vadd.f32 %v10375_v3, %v1445_v6  ;;  %4857 = vmatmul.f32.gmra.mxu3 %v3316_v21  ;;  %6683 = vmatmul.f32.gmra.mxu2 %v5654_v22  ;;  %v465_v6 = vld [vmem:[#allocation2 + $0x798] sm:$0xff] }
 0x7df   : > { %v5126_v42 = vadd.f32 %v4042_v43, %v2532_v16  ;;  %1492 = vmatmul.f32.gmra.mxu0 %v464_v11  ;;  %4089 = vmatmul.f32.gmra.mxu1 %v3060_v25  ;;  %v11366_v16 = vld [vmem:[#allocation72_spill] sm:$0xff] }
 0x7e0   : > { %v4810_v54 = vpop.f32.mrf.mxu3  ;;  %v6636_v61 = vpop.f32.mrf.mxu2  ;;  %v2789_v11 = vadd.f32 %v10375_v3, %v11366_v16  ;;  %v3062_v16 = vld [vmem:[#allocation2 + $0x8a0] sm:$0xff] }
 0x7e1   : > { %v10434_v46 = vadd.f32 %v4810_v54, %v2788_v60  ;;  %v7720_v13 = vadd.f32 %v6636_v61, %v5126_v42  ;;  %v3318_v61 = vld [vmem:[#allocation2 + $0x10a0] sm:$0xff] }
 0x7e3   : > { %11365 = vst [vmem:[#allocation71_spill] sm:$0xff] %v10434_v46 }
 0x7e4   : > { %8232 = vst [vmem:[%s9101_s18 + $0x710] sm:$0xff] %v7720_v13  ;;  %v1448_v37 = vpop.f32.mrf.mxu0  ;;  %v4045_v22 = vpop.f32.mrf.mxu1  ;;  %v5656_v13 = vld [vmem:[#allocation2 + $0x9a0] sm:$0xff] }
 0x7e5   : > { %v2533_v21 = vadd.f32 %v10375_v3, %v1448_v37  ;;  %4860 = vmatmul.f32.gmra.mxu3 %v3317_v20  ;;  %6686 = vmatmul.f32.gmra.mxu2 %v5655_v57  ;;  %v466_v37 = vld [vmem:[#allocation2 + $0x7a0] sm:$0xff] }
 0x7e7   : > { %v5127_v43 = vadd.f32 %v4045_v22, %v2533_v21  ;;  %1495 = vmatmul.f32.gmra.mxu0 %v465_v6  ;;  %4092 = vmatmul.f32.gmra.mxu1 %v3061_v56  ;;  %v11368_v21 = vld [vmem:[#allocation73_spill] sm:$0xff] }
 0x7e8   : > { %v4813_v25 = vpop.f32.mrf.mxu3  ;;  %v6639_v60 = vpop.f32.mrf.mxu2  ;;  %v2790_v6 = vadd.f32 %v10375_v3, %v11368_v21  ;;  %v3063_v21 = vld [vmem:[#allocation2 + $0x8a8] sm:$0xff] }
 0x7e9   : > { %v10440_v42 = vadd.f32 %v4813_v25, %v2789_v11  ;;  %v7721_v54 = vadd.f32 %v6639_v60, %v5127_v43  ;;  %v3319_v60 = vld [vmem:[#allocation2 + $0x10a8] sm:$0xff] }
 0x7eb   : > { %11367 = vst [vmem:[#allocation72_spill] sm:$0xff] %v10440_v42 }
 0x7ec   : > { %8233 = vst [vmem:[%s9101_s18 + $0x718] sm:$0xff] %v7721_v54  ;;  %v1451_v46 = vpop.f32.mrf.mxu0  ;;  %v4048_v57 = vpop.f32.mrf.mxu1  ;;  %v5657_v54 = vld [vmem:[#allocation2 + $0x9a8] sm:$0xff] }
 0x7ed   : > { %v2534_v20 = vadd.f32 %v10375_v3, %v1451_v46  ;;  %4863 = vmatmul.f32.gmra.mxu3 %v3318_v61  ;;  %6689 = vmatmul.f32.gmra.mxu2 %v5656_v13  ;;  %v467_v46 = vld [vmem:[#allocation2 + $0x7a8] sm:$0xff] }
 0x7ef   : > { %v5128_v22 = vadd.f32 %v4048_v57, %v2534_v20  ;;  %1498 = vmatmul.f32.gmra.mxu0 %v466_v37  ;;  %4095 = vmatmul.f32.gmra.mxu1 %v3062_v16  ;;  %v11370_v20 = vld [vmem:[#allocation74_spill] sm:$0xff] }
 0x7f0   : > { %v4816_v56 = vpop.f32.mrf.mxu3  ;;  %v6642_v11 = vpop.f32.mrf.mxu2  ;;  %v2791_v37 = vadd.f32 %v10375_v3, %v11370_v20  ;;  %v3064_v20 = vld [vmem:[#allocation2 + $0x8b0] sm:$0xff] }
 0x7f1   : > { %v10446_v43 = vadd.f32 %v4816_v56, %v2790_v6  ;;  %v7722_v25 = vadd.f32 %v6642_v11, %v5128_v22  ;;  %v3320_v11 = vld [vmem:[#allocation2 + $0x10b0] sm:$0xff] }
 0x7f3   : > { %11369 = vst [vmem:[#allocation73_spill] sm:$0xff] %v10446_v43 }
 0x7f4   : > { %8234 = vst [vmem:[%s9101_s18 + $0x720] sm:$0xff] %v7722_v25  ;;  %v1454_v42 = vpop.f32.mrf.mxu0  ;;  %v4051_v13 = vpop.f32.mrf.mxu1  ;;  %v5658_v25 = vld [vmem:[#allocation2 + $0x9b0] sm:$0xff] }
 0x7f5   : > { %v2535_v61 = vadd.f32 %v10375_v3, %v1454_v42  ;;  %4866 = vmatmul.f32.gmra.mxu3 %v3319_v60  ;;  %6692 = vmatmul.f32.gmra.mxu2 %v5657_v54  ;;  %v468_v42 = vld [vmem:[#allocation2 + $0x7b0] sm:$0xff] }
 0x7f7   : > { %v5129_v57 = vadd.f32 %v4051_v13, %v2535_v61  ;;  %1501 = vmatmul.f32.gmra.mxu0 %v467_v46  ;;  %4098 = vmatmul.f32.gmra.mxu1 %v3063_v21  ;;  %v11372_v61 = vld [vmem:[#allocation75_spill] sm:$0xff] }
 0x7f8   : > { %v4819_v16 = vpop.f32.mrf.mxu3  ;;  %v6645_v6 = vpop.f32.mrf.mxu2  ;;  %v2792_v46 = vadd.f32 %v10375_v3, %v11372_v61  ;;  %v3065_v61 = vld [vmem:[#allocation2 + $0x8b8] sm:$0xff] }
 0x7f9   : > { %v10452_v22 = vadd.f32 %v4819_v16, %v2791_v37  ;;  %v7723_v56 = vadd.f32 %v6645_v6, %v5129_v57  ;;  %v3321_v6 = vld [vmem:[#allocation2 + $0x10b8] sm:$0xff] }
 0x7fb   : > { %11371 = vst [vmem:[#allocation74_spill] sm:$0xff] %v10452_v22 }
 0x7fc   : > { %8235 = vst [vmem:[%s9101_s18 + $0x728] sm:$0xff] %v7723_v56  ;;  %v1457_v43 = vpop.f32.mrf.mxu0  ;;  %v4054_v54 = vpop.f32.mrf.mxu1  ;;  %v5659_v56 = vld [vmem:[#allocation2 + $0x9b8] sm:$0xff] }
 0x7fd   : > { %v2536_v60 = vadd.f32 %v10375_v3, %v1457_v43  ;;  %4869 = vmatmul.f32.gmra.mxu3 %v3320_v11  ;;  %6695 = vmatmul.f32.gmra.mxu2 %v5658_v25  ;;  %v469_v43 = vld [vmem:[#allocation2 + $0x7b8] sm:$0xff] }
 0x7ff   : > { %v5130_v13 = vadd.f32 %v4054_v54, %v2536_v60  ;;  %1504 = vmatmul.f32.gmra.mxu0 %v468_v42  ;;  %4101 = vmatmul.f32.gmra.mxu1 %v3064_v20  ;;  %v11374_v60 = vld [vmem:[#allocation76_spill] sm:$0xff] }
 0x800   : > { %v4822_v21 = vpop.f32.mrf.mxu3  ;;  %v6648_v37 = vpop.f32.mrf.mxu2  ;;  %v2793_v42 = vadd.f32 %v10375_v3, %v11374_v60  ;;  %v3066_v60 = vld [vmem:[#allocation2 + $0x8c0] sm:$0xff] }
 0x801   : > { %v10458_v57 = vadd.f32 %v4822_v21, %v2792_v46  ;;  %v7724_v16 = vadd.f32 %v6648_v37, %v5130_v13  ;;  %v3322_v37 = vld [vmem:[#allocation2 + $0x10c0] sm:$0xff] }
 0x803   : > { %11373 = vst [vmem:[#allocation75_spill] sm:$0xff] %v10458_v57 }
 0x804   : > { %8236 = vst [vmem:[%s9101_s18 + $0x730] sm:$0xff] %v7724_v16  ;;  %v1460_v22 = vpop.f32.mrf.mxu0  ;;  %v4057_v25 = vpop.f32.mrf.mxu1  ;;  %v5660_v16 = vld [vmem:[#allocation2 + $0x9c0] sm:$0xff] }
 0x805   : > { %v2537_v11 = vadd.f32 %v10375_v3, %v1460_v22  ;;  %4872 = vmatmul.f32.gmra.mxu3 %v3321_v6  ;;  %6698 = vmatmul.f32.gmra.mxu2 %v5659_v56  ;;  %v470_v22 = vld [vmem:[#allocation2 + $0x7c0] sm:$0xff] }
 0x807   : > { %v5131_v54 = vadd.f32 %v4057_v25, %v2537_v11  ;;  %1507 = vmatmul.f32.gmra.mxu0 %v469_v43  ;;  %4104 = vmatmul.f32.gmra.mxu1 %v3065_v61  ;;  %v11376_v11 = vld [vmem:[#allocation77_spill] sm:$0xff] }
 0x808   : > { %v4825_v20 = vpop.f32.mrf.mxu3  ;;  %v6651_v46 = vpop.f32.mrf.mxu2  ;;  %v2794_v43 = vadd.f32 %v10375_v3, %v11376_v11  ;;  %v3067_v11 = vld [vmem:[#allocation2 + $0x8c8] sm:$0xff] }
 0x809   : > { %v10464_v13 = vadd.f32 %v4825_v20, %v2793_v42  ;;  %v7725_v21 = vadd.f32 %v6651_v46, %v5131_v54  ;;  %v3323_v46 = vld [vmem:[#allocation2 + $0x10c8] sm:$0xff] }
 0x80b   : > { %11375 = vst [vmem:[#allocation76_spill] sm:$0xff] %v10464_v13 }
 0x80c   : > { %8237 = vst [vmem:[%s9101_s18 + $0x738] sm:$0xff] %v7725_v21  ;;  %v1463_v57 = vpop.f32.mrf.mxu0  ;;  %v4060_v56 = vpop.f32.mrf.mxu1  ;;  %v5661_v21 = vld [vmem:[#allocation2 + $0x9c8] sm:$0xff] }
 0x80d   : > { %v2538_v6 = vadd.f32 %v10375_v3, %v1463_v57  ;;  %4875 = vmatmul.f32.gmra.mxu3 %v3322_v37  ;;  %6701 = vmatmul.f32.gmra.mxu2 %v5660_v16  ;;  %v471_v57 = vld [vmem:[#allocation2 + $0x7c8] sm:$0xff] }
 0x80f   : > { %v5132_v25 = vadd.f32 %v4060_v56, %v2538_v6  ;;  %1510 = vmatmul.f32.gmra.mxu0 %v470_v22  ;;  %4107 = vmatmul.f32.gmra.mxu1 %v3066_v60  ;;  %v11378_v6 = vld [vmem:[#allocation78_spill] sm:$0xff] }
 0x810   : > { %v4828_v61 = vpop.f32.mrf.mxu3  ;;  %v6654_v42 = vpop.f32.mrf.mxu2  ;;  %v2795_v22 = vadd.f32 %v10375_v3, %v11378_v6  ;;  %v3068_v6 = vld [vmem:[#allocation2 + $0x8d0] sm:$0xff] }
 0x811   : > { %v10470_v54 = vadd.f32 %v4828_v61, %v2794_v43  ;;  %v7726_v20 = vadd.f32 %v6654_v42, %v5132_v25  ;;  %v3324_v42 = vld [vmem:[#allocation2 + $0x10d0] sm:$0xff] }
 0x813   : > { %11377 = vst [vmem:[#allocation77_spill] sm:$0xff] %v10470_v54 }
 0x814   : > { %8238 = vst [vmem:[%s9101_s18 + $0x740] sm:$0xff] %v7726_v20  ;;  %v1466_v13 = vpop.f32.mrf.mxu0  ;;  %v4063_v16 = vpop.f32.mrf.mxu1  ;;  %v5662_v20 = vld [vmem:[#allocation2 + $0x9d0] sm:$0xff] }
 0x815   : > { %v2539_v37 = vadd.f32 %v10375_v3, %v1466_v13  ;;  %4878 = vmatmul.f32.gmra.mxu3 %v3323_v46  ;;  %6704 = vmatmul.f32.gmra.mxu2 %v5661_v21  ;;  %v472_v13 = vld [vmem:[#allocation2 + $0x7d0] sm:$0xff] }
 0x817   : > { %v5133_v56 = vadd.f32 %v4063_v16, %v2539_v37  ;;  %1513 = vmatmul.f32.gmra.mxu0 %v471_v57  ;;  %4110 = vmatmul.f32.gmra.mxu1 %v3067_v11  ;;  %v11380_v37 = vld [vmem:[#allocation79_spill] sm:$0xff] }
 0x818   : > { %v4831_v60 = vpop.f32.mrf.mxu3  ;;  %v6657_v43 = vpop.f32.mrf.mxu2  ;;  %v2796_v57 = vadd.f32 %v10375_v3, %v11380_v37  ;;  %v3069_v37 = vld [vmem:[#allocation2 + $0x8d8] sm:$0xff] }
 0x819   : > { %v10476_v25 = vadd.f32 %v4831_v60, %v2795_v22  ;;  %v7727_v61 = vadd.f32 %v6657_v43, %v5133_v56  ;;  %v3325_v43 = vld [vmem:[#allocation2 + $0x10d8] sm:$0xff] }
 0x81b   : > { %11379 = vst [vmem:[#allocation78_spill] sm:$0xff] %v10476_v25 }
 0x81c   : > { %8239 = vst [vmem:[%s9101_s18 + $0x748] sm:$0xff] %v7727_v61  ;;  %v1469_v54 = vpop.f32.mrf.mxu0  ;;  %v4066_v21 = vpop.f32.mrf.mxu1  ;;  %v5663_v61 = vld [vmem:[#allocation2 + $0x9d8] sm:$0xff] }
 0x81d   : > { %v2540_v46 = vadd.f32 %v10375_v3, %v1469_v54  ;;  %4881 = vmatmul.f32.gmra.mxu3 %v3324_v42  ;;  %6707 = vmatmul.f32.gmra.mxu2 %v5662_v20  ;;  %v473_v54 = vld [vmem:[#allocation2 + $0x7d8] sm:$0xff] }
 0x81f   : > { %v5134_v16 = vadd.f32 %v4066_v21, %v2540_v46  ;;  %1516 = vmatmul.f32.gmra.mxu0 %v472_v13  ;;  %4113 = vmatmul.f32.gmra.mxu1 %v3068_v6  ;;  %v11382_v46 = vld [vmem:[#allocation80_spill] sm:$0xff] }
 0x820   : > { %v4834_v11 = vpop.f32.mrf.mxu3  ;;  %v6660_v22 = vpop.f32.mrf.mxu2  ;;  %v2797_v13 = vadd.f32 %v10375_v3, %v11382_v46  ;;  %v3070_v46 = vld [vmem:[#allocation2 + $0x8e0] sm:$0xff] }
 0x821   : > { %v10482_v56 = vadd.f32 %v4834_v11, %v2796_v57  ;;  %v7728_v60 = vadd.f32 %v6660_v22, %v5134_v16  ;;  %v3326_v22 = vld [vmem:[#allocation2 + $0x10e0] sm:$0xff] }
 0x823   : > { %11381 = vst [vmem:[#allocation79_spill] sm:$0xff] %v10482_v56 }
 0x824   : > { %8240 = vst [vmem:[%s9101_s18 + $0x750] sm:$0xff] %v7728_v60  ;;  %v1472_v25 = vpop.f32.mrf.mxu0  ;;  %v4069_v20 = vpop.f32.mrf.mxu1  ;;  %v5664_v60 = vld [vmem:[#allocation2 + $0x9e0] sm:$0xff] }
 0x825   : > { %v2541_v42 = vadd.f32 %v10375_v3, %v1472_v25  ;;  %4884 = vmatmul.f32.gmra.mxu3 %v3325_v43  ;;  %6710 = vmatmul.f32.gmra.mxu2 %v5663_v61  ;;  %v474_v25 = vld [vmem:[#allocation2 + $0x7e0] sm:$0xff] }
 0x827   : > { %v5135_v21 = vadd.f32 %v4069_v20, %v2541_v42  ;;  %1519 = vmatmul.f32.gmra.mxu0 %v473_v54  ;;  %4116 = vmatmul.f32.gmra.mxu1 %v3069_v37  ;;  %v11384_v42 = vld [vmem:[#allocation81_spill] sm:$0xff] }
 0x828   : > { %v4837_v6 = vpop.f32.mrf.mxu3  ;;  %v6663_v57 = vpop.f32.mrf.mxu2  ;;  %v2798_v54 = vadd.f32 %v10375_v3, %v11384_v42  ;;  %v3071_v42 = vld [vmem:[#allocation2 + $0x8e8] sm:$0xff] }
 0x829   : > { %v10488_v16 = vadd.f32 %v4837_v6, %v2797_v13  ;;  %v7729_v11 = vadd.f32 %v6663_v57, %v5135_v21  ;;  %v3327_v57 = vld [vmem:[#allocation2 + $0x10e8] sm:$0xff] }
 0x82b   : > { %11383 = vst [vmem:[#allocation80_spill] sm:$0xff] %v10488_v16 }
 0x82c   : > { %8241 = vst [vmem:[%s9101_s18 + $0x758] sm:$0xff] %v7729_v11  ;;  %v1475_v56 = vpop.f32.mrf.mxu0  ;;  %v4072_v61 = vpop.f32.mrf.mxu1  ;;  %v5665_v11 = vld [vmem:[#allocation2 + $0x9e8] sm:$0xff] }
 0x82d   : > { %v2542_v43 = vadd.f32 %v10375_v3, %v1475_v56  ;;  %4887 = vmatmul.f32.gmra.mxu3 %v3326_v22  ;;  %6713 = vmatmul.f32.gmra.mxu2 %v5664_v60  ;;  %v475_v56 = vld [vmem:[#allocation2 + $0x7e8] sm:$0xff] }
 0x82f   : > { %v5136_v20 = vadd.f32 %v4072_v61, %v2542_v43  ;;  %1522 = vmatmul.f32.gmra.mxu0 %v474_v25  ;;  %4119 = vmatmul.f32.gmra.mxu1 %v3070_v46  ;;  %v11386_v43 = vld [vmem:[#allocation82_spill] sm:$0xff] }
 0x830   : > { %v4840_v37 = vpop.f32.mrf.mxu3  ;;  %v6666_v13 = vpop.f32.mrf.mxu2  ;;  %v2799_v25 = vadd.f32 %v10375_v3, %v11386_v43  ;;  %v3072_v43 = vld [vmem:[#allocation2 + $0x8f0] sm:$0xff] }
 0x831   : > { %v10494_v21 = vadd.f32 %v4840_v37, %v2798_v54  ;;  %v7730_v6 = vadd.f32 %v6666_v13, %v5136_v20  ;;  %v3328_v13 = vld [vmem:[#allocation2 + $0x10f0] sm:$0xff] }
 0x833   : > { %11385 = vst [vmem:[#allocation81_spill] sm:$0xff] %v10494_v21 }
 0x834   : > { %8242 = vst [vmem:[%s9101_s18 + $0x760] sm:$0xff] %v7730_v6  ;;  %v1478_v16 = vpop.f32.mrf.mxu0  ;;  %v4075_v60 = vpop.f32.mrf.mxu1  ;;  %v5666_v6 = vld [vmem:[#allocation2 + $0x9f0] sm:$0xff] }
 0x835   : > { %v2543_v22 = vadd.f32 %v10375_v3, %v1478_v16  ;;  %4890 = vmatmul.f32.gmra.mxu3 %v3327_v57  ;;  %6716 = vmatmul.f32.gmra.mxu2 %v5665_v11  ;;  %v476_v16 = vld [vmem:[#allocation2 + $0x7f0] sm:$0xff] }
 0x837   : > { %v5137_v61 = vadd.f32 %v4075_v60, %v2543_v22  ;;  %1525 = vmatmul.f32.gmra.mxu0 %v475_v56  ;;  %4122 = vmatmul.f32.gmra.mxu1 %v3071_v42  ;;  %v11388_v22 = vld [vmem:[#allocation83_spill] sm:$0xff] }
 0x838   : > { %v4843_v46 = vpop.f32.mrf.mxu3  ;;  %v6669_v54 = vpop.f32.mrf.mxu2  ;;  %v2800_v56 = vadd.f32 %v10375_v3, %v11388_v22  ;;  %v3073_v22 = vld [vmem:[#allocation2 + $0x8f8] sm:$0xff] }
 0x839   : > { %v10500_v20 = vadd.f32 %v4843_v46, %v2799_v25  ;;  %v7731_v37 = vadd.f32 %v6669_v54, %v5137_v61  ;;  %v3329_v54 = vld [vmem:[#allocation2 + $0x10f8] sm:$0xff] }
 0x83b   : > { %11387 = vst [vmem:[#allocation82_spill] sm:$0xff] %v10500_v20 }
 0x83c   : > { %8243 = vst [vmem:[%s9101_s18 + $0x768] sm:$0xff] %v7731_v37  ;;  %v1481_v21 = vpop.f32.mrf.mxu0  ;;  %v4078_v11 = vpop.f32.mrf.mxu1  ;;  %v5667_v37 = vld [vmem:[#allocation2 + $0x9f8] sm:$0xff] }
 0x83d   : > { %v2544_v57 = vadd.f32 %v10375_v3, %v1481_v21  ;;  %4893 = vmatmul.f32.gmra.mxu3 %v3328_v13  ;;  %6719 = vmatmul.f32.gmra.mxu2 %v5666_v6  ;;  %v477_v21 = vld [vmem:[#allocation2 + $0x7f8] sm:$0xff] }
 0x83f   : > { %v5138_v60 = vadd.f32 %v4078_v11, %v2544_v57  ;;  %1528 = vmatmul.f32.gmra.mxu0 %v476_v16  ;;  %4125 = vmatmul.f32.gmra.mxu1 %v3072_v43  ;;  %v11390_v57 = vld [vmem:[#allocation84_spill] sm:$0xff] }
 0x840   : > { %v4846_v42 = vpop.f32.mrf.mxu3  ;;  %v6672_v25 = vpop.f32.mrf.mxu2  ;;  %v2801_v16 = vadd.f32 %v10375_v3, %v11390_v57  ;;  %v3074_v57 = vld [vmem:[#allocation2 + $0x900] sm:$0xff] }
 0x841   : > { %v10506_v61 = vadd.f32 %v4846_v42, %v2800_v56  ;;  %v7732_v46 = vadd.f32 %v6672_v25, %v5138_v60  ;;  %v5668_v25 = vld [vmem:[#allocation2 + $0xa00] sm:$0xff] }
 0x843   : > { %11389 = vst [vmem:[#allocation83_spill] sm:$0xff] %v10506_v61 }
 0x844   : > { %8244 = vst [vmem:[%s9101_s18 + $0x770] sm:$0xff] %v7732_v46  ;;  %v1484_v20 = vpop.f32.mrf.mxu0  ;;  %v4081_v6 = vpop.f32.mrf.mxu1  ;;  %v5796_v46 = vld [vmem:[#allocation2 + $0xe00] sm:$0xff] }
 0x845   : > { %v2545_v13 = vadd.f32 %v10375_v3, %v1484_v20  ;;  %4896 = vmatmul.f32.gmra.mxu3 %v3329_v54  ;;  %6722 = vmatmul.f32.gmra.mxu2 %v5667_v37  ;;  %v478_v20 = vld [vmem:[#allocation2 + $0x800] sm:$0xff] }
 0x847   : > { %v5139_v11 = vadd.f32 %v4081_v6, %v2545_v13  ;;  %1531 = vmatmul.f32.gmra.mxu0 %v477_v21  ;;  %4128 = vmatmul.f32.gmra.mxu1 %v3073_v22  ;;  %v11392_v13 = vld [vmem:[#allocation85_spill] sm:$0xff] }
 0x848   : > { %v4849_v43 = vpop.f32.mrf.mxu3  ;;  %v6675_v56 = vpop.f32.mrf.mxu2  ;;  %v2802_v21 = vadd.f32 %v10375_v3, %v11392_v13  ;;  %v3075_v13 = vld [vmem:[#allocation2 + $0x908] sm:$0xff] }
 0x849   : > { %v10512_v60 = vadd.f32 %v4849_v43, %v2801_v16  ;;  %v7733_v42 = vadd.f32 %v6675_v56, %v5139_v11  ;;  %v5669_v56 = vld [vmem:[#allocation2 + $0xa08] sm:$0xff] }
 0x84b   : > { %11391 = vst [vmem:[#allocation84_spill] sm:$0xff] %v10512_v60 }
 0x84c   : > { %8245 = vst [vmem:[%s9101_s18 + $0x778] sm:$0xff] %v7733_v42  ;;  %v1487_v61 = vpop.f32.mrf.mxu0  ;;  %v4084_v37 = vpop.f32.mrf.mxu1  ;;  %v5797_v42 = vld [vmem:[#allocation2 + $0xe08] sm:$0xff] }
 0x84d   : > { %v2546_v54 = vadd.f32 %v10375_v3, %v1487_v61  ;;  %6725 = vmatmul.f32.gmra.mxu2 %v5668_v25  ;;  %7109 = vmatmul.f32.vlgmr.msra.gmra.mxu3 %v5796_v46  ;;  %v479_v61 = vld [vmem:[#allocation2 + $0x808] sm:$0xff] }
 0x84f   : > { %v5140_v6 = vadd.f32 %v4084_v37, %v2546_v54  ;;  %1534 = vmatmul.f32.gmra.mxu0 %v478_v20  ;;  %4131 = vmatmul.f32.gmra.mxu1 %v3074_v57  ;;  %v11394_v54 = vld [vmem:[#allocation86_spill] sm:$0xff] }
 0x850   : > { %v4852_v22 = vpop.f32.mrf.mxu3  ;;  %v6678_v16 = vpop.f32.mrf.mxu2  ;;  %v2803_v20 = vadd.f32 %v10375_v3, %v11394_v54  ;;  %v3076_v54 = vld [vmem:[#allocation2 + $0x910] sm:$0xff] }
 0x851   : > { %v10518_v11 = vadd.f32 %v4852_v22, %v2802_v21  ;;  %v7734_v43 = vadd.f32 %v6678_v16, %v5140_v6  ;;  %v5670_v16 = vld [vmem:[#allocation2 + $0xa10] sm:$0xff] }
 0x853   : > { %11393 = vst [vmem:[#allocation85_spill] sm:$0xff] %v10518_v11 }
 0x854   : > { %8246 = vst [vmem:[%s9101_s18 + $0x780] sm:$0xff] %v7734_v43  ;;  %v1490_v60 = vpop.f32.mrf.mxu0  ;;  %v4087_v46 = vpop.f32.mrf.mxu1  ;;  %v5798_v43 = vld [vmem:[#allocation2 + $0xe10] sm:$0xff] }
 0x855   : > { %v2547_v25 = vadd.f32 %v10375_v3, %v1490_v60  ;;  %6728 = vmatmul.f32.gmra.mxu2 %v5669_v56  ;;  %7112 = vmatmul.f32.gmra.mxu3 %v5797_v42  ;;  %v480_v60 = vld [vmem:[#allocation2 + $0x810] sm:$0xff] }
 0x857   : > { %v5141_v37 = vadd.f32 %v4087_v46, %v2547_v25  ;;  %1537 = vmatmul.f32.gmra.mxu0 %v479_v61  ;;  %4134 = vmatmul.f32.gmra.mxu1 %v3075_v13  ;;  %v11396_v25 = vld [vmem:[#allocation87_spill] sm:$0xff] }
 0x858   : > { %v4855_v57 = vpop.f32.mrf.mxu3  ;;  %v6681_v21 = vpop.f32.mrf.mxu2  ;;  %v2804_v61 = vadd.f32 %v10375_v3, %v11396_v25  ;;  %v3077_v25 = vld [vmem:[#allocation2 + $0x918] sm:$0xff] }
 0x859   : > { %v10524_v6 = vadd.f32 %v4855_v57, %v2803_v20  ;;  %v7735_v22 = vadd.f32 %v6681_v21, %v5141_v37  ;;  %v5671_v21 = vld [vmem:[#allocation2 + $0xa18] sm:$0xff] }
 0x85b   : > { %11395 = vst [vmem:[#allocation86_spill] sm:$0xff] %v10524_v6 }
 0x85c   : > { %8247 = vst [vmem:[%s9101_s18 + $0x788] sm:$0xff] %v7735_v22  ;;  %v1493_v11 = vpop.f32.mrf.mxu0  ;;  %v4090_v42 = vpop.f32.mrf.mxu1  ;;  %v5799_v22 = vld [vmem:[#allocation2 + $0xe18] sm:$0xff] }
 0x85d   : > { %v2548_v56 = vadd.f32 %v10375_v3, %v1493_v11  ;;  %6731 = vmatmul.f32.gmra.mxu2 %v5670_v16  ;;  %7115 = vmatmul.f32.gmra.mxu3 %v5798_v43  ;;  %v481_v11 = vld [vmem:[#allocation2 + $0x818] sm:$0xff] }
 0x85f   : > { %v5142_v46 = vadd.f32 %v4090_v42, %v2548_v56  ;;  %1540 = vmatmul.f32.gmra.mxu0 %v480_v60  ;;  %4137 = vmatmul.f32.gmra.mxu1 %v3076_v54  ;;  %v11398_v56 = vld [vmem:[#allocation88_spill] sm:$0xff] }
 0x860   : > { %v4858_v13 = vpop.f32.mrf.mxu3  ;;  %v6684_v20 = vpop.f32.mrf.mxu2  ;;  %v2805_v60 = vadd.f32 %v10375_v3, %v11398_v56  ;;  %v3078_v56 = vld [vmem:[#allocation2 + $0x920] sm:$0xff] }
 0x861   : > { %v10530_v37 = vadd.f32 %v4858_v13, %v2804_v61  ;;  %v7736_v57 = vadd.f32 %v6684_v20, %v5142_v46  ;;  %v5672_v20 = vld [vmem:[#allocation2 + $0xa20] sm:$0xff] }
 0x863   : > { %11397 = vst [vmem:[#allocation87_spill] sm:$0xff] %v10530_v37 }
 0x864   : > { %8248 = vst [vmem:[%s9101_s18 + $0x790] sm:$0xff] %v7736_v57  ;;  %v1496_v6 = vpop.f32.mrf.mxu0  ;;  %v4093_v43 = vpop.f32.mrf.mxu1  ;;  %v5800_v57 = vld [vmem:[#allocation2 + $0xe20] sm:$0xff] }
 0x865   : > { %v2549_v16 = vadd.f32 %v10375_v3, %v1496_v6  ;;  %6734 = vmatmul.f32.gmra.mxu2 %v5671_v21  ;;  %7118 = vmatmul.f32.gmra.mxu3 %v5799_v22  ;;  %v482_v6 = vld [vmem:[#allocation2 + $0x820] sm:$0xff] }
 0x867   : > { %v5143_v42 = vadd.f32 %v4093_v43, %v2549_v16  ;;  %1543 = vmatmul.f32.gmra.mxu0 %v481_v11  ;;  %4140 = vmatmul.f32.gmra.mxu1 %v3077_v25  ;;  %v11400_v16 = vld [vmem:[#allocation89_spill] sm:$0xff] }
 0x868   : > { %v4861_v54 = vpop.f32.mrf.mxu3  ;;  %v6687_v61 = vpop.f32.mrf.mxu2  ;;  %v2806_v11 = vadd.f32 %v10375_v3, %v11400_v16  ;;  %v3079_v16 = vld [vmem:[#allocation2 + $0x928] sm:$0xff] }
 0x869   : > { %v10536_v46 = vadd.f32 %v4861_v54, %v2805_v60  ;;  %v7737_v13 = vadd.f32 %v6687_v61, %v5143_v42  ;;  %v5673_v61 = vld [vmem:[#allocation2 + $0xa28] sm:$0xff] }
 0x86b   : > { %11399 = vst [vmem:[#allocation88_spill] sm:$0xff] %v10536_v46 }
 0x86c   : > { %8249 = vst [vmem:[%s9101_s18 + $0x798] sm:$0xff] %v7737_v13  ;;  %v1499_v37 = vpop.f32.mrf.mxu0  ;;  %v4096_v22 = vpop.f32.mrf.mxu1  ;;  %v5801_v13 = vld [vmem:[#allocation2 + $0xe28] sm:$0xff] }
 0x86d   : > { %v2550_v21 = vadd.f32 %v10375_v3, %v1499_v37  ;;  %6737 = vmatmul.f32.gmra.mxu2 %v5672_v20  ;;  %7121 = vmatmul.f32.gmra.mxu3 %v5800_v57  ;;  %v483_v37 = vld [vmem:[#allocation2 + $0x828] sm:$0xff] }
 0x86f   : > { %v5144_v43 = vadd.f32 %v4096_v22, %v2550_v21  ;;  %1546 = vmatmul.f32.gmra.mxu0 %v482_v6  ;;  %4143 = vmatmul.f32.gmra.mxu1 %v3078_v56  ;;  %v11402_v21 = vld [vmem:[#allocation90_spill] sm:$0xff] }
 0x870   : > { %v4864_v25 = vpop.f32.mrf.mxu3  ;;  %v6690_v60 = vpop.f32.mrf.mxu2  ;;  %v2807_v6 = vadd.f32 %v10375_v3, %v11402_v21 }
 0x871   : > { %v10542_v42 = vadd.f32 %v4864_v25, %v2806_v11  ;;  %v7738_v54 = vadd.f32 %v6690_v60, %v5144_v43  ;;  %v5674_v60 = vld [vmem:[#allocation2 + $0xa30] sm:$0xff] }
 0x873   : > { %11401 = vst [vmem:[#allocation89_spill] sm:$0xff] %v10542_v42 }
 0x874   : > { %8250 = vst [vmem:[%s9101_s18 + $0x7a0] sm:$0xff] %v7738_v54  ;;  %v1502_v46 = vpop.f32.mrf.mxu0  ;;  %v4099_v57 = vpop.f32.mrf.mxu1  ;;  %v5802_v54 = vld [vmem:[#allocation2 + $0xe30] sm:$0xff] }
 0x875   : > { %v2551_v20 = vadd.f32 %v10375_v3, %v1502_v46  ;;  %6740 = vmatmul.f32.gmra.mxu2 %v5673_v61  ;;  %7124 = vmatmul.f32.gmra.mxu3 %v5801_v13  ;;  %v484_v46 = vld [vmem:[#allocation2 + $0x830] sm:$0xff]  ;;  %v10551_v61 = vld [vmem:[#allocation7] ss:$0 sm:$0xff] }
 0x877   : > { %v5145_v22 = vadd.f32 %v4099_v57, %v2551_v20  ;;  %1549 = vmatmul.f32.gmra.mxu0 %v483_v37  ;;  %4146 = vmatmul.f32.gmra.mxu1 %v3079_v16  ;;  %v3080_v37 = vld [vmem:[#allocation2 + $0x930] sm:$0xff]  ;;  %v11404_v20 = vld [vmem:[#allocation91_spill] sm:$0xff] }
 0x878   : > { %v4867_v56 = vpop.f32.mrf.mxu3  ;;  %v6693_v11 = vpop.f32.mrf.mxu2  ;;  %v2808_v57 = vadd.f32 %v10551_v61, %v11404_v20  ;;  %v3081_v20 = vld [vmem:[#allocation2 + $0x938] sm:$0xff] }
 0x879   : > { %v10548_v43 = vadd.f32 %v4867_v56, %v2807_v6  ;;  %v7739_v25 = vadd.f32 %v6693_v11, %v5145_v22  ;;  %v5675_v11 = vld [vmem:[#allocation2 + $0xa38] sm:$0xff] }
 0x87b   : > { %11403 = vst [vmem:[#allocation90_spill] sm:$0xff] %v10548_v43 }
 0x87c   : > { %8251 = vst [vmem:[%s9101_s18 + $0x7a8] sm:$0xff] %v7739_v25  ;;  %v1505_v42 = vpop.f32.mrf.mxu0  ;;  %v4102_v3 = vpop.f32.mrf.mxu1  ;;  %v5803_v25 = vld [vmem:[#allocation2 + $0xe38] sm:$0xff] }
 0x87d   : > { %v2552_v13 = vadd.f32 %v10551_v61, %v1505_v42  ;;  %6743 = vmatmul.f32.gmra.mxu2 %v5674_v60  ;;  %7127 = vmatmul.f32.gmra.mxu3 %v5802_v54  ;;  %v485_v42 = vld [vmem:[#allocation2 + $0x838] sm:$0xff] }
 0x87f   : > { %v5146_v16 = vadd.f32 %v4102_v3, %v2552_v13  ;;  %1552 = vmatmul.f32.gmra.mxu0 %v484_v46  ;;  %4149 = vmatmul.f32.gmra.mxu1 %v3080_v37  ;;  %v11406_v13 = vld [vmem:[#allocation92_spill] sm:$0xff] }
 0x880   : > { %v4870_v21 = vpop.f32.mrf.mxu3  ;;  %v6696_v6 = vpop.f32.mrf.mxu2  ;;  %v2809_v46 = vadd.f32 %v10551_v61, %v11406_v13  ;;  %v3082_v13 = vld [vmem:[#allocation2 + $0x940] sm:$0xff] }
 0x881   : > { %v10556_v22 = vadd.f32 %v4870_v21, %v2808_v57  ;;  %v7740_v56 = vadd.f32 %v6696_v6, %v5146_v16  ;;  %v5676_v6 = vld [vmem:[#allocation2 + $0xa40] sm:$0xff] }
 0x883   : > { %11405 = vst [vmem:[#allocation91_spill] sm:$0xff] %v10556_v22 }
 0x884   : > { %8252 = vst [vmem:[%s9101_s18 + $0x7b0] sm:$0xff] %v7740_v56  ;;  %v1508_v43 = vpop.f32.mrf.mxu0  ;;  %v4105_v54 = vpop.f32.mrf.mxu1  ;;  %v5804_v56 = vld [vmem:[#allocation2 + $0xe40] sm:$0xff] }
 0x885   : > { %v2553_v60 = vadd.f32 %v10551_v61, %v1508_v43  ;;  %6746 = vmatmul.f32.gmra.mxu2 %v5675_v11  ;;  %7130 = vmatmul.f32.gmra.mxu3 %v5803_v25  ;;  %v486_v43 = vld [vmem:[#allocation2 + $0x840] sm:$0xff] }
 0x887   : > { %v5147_v3 = vadd.f32 %v4105_v54, %v2553_v60  ;;  %1555 = vmatmul.f32.gmra.mxu0 %v485_v42  ;;  %4152 = vmatmul.f32.gmra.mxu1 %v3081_v20  ;;  %v11408_v60 = vld [vmem:[#allocation93_spill] sm:$0xff] }
 0x888   : > { %v4873_v37 = vpop.f32.mrf.mxu3  ;;  %v6699_v57 = vpop.f32.mrf.mxu2  ;;  %v2810_v42 = vadd.f32 %v10551_v61, %v11408_v60  ;;  %v3083_v60 = vld [vmem:[#allocation2 + $0x948] sm:$0xff] }
 0x889   : > { %v10562_v16 = vadd.f32 %v4873_v37, %v2809_v46  ;;  %v7741_v21 = vadd.f32 %v6699_v57, %v5147_v3  ;;  %v5677_v57 = vld [vmem:[#allocation2 + $0xa48] sm:$0xff] }
 0x88b   : > { %11407 = vst [vmem:[#allocation92_spill] sm:$0xff] %v10562_v16 }
 0x88c   : > { %8253 = vst [vmem:[%s9101_s18 + $0x7b8] sm:$0xff] %v7741_v21  ;;  %v1511_v22 = vpop.f32.mrf.mxu0  ;;  %v4108_v25 = vpop.f32.mrf.mxu1  ;;  %v5805_v21 = vld [vmem:[#allocation2 + $0xe48] sm:$0xff] }
 0x88d   : > { %v2554_v11 = vadd.f32 %v10551_v61, %v1511_v22  ;;  %6749 = vmatmul.f32.gmra.mxu2 %v5676_v6  ;;  %7133 = vmatmul.f32.gmra.mxu3 %v5804_v56  ;;  %v487_v22 = vld [vmem:[#allocation2 + $0x848] sm:$0xff] }
 0x88f   : > { %v5148_v54 = vadd.f32 %v4108_v25, %v2554_v11  ;;  %1558 = vmatmul.f32.gmra.mxu0 %v486_v43  ;;  %4155 = vmatmul.f32.gmra.mxu1 %v3082_v13  ;;  %v11410_v11 = vld [vmem:[#allocation94_spill] sm:$0xff] }
 0x890   : > { %v4876_v20 = vpop.f32.mrf.mxu3  ;;  %v6702_v46 = vpop.f32.mrf.mxu2  ;;  %v2811_v43 = vadd.f32 %v10551_v61, %v11410_v11  ;;  %v3084_v11 = vld [vmem:[#allocation2 + $0x950] sm:$0xff] }
 0x891   : > { %v10568_v3 = vadd.f32 %v4876_v20, %v2810_v42  ;;  %v7742_v37 = vadd.f32 %v6702_v46, %v5148_v54  ;;  %v5678_v46 = vld [vmem:[#allocation2 + $0xa50] sm:$0xff] }
 0x893   : > { %11409 = vst [vmem:[#allocation93_spill] sm:$0xff] %v10568_v3 }
 0x894   : > { %8254 = vst [vmem:[%s9101_s18 + $0x7c0] sm:$0xff] %v7742_v37  ;;  %v1514_v16 = vpop.f32.mrf.mxu0  ;;  %v4111_v56 = vpop.f32.mrf.mxu1  ;;  %v5806_v37 = vld [vmem:[#allocation2 + $0xe50] sm:$0xff] }
 0x895   : > { %v2555_v6 = vadd.f32 %v10551_v61, %v1514_v16  ;;  %6752 = vmatmul.f32.gmra.mxu2 %v5677_v57  ;;  %7136 = vmatmul.f32.gmra.mxu3 %v5805_v21  ;;  %v488_v16 = vld [vmem:[#allocation2 + $0x850] sm:$0xff] }
 0x897   : > { %v5149_v25 = vadd.f32 %v4111_v56, %v2555_v6  ;;  %1561 = vmatmul.f32.gmra.mxu0 %v487_v22  ;;  %4158 = vmatmul.f32.gmra.mxu1 %v3083_v60  ;;  %v11412_v6 = vld [vmem:[#allocation95_spill] sm:$0xff] }
 0x898   : > { %v4879_v13 = vpop.f32.mrf.mxu3  ;;  %v6705_v42 = vpop.f32.mrf.mxu2  ;;  %v2812_v22 = vadd.f32 %v10551_v61, %v11412_v6  ;;  %v3085_v6 = vld [vmem:[#allocation2 + $0x958] sm:$0xff] }
 0x899   : > { %v10574_v54 = vadd.f32 %v4879_v13, %v2811_v43  ;;  %v7743_v20 = vadd.f32 %v6705_v42, %v5149_v25  ;;  %v5679_v42 = vld [vmem:[#allocation2 + $0xa58] sm:$0xff] }
 0x89b   : > { %11411 = vst [vmem:[#allocation94_spill] sm:$0xff] %v10574_v54 }
 0x89c   : > { %8255 = vst [vmem:[%s9101_s18 + $0x7c8] sm:$0xff] %v7743_v20  ;;  %v1517_v3 = vpop.f32.mrf.mxu0  ;;  %v4114_v21 = vpop.f32.mrf.mxu1  ;;  %v5807_v20 = vld [vmem:[#allocation2 + $0xe58] sm:$0xff] }
 0x89d   : > { %v2556_v57 = vadd.f32 %v10551_v61, %v1517_v3  ;;  %6755 = vmatmul.f32.gmra.mxu2 %v5678_v46  ;;  %7139 = vmatmul.f32.gmra.mxu3 %v5806_v37  ;;  %v489_v3 = vld [vmem:[#allocation2 + $0x858] sm:$0xff] }
 0x89f   : > { %v5150_v56 = vadd.f32 %v4114_v21, %v2556_v57  ;;  %1564 = vmatmul.f32.gmra.mxu0 %v488_v16  ;;  %4161 = vmatmul.f32.gmra.mxu1 %v3084_v11  ;;  %v11414_v57 = vld [vmem:[#allocation96_spill] sm:$0xff] }
 0x8a0   : > { %v4882_v60 = vpop.f32.mrf.mxu3  ;;  %v6708_v43 = vpop.f32.mrf.mxu2  ;;  %v2813_v16 = vadd.f32 %v10551_v61, %v11414_v57  ;;  %v3086_v57 = vld [vmem:[#allocation2 + $0x960] sm:$0xff] }
 0x8a1   : > { %v10580_v25 = vadd.f32 %v4882_v60, %v2812_v22  ;;  %v7744_v13 = vadd.f32 %v6708_v43, %v5150_v56  ;;  %v5680_v43 = vld [vmem:[#allocation2 + $0xa60] sm:$0xff] }
 0x8a3   : > { %11413 = vst [vmem:[#allocation95_spill] sm:$0xff] %v10580_v25 }
 0x8a4   : > { %8256 = vst [vmem:[%s9101_s18 + $0x7d0] sm:$0xff] %v7744_v13  ;;  %v1520_v54 = vpop.f32.mrf.mxu0  ;;  %v4117_v37 = vpop.f32.mrf.mxu1  ;;  %v5808_v13 = vld [vmem:[#allocation2 + $0xe60] sm:$0xff] }
 0x8a5   : > { %v2557_v46 = vadd.f32 %v10551_v61, %v1520_v54  ;;  %6758 = vmatmul.f32.gmra.mxu2 %v5679_v42  ;;  %7142 = vmatmul.f32.gmra.mxu3 %v5807_v20  ;;  %v490_v54 = vld [vmem:[#allocation2 + $0x860] sm:$0xff] }
 0x8a7   : > { %v5151_v21 = vadd.f32 %v4117_v37, %v2557_v46  ;;  %1567 = vmatmul.f32.gmra.mxu0 %v489_v3  ;;  %4164 = vmatmul.f32.gmra.mxu1 %v3085_v6  ;;  %v11416_v46 = vld [vmem:[#allocation97_spill] sm:$0xff] }
 0x8a8   : > { %v4885_v11 = vpop.f32.mrf.mxu3  ;;  %v6711_v22 = vpop.f32.mrf.mxu2  ;;  %v2814_v3 = vadd.f32 %v10551_v61, %v11416_v46  ;;  %v3087_v46 = vld [vmem:[#allocation2 + $0x968] sm:$0xff] }
 0x8a9   : > { %v10586_v56 = vadd.f32 %v4885_v11, %v2813_v16  ;;  %v7745_v60 = vadd.f32 %v6711_v22, %v5151_v21  ;;  %v5681_v22 = vld [vmem:[#allocation2 + $0xa68] sm:$0xff] }
 0x8ab   : > { %11415 = vst [vmem:[#allocation96_spill] sm:$0xff] %v10586_v56 }
 0x8ac   : > { %8257 = vst [vmem:[%s9101_s18 + $0x7d8] sm:$0xff] %v7745_v60  ;;  %v1523_v25 = vpop.f32.mrf.mxu0  ;;  %v4120_v20 = vpop.f32.mrf.mxu1  ;;  %v5809_v60 = vld [vmem:[#allocation2 + $0xe68] sm:$0xff] }
 0x8ad   : > { %v2558_v42 = vadd.f32 %v10551_v61, %v1523_v25  ;;  %6761 = vmatmul.f32.gmra.mxu2 %v5680_v43  ;;  %7145 = vmatmul.f32.gmra.mxu3 %v5808_v13  ;;  %v491_v25 = vld [vmem:[#allocation2 + $0x868] sm:$0xff] }
 0x8af   : > { %v5152_v37 = vadd.f32 %v4120_v20, %v2558_v42  ;;  %1570 = vmatmul.f32.gmra.mxu0 %v490_v54  ;;  %4167 = vmatmul.f32.gmra.mxu1 %v3086_v57  ;;  %v11418_v42 = vld [vmem:[#allocation98_spill] sm:$0xff] }
 0x8b0   : > { %v4888_v6 = vpop.f32.mrf.mxu3  ;;  %v6714_v16 = vpop.f32.mrf.mxu2  ;;  %v2815_v54 = vadd.f32 %v10551_v61, %v11418_v42  ;;  %v3088_v42 = vld [vmem:[#allocation2 + $0x970] sm:$0xff] }
 0x8b1   : > { %v10592_v21 = vadd.f32 %v4888_v6, %v2814_v3  ;;  %v7746_v11 = vadd.f32 %v6714_v16, %v5152_v37  ;;  %v5682_v16 = vld [vmem:[#allocation2 + $0xa70] sm:$0xff] }
 0x8b3   : > { %11417 = vst [vmem:[#allocation97_spill] sm:$0xff] %v10592_v21 }
 0x8b4   : > { %8258 = vst [vmem:[%s9101_s18 + $0x7e0] sm:$0xff] %v7746_v11  ;;  %v1526_v56 = vpop.f32.mrf.mxu0  ;;  %v4123_v13 = vpop.f32.mrf.mxu1  ;;  %v5810_v11 = vld [vmem:[#allocation2 + $0xe70] sm:$0xff] }
 0x8b5   : > { %v2559_v43 = vadd.f32 %v10551_v61, %v1526_v56  ;;  %6764 = vmatmul.f32.gmra.mxu2 %v5681_v22  ;;  %7148 = vmatmul.f32.gmra.mxu3 %v5809_v60  ;;  %v492_v56 = vld [vmem:[#allocation2 + $0x870] sm:$0xff] }
 0x8b7   : > { %v5153_v20 = vadd.f32 %v4123_v13, %v2559_v43  ;;  %1573 = vmatmul.f32.gmra.mxu0 %v491_v25  ;;  %4170 = vmatmul.f32.gmra.mxu1 %v3087_v46  ;;  %v11420_v43 = vld [vmem:[#allocation99_spill] sm:$0xff] }
 0x8b8   : > { %v4891_v57 = vpop.f32.mrf.mxu3  ;;  %v6717_v3 = vpop.f32.mrf.mxu2  ;;  %v2816_v25 = vadd.f32 %v10551_v61, %v11420_v43  ;;  %v3089_v43 = vld [vmem:[#allocation2 + $0x978] sm:$0xff] }
 0x8b9   : > { %v10598_v37 = vadd.f32 %v4891_v57, %v2815_v54  ;;  %v7747_v6 = vadd.f32 %v6717_v3, %v5153_v20  ;;  %v5683_v3 = vld [vmem:[#allocation2 + $0xa78] sm:$0xff] }
 0x8bb   : > { %11419 = vst [vmem:[#allocation98_spill] sm:$0xff] %v10598_v37 }
 0x8bc   : > { %8259 = vst [vmem:[%s9101_s18 + $0x7e8] sm:$0xff] %v7747_v6  ;;  %v1529_v21 = vpop.f32.mrf.mxu0  ;;  %v4126_v60 = vpop.f32.mrf.mxu1  ;;  %v5811_v6 = vld [vmem:[#allocation2 + $0xe78] sm:$0xff] }
 0x8bd   : > { %v2560_v22 = vadd.f32 %v10551_v61, %v1529_v21  ;;  %6767 = vmatmul.f32.gmra.mxu2 %v5682_v16  ;;  %7151 = vmatmul.f32.gmra.mxu3 %v5810_v11  ;;  %v493_v21 = vld [vmem:[#allocation2 + $0x878] sm:$0xff] }
 0x8bf   : > { %v5154_v13 = vadd.f32 %v4126_v60, %v2560_v22  ;;  %1576 = vmatmul.f32.gmra.mxu0 %v492_v56  ;;  %4173 = vmatmul.f32.gmra.mxu1 %v3088_v42  ;;  %v11422_v22 = vld [vmem:[#allocation100_spill] sm:$0xff] }
 0x8c0   : > { %v4894_v46 = vpop.f32.mrf.mxu3  ;;  %v6720_v54 = vpop.f32.mrf.mxu2  ;;  %v2817_v56 = vadd.f32 %v10551_v61, %v11422_v22 }
 0x8c1   : > { %v10604_v20 = vadd.f32 %v4894_v46, %v2816_v25  ;;  %v7748_v57 = vadd.f32 %v6720_v54, %v5154_v13  ;;  %v5684_v54 = vld [vmem:[#allocation2 + $0xa80] sm:$0xff] }
 0x8c3   : > { %11421 = vst [vmem:[#allocation99_spill] sm:$0xff] %v10604_v20 }
 0x8c4   : > { %8260 = vst [vmem:[%s9101_s18 + $0x7f0] sm:$0xff] %v7748_v57  ;;  %v1532_v37 = vpop.f32.mrf.mxu0  ;;  %v4129_v11 = vpop.f32.mrf.mxu1  ;;  %v5812_v57 = vld [vmem:[#allocation2 + $0xe80] sm:$0xff] }
 0x8c5   : > { %v2561_v16 = vadd.f32 %v10551_v61, %v1532_v37  ;;  %6770 = vmatmul.f32.gmra.mxu2 %v5683_v3  ;;  %7154 = vmatmul.f32.gmra.mxu3 %v5811_v6  ;;  %v494_v37 = vld [vmem:[#allocation2 + $0x880] sm:$0xff] }
 0x8c7   : > { %v5155_v60 = vadd.f32 %v4129_v11, %v2561_v16  ;;  %1579 = vmatmul.f32.gmra.mxu0 %v493_v21  ;;  %4176 = vmatmul.f32.gmra.mxu1 %v3089_v43  ;;  %v3090_v16 = vld [vmem:[#allocation2 + $0x980] sm:$0xff] }
 0x8c8   : > { %v4897_v42 = vpop.f32.mrf.mxu3  ;;  %v6723_v25 = vpop.f32.mrf.mxu2 }
 0x8c9   : > { %v10610_v13 = vadd.f32 %v4897_v42, %v2817_v56  ;;  %v7749_v46 = vadd.f32 %v6723_v25, %v5155_v60  ;;  %v5685_v60 = vld [vmem:[#allocation2 + $0xa88] sm:$0xff] }
 0x8ca   : > { %v5813_v42 = vld [vmem:[#allocation2 + $0xe88] sm:$0xff] }
 0x8cb   : > { %8261 = vst [vmem:[%s9101_s18 + $0x7f8] sm:$0xff] %v7749_v46  ;;  %v495_v46 = vld [vmem:[#allocation2 + $0x888] sm:$0xff] }
 0x8cc   : > { %v1535_v20 = vpop.f32.mrf.mxu0  ;;  %v4132_v6 = vpop.f32.mrf.mxu1 }
 0x8cd   : > { %v2562_v3 = vadd.f32 %v10551_v61, %v1535_v20  ;;  %6773 = vmatmul.f32.gmra.mxu2 %v5684_v54  ;;  %7157 = vmatmul.f32.gmra.mxu3 %v5812_v57  ;;  %v3091_v57 = vld [vmem:[#allocation2 + $0x988] sm:$0xff] }
 0x8cf   : > { %v5156_v21 = vadd.f32 %v4132_v6, %v2562_v3  ;;  %1582 = vmatmul.f32.gmra.mxu0 %v494_v37  ;;  %4179 = vmatmul.f32.gmra.mxu1 %v3090_v16 }
 0x8d0   : > { %v6726_v11 = vpop.f32.mrf.mxu2  ;;  %v7110_v43 = vpop.f32.mrf.mxu3 }
 0x8d1   : > { %v7750_v22 = vadd.f32 %v6726_v11, %v5156_v21  ;;  %v7878_v56 = vadd.f32 %v7110_v43, %v9838_v26  ;;  %v5686_v21 = vld [vmem:[#allocation2 + $0xa90] sm:$0xff] }
 0x8d2   : > { %v5814_v11 = vld [vmem:[#allocation2 + $0xe90] sm:$0xff] }
 0x8d3   : > { %8262 = vst [vmem:[%s9101_s18 + $0x800] sm:$0xff] %v7750_v22  ;;  %v496_v22 = vld [vmem:[#allocation2 + $0x890] sm:$0xff] }
 0x8d4   : > { %8390 = vst [vmem:[%s9101_s18 + $0xc00] sm:$0xff] %v7878_v56  ;;  %v1538_v25 = vpop.f32.mrf.mxu0  ;;  %v4135_v54 = vpop.f32.mrf.mxu1 }
 0x8d5   : > { %v2563_v20 = vadd.f32 %v10551_v61, %v1538_v25  ;;  %6776 = vmatmul.f32.gmra.mxu2 %v5685_v60  ;;  %7160 = vmatmul.f32.gmra.mxu3 %v5813_v42  ;;  %v3092_v42 = vld [vmem:[#allocation2 + $0x990] sm:$0xff] }
 0x8d7   : > { %v5157_v37 = vadd.f32 %v4135_v54, %v2563_v20  ;;  %1585 = vmatmul.f32.gmra.mxu0 %v495_v46  ;;  %4182 = vmatmul.f32.gmra.mxu1 %v3091_v57  ;;  %v5687_v57 = vld [vmem:[#allocation2 + $0xa98] sm:$0xff] }
 0x8d8   : > { %v6729_v3 = vpop.f32.mrf.mxu2  ;;  %v7113_v6 = vpop.f32.mrf.mxu3 }
 0x8d9   : > { %v7751_v26 = vadd.f32 %v6729_v3, %v5157_v37  ;;  %v7879_v16 = vadd.f32 %v7113_v6, %v9844_v32  ;;  %v5815_v37 = vld [vmem:[#allocation2 + $0xe98] sm:$0xff] }
 0x8da   : > { %v497_v6 = vld [vmem:[#allocation2 + $0x898] sm:$0xff] }
 0x8db   : > { %8263 = vst [vmem:[%s9101_s18 + $0x808] sm:$0xff] %v7751_v26 }
 0x8dc   : > { %8391 = vst [vmem:[%s9101_s18 + $0xc08] sm:$0xff] %v7879_v16  ;;  %v1541_v43 = vpop.f32.mrf.mxu0  ;;  %v4138_v60 = vpop.f32.mrf.mxu1 }
 0x8dd   : > { %v2564_v56 = vadd.f32 %v10551_v61, %v1541_v43  ;;  %6779 = vmatmul.f32.gmra.mxu2 %v5686_v21  ;;  %7163 = vmatmul.f32.gmra.mxu3 %v5814_v11  ;;  %v3093_v21 = vld [vmem:[#allocation2 + $0x998] sm:$0xff] }
 0x8df   : > { %v5158_v25 = vadd.f32 %v4138_v60, %v2564_v56  ;;  %1588 = vmatmul.f32.gmra.mxu0 %v496_v22  ;;  %4185 = vmatmul.f32.gmra.mxu1 %v3092_v42  ;;  %v5688_v60 = vld [vmem:[#allocation2 + $0xaa0] sm:$0xff] }
 0x8e0   : > { %v6732_v46 = vpop.f32.mrf.mxu2  ;;  %v7116_v20 = vpop.f32.mrf.mxu3  ;;  %v5816_v42 = vld [vmem:[#allocation2 + $0xea0] sm:$0xff] }
 0x8e1   : > { %v7752_v32 = vadd.f32 %v6732_v46, %v5158_v25  ;;  %v7880_v54 = vadd.f32 %v7116_v20, %v9852_v47  ;;  %v498_v46 = vld [vmem:[#allocation2 + $0x8a0] sm:$0xff] }
 0x8e3   : > { %8264 = vst [vmem:[%s9101_s18 + $0x810] sm:$0xff] %v7752_v32 }
 0x8e4   : > { %8392 = vst [vmem:[%s9101_s18 + $0xc10] sm:$0xff] %v7880_v54  ;;  %v1544_v3 = vpop.f32.mrf.mxu0  ;;  %v4141_v16 = vpop.f32.mrf.mxu1  ;;  %v3094_v54 = vld [vmem:[#allocation2 + $0x9a0] sm:$0xff] }
 0x8e5   : > { %v2565_v26 = vadd.f32 %v10551_v61, %v1544_v3  ;;  %6782 = vmatmul.f32.gmra.mxu2 %v5687_v57  ;;  %7166 = vmatmul.f32.gmra.mxu3 %v5815_v37 }
 0x8e7   : > { %v5159_v11 = vadd.f32 %v4141_v16, %v2565_v26  ;;  %1591 = vmatmul.f32.gmra.mxu0 %v497_v6  ;;  %4188 = vmatmul.f32.gmra.mxu1 %v3093_v21  ;;  %v5689_v26 = vld [vmem:[#allocation2 + $0xaa8] sm:$0xff] }
 0x8e8   : > { %v6735_v43 = vpop.f32.mrf.mxu2  ;;  %v7119_v22 = vpop.f32.mrf.mxu3  ;;  %v5817_v16 = vld [vmem:[#allocation2 + $0xea8] sm:$0xff] }
 0x8e9   : > { %v7753_v47 = vadd.f32 %v6735_v43, %v5159_v11  ;;  %v7881_v56 = vadd.f32 %v7119_v22, %v9858_v58  ;;  %v499_v11 = vld [vmem:[#allocation2 + $0x8a8] sm:$0xff] }
 0x8eb   : > { %8265 = vst [vmem:[%s9101_s18 + $0x818] sm:$0xff] %v7753_v47  ;;  %v3095_v47 = vld [vmem:[#allocation2 + $0x9a8] sm:$0xff] }
 0x8ec   : > { %8393 = vst [vmem:[%s9101_s18 + $0xc18] sm:$0xff] %v7881_v56  ;;  %v1547_v25 = vpop.f32.mrf.mxu0  ;;  %v4144_v32 = vpop.f32.mrf.mxu1 }
 0x8ed   : > { %v2566_v20 = vadd.f32 %v10551_v61, %v1547_v25  ;;  %6785 = vmatmul.f32.gmra.mxu2 %v5688_v60  ;;  %7169 = vmatmul.f32.gmra.mxu3 %v5816_v42 }
 0x8ef   : > { %v5160_v57 = vadd.f32 %v4144_v32, %v2566_v20  ;;  %1594 = vmatmul.f32.gmra.mxu0 %v498_v46  ;;  %4191 = vmatmul.f32.gmra.mxu1 %v3094_v54  ;;  %v5690_v46 = vld [vmem:[#allocation2 + $0xab0] sm:$0xff] }
 0x8f0   : > { %v6738_v37 = vpop.f32.mrf.mxu2  ;;  %v7122_v3 = vpop.f32.mrf.mxu3  ;;  %v5818_v20 = vld [vmem:[#allocation2 + $0xeb0] sm:$0xff] }
 0x8f1   : > { %v7754_v58 = vadd.f32 %v6738_v37, %v5160_v57  ;;  %v7882_v6 = vadd.f32 %v7122_v3, %v9864_v17  ;;  %v500_v54 = vld [vmem:[#allocation2 + $0x8b0] sm:$0xff] }
 0x8f2   : > { %v3096_v3 = vld [vmem:[#allocation2 + $0x9b0] sm:$0xff] }
 0x8f3   : > { %8266 = vst [vmem:[%s9101_s18 + $0x820] sm:$0xff] %v7754_v58 }
 0x8f4   : > { %8394 = vst [vmem:[%s9101_s18 + $0xc20] sm:$0xff] %v7882_v6  ;;  %v1550_v21 = vpop.f32.mrf.mxu0  ;;  %v4147_v22 = vpop.f32.mrf.mxu1 }
 0x8f5   : > { %v2567_v43 = vadd.f32 %v10551_v61, %v1550_v21  ;;  %6788 = vmatmul.f32.gmra.mxu2 %v5689_v26  ;;  %7172 = vmatmul.f32.gmra.mxu3 %v5817_v16  ;;  %v5691_v21 = vld [vmem:[#allocation2 + $0xab8] sm:$0xff] }
 0x8f7   : > { %v5161_v56 = vadd.f32 %v4147_v22, %v2567_v43  ;;  %1597 = vmatmul.f32.gmra.mxu0 %v499_v11  ;;  %4194 = vmatmul.f32.gmra.mxu1 %v3095_v47  ;;  %v5819_v11 = vld [vmem:[#allocation2 + $0xeb8] sm:$0xff] }
 0x8f8   : > { %v6741_v60 = vpop.f32.mrf.mxu2  ;;  %v7125_v42 = vpop.f32.mrf.mxu3  ;;  %v501_v22 = vld [vmem:[#allocation2 + $0x8b8] sm:$0xff] }
 0x8f9   : > { %v7755_v17 = vadd.f32 %v6741_v60, %v5161_v56  ;;  %v7883_v25 = vadd.f32 %v7125_v42, %v9870_v35  ;;  %v3097_v60 = vld [vmem:[#allocation2 + $0x9b8] sm:$0xff] }
 0x8fb   : > { %8267 = vst [vmem:[%s9101_s18 + $0x828] sm:$0xff] %v7755_v17 }
 0x8fc   : > { %8395 = vst [vmem:[%s9101_s18 + $0xc28] sm:$0xff] %v7883_v25  ;;  %v1553_v32 = vpop.f32.mrf.mxu0  ;;  %v4150_v37 = vpop.f32.mrf.mxu1 }
 0x8fd   : > { %v2568_v57 = vadd.f32 %v10551_v61, %v1553_v32  ;;  %6791 = vmatmul.f32.gmra.mxu2 %v5690_v46  ;;  %7175 = vmatmul.f32.gmra.mxu3 %v5818_v20  ;;  %v5692_v20 = vld [vmem:[#allocation2 + $0xac0] sm:$0xff] }
 0x8fe   : > { %v5820_v32 = vld [vmem:[#allocation2 + $0xec0] sm:$0xff] }
 0x8ff   : > { %v5162_v58 = vadd.f32 %v4150_v37, %v2568_v57  ;;  %1600 = vmatmul.f32.gmra.mxu0 %v500_v54  ;;  %4197 = vmatmul.f32.gmra.mxu1 %v3096_v3  ;;  %v502_v57 = vld [vmem:[#allocation2 + $0x8c0] sm:$0xff] }
 0x900   : > { %v6744_v6 = vpop.f32.mrf.mxu2  ;;  %v7128_v26 = vpop.f32.mrf.mxu3 }
 0x901   : > { %v7756_v35 = vadd.f32 %v6744_v6, %v5162_v58  ;;  %v7884_v16 = vadd.f32 %v7128_v26, %v9876_v36  ;;  %v3098_v58 = vld [vmem:[#allocation2 + $0x9c0] sm:$0xff] }
 0x903   : > { %8268 = vst [vmem:[%s9101_s18 + $0x830] sm:$0xff] %v7756_v35 }
 0x904   : > { %8396 = vst [vmem:[%s9101_s18 + $0xc30] sm:$0xff] %v7884_v16  ;;  %v1556_v43 = vpop.f32.mrf.mxu0  ;;  %v4153_v56 = vpop.f32.mrf.mxu1 }
 0x905   : > { %v2569_v47 = vadd.f32 %v10551_v61, %v1556_v43  ;;  %6794 = vmatmul.f32.gmra.mxu2 %v5691_v21  ;;  %7178 = vmatmul.f32.gmra.mxu3 %v5819_v11  ;;  %v5693_v21 = vld [vmem:[#allocation2 + $0xac8] sm:$0xff] }
 0x906   : > { %v5821_v11 = vld [vmem:[#allocation2 + $0xec8] sm:$0xff] }
 0x907   : > { %v5163_v42 = vadd.f32 %v4153_v56, %v2569_v47  ;;  %1603 = vmatmul.f32.gmra.mxu0 %v501_v22  ;;  %4200 = vmatmul.f32.gmra.mxu1 %v3097_v60  ;;  %v503_v22 = vld [vmem:[#allocation2 + $0x8c8] sm:$0xff] }
 0x908   : > { %v6747_v17 = vpop.f32.mrf.mxu2  ;;  %v7131_v25 = vpop.f32.mrf.mxu3  ;;  %v3099_v60 = vld [vmem:[#allocation2 + $0x9c8] sm:$0xff] }
 0x909   : > { %v7757_v36 = vadd.f32 %v6747_v17, %v5163_v42  ;;  %v7885_v46 = vadd.f32 %v7131_v25, %v9882_v2 }
 0x90b   : > { %8269 = vst [vmem:[%s9101_s18 + $0x838] sm:$0xff] %v7757_v36 }
 0x90c   : > { %8397 = vst [vmem:[%s9101_s18 + $0xc38] sm:$0xff] %v7885_v46  ;;  %v1559_v54 = vpop.f32.mrf.mxu0  ;;  %v4156_v3 = vpop.f32.mrf.mxu1  ;;  %v5694_v46 = vld [vmem:[#allocation2 + $0xad0] sm:$0xff] }
 0x90d   : > { %v2570_v37 = vadd.f32 %v10551_v61, %v1559_v54  ;;  %6797 = vmatmul.f32.gmra.mxu2 %v5692_v20  ;;  %7181 = vmatmul.f32.gmra.mxu3 %v5820_v32  ;;  %v5822_v20 = vld [vmem:[#allocation2 + $0xed0] sm:$0xff] }
 0x90e   : > { %v504_v54 = vld [vmem:[#allocation2 + $0x8d0] sm:$0xff] }
 0x90f   : > { %v5164_v6 = vadd.f32 %v4156_v3, %v2570_v37  ;;  %1606 = vmatmul.f32.gmra.mxu0 %v502_v57  ;;  %4203 = vmatmul.f32.gmra.mxu1 %v3098_v58  ;;  %v3100_v3 = vld [vmem:[#allocation2 + $0x9d0] sm:$0xff] }
 0x910   : > { %v6750_v26 = vpop.f32.mrf.mxu2  ;;  %v7134_v35 = vpop.f32.mrf.mxu3 }
 0x911   : > { %v7758_v2 = vadd.f32 %v6750_v26, %v5164_v6  ;;  %v7886_v16 = vadd.f32 %v7134_v35, %v9888_v41 }
 0x913   : > { %8270 = vst [vmem:[%s9101_s18 + $0x840] sm:$0xff] %v7758_v2  ;;  %v5695_v2 = vld [vmem:[#allocation2 + $0xad8] sm:$0xff] }
 0x914   : > { %8398 = vst [vmem:[%s9101_s18 + $0xc40] sm:$0xff] %v7886_v16  ;;  %v1562_v43 = vpop.f32.mrf.mxu0  ;;  %v4159_v56 = vpop.f32.mrf.mxu1  ;;  %v5823_v16 = vld [vmem:[#allocation2 + $0xed8] sm:$0xff] }
 0x915   : > { %v2571_v47 = vadd.f32 %v10551_v61, %v1562_v43  ;;  %6800 = vmatmul.f32.gmra.mxu2 %v5693_v21  ;;  %7184 = vmatmul.f32.gmra.mxu3 %v5821_v11  ;;  %v505_v11 = vld [vmem:[#allocation2 + $0x8d8] sm:$0xff] }
 0x917   : > { %v5165_v42 = vadd.f32 %v4159_v56, %v2571_v47  ;;  %1609 = vmatmul.f32.gmra.mxu0 %v503_v22  ;;  %4206 = vmatmul.f32.gmra.mxu1 %v3099_v60  ;;  %v3101_v47 = vld [vmem:[#allocation2 + $0x9d8] sm:$0xff] }
 0x918   : > { %v6753_v17 = vpop.f32.mrf.mxu2  ;;  %v7137_v25 = vpop.f32.mrf.mxu3 }
 0x919   : > { %v7759_v41 = vadd.f32 %v6753_v17, %v5165_v42  ;;  %v7887_v36 = vadd.f32 %v7137_v25, %v9894_v49  ;;  %v5696_v25 = vld [vmem:[#allocation2 + $0xae0] sm:$0xff] }
 0x91b   : > { %8271 = vst [vmem:[%s9101_s18 + $0x848] sm:$0xff] %v7759_v41  ;;  %v5824_v41 = vld [vmem:[#allocation2 + $0xee0] sm:$0xff] }
 0x91c   : > { %8399 = vst [vmem:[%s9101_s18 + $0xc48] sm:$0xff] %v7887_v36  ;;  %v1565_v32 = vpop.f32.mrf.mxu0  ;;  %v4162_v37 = vpop.f32.mrf.mxu1 }
 0x91d   : > { %v2572_v57 = vadd.f32 %v10551_v61, %v1565_v32  ;;  %6803 = vmatmul.f32.gmra.mxu2 %v5694_v46  ;;  %7187 = vmatmul.f32.gmra.mxu3 %v5822_v20  ;;  %v506_v46 = vld [vmem:[#allocation2 + $0x8e0] sm:$0xff] }
 0x91f   : > { %v5166_v58 = vadd.f32 %v4162_v37, %v2572_v57  ;;  %1612 = vmatmul.f32.gmra.mxu0 %v504_v54  ;;  %4209 = vmatmul.f32.gmra.mxu1 %v3100_v3  ;;  %v3102_v54 = vld [vmem:[#allocation2 + $0x9e0] sm:$0xff] }
 0x920   : > { %v6756_v6 = vpop.f32.mrf.mxu2  ;;  %v7140_v26 = vpop.f32.mrf.mxu3 }
 0x921   : > { %v7760_v49 = vadd.f32 %v6756_v6, %v5166_v58  ;;  %v7888_v35 = vadd.f32 %v7140_v26, %v9900_v14  ;;  %v5697_v6 = vld [vmem:[#allocation2 + $0xae8] sm:$0xff] }
 0x922   : > { %v5825_v26 = vld [vmem:[#allocation2 + $0xee8] sm:$0xff] }
 0x923   : > { %8272 = vst [vmem:[%s9101_s18 + $0x850] sm:$0xff] %v7760_v49 }
 0x924   : > { %8400 = vst [vmem:[%s9101_s18 + $0xc50] sm:$0xff] %v7888_v35  ;;  %v1568_v21 = vpop.f32.mrf.mxu0  ;;  %v4165_v22 = vpop.f32.mrf.mxu1  ;;  %v507_v35 = vld [vmem:[#allocation2 + $0x8e8] sm:$0xff] }
 0x925   : > { %v2573_v43 = vadd.f32 %v10551_v61, %v1568_v21  ;;  %6806 = vmatmul.f32.gmra.mxu2 %v5695_v2  ;;  %7190 = vmatmul.f32.gmra.mxu3 %v5823_v16  ;;  %v3103_v21 = vld [vmem:[#allocation2 + $0x9e8] sm:$0xff] }
 0x927   : > { %v5167_v56 = vadd.f32 %v4165_v22, %v2573_v43  ;;  %1615 = vmatmul.f32.gmra.mxu0 %v505_v11  ;;  %4212 = vmatmul.f32.gmra.mxu1 %v3101_v47 }
 0x928   : > { %v6759_v60 = vpop.f32.mrf.mxu2  ;;  %v7143_v42 = vpop.f32.mrf.mxu3 }
 0x929   : > { %v7761_v14 = vadd.f32 %v6759_v60, %v5167_v56  ;;  %v7889_v17 = vadd.f32 %v7143_v42, %v9906_v39  ;;  %v5698_v56 = vld [vmem:[#allocation2 + $0xaf0] sm:$0xff] }
 0x92a   : > { %v5826_v60 = vld [vmem:[#allocation2 + $0xef0] sm:$0xff] }
 0x92b   : > { %8273 = vst [vmem:[%s9101_s18 + $0x858] sm:$0xff] %v7761_v14  ;;  %v508_v14 = vld [vmem:[#allocation2 + $0x8f0] sm:$0xff] }
 0x92c   : > { %8401 = vst [vmem:[%s9101_s18 + $0xc58] sm:$0xff] %v7889_v17  ;;  %v1571_v36 = vpop.f32.mrf.mxu0  ;;  %v4168_v32 = vpop.f32.mrf.mxu1 }
 0x92d   : > { %v2574_v20 = vadd.f32 %v10551_v61, %v1571_v36  ;;  %6809 = vmatmul.f32.gmra.mxu2 %v5696_v25  ;;  %7193 = vmatmul.f32.gmra.mxu3 %v5824_v41  ;;  %v3104_v41 = vld [vmem:[#allocation2 + $0x9f0] sm:$0xff] }
 0x92f   : > { %v5168_v57 = vadd.f32 %v4168_v32, %v2574_v20  ;;  %1618 = vmatmul.f32.gmra.mxu0 %v506_v46  ;;  %4215 = vmatmul.f32.gmra.mxu1 %v3102_v54  ;;  %v5699_v54 = vld [vmem:[#allocation2 + $0xaf8] sm:$0xff] }
 0x930   : > { %v6762_v37 = vpop.f32.mrf.mxu2  ;;  %v7146_v3 = vpop.f32.mrf.mxu3 }
 0x931   : > { %v7762_v39 = vadd.f32 %v6762_v37, %v5168_v57  ;;  %v7890_v58 = vadd.f32 %v7146_v3, %v9912_v48  ;;  %v5827_v57 = vld [vmem:[#allocation2 + $0xef8] sm:$0xff] }
 0x932   : > { %v509_v3 = vld [vmem:[#allocation2 + $0x8f8] sm:$0xff] }
 0x933   : > { %8274 = vst [vmem:[%s9101_s18 + $0x860] sm:$0xff] %v7762_v39 }
 0x934   : > { %8402 = vst [vmem:[%s9101_s18 + $0xc60] sm:$0xff] %v7890_v58  ;;  %v1574_v49 = vpop.f32.mrf.mxu0  ;;  %v4171_v16 = vpop.f32.mrf.mxu1 }
 0x935   : > { %v2575_v2 = vadd.f32 %v10551_v61, %v1574_v49  ;;  %6812 = vmatmul.f32.gmra.mxu2 %v5697_v6  ;;  %7196 = vmatmul.f32.gmra.mxu3 %v5825_v26  ;;  %v3105_v6 = vld [vmem:[#allocation2 + $0x9f8] sm:$0xff] }
 0x937   : > { %v5169_v11 = vadd.f32 %v4171_v16, %v2575_v2  ;;  %1621 = vmatmul.f32.gmra.mxu0 %v507_v35  ;;  %4218 = vmatmul.f32.gmra.mxu1 %v3103_v21  ;;  %v5700_v16 = vld [vmem:[#allocation2 + $0xb00] sm:$0xff] }
 0x938   : > { %v6765_v43 = vpop.f32.mrf.mxu2  ;;  %v7149_v22 = vpop.f32.mrf.mxu3  ;;  %v5828_v21 = vld [vmem:[#allocation2 + $0xf00] sm:$0xff] }
 0x939   : > { %v7763_v48 = vadd.f32 %v6765_v43, %v5169_v11  ;;  %v7891_v47 = vadd.f32 %v7149_v22, %v9918_v24  ;;  %v510_v43 = vld [vmem:[#allocation2 + $0x900] sm:$0xff] }
 0x93b   : > { %8275 = vst [vmem:[%s9101_s18 + $0x868] sm:$0xff] %v7763_v48 }
 0x93c   : > { %8403 = vst [vmem:[%s9101_s18 + $0xc68] sm:$0xff] %v7891_v47  ;;  %v1577_v42 = vpop.f32.mrf.mxu0  ;;  %v4174_v25 = vpop.f32.mrf.mxu1  ;;  %v3106_v47 = vld [vmem:[#allocation2 + $0xa00] sm:$0xff] }
 0x93d   : > { %v2576_v17 = vadd.f32 %v10551_v61, %v1577_v42  ;;  %6815 = vmatmul.f32.gmra.mxu2 %v5698_v56  ;;  %7199 = vmatmul.f32.gmra.mxu3 %v5826_v60 }
 0x93f   : > { %v5170_v36 = vadd.f32 %v4174_v25, %v2576_v17  ;;  %1624 = vmatmul.f32.gmra.mxu0 %v508_v14  ;;  %4221 = vmatmul.f32.gmra.mxu1 %v3104_v41  ;;  %v5701_v17 = vld [vmem:[#allocation2 + $0xb08] sm:$0xff] }
 0x940   : > { %v6768_v46 = vpop.f32.mrf.mxu2  ;;  %v7152_v20 = vpop.f32.mrf.mxu3  ;;  %v5829_v25 = vld [vmem:[#allocation2 + $0xf08] sm:$0xff] }
 0x941   : > { %v7764_v24 = vadd.f32 %v6768_v46, %v5170_v36  ;;  %v7892_v32 = vadd.f32 %v7152_v20, %v9924_v53  ;;  %v511_v36 = vld [vmem:[#allocation2 + $0x908] sm:$0xff] }
 0x943   : > { %8276 = vst [vmem:[%s9101_s18 + $0x870] sm:$0xff] %v7764_v24  ;;  %v3107_v24 = vld [vmem:[#allocation2 + $0xa08] sm:$0xff] }
 0x944   : > { %8404 = vst [vmem:[%s9101_s18 + $0xc70] sm:$0xff] %v7892_v32  ;;  %v1580_v37 = vpop.f32.mrf.mxu0  ;;  %v4177_v58 = vpop.f32.mrf.mxu1 }
 0x945   : > { %v2577_v39 = vadd.f32 %v10551_v61, %v1580_v37  ;;  %6818 = vmatmul.f32.gmra.mxu2 %v5699_v54  ;;  %7202 = vmatmul.f32.gmra.mxu3 %v5827_v57 }
 0x947   : > { %v5171_v26 = vadd.f32 %v4177_v58, %v2577_v39  ;;  %1627 = vmatmul.f32.gmra.mxu0 %v509_v3  ;;  %4224 = vmatmul.f32.gmra.mxu1 %v3105_v6  ;;  %v5702_v3 = vld [vmem:[#allocation2 + $0xb10] sm:$0xff] }
 0x948   : > { %v6771_v49 = vpop.f32.mrf.mxu2  ;;  %v7155_v35 = vpop.f32.mrf.mxu3  ;;  %v5830_v39 = vld [vmem:[#allocation2 + $0xf10] sm:$0xff] }
 0x949   : > { %v7765_v53 = vadd.f32 %v6771_v49, %v5171_v26  ;;  %v7893_v2 = vadd.f32 %v7155_v35, %v9930_v7  ;;  %v512_v6 = vld [vmem:[#allocation2 + $0x910] sm:$0xff] }
 0x94a   : > { %v3108_v35 = vld [vmem:[#allocation2 + $0xa10] sm:$0xff] }
 0x94b   : > { %8277 = vst [vmem:[%s9101_s18 + $0x878] sm:$0xff] %v7765_v53 }
 0x94c   : > { %8405 = vst [vmem:[%s9101_s18 + $0xc78] sm:$0xff] %v7893_v2  ;;  %v1583_v11 = vpop.f32.mrf.mxu0  ;;  %v4180_v48 = vpop.f32.mrf.mxu1 }
 0x94d   : > { %v2578_v22 = vadd.f32 %v10551_v61, %v1583_v11  ;;  %6821 = vmatmul.f32.gmra.mxu2 %v5700_v16  ;;  %7205 = vmatmul.f32.gmra.mxu3 %v5828_v21  ;;  %v5703_v11 = vld [vmem:[#allocation2 + $0xb18] sm:$0xff] }
 0x94f   : > { %v5172_v56 = vadd.f32 %v4180_v48, %v2578_v22  ;;  %1630 = vmatmul.f32.gmra.mxu0 %v510_v43  ;;  %4227 = vmatmul.f32.gmra.mxu1 %v3106_v47  ;;  %v5831_v43 = vld [vmem:[#allocation2 + $0xf18] sm:$0xff] }
 0x950   : > { %v6774_v60 = vpop.f32.mrf.mxu2  ;;  %v7158_v42 = vpop.f32.mrf.mxu3  ;;  %v513_v48 = vld [vmem:[#allocation2 + $0x918] sm:$0xff] }
 0x951   : > { %v7766_v7 = vadd.f32 %v6774_v60, %v5172_v56  ;;  %v7894_v14 = vadd.f32 %v7158_v42, %v9936_v4  ;;  %v3109_v60 = vld [vmem:[#allocation2 + $0xa18] sm:$0xff] }
 0x953   : > { %8278 = vst [vmem:[%s9101_s18 + $0x880] sm:$0xff] %v7766_v7 }
 0x954   : > { %8406 = vst [vmem:[%s9101_s18 + $0xc80] sm:$0xff] %v7894_v14  ;;  %v1586_v41 = vpop.f32.mrf.mxu0  ;;  %v4183_v20 = vpop.f32.mrf.mxu1 }
 0x955   : > { %v2579_v46 = vadd.f32 %v10551_v61, %v1586_v41  ;;  %6824 = vmatmul.f32.gmra.mxu2 %v5701_v17  ;;  %7208 = vmatmul.f32.gmra.mxu3 %v5829_v25  ;;  %v5704_v25 = vld [vmem:[#allocation2 + $0xb20] sm:$0xff] }
 0x956   : > { %v5832_v41 = vld [vmem:[#allocation2 + $0xf20] sm:$0xff] }
 0x957   : > { %v5173_v32 = vadd.f32 %v4183_v20, %v2579_v46  ;;  %1633 = vmatmul.f32.gmra.mxu0 %v511_v36  ;;  %4230 = vmatmul.f32.gmra.mxu1 %v3107_v24  ;;  %v514_v46 = vld [vmem:[#allocation2 + $0x920] sm:$0xff] }
 0x958   : > { %v6777_v54 = vpop.f32.mrf.mxu2  ;;  %v7161_v57 = vpop.f32.mrf.mxu3 }
 0x959   : > { %v7767_v4 = vadd.f32 %v6777_v54, %v5173_v32  ;;  %v7895_v37 = vadd.f32 %v7161_v57, %v9942_v8  ;;  %v3110_v32 = vld [vmem:[#allocation2 + $0xa20] sm:$0xff] }
 0x95b   : > { %8279 = vst [vmem:[%s9101_s18 + $0x888] sm:$0xff] %v7767_v4 }
 0x95c   : > { %8407 = vst [vmem:[%s9101_s18 + $0xc88] sm:$0xff] %v7895_v37  ;;  %v1589_v58 = vpop.f32.mrf.mxu0  ;;  %v4186_v49 = vpop.f32.mrf.mxu1 }
 0x95d   : > { %v2580_v26 = vadd.f32 %v10551_v61, %v1589_v58  ;;  %6827 = vmatmul.f32.gmra.mxu2 %v5702_v3  ;;  %7211 = vmatmul.f32.gmra.mxu3 %v5830_v39  ;;  %v10689_v61 = vld [vmem:[#allocation7] ss:$0 sm:$0xff]  ;;  %v5705_v3 = vld [vmem:[#allocation2 + $0xb28] sm:$0xff] }
 0x95e   : > { %v5833_v39 = vld [vmem:[#allocation2 + $0xf28] sm:$0xff] }
 0x95f   : > { %v5174_v53 = vadd.f32 %v4186_v49, %v2580_v26  ;;  %1636 = vmatmul.f32.gmra.mxu0 %v512_v6  ;;  %4233 = vmatmul.f32.gmra.mxu1 %v3108_v35  ;;  %v515_v6 = vld [vmem:[#allocation2 + $0x928] sm:$0xff] }
 0x960   : > { %v6780_v2 = vpop.f32.mrf.mxu2  ;;  %v7164_v16 = vpop.f32.mrf.mxu3  ;;  %v3111_v35 = vld [vmem:[#allocation2 + $0xa28] sm:$0xff] }
 0x961   : > { %v7768_v8 = vadd.f32 %v6780_v2, %v5174_v53  ;;  %v7896_v21 = vadd.f32 %v7164_v16, %v9948_v38 }
 0x963   : > { %8280 = vst [vmem:[%s9101_s18 + $0x890] sm:$0xff] %v7768_v8 }
 0x964   : > { %8408 = vst [vmem:[%s9101_s18 + $0xc90] sm:$0xff] %v7896_v21  ;;  %v1592_v22 = vpop.f32.mrf.mxu0  ;;  %v4189_v56 = vpop.f32.mrf.mxu1  ;;  %v5706_v21 = vld [vmem:[#allocation2 + $0xb30] sm:$0xff] }
 0x965   : > { %v2581_v47 = vadd.f32 %v10689_v61, %v1592_v22  ;;  %6830 = vmatmul.f32.gmra.mxu2 %v5703_v11  ;;  %7214 = vmatmul.f32.gmra.mxu3 %v5831_v43  ;;  %v5834_v11 = vld [vmem:[#allocation2 + $0xf30] sm:$0xff] }
 0x966   : > { %v516_v22 = vld [vmem:[#allocation2 + $0x930] sm:$0xff] }
 0x967   : > { %v5175_v42 = vadd.f32 %v4189_v56, %v2581_v47  ;;  %1639 = vmatmul.f32.gmra.mxu0 %v513_v48  ;;  %4236 = vmatmul.f32.gmra.mxu1 %v3109_v60  ;;  %v3112_v56 = vld [vmem:[#allocation2 + $0xa30] sm:$0xff] }
 0x968   : > { %v6783_v7 = vpop.f32.mrf.mxu2  ;;  %v7167_v38 = vpop.f32.mrf.mxu3 }
 0x969   : > { %v7769_v14 = vadd.f32 %v6783_v7, %v5175_v42  ;;  %v7897_v17 = vadd.f32 %v7167_v38, %v9954_v52 }
 0x96b   : > { %8281 = vst [vmem:[%s9101_s18 + $0x898] sm:$0xff] %v7769_v14  ;;  %v5707_v14 = vld [vmem:[#allocation2 + $0xb38] sm:$0xff] }
 0x96c   : > { %8409 = vst [vmem:[%s9101_s18 + $0xc98] sm:$0xff] %v7897_v17  ;;  %v1595_v36 = vpop.f32.mrf.mxu0  ;;  %v4192_v24 = vpop.f32.mrf.mxu1  ;;  %v5835_v17 = vld [vmem:[#allocation2 + $0xf38] sm:$0xff] }
 0x96d   : > { %v2582_v20 = vadd.f32 %v10689_v61, %v1595_v36  ;;  %6833 = vmatmul.f32.gmra.mxu2 %v5704_v25  ;;  %7217 = vmatmul.f32.gmra.mxu3 %v5832_v41  ;;  %v517_v41 = vld [vmem:[#allocation2 + $0x938] sm:$0xff] }
 0x96f   : > { %v5176_v54 = vadd.f32 %v4192_v24, %v2582_v20  ;;  %1642 = vmatmul.f32.gmra.mxu0 %v514_v46  ;;  %4239 = vmatmul.f32.gmra.mxu1 %v3110_v32  ;;  %v3113_v20 = vld [vmem:[#allocation2 + $0xa38] sm:$0xff] }
 0x970   : > { %v6786_v57 = vpop.f32.mrf.mxu2  ;;  %v7170_v4 = vpop.f32.mrf.mxu3 }
 0x971   : > { %v7770_v52 = vadd.f32 %v6786_v57, %v5176_v54  ;;  %v7898_v37 = vadd.f32 %v7170_v4, %v9960_v12  ;;  %v5708_v4 = vld [vmem:[#allocation2 + $0xb40] sm:$0xff] }
 0x973   : > { %8282 = vst [vmem:[%s9101_s18 + $0x8a0] sm:$0xff] %v7770_v52  ;;  %v5836_v52 = vld [vmem:[#allocation2 + $0xf40] sm:$0xff] }
 0x974   : > { %8410 = vst [vmem:[%s9101_s18 + $0xca0] sm:$0xff] %v7898_v37  ;;  %v1598_v58 = vpop.f32.mrf.mxu0  ;;  %v4195_v49 = vpop.f32.mrf.mxu1 }
 0x975   : > { %v2583_v26 = vadd.f32 %v10689_v61, %v1598_v58  ;;  %6836 = vmatmul.f32.gmra.mxu2 %v5705_v3  ;;  %7220 = vmatmul.f32.gmra.mxu3 %v5833_v39  ;;  %v518_v3 = vld [vmem:[#allocation2 + $0x940] sm:$0xff] }
 0x977   : > { %v5177_v53 = vadd.f32 %v4195_v49, %v2583_v26  ;;  %1645 = vmatmul.f32.gmra.mxu0 %v515_v6  ;;  %4242 = vmatmul.f32.gmra.mxu1 %v3111_v35  ;;  %v3114_v6 = vld [vmem:[#allocation2 + $0xa40] sm:$0xff] }
 0x978   : > { %v6789_v2 = vpop.f32.mrf.mxu2  ;;  %v7173_v16 = vpop.f32.mrf.mxu3 }
 0x979   : > { %v7771_v12 = vadd.f32 %v6789_v2, %v5177_v53  ;;  %v7899_v8 = vadd.f32 %v7173_v16, %v9966_v33  ;;  %v5709_v2 = vld [vmem:[#allocation2 + $0xb48] sm:$0xff] }
 0x97a   : > { %v5837_v16 = vld [vmem:[#allocation2 + $0xf48] sm:$0xff] }
 0x97b   : > { %8283 = vst [vmem:[%s9101_s18 + $0x8a8] sm:$0xff] %v7771_v12 }
 0x97c   : > { %8411 = vst [vmem:[%s9101_s18 + $0xca8] sm:$0xff] %v7899_v8  ;;  %v1601_v43 = vpop.f32.mrf.mxu0  ;;  %v4198_v47 = vpop.f32.mrf.mxu1  ;;  %v519_v8 = vld [vmem:[#allocation2 + $0x948] sm:$0xff] }
 0x97d   : > { %v2584_v48 = vadd.f32 %v10689_v61, %v1601_v43  ;;  %6839 = vmatmul.f32.gmra.mxu2 %v5706_v21  ;;  %7223 = vmatmul.f32.gmra.mxu3 %v5834_v11  ;;  %v3115_v43 = vld [vmem:[#allocation2 + $0xa48] sm:$0xff] }
 0x97f   : > { %v5178_v60 = vadd.f32 %v4198_v47, %v2584_v48  ;;  %1648 = vmatmul.f32.gmra.mxu0 %v516_v22  ;;  %4245 = vmatmul.f32.gmra.mxu1 %v3112_v56 }
 0x980   : > { %v6792_v42 = vpop.f32.mrf.mxu2  ;;  %v7176_v7 = vpop.f32.mrf.mxu3 }
 0x981   : > { %v7772_v33 = vadd.f32 %v6792_v42, %v5178_v60  ;;  %v7900_v38 = vadd.f32 %v7176_v7, %v9972_v45  ;;  %v5710_v60 = vld [vmem:[#allocation2 + $0xb50] sm:$0xff] }
 0x982   : > { %v5838_v42 = vld [vmem:[#allocation2 + $0xf50] sm:$0xff] }
 0x983   : > { %8284 = vst [vmem:[%s9101_s18 + $0x8b0] sm:$0xff] %v7772_v33  ;;  %v520_v33 = vld [vmem:[#allocation2 + $0x950] sm:$0xff] }
 0x984   : > { %8412 = vst [vmem:[%s9101_s18 + $0xcb0] sm:$0xff] %v7900_v38  ;;  %v1604_v25 = vpop.f32.mrf.mxu0  ;;  %v4201_v46 = vpop.f32.mrf.mxu1 }
 0x985   : > { %v2585_v36 = vadd.f32 %v10689_v61, %v1604_v25  ;;  %6842 = vmatmul.f32.gmra.mxu2 %v5707_v14  ;;  %7226 = vmatmul.f32.gmra.mxu3 %v5835_v17  ;;  %v3116_v17 = vld [vmem:[#allocation2 + $0xa50] sm:$0xff] }
 0x987   : > { %v5179_v24 = vadd.f32 %v4201_v46, %v2585_v36  ;;  %1651 = vmatmul.f32.gmra.mxu0 %v517_v41  ;;  %4248 = vmatmul.f32.gmra.mxu1 %v3113_v20  ;;  %v5711_v20 = vld [vmem:[#allocation2 + $0xb58] sm:$0xff] }
 0x988   : > { %v6795_v32 = vpop.f32.mrf.mxu2  ;;  %v7179_v54 = vpop.f32.mrf.mxu3 }
 0x989   : > { %v7773_v45 = vadd.f32 %v6795_v32, %v5179_v24  ;;  %v7901_v57 = vadd.f32 %v7179_v54, %v9978_v9  ;;  %v5839_v24 = vld [vmem:[#allocation2 + $0xf58] sm:$0xff] }
 0x98a   : > { %v521_v54 = vld [vmem:[#allocation2 + $0x958] sm:$0xff] }
 0x98b   : > { %8285 = vst [vmem:[%s9101_s18 + $0x8b8] sm:$0xff] %v7773_v45 }
 0x98c   : > { %8413 = vst [vmem:[%s9101_s18 + $0xcb8] sm:$0xff] %v7901_v57  ;;  %v1607_v37 = vpop.f32.mrf.mxu0  ;;  %v4204_v58 = vpop.f32.mrf.mxu1 }
 0x98d   : > { %v2586_v39 = vadd.f32 %v10689_v61, %v1607_v37  ;;  %6845 = vmatmul.f32.gmra.mxu2 %v5708_v4  ;;  %7229 = vmatmul.f32.gmra.mxu3 %v5836_v52  ;;  %v3117_v4 = vld [vmem:[#allocation2 + $0xa58] sm:$0xff] }
 0x98f   : > { %v5180_v26 = vadd.f32 %v4204_v58, %v2586_v39  ;;  %1654 = vmatmul.f32.gmra.mxu0 %v518_v3  ;;  %4251 = vmatmul.f32.gmra.mxu1 %v3114_v6  ;;  %v5712_v58 = vld [vmem:[#allocation2 + $0xb60] sm:$0xff] }
 0x990   : > { %v6798_v49 = vpop.f32.mrf.mxu2  ;;  %v7182_v35 = vpop.f32.mrf.mxu3  ;;  %v5840_v6 = vld [vmem:[#allocation2 + $0xf60] sm:$0xff] }
 0x991   : > { %v7774_v9 = vadd.f32 %v6798_v49, %v5180_v26  ;;  %v7902_v53 = vadd.f32 %v7182_v35, %v9984_v30  ;;  %v522_v49 = vld [vmem:[#allocation2 + $0x960] sm:$0xff] }
 0x993   : > { %8286 = vst [vmem:[%s9101_s18 + $0x8c0] sm:$0xff] %v7774_v9 }
 0x994   : > { %8414 = vst [vmem:[%s9101_s18 + $0xcc0] sm:$0xff] %v7902_v53  ;;  %v1610_v12 = vpop.f32.mrf.mxu0  ;;  %v4207_v11 = vpop.f32.mrf.mxu1  ;;  %v3118_v53 = vld [vmem:[#allocation2 + $0xa60] sm:$0xff] }
 0x995   : > { %v2587_v21 = vadd.f32 %v10689_v61, %v1610_v12  ;;  %6848 = vmatmul.f32.gmra.mxu2 %v5709_v2  ;;  %7232 = vmatmul.f32.gmra.mxu3 %v5837_v16 }
 0x997   : > { %v5181_v22 = vadd.f32 %v4207_v11, %v2587_v21  ;;  %1657 = vmatmul.f32.gmra.mxu0 %v519_v8  ;;  %4254 = vmatmul.f32.gmra.mxu1 %v3115_v43  ;;  %v5713_v21 = vld [vmem:[#allocation2 + $0xb68] sm:$0xff] }
 0x998   : > { %v6801_v48 = vpop.f32.mrf.mxu2  ;;  %v7185_v47 = vpop.f32.mrf.mxu3  ;;  %v5841_v11 = vld [vmem:[#allocation2 + $0xf68] sm:$0xff] }
 0x999   : > { %v7775_v30 = vadd.f32 %v6801_v48, %v5181_v22  ;;  %v7903_v56 = vadd.f32 %v7185_v47, %v9990_v44  ;;  %v523_v22 = vld [vmem:[#allocation2 + $0x968] sm:$0xff] }
 0x99b   : > { %8287 = vst [vmem:[%s9101_s18 + $0x8c8] sm:$0xff] %v7775_v30  ;;  %v3119_v30 = vld [vmem:[#allocation2 + $0xa68] sm:$0xff] }
 0x99c   : > { %8415 = vst [vmem:[%s9101_s18 + $0xcc8] sm:$0xff] %v7903_v56  ;;  %v1613_v7 = vpop.f32.mrf.mxu0  ;;  %v4210_v14 = vpop.f32.mrf.mxu1 }
 0x99d   : > { %v2588_v38 = vadd.f32 %v10689_v61, %v1613_v7  ;;  %6851 = vmatmul.f32.gmra.mxu2 %v5710_v60  ;;  %7235 = vmatmul.f32.gmra.mxu3 %v5838_v42 }
 0x99f   : > { %v5182_v25 = vadd.f32 %v4210_v14, %v2588_v38  ;;  %1660 = vmatmul.f32.gmra.mxu0 %v520_v33  ;;  %4257 = vmatmul.f32.gmra.mxu1 %v3116_v17  ;;  %v5714_v33 = vld [vmem:[#allocation2 + $0xb70] sm:$0xff] }
 0x9a0   : > { %v6804_v41 = vpop.f32.mrf.mxu2  ;;  %v7188_v36 = vpop.f32.mrf.mxu3  ;;  %v5842_v38 = vld [vmem:[#allocation2 + $0xf70] sm:$0xff] }
 0x9a1   : > { %v7776_v44 = vadd.f32 %v6804_v41, %v5182_v25  ;;  %v7904_v46 = vadd.f32 %v7188_v36, %v9996_v1  ;;  %v524_v17 = vld [vmem:[#allocation2 + $0x970] sm:$0xff] }
 0x9a2   : > { %v3120_v36 = vld [vmem:[#allocation2 + $0xa70] sm:$0xff] }
 0x9a3   : > { %8288 = vst [vmem:[%s9101_s18 + $0x8d0] sm:$0xff] %v7776_v44 }
 0x9a4   : > { %8416 = vst [vmem:[%s9101_s18 + $0xcd0] sm:$0xff] %v7904_v46  ;;  %v1616_v32 = vpop.f32.mrf.mxu0  ;;  %v4213_v57 = vpop.f32.mrf.mxu1 }
 0x9a5   : > { %v2589_v45 = vadd.f32 %v10689_v61, %v1616_v32  ;;  %6854 = vmatmul.f32.gmra.mxu2 %v5711_v20  ;;  %7238 = vmatmul.f32.gmra.mxu3 %v5839_v24  ;;  %v5715_v32 = vld [vmem:[#allocation2 + $0xb78] sm:$0xff] }
 0x9a7   : > { %v5183_v52 = vadd.f32 %v4213_v57, %v2589_v45  ;;  %1663 = vmatmul.f32.gmra.mxu0 %v521_v54  ;;  %4260 = vmatmul.f32.gmra.mxu1 %v3117_v4  ;;  %v5843_v54 = vld [vmem:[#allocation2 + $0xf78] sm:$0xff] }
 0x9a8   : > { %v6807_v37 = vpop.f32.mrf.mxu2  ;;  %v7191_v3 = vpop.f32.mrf.mxu3  ;;  %v525_v57 = vld [vmem:[#allocation2 + $0x978] sm:$0xff] }
 0x9a9   : > { %v7777_v1 = vadd.f32 %v6807_v37, %v5183_v52  ;;  %v7905_v39 = vadd.f32 %v7191_v3, %v10002_v34  ;;  %v3121_v37 = vld [vmem:[#allocation2 + $0xa78] sm:$0xff] }
 0x9ab   : > { %8289 = vst [vmem:[%s9101_s18 + $0x8d8] sm:$0xff] %v7777_v1 }
 0x9ac   : > { %8417 = vst [vmem:[%s9101_s18 + $0xcd8] sm:$0xff] %v7905_v39  ;;  %v1619_v26 = vpop.f32.mrf.mxu0  ;;  %v4216_v9 = vpop.f32.mrf.mxu1 }
 0x9ad   : > { %v2590_v35 = vadd.f32 %v10689_v61, %v1619_v26  ;;  %6857 = vmatmul.f32.gmra.mxu2 %v5712_v58  ;;  %7241 = vmatmul.f32.gmra.mxu3 %v5840_v6  ;;  %v5716_v6 = vld [vmem:[#allocation2 + $0xb80] sm:$0xff] }
 0x9ae   : > { %v5844_v26 = vld [vmem:[#allocation2 + $0xf80] sm:$0xff] }
 0x9af   : > { %v5184_v2 = vadd.f32 %v4216_v9, %v2590_v35  ;;  %1666 = vmatmul.f32.gmra.mxu0 %v522_v49  ;;  %4263 = vmatmul.f32.gmra.mxu1 %v3118_v53  ;;  %v526_v35 = vld [vmem:[#allocation2 + $0x980] sm:$0xff] }
 0x9b0   : > { %v6810_v16 = vpop.f32.mrf.mxu2  ;;  %v7194_v12 = vpop.f32.mrf.mxu3 }
 0x9b1   : > { %v7778_v34 = vadd.f32 %v6810_v16, %v5184_v2  ;;  %v7906_v8 = vadd.f32 %v7194_v12, %v10008_v50  ;;  %v3122_v2 = vld [vmem:[#allocation2 + $0xa80] sm:$0xff] }
 0x9b3   : > { %8290 = vst [vmem:[%s9101_s18 + $0x8e0] sm:$0xff] %v7778_v34 }
 0x9b4   : > { %8418 = vst [vmem:[%s9101_s18 + $0xce0] sm:$0xff] %v7906_v8  ;;  %v1622_v43 = vpop.f32.mrf.mxu0  ;;  %v4219_v47 = vpop.f32.mrf.mxu1 }
 0x9b5   : > { %v2591_v48 = vadd.f32 %v10689_v61, %v1622_v43  ;;  %6860 = vmatmul.f32.gmra.mxu2 %v5713_v21  ;;  %7244 = vmatmul.f32.gmra.mxu3 %v5841_v11  ;;  %v5717_v21 = vld [vmem:[#allocation2 + $0xb88] sm:$0xff] }
 0x9b6   : > { %v5845_v11 = vld [vmem:[#allocation2 + $0xf88] sm:$0xff] }
 0x9b7   : > { %v5185_v56 = vadd.f32 %v4219_v47, %v2591_v48  ;;  %1669 = vmatmul.f32.gmra.mxu0 %v523_v22  ;;  %4266 = vmatmul.f32.gmra.mxu1 %v3119_v30  ;;  %v527_v22 = vld [vmem:[#allocation2 + $0x988] sm:$0xff] }
 0x9b8   : > { %v6813_v60 = vpop.f32.mrf.mxu2  ;;  %v7197_v42 = vpop.f32.mrf.mxu3  ;;  %v3123_v30 = vld [vmem:[#allocation2 + $0xa88] sm:$0xff] }
 0x9b9   : > { %v7779_v50 = vadd.f32 %v6813_v60, %v5185_v56  ;;  %v7907_v7 = vadd.f32 %v7197_v42, %v10014_v18 }
 0x9bb   : > { %8291 = vst [vmem:[%s9101_s18 + $0x8e8] sm:$0xff] %v7779_v50 }
 0x9bc   : > { %8419 = vst [vmem:[%s9101_s18 + $0xce8] sm:$0xff] %v7907_v7  ;;  %v1625_v14 = vpop.f32.mrf.mxu0  ;;  %v4222_v41 = vpop.f32.mrf.mxu1  ;;  %v5718_v7 = vld [vmem:[#allocation2 + $0xb90] sm:$0xff] }
 0x9bd   : > { %v2592_v25 = vadd.f32 %v10689_v61, %v1625_v14  ;;  %6863 = vmatmul.f32.gmra.mxu2 %v5714_v33  ;;  %7247 = vmatmul.f32.gmra.mxu3 %v5842_v38  ;;  %v5846_v33 = vld [vmem:[#allocation2 + $0xf90] sm:$0xff] }
 0x9be   : > { %v528_v14 = vld [vmem:[#allocation2 + $0x990] sm:$0xff] }
 0x9bf   : > { %v5186_v44 = vadd.f32 %v4222_v41, %v2592_v25  ;;  %1672 = vmatmul.f32.gmra.mxu0 %v524_v17  ;;  %4269 = vmatmul.f32.gmra.mxu1 %v3120_v36  ;;  %v3124_v41 = vld [vmem:[#allocation2 + $0xa90] sm:$0xff] }
 0x9c0   : > { %v6816_v46 = vpop.f32.mrf.mxu2  ;;  %v7200_v20 = vpop.f32.mrf.mxu3 }
 0x9c1   : > { %v7780_v18 = vadd.f32 %v6816_v46, %v5186_v44  ;;  %v7908_v24 = vadd.f32 %v7200_v20, %v10020_v40 }
 0x9c3   : > { %8292 = vst [vmem:[%s9101_s18 + $0x8f0] sm:$0xff] %v7780_v18  ;;  %v5719_v18 = vld [vmem:[#allocation2 + $0xb98] sm:$0xff] }
 0x9c4   : > { %8420 = vst [vmem:[%s9101_s18 + $0xcf0] sm:$0xff] %v7908_v24  ;;  %v1628_v45 = vpop.f32.mrf.mxu0  ;;  %v4225_v52 = vpop.f32.mrf.mxu1  ;;  %v5847_v24 = vld [vmem:[#allocation2 + $0xf98] sm:$0xff] }
 0x9c5   : > { %v2593_v4 = vadd.f32 %v10689_v61, %v1628_v45  ;;  %6866 = vmatmul.f32.gmra.mxu2 %v5715_v32  ;;  %7250 = vmatmul.f32.gmra.mxu3 %v5843_v54  ;;  %v529_v54 = vld [vmem:[#allocation2 + $0x998] sm:$0xff] }
 0x9c7   : > { %v5187_v3 = vadd.f32 %v4225_v52, %v2593_v4  ;;  %1675 = vmatmul.f32.gmra.mxu0 %v525_v57  ;;  %4272 = vmatmul.f32.gmra.mxu1 %v3121_v37  ;;  %v3125_v4 = vld [vmem:[#allocation2 + $0xa98] sm:$0xff] }
 0x9c8   : > { %v6819_v1 = vpop.f32.mrf.mxu2  ;;  %v7203_v39 = vpop.f32.mrf.mxu3 }
 0x9c9   : > { %v7781_v40 = vadd.f32 %v6819_v1, %v5187_v3  ;;  %v7909_v58 = vadd.f32 %v7203_v39, %v10028_v0  ;;  %v5720_v39 = vld [vmem:[#allocation2 + $0xba0] sm:$0xff] }
 0x9cb   : > { %8293 = vst [vmem:[%s9101_s18 + $0x8f8] sm:$0xff] %v7781_v40  ;;  %v5848_v40 = vld [vmem:[#allocation2 + $0xfa0] sm:$0xff] }
 0x9cc   : > { %8421 = vst [vmem:[%s9101_s18 + $0xcf8] sm:$0xff] %v7909_v58  ;;  %v1631_v49 = vpop.f32.mrf.mxu0  ;;  %v4228_v53 = vpop.f32.mrf.mxu1 }
 0x9cd   : > { %v2594_v9 = vadd.f32 %v10689_v61, %v1631_v49  ;;  %6869 = vmatmul.f32.gmra.mxu2 %v5716_v6  ;;  %7253 = vmatmul.f32.gmra.mxu3 %v5844_v26  ;;  %v530_v6 = vld [vmem:[#allocation2 + $0x9a0] sm:$0xff] }
 0x9cf   : > { %v5188_v16 = vadd.f32 %v4228_v53, %v2594_v9  ;;  %1678 = vmatmul.f32.gmra.mxu0 %v526_v35  ;;  %4275 = vmatmul.f32.gmra.mxu1 %v3122_v2  ;;  %v3126_v35 = vld [vmem:[#allocation2 + $0xaa0] sm:$0xff] }
 0x9d0   : > { %v6822_v12 = vpop.f32.mrf.mxu2  ;;  %v7206_v34 = vpop.f32.mrf.mxu3 }
 0x9d1   : > { %v7782_v0 = vadd.f32 %v6822_v12, %v5188_v16  ;;  %v7910_v8 = vadd.f32 %v7206_v34, %v10034_v29  ;;  %v5721_v12 = vld [vmem:[#allocation2 + $0xba8] sm:$0xff] }
 0x9d2   : > { %v5849_v34 = vld [vmem:[#allocation2 + $0xfa8] sm:$0xff] }
 0x9d3   : > { %8294 = vst [vmem:[%s9101_s18 + $0x900] sm:$0xff] %v7782_v0 }
 0x9d4   : > { %8422 = vst [vmem:[%s9101_s18 + $0xd00] sm:$0xff] %v7910_v8  ;;  %v1634_v43 = vpop.f32.mrf.mxu0  ;;  %v4231_v47 = vpop.f32.mrf.mxu1  ;;  %v531_v8 = vld [vmem:[#allocation2 + $0x9a8] sm:$0xff] }
 0x9d5   : > { %v2595_v48 = vadd.f32 %v10689_v61, %v1634_v43  ;;  %6872 = vmatmul.f32.gmra.mxu2 %v5717_v21  ;;  %7256 = vmatmul.f32.gmra.mxu3 %v5845_v11  ;;  %v3127_v43 = vld [vmem:[#allocation2 + $0xaa8] sm:$0xff] }
 0x9d7   : > { %v5189_v56 = vadd.f32 %v4231_v47, %v2595_v48  ;;  %1681 = vmatmul.f32.gmra.mxu0 %v527_v22  ;;  %4278 = vmatmul.f32.gmra.mxu1 %v3123_v30 }
 0x9d8   : > { %v6825_v60 = vpop.f32.mrf.mxu2  ;;  %v7209_v42 = vpop.f32.mrf.mxu3 }
 0x9d9   : > { %v7783_v29 = vadd.f32 %v6825_v60, %v5189_v56  ;;  %v7911_v50 = vadd.f32 %v7209_v42, %v10040_v51  ;;  %v5722_v56 = vld [vmem:[#allocation2 + $0xbb0] sm:$0xff] }
 0x9da   : > { %v5850_v60 = vld [vmem:[#allocation2 + $0xfb0] sm:$0xff] }
 0x9db   : > { %8295 = vst [vmem:[%s9101_s18 + $0x908] sm:$0xff] %v7783_v29  ;;  %v532_v29 = vld [vmem:[#allocation2 + $0x9b0] sm:$0xff] }
 0x9dc   : > { %8423 = vst [vmem:[%s9101_s18 + $0xd08] sm:$0xff] %v7911_v50  ;;  %v1637_v38 = vpop.f32.mrf.mxu0  ;;  %v4234_v25 = vpop.f32.mrf.mxu1 }
 0x9dd   : > { %v2596_v17 = vadd.f32 %v10689_v61, %v1637_v38  ;;  %6875 = vmatmul.f32.gmra.mxu2 %v5718_v7  ;;  %7259 = vmatmul.f32.gmra.mxu3 %v5846_v33  ;;  %v3128_v33 = vld [vmem:[#allocation2 + $0xab0] sm:$0xff] }
 0x9df   : > { %v5190_v36 = vadd.f32 %v4234_v25, %v2596_v17  ;;  %1684 = vmatmul.f32.gmra.mxu0 %v528_v14  ;;  %4281 = vmatmul.f32.gmra.mxu1 %v3124_v41  ;;  %v5723_v41 = vld [vmem:[#allocation2 + $0xbb8] sm:$0xff] }
 0x9e0   : > { %v6828_v44 = vpop.f32.mrf.mxu2  ;;  %v7212_v46 = vpop.f32.mrf.mxu3 }
 0x9e1   : > { %v7784_v51 = vadd.f32 %v6828_v44, %v5190_v36  ;;  %v7912_v20 = vadd.f32 %v7212_v46, %v10046_v55  ;;  %v5851_v36 = vld [vmem:[#allocation2 + $0xfb8] sm:$0xff] }
 0x9e2   : > { %v533_v46 = vld [vmem:[#allocation2 + $0x9b8] sm:$0xff] }
 0x9e3   : > { %8296 = vst [vmem:[%s9101_s18 + $0x910] sm:$0xff] %v7784_v51 }
 0x9e4   : > { %8424 = vst [vmem:[%s9101_s18 + $0xd10] sm:$0xff] %v7912_v20  ;;  %v1640_v32 = vpop.f32.mrf.mxu0  ;;  %v4237_v57 = vpop.f32.mrf.mxu1 }
 0x9e5   : > { %v2597_v45 = vadd.f32 %v10689_v61, %v1640_v32  ;;  %6878 = vmatmul.f32.gmra.mxu2 %v5719_v18  ;;  %7262 = vmatmul.f32.gmra.mxu3 %v5847_v24  ;;  %v3129_v18 = vld [vmem:[#allocation2 + $0xab8] sm:$0xff] }
 0x9e7   : > { %v5191_v52 = vadd.f32 %v4237_v57, %v2597_v45  ;;  %1687 = vmatmul.f32.gmra.mxu0 %v529_v54  ;;  %4284 = vmatmul.f32.gmra.mxu1 %v3125_v4  ;;  %v5724_v57 = vld [vmem:[#allocation2 + $0xbc0] sm:$0xff] }
 0x9e8   : > { %v6831_v37 = vpop.f32.mrf.mxu2  ;;  %v7215_v3 = vpop.f32.mrf.mxu3  ;;  %v5852_v4 = vld [vmem:[#allocation2 + $0xfc0] sm:$0xff] }
 0x9e9   : > { %v7785_v55 = vadd.f32 %v6831_v37, %v5191_v52  ;;  %v7913_v1 = vadd.f32 %v7215_v3, %v10052_v59  ;;  %v534_v37 = vld [vmem:[#allocation2 + $0x9c0] sm:$0xff] }
 0x9eb   : > { %8297 = vst [vmem:[%s9101_s18 + $0x918] sm:$0xff] %v7785_v55 }
 0x9ec   : > { %8425 = vst [vmem:[%s9101_s18 + $0xd18] sm:$0xff] %v7913_v1  ;;  %v1643_v58 = vpop.f32.mrf.mxu0  ;;  %v4240_v49 = vpop.f32.mrf.mxu1  ;;  %v3130_v1 = vld [vmem:[#allocation2 + $0xac0] sm:$0xff] }
 0x9ed   : > { %v2598_v26 = vadd.f32 %v10689_v61, %v1643_v58  ;;  %6881 = vmatmul.f32.gmra.mxu2 %v5720_v39  ;;  %7265 = vmatmul.f32.gmra.mxu3 %v5848_v40 }
 0x9ef   : > { %v5192_v9 = vadd.f32 %v4240_v49, %v2598_v26  ;;  %1690 = vmatmul.f32.gmra.mxu0 %v530_v6  ;;  %4287 = vmatmul.f32.gmra.mxu1 %v3126_v35  ;;  %v5725_v26 = vld [vmem:[#allocation2 + $0xbc8] sm:$0xff] }
 0x9f0   : > { %v6834_v53 = vpop.f32.mrf.mxu2  ;;  %v7218_v2 = vpop.f32.mrf.mxu3  ;;  %v5853_v49 = vld [vmem:[#allocation2 + $0xfc8] sm:$0xff] }
 0x9f1   : > { %v7786_v59 = vadd.f32 %v6834_v53, %v5192_v9  ;;  %v7914_v16 = vadd.f32 %v7218_v2, %v10058_v63  ;;  %v535_v9 = vld [vmem:[#allocation2 + $0x9c8] sm:$0xff] }
 0x9f3   : > { %8298 = vst [vmem:[%s9101_s18 + $0x920] sm:$0xff] %v7786_v59  ;;  %v3131_v59 = vld [vmem:[#allocation2 + $0xac8] sm:$0xff] }
 0x9f4   : > { %8426 = vst [vmem:[%s9101_s18 + $0xd20] sm:$0xff] %v7914_v16  ;;  %v1646_v0 = vpop.f32.mrf.mxu0  ;;  %v4243_v11 = vpop.f32.mrf.mxu1 }
 0x9f5   : > { %v2599_v21 = vadd.f32 %v10689_v61, %v1646_v0  ;;  %6884 = vmatmul.f32.gmra.mxu2 %v5721_v12  ;;  %7268 = vmatmul.f32.gmra.mxu3 %v5849_v34 }
 0x9f7   : > { %v5193_v22 = vadd.f32 %v4243_v11, %v2599_v21  ;;  %1693 = vmatmul.f32.gmra.mxu0 %v531_v8  ;;  %4290 = vmatmul.f32.gmra.mxu1 %v3127_v43  ;;  %v5726_v8 = vld [vmem:[#allocation2 + $0xbd0] sm:$0xff] }
 0x9f8   : > { %v6837_v48 = vpop.f32.mrf.mxu2  ;;  %v7221_v47 = vpop.f32.mrf.mxu3  ;;  %v5854_v21 = vld [vmem:[#allocation2 + $0xfd0] sm:$0xff] }
 0x9f9   : > { %v7787_v63 = vadd.f32 %v6837_v48, %v5193_v22  ;;  %v7915_v30 = vadd.f32 %v7221_v47, %v10064_v5  ;;  %v536_v43 = vld [vmem:[#allocation2 + $0x9d0] sm:$0xff] }
 0x9fa   : > { %v3132_v47 = vld [vmem:[#allocation2 + $0xad0] sm:$0xff] }
 0x9fb   : > { %8299 = vst [vmem:[%s9101_s18 + $0x928] sm:$0xff] %v7787_v63 }
 0x9fc   : > { %8427 = vst [vmem:[%s9101_s18 + $0xd28] sm:$0xff] %v7915_v30  ;;  %v1649_v42 = vpop.f32.mrf.mxu0  ;;  %v4246_v7 = vpop.f32.mrf.mxu1 }
 0x9fd   : > { %v2600_v50 = vadd.f32 %v10689_v61, %v1649_v42  ;;  %6887 = vmatmul.f32.gmra.mxu2 %v5722_v56  ;;  %7271 = vmatmul.f32.gmra.mxu3 %v5850_v60  ;;  %v5727_v42 = vld [vmem:[#allocation2 + $0xbd8] sm:$0xff] }
 0x9ff   : > { %v5194_v38 = vadd.f32 %v4246_v7, %v2600_v50  ;;  %1696 = vmatmul.f32.gmra.mxu0 %v532_v29  ;;  %4293 = vmatmul.f32.gmra.mxu1 %v3128_v33  ;;  %v5855_v29 = vld [vmem:[#allocation2 + $0xfd8] sm:$0xff] }
 0xa00   : > { %v6840_v14 = vpop.f32.mrf.mxu2  ;;  %v7224_v17 = vpop.f32.mrf.mxu3  ;;  %v537_v7 = vld [vmem:[#allocation2 + $0x9d8] sm:$0xff] }
 0xa01   : > { %v7788_v5 = vadd.f32 %v6840_v14, %v5194_v38  ;;  %v7916_v25 = vadd.f32 %v7224_v17, %v10070_v23  ;;  %v3133_v14 = vld [vmem:[#allocation2 + $0xad8] sm:$0xff] }
 0xa03   : > { %8300 = vst [vmem:[%s9101_s18 + $0x930] sm:$0xff] %v7788_v5 }
 0xa04   : > { %8428 = vst [vmem:[%s9101_s18 + $0xd30] sm:$0xff] %v7916_v25  ;;  %v1652_v44 = vpop.f32.mrf.mxu0  ;;  %v4249_v20 = vpop.f32.mrf.mxu1 }
 0xa05   : > { %v2601_v51 = vadd.f32 %v10689_v61, %v1652_v44  ;;  %6890 = vmatmul.f32.gmra.mxu2 %v5723_v41  ;;  %7274 = vmatmul.f32.gmra.mxu3 %v5851_v36  ;;  %v5728_v36 = vld [vmem:[#allocation2 + $0xbe0] sm:$0xff] }
 0xa06   : > { %v5856_v44 = vld [vmem:[#allocation2 + $0xfe0] sm:$0xff] }
 0xa07   : > { %v5195_v24 = vadd.f32 %v4249_v20, %v2601_v51  ;;  %1699 = vmatmul.f32.gmra.mxu0 %v533_v46  ;;  %4296 = vmatmul.f32.gmra.mxu1 %v3129_v18  ;;  %v538_v51 = vld [vmem:[#allocation2 + $0x9e0] sm:$0xff] }
 0xa08   : > { %v6843_v32 = vpop.f32.mrf.mxu2  ;;  %v7227_v54 = vpop.f32.mrf.mxu3 }
 0xa09   : > { %v7789_v23 = vadd.f32 %v6843_v32, %v5195_v24  ;;  %v7917_v45 = vadd.f32 %v7227_v54, %v10076_v10  ;;  %v3134_v24 = vld [vmem:[#allocation2 + $0xae0] sm:$0xff] }
 0xa0b   : > { %8301 = vst [vmem:[%s9101_s18 + $0x938] sm:$0xff] %v7789_v23 }
 0xa0c   : > { %8429 = vst [vmem:[%s9101_s18 + $0xd38] sm:$0xff] %v7917_v45  ;;  %v1655_v52 = vpop.f32.mrf.mxu0  ;;  %v4252_v55 = vpop.f32.mrf.mxu1 }
 0xa0d   : > { %v2602_v3 = vadd.f32 %v10689_v61, %v1655_v52  ;;  %6893 = vmatmul.f32.gmra.mxu2 %v5724_v57  ;;  %7277 = vmatmul.f32.gmra.mxu3 %v5852_v4  ;;  %v5729_v57 = vld [vmem:[#allocation2 + $0xbe8] sm:$0xff] }
 0xa0e   : > { %v5857_v4 = vld [vmem:[#allocation2 + $0xfe8] sm:$0xff] }
 0xa0f   : > { %v5196_v39 = vadd.f32 %v4252_v55, %v2602_v3  ;;  %1702 = vmatmul.f32.gmra.mxu0 %v534_v37  ;;  %4299 = vmatmul.f32.gmra.mxu1 %v3130_v1  ;;  %v539_v37 = vld [vmem:[#allocation2 + $0x9e8] sm:$0xff] }
 0xa10   : > { %v6846_v40 = vpop.f32.mrf.mxu2  ;;  %v7230_v58 = vpop.f32.mrf.mxu3  ;;  %v3135_v1 = vld [vmem:[#allocation2 + $0xae8] sm:$0xff] }
 0xa11   : > { %v7790_v10 = vadd.f32 %v6846_v40, %v5196_v39  ;;  %v7918_v6 = vadd.f32 %v7230_v58, %v10082_v15 }
 0xa13   : > { %8302 = vst [vmem:[%s9101_s18 + $0x940] sm:$0xff] %v7790_v10 }
 0xa14   : > { %8430 = vst [vmem:[%s9101_s18 + $0xd40] sm:$0xff] %v7918_v6  ;;  %v1658_v35 = vpop.f32.mrf.mxu0  ;;  %v4255_v2 = vpop.f32.mrf.mxu1  ;;  %v5730_v6 = vld [vmem:[#allocation2 + $0xbf0] sm:$0xff] }
 0xa15   : > { %v2603_v53 = vadd.f32 %v10689_v61, %v1658_v35  ;;  %6896 = vmatmul.f32.gmra.mxu2 %v5725_v26  ;;  %7280 = vmatmul.f32.gmra.mxu3 %v5853_v49  ;;  %v5858_v26 = vld [vmem:[#allocation2 + $0xff0] sm:$0xff] }
 0xa16   : > { %v540_v35 = vld [vmem:[#allocation2 + $0x9f0] sm:$0xff] }
 0xa17   : > { %v5197_v16 = vadd.f32 %v4255_v2, %v2603_v53  ;;  %1705 = vmatmul.f32.gmra.mxu0 %v535_v9  ;;  %4302 = vmatmul.f32.gmra.mxu1 %v3131_v59  ;;  %v3136_v2 = vld [vmem:[#allocation2 + $0xaf0] sm:$0xff] }
 0xa18   : > { %v6849_v12 = vpop.f32.mrf.mxu2  ;;  %v7233_v34 = vpop.f32.mrf.mxu3 }
 0xa19   : > { %v7791_v15 = vadd.f32 %v6849_v12, %v5197_v16  ;;  %v7919_v0 = vadd.f32 %v7233_v34, %v10088_v19  ;;  %v11423_v34 = vld [vmem:[#allocation101_spill] sm:$0xff] }
 0xa1b   : > { %8303 = vst [vmem:[%s9101_s18 + $0x948] sm:$0xff] %v7791_v15 }
 0xa1c   : > { %8431 = vst [vmem:[%s9101_s18 + $0xd48] sm:$0xff] %v7919_v0  ;;  %v1661_v11 = vpop.f32.mrf.mxu0  ;;  %v4258_v48 = vpop.f32.mrf.mxu1  ;;  %v5731_v0 = vld [vmem:[#allocation2 + $0xbf8] sm:$0xff] }
 0xa1d   : > { %v2604_v22 = vadd.f32 %v10689_v61, %v1661_v11  ;;  %6899 = vmatmul.f32.gmra.mxu2 %v5726_v8  ;;  %7283 = vmatmul.f32.gmra.mxu3 %v5854_v21  ;;  %v5859_v8 = vld [vmem:[#allocation2 + $0xff8] sm:$0xff] }
 0xa1e   : > { %v541_v11 = vld [vmem:[#allocation2 + $0x9f8] sm:$0xff] }
 0xa1f   : > { %v5198_v63 = vadd.f32 %v4258_v48, %v2604_v22  ;;  %1708 = vmatmul.f32.gmra.mxu0 %v536_v43  ;;  %4305 = vmatmul.f32.gmra.mxu1 %v3132_v47  ;;  %v3137_v48 = vld [vmem:[#allocation2 + $0xaf8] sm:$0xff] }
 0xa20   : > { %v6852_v30 = vpop.f32.mrf.mxu2  ;;  %v7236_v56 = vpop.f32.mrf.mxu3 }
 0xa21   : > { %v7792_v19 = vadd.f32 %v6852_v30, %v5198_v63  ;;  %v7920_v60 = vadd.f32 %v7236_v56, %v10094_v28 }
 0xa23   : > { %8304 = vst [vmem:[%s9101_s18 + $0x950] sm:$0xff] %v7792_v19  ;;  %v11424_v19 = vld [vmem:[#allocation20_spill] sm:$0xff] }
 0xa24   : > { %8432 = vst [vmem:[%s9101_s18 + $0xd50] sm:$0xff] %v7920_v60  ;;  %v1664_v50 = vpop.f32.mrf.mxu0  ;;  %v4261_v38 = vpop.f32.mrf.mxu1 }
 0xa25   : > { %v2605_v33 = vadd.f32 %v10689_v61, %v1664_v50  ;;  %6902 = vmatmul.f32.gmra.mxu2 %v5727_v42  ;;  %7286 = vmatmul.f32.gmra.mxu3 %v5855_v29  ;;  %v5732_v42 = vld [vmem:[#allocation2 + $0xc00] sm:$0xff] }
 0xa26   : > { %v5860_v29 = vld [vmem:[#allocation2 + $0x1000] sm:$0xff] }
 0xa27   : > { %v5199_v17 = vadd.f32 %v4261_v38, %v2605_v33  ;;  %1711 = vmatmul.f32.gmra.mxu0 %v537_v7  ;;  %4308 = vmatmul.f32.gmra.mxu1 %v3133_v14  ;;  %v542_v7 = vld [vmem:[#allocation2 + $0xa00] sm:$0xff] }
 0xa28   : > { %v6855_v5 = vpop.f32.mrf.mxu2  ;;  %v7239_v25 = vpop.f32.mrf.mxu3  ;;  %v3138_v14 = vld [vmem:[#allocation2 + $0xb00] sm:$0xff] }
 0xa29   : > { %v7793_v28 = vadd.f32 %v6855_v5, %v5199_v17  ;;  %v7921_v41 = vadd.f32 %v7239_v25, %v10100_v27 }
 0xa2b   : > { %8305 = vst [vmem:[%s9101_s18 + $0x958] sm:$0xff] %v7793_v28 }
 0xa2c   : > { %8433 = vst [vmem:[%s9101_s18 + $0xd58] sm:$0xff] %v7921_v41  ;;  %v1667_v46 = vpop.f32.mrf.mxu0  ;;  %v4264_v18 = vpop.f32.mrf.mxu1  ;;  %v11425_v41 = vld [vmem:[#allocation21_spill] sm:$0xff] }
 0xa2d   : > { %v2606_v20 = vadd.f32 %v10689_v61, %v1667_v46  ;;  %6905 = vmatmul.f32.gmra.mxu2 %v5728_v36  ;;  %7289 = vmatmul.f32.gmra.mxu3 %v5856_v44  ;;  %v5733_v44 = vld [vmem:[#allocation2 + $0xc08] sm:$0xff] }
 0xa2e   : > { %v5861_v46 = vld [vmem:[#allocation2 + $0x1008] sm:$0xff] }
 0xa2f   : > { %v5200_v32 = vadd.f32 %v4264_v18, %v2606_v20  ;;  %1714 = vmatmul.f32.gmra.mxu0 %v538_v51  ;;  %4311 = vmatmul.f32.gmra.mxu1 %v3134_v24  ;;  %v543_v20 = vld [vmem:[#allocation2 + $0xa08] sm:$0xff] }
 0xa30   : > { %v6858_v54 = vpop.f32.mrf.mxu2  ;;  %v7242_v23 = vpop.f32.mrf.mxu3 }
 0xa31   : > { %v7794_v27 = vadd.f32 %v6858_v54, %v5200_v32  ;;  %v7922_v45 = vadd.f32 %v7242_v23, %v10106_v31  ;;  %v3139_v32 = vld [vmem:[#allocation2 + $0xb08] sm:$0xff] }
 0xa33   : > { %8306 = vst [vmem:[%s9101_s18 + $0x960] sm:$0xff] %v7794_v27 }
 0xa34   : > { %8434 = vst [vmem:[%s9101_s18 + $0xd60] sm:$0xff] %v7922_v45  ;;  %v1670_v52 = vpop.f32.mrf.mxu0  ;;  %v4267_v55 = vpop.f32.mrf.mxu1 }
 0xa35   : > { %v2607_v3 = vadd.f32 %v10689_v61, %v1670_v52  ;;  %6908 = vmatmul.f32.gmra.mxu2 %v5729_v57  ;;  %7292 = vmatmul.f32.gmra.mxu3 %v5857_v4  ;;  %v11426_v57 = vld [vmem:[#allocation22_spill] sm:$0xff] }
 0xa36   : > { %v5734_v52 = vld [vmem:[#allocation2 + $0xc10] sm:$0xff] }
 0xa37   : > { %v5201_v39 = vadd.f32 %v4267_v55, %v2607_v3  ;;  %1717 = vmatmul.f32.gmra.mxu0 %v539_v37  ;;  %4314 = vmatmul.f32.gmra.mxu1 %v3135_v1  ;;  %v5862_v37 = vld [vmem:[#allocation2 + $0x1010] sm:$0xff] }
 0xa38   : > { %v6861_v40 = vpop.f32.mrf.mxu2  ;;  %v7245_v58 = vpop.f32.mrf.mxu3  ;;  %v544_v55 = vld [vmem:[#allocation2 + $0xa10] sm:$0xff] }
 0xa39   : > { %v7795_v31 = vadd.f32 %v6861_v40, %v5201_v39  ;;  %v7923_v10 = vadd.f32 %v7245_v58, %v10112_v62  ;;  %v3140_v40 = vld [vmem:[#allocation2 + $0xb10] sm:$0xff] }
 0xa3b   : > { %8307 = vst [vmem:[%s9101_s18 + $0x968] sm:$0xff] %v7795_v31 }
 0xa3c   : > { %8435 = vst [vmem:[%s9101_s18 + $0xd68] sm:$0xff] %v7923_v10  ;;  %v1673_v49 = vpop.f32.mrf.mxu0  ;;  %v4270_v53 = vpop.f32.mrf.mxu1 }
 0xa3d   : > { %v2608_v9 = vadd.f32 %v10689_v61, %v1673_v49  ;;  %6911 = vmatmul.f32.gmra.mxu2 %v5730_v6  ;;  %7295 = vmatmul.f32.gmra.mxu3 %v5858_v26  ;;  %v11427_v26 = vld [vmem:[#allocation23_spill] sm:$0xff] }
 0xa3f   : > { %v5202_v59 = vadd.f32 %v4270_v53, %v2608_v9  ;;  %1720 = vmatmul.f32.gmra.mxu0 %v540_v35  ;;  %4317 = vmatmul.f32.gmra.mxu1 %v3136_v2  ;;  %v5735_v35 = vld [vmem:[#allocation2 + $0xc18] sm:$0xff] }
 0xa40   : > { %v6864_v16 = vpop.f32.mrf.mxu2  ;;  %v7248_v12 = vpop.f32.mrf.mxu3  ;;  %v5863_v9 = vld [vmem:[#allocation2 + $0x1018] sm:$0xff] }
 0xa41   : > { %v7796_v62 = vadd.f32 %v6864_v16, %v5202_v59  ;;  %v7924_v15 = vadd.f32 %v7248_v12, %v11423_v34  ;;  %v545_v2 = vld [vmem:[#allocation2 + $0xa18] sm:$0xff] }
 0xa42   : > { %v3141_v12 = vld [vmem:[#allocation2 + $0xb18] sm:$0xff] }
 0xa43   : > { %8308 = vst [vmem:[%s9101_s18 + $0x970] sm:$0xff] %v7796_v62 }
 0xa44   : > { %8436 = vst [vmem:[%s9101_s18 + $0xd70] sm:$0xff] %v7924_v15  ;;  %v1676_v21 = vpop.f32.mrf.mxu0  ;;  %v4273_v22 = vpop.f32.mrf.mxu1 }
 0xa45   : > { %v2609_v43 = vadd.f32 %v10689_v61, %v1676_v21  ;;  %6914 = vmatmul.f32.gmra.mxu2 %v5731_v0  ;;  %7298 = vmatmul.f32.gmra.mxu3 %v5859_v8  ;;  %v10807_v61 = vld [vmem:[#allocation7] ss:$0 sm:$0xff]  ;;  %v11428_v8 = vld [vmem:[#allocation24_spill] sm:$0xff] }
 0xa47   : > { %v5203_v47 = vadd.f32 %v4273_v22, %v2609_v43  ;;  %1723 = vmatmul.f32.gmra.mxu0 %v541_v11  ;;  %4320 = vmatmul.f32.gmra.mxu1 %v3137_v48  ;;  %v5736_v11 = vld [vmem:[#allocation2 + $0xc20] sm:$0xff] }
 0xa48   : > { %v6867_v63 = vpop.f32.mrf.mxu2  ;;  %v7251_v30 = vpop.f32.mrf.mxu3  ;;  %v5864_v43 = vld [vmem:[#allocation2 + $0x1020] sm:$0xff] }
 0xa49   : > { %v7797_v56 = vadd.f32 %v6867_v63, %v5203_v47  ;;  %v7925_v60 = vadd.f32 %v7251_v30, %v11424_v19  ;;  %v546_v48 = vld [vmem:[#allocation2 + $0xa20] sm:$0xff] }
 0xa4a   : > { %v3142_v30 = vld [vmem:[#allocation2 + $0xb20] sm:$0xff] }
 0xa4b   : > { %8309 = vst [vmem:[%s9101_s18 + $0x978] sm:$0xff] %v7797_v56 }
 0xa4c   : > { %8437 = vst [vmem:[%s9101_s18 + $0xd78] sm:$0xff] %v7925_v60  ;;  %v1679_v50 = vpop.f32.mrf.mxu0  ;;  %v4276_v38 = vpop.f32.mrf.mxu1 }
 0xa4d   : > { %v2610_v33 = vadd.f32 %v10807_v61, %v1679_v50  ;;  %6917 = vmatmul.f32.gmra.mxu2 %v5732_v42  ;;  %7301 = vmatmul.f32.gmra.mxu3 %v5860_v29  ;;  %v11429_v29 = vld [vmem:[#allocation25_spill] sm:$0xff] }
 0xa4f   : > { %v5204_v17 = vadd.f32 %v4276_v38, %v2610_v33  ;;  %1726 = vmatmul.f32.gmra.mxu0 %v542_v7  ;;  %4323 = vmatmul.f32.gmra.mxu1 %v3138_v14  ;;  %v5737_v7 = vld [vmem:[#allocation2 + $0xc28] sm:$0xff] }
 0xa50   : > { %v6870_v5 = vpop.f32.mrf.mxu2  ;;  %v7254_v25 = vpop.f32.mrf.mxu3  ;;  %v5865_v33 = vld [vmem:[#allocation2 + $0x1028] sm:$0xff] }
 0xa51   : > { %v7798_v28 = vadd.f32 %v6870_v5, %v5204_v17  ;;  %v7926_v36 = vadd.f32 %v7254_v25, %v11425_v41  ;;  %v547_v14 = vld [vmem:[#allocation2 + $0xa28] sm:$0xff] }
 0xa52   : > { %v3143_v25 = vld [vmem:[#allocation2 + $0xb28] sm:$0xff] }
 0xa53   : > { %8310 = vst [vmem:[%s9101_s18 + $0x980] sm:$0xff] %v7798_v28 }
 0xa54   : > { %8438 = vst [vmem:[%s9101_s18 + $0xd80] sm:$0xff] %v7926_v36  ;;  %v1682_v51 = vpop.f32.mrf.mxu0  ;;  %v4279_v24 = vpop.f32.mrf.mxu1 }
 0xa55   : > { %v2611_v18 = vadd.f32 %v10807_v61, %v1682_v51  ;;  %6920 = vmatmul.f32.gmra.mxu2 %v5733_v44  ;;  %7304 = vmatmul.f32.gmra.mxu3 %v5861_v46  ;;  %v11430_v46 = vld [vmem:[#allocation26_spill] sm:$0xff] }
 0xa57   : > { %v5205_v54 = vadd.f32 %v4279_v24, %v2611_v18  ;;  %1729 = vmatmul.f32.gmra.mxu0 %v543_v20  ;;  %4326 = vmatmul.f32.gmra.mxu1 %v3139_v32  ;;  %v5738_v20 = vld [vmem:[#allocation2 + $0xc30] sm:$0xff] }
 0xa58   : > { %v6873_v23 = vpop.f32.mrf.mxu2  ;;  %v7257_v27 = vpop.f32.mrf.mxu3  ;;  %v5866_v18 = vld [vmem:[#allocation2 + $0x1030] sm:$0xff] }
 0xa59   : > { %v7799_v45 = vadd.f32 %v6873_v23, %v5205_v54  ;;  %v7927_v4 = vadd.f32 %v7257_v27, %v11426_v57  ;;  %v548_v32 = vld [vmem:[#allocation2 + $0xa30] sm:$0xff] }
 0xa5a   : > { %v3144_v27 = vld [vmem:[#allocation2 + $0xb30] sm:$0xff] }
 0xa5b   : > { %8311 = vst [vmem:[%s9101_s18 + $0x988] sm:$0xff] %v7799_v45 }
 0xa5c   : > { %8439 = vst [vmem:[%s9101_s18 + $0xd88] sm:$0xff] %v7927_v4  ;;  %v1685_v3 = vpop.f32.mrf.mxu0  ;;  %v4282_v39 = vpop.f32.mrf.mxu1 }
 0xa5d   : > { %v2612_v1 = vadd.f32 %v10807_v61, %v1685_v3  ;;  %6923 = vmatmul.f32.gmra.mxu2 %v5734_v52  ;;  %7307 = vmatmul.f32.gmra.mxu3 %v5862_v37  ;;  %v11431_v37 = vld [vmem:[#allocation27_spill] sm:$0xff] }
 0xa5f   : > { %v5206_v58 = vadd.f32 %v4282_v39, %v2612_v1  ;;  %1732 = vmatmul.f32.gmra.mxu0 %v544_v55  ;;  %4329 = vmatmul.f32.gmra.mxu1 %v3140_v40  ;;  %v5739_v55 = vld [vmem:[#allocation2 + $0xc38] sm:$0xff] }
 0xa60   : > { %v6876_v31 = vpop.f32.mrf.mxu2  ;;  %v7260_v10 = vpop.f32.mrf.mxu3  ;;  %v5867_v1 = vld [vmem:[#allocation2 + $0x1038] sm:$0xff] }
 0xa61   : > { %v7800_v6 = vadd.f32 %v6876_v31, %v5206_v58  ;;  %v7928_v49 = vadd.f32 %v7260_v10, %v11427_v26  ;;  %v549_v40 = vld [vmem:[#allocation2 + $0xa38] sm:$0xff] }
 0xa62   : > { %v3145_v10 = vld [vmem:[#allocation2 + $0xb38] sm:$0xff] }
 0xa63   : > { %8312 = vst [vmem:[%s9101_s18 + $0x990] sm:$0xff] %v7800_v6 }
 0xa64   : > { %8440 = vst [vmem:[%s9101_s18 + $0xd90] sm:$0xff] %v7928_v49  ;;  %v1688_v53 = vpop.f32.mrf.mxu0  ;;  %v4285_v16 = vpop.f32.mrf.mxu1 }
 0xa65   : > { %v2613_v59 = vadd.f32 %v10807_v61, %v1688_v53  ;;  %6926 = vmatmul.f32.gmra.mxu2 %v5735_v35  ;;  %7310 = vmatmul.f32.gmra.mxu3 %v5863_v9  ;;  %v11432_v9 = vld [vmem:[#allocation28_spill] sm:$0xff] }
 0xa67   : > { %v5207_v62 = vadd.f32 %v4285_v16, %v2613_v59  ;;  %1735 = vmatmul.f32.gmra.mxu0 %v545_v2  ;;  %4332 = vmatmul.f32.gmra.mxu1 %v3141_v12  ;;  %v5740_v2 = vld [vmem:[#allocation2 + $0xc40] sm:$0xff] }
 0xa68   : > { %v6879_v34 = vpop.f32.mrf.mxu2  ;;  %v7263_v15 = vpop.f32.mrf.mxu3  ;;  %v5868_v59 = vld [vmem:[#allocation2 + $0x1040] sm:$0xff] }
 0xa69   : > { %v7801_v0 = vadd.f32 %v6879_v34, %v5207_v62  ;;  %v7929_v21 = vadd.f32 %v7263_v15, %v11428_v8  ;;  %v550_v12 = vld [vmem:[#allocation2 + $0xa40] sm:$0xff] }
 0xa6a   : > { %v3146_v15 = vld [vmem:[#allocation2 + $0xb40] sm:$0xff] }
 0xa6b   : > { %8313 = vst [vmem:[%s9101_s18 + $0x998] sm:$0xff] %v7801_v0 }
 0xa6c   : > { %8441 = vst [vmem:[%s9101_s18 + $0xd98] sm:$0xff] %v7929_v21  ;;  %v1691_v22 = vpop.f32.mrf.mxu0  ;;  %v4288_v63 = vpop.f32.mrf.mxu1 }
 0xa6d   : > { %v2614_v47 = vadd.f32 %v10807_v61, %v1691_v22  ;;  %6929 = vmatmul.f32.gmra.mxu2 %v5736_v11  ;;  %7313 = vmatmul.f32.gmra.mxu3 %v5864_v43  ;;  %v11433_v43 = vld [vmem:[#allocation29_spill] sm:$0xff] }
 0xa6f   : > { %v5208_v56 = vadd.f32 %v4288_v63, %v2614_v47  ;;  %1738 = vmatmul.f32.gmra.mxu0 %v546_v48  ;;  %4335 = vmatmul.f32.gmra.mxu1 %v3142_v30  ;;  %v5741_v48 = vld [vmem:[#allocation2 + $0xc48] sm:$0xff] }
 0xa70   : > { %v6882_v19 = vpop.f32.mrf.mxu2  ;;  %v7266_v60 = vpop.f32.mrf.mxu3  ;;  %v5869_v47 = vld [vmem:[#allocation2 + $0x1048] sm:$0xff] }
 0xa71   : > { %v7802_v42 = vadd.f32 %v6882_v19, %v5208_v56  ;;  %v7930_v50 = vadd.f32 %v7266_v60, %v11429_v29  ;;  %v551_v30 = vld [vmem:[#allocation2 + $0xa48] sm:$0xff] }
 0xa72   : > { %v3147_v60 = vld [vmem:[#allocation2 + $0xb48] sm:$0xff] }
 0xa73   : > { %8314 = vst [vmem:[%s9101_s18 + $0x9a0] sm:$0xff] %v7802_v42 }
 0xa74   : > { %8442 = vst [vmem:[%s9101_s18 + $0xda0] sm:$0xff] %v7930_v50  ;;  %v1694_v38 = vpop.f32.mrf.mxu0  ;;  %v4291_v5 = vpop.f32.mrf.mxu1 }
 0xa75   : > { %v2615_v17 = vadd.f32 %v10807_v61, %v1694_v38  ;;  %6932 = vmatmul.f32.gmra.mxu2 %v5737_v7  ;;  %7316 = vmatmul.f32.gmra.mxu3 %v5865_v33  ;;  %v11434_v33 = vld [vmem:[#allocation30_spill] sm:$0xff] }
 0xa77   : > { %v5209_v28 = vadd.f32 %v4291_v5, %v2615_v17  ;;  %1741 = vmatmul.f32.gmra.mxu0 %v547_v14  ;;  %4338 = vmatmul.f32.gmra.mxu1 %v3143_v25  ;;  %v5742_v14 = vld [vmem:[#allocation2 + $0xc50] sm:$0xff] }
 0xa78   : > { %v6885_v41 = vpop.f32.mrf.mxu2  ;;  %v7269_v36 = vpop.f32.mrf.mxu3  ;;  %v5870_v17 = vld [vmem:[#allocation2 + $0x1050] sm:$0xff] }
 0xa79   : > { %v7803_v44 = vadd.f32 %v6885_v41, %v5209_v28  ;;  %v7931_v51 = vadd.f32 %v7269_v36, %v11430_v46  ;;  %v552_v25 = vld [vmem:[#allocation2 + $0xa50] sm:$0xff] }
 0xa7a   : > { %v3148_v36 = vld [vmem:[#allocation2 + $0xb50] sm:$0xff] }
 0xa7b   : > { %8315 = vst [vmem:[%s9101_s18 + $0x9a8] sm:$0xff] %v7803_v44 }
 0xa7c   : > { %8443 = vst [vmem:[%s9101_s18 + $0xda8] sm:$0xff] %v7931_v51  ;;  %v1697_v24 = vpop.f32.mrf.mxu0  ;;  %v4294_v23 = vpop.f32.mrf.mxu1 }
 0xa7d   : > { %v2616_v54 = vadd.f32 %v10807_v61, %v1697_v24  ;;  %6935 = vmatmul.f32.gmra.mxu2 %v5738_v20  ;;  %7319 = vmatmul.f32.gmra.mxu3 %v5866_v18  ;;  %v11435_v18 = vld [vmem:[#allocation31_spill] sm:$0xff] }
 0xa7f   : > { %v5210_v45 = vadd.f32 %v4294_v23, %v2616_v54  ;;  %1744 = vmatmul.f32.gmra.mxu0 %v548_v32  ;;  %4341 = vmatmul.f32.gmra.mxu1 %v3144_v27  ;;  %v5743_v32 = vld [vmem:[#allocation2 + $0xc58] sm:$0xff] }
 0xa80   : > { %v6888_v57 = vpop.f32.mrf.mxu2  ;;  %v7272_v4 = vpop.f32.mrf.mxu3  ;;  %v5871_v54 = vld [vmem:[#allocation2 + $0x1058] sm:$0xff] }
 0xa81   : > { %v7804_v52 = vadd.f32 %v6888_v57, %v5210_v45  ;;  %v7932_v3 = vadd.f32 %v7272_v4, %v11431_v37  ;;  %v553_v27 = vld [vmem:[#allocation2 + $0xa58] sm:$0xff] }
 0xa82   : > { %v3149_v4 = vld [vmem:[#allocation2 + $0xb58] sm:$0xff] }
 0xa83   : > { %8316 = vst [vmem:[%s9101_s18 + $0x9b0] sm:$0xff] %v7804_v52 }
 0xa84   : > { %8444 = vst [vmem:[%s9101_s18 + $0xdb0] sm:$0xff] %v7932_v3  ;;  %v1700_v39 = vpop.f32.mrf.mxu0  ;;  %v4297_v31 = vpop.f32.mrf.mxu1 }
 0xa85   : > { %v2617_v58 = vadd.f32 %v10807_v61, %v1700_v39  ;;  %6938 = vmatmul.f32.gmra.mxu2 %v5739_v55  ;;  %7322 = vmatmul.f32.gmra.mxu3 %v5867_v1  ;;  %v11436_v1 = vld [vmem:[#allocation32_spill] sm:$0xff] }
 0xa87   : > { %v5211_v6 = vadd.f32 %v4297_v31, %v2617_v58  ;;  %1747 = vmatmul.f32.gmra.mxu0 %v549_v40  ;;  %4344 = vmatmul.f32.gmra.mxu1 %v3145_v10  ;;  %v5744_v40 = vld [vmem:[#allocation2 + $0xc60] sm:$0xff] }
 0xa88   : > { %v6891_v26 = vpop.f32.mrf.mxu2  ;;  %v7275_v49 = vpop.f32.mrf.mxu3  ;;  %v5872_v58 = vld [vmem:[#allocation2 + $0x1060] sm:$0xff] }
 0xa89   : > { %v7805_v35 = vadd.f32 %v6891_v26, %v5211_v6  ;;  %v7933_v53 = vadd.f32 %v7275_v49, %v11432_v9  ;;  %v554_v10 = vld [vmem:[#allocation2 + $0xa60] sm:$0xff] }
 0xa8a   : > { %v3150_v49 = vld [vmem:[#allocation2 + $0xb60] sm:$0xff] }
 0xa8b   : > { %8317 = vst [vmem:[%s9101_s18 + $0x9b8] sm:$0xff] %v7805_v35 }
 0xa8c   : > { %8445 = vst [vmem:[%s9101_s18 + $0xdb8] sm:$0xff] %v7933_v53  ;;  %v1703_v16 = vpop.f32.mrf.mxu0  ;;  %v4300_v34 = vpop.f32.mrf.mxu1 }
 0xa8d   : > { %v2618_v62 = vadd.f32 %v10807_v61, %v1703_v16  ;;  %6941 = vmatmul.f32.gmra.mxu2 %v5740_v2  ;;  %7325 = vmatmul.f32.gmra.mxu3 %v5868_v59  ;;  %v11437_v59 = vld [vmem:[#allocation33_spill] sm:$0xff] }
 0xa8f   : > { %v5212_v0 = vadd.f32 %v4300_v34, %v2618_v62  ;;  %1750 = vmatmul.f32.gmra.mxu0 %v550_v12  ;;  %4347 = vmatmul.f32.gmra.mxu1 %v3146_v15  ;;  %v5745_v12 = vld [vmem:[#allocation2 + $0xc68] sm:$0xff] }
 0xa90   : > { %v6894_v8 = vpop.f32.mrf.mxu2  ;;  %v7278_v21 = vpop.f32.mrf.mxu3  ;;  %v5873_v62 = vld [vmem:[#allocation2 + $0x1068] sm:$0xff] }
 0xa91   : > { %v7806_v11 = vadd.f32 %v6894_v8, %v5212_v0  ;;  %v7934_v22 = vadd.f32 %v7278_v21, %v11433_v43  ;;  %v555_v15 = vld [vmem:[#allocation2 + $0xa68] sm:$0xff] }
 0xa92   : > { %v3151_v21 = vld [vmem:[#allocation2 + $0xb68] sm:$0xff] }
 0xa93   : > { %8318 = vst [vmem:[%s9101_s18 + $0x9c0] sm:$0xff] %v7806_v11 }
 0xa94   : > { %8446 = vst [vmem:[%s9101_s18 + $0xdc0] sm:$0xff] %v7934_v22  ;;  %v1706_v63 = vpop.f32.mrf.mxu0  ;;  %v4303_v19 = vpop.f32.mrf.mxu1 }
 0xa95   : > { %v2619_v56 = vadd.f32 %v10807_v61, %v1706_v63  ;;  %6944 = vmatmul.f32.gmra.mxu2 %v5741_v48  ;;  %7328 = vmatmul.f32.gmra.mxu3 %v5869_v47  ;;  %v11438_v47 = vld [vmem:[#allocation34_spill] sm:$0xff] }
 0xa97   : > { %v5213_v42 = vadd.f32 %v4303_v19, %v2619_v56  ;;  %1753 = vmatmul.f32.gmra.mxu0 %v551_v30  ;;  %4350 = vmatmul.f32.gmra.mxu1 %v3147_v60  ;;  %v5746_v30 = vld [vmem:[#allocation2 + $0xc70] sm:$0xff] }
 0xa98   : > { %v6897_v29 = vpop.f32.mrf.mxu2  ;;  %v7281_v50 = vpop.f32.mrf.mxu3  ;;  %v5874_v56 = vld [vmem:[#allocation2 + $0x1070] sm:$0xff] }
 0xa99   : > { %v7807_v7 = vadd.f32 %v6897_v29, %v5213_v42  ;;  %v7935_v38 = vadd.f32 %v7281_v50, %v11434_v33  ;;  %v556_v60 = vld [vmem:[#allocation2 + $0xa70] sm:$0xff] }
 0xa9a   : > { %v3152_v50 = vld [vmem:[#allocation2 + $0xb70] sm:$0xff] }
 0xa9b   : > { %8319 = vst [vmem:[%s9101_s18 + $0x9c8] sm:$0xff] %v7807_v7 }
 0xa9c   : > { %8447 = vst [vmem:[%s9101_s18 + $0xdc8] sm:$0xff] %v7935_v38  ;;  %v1709_v5 = vpop.f32.mrf.mxu0  ;;  %v4306_v41 = vpop.f32.mrf.mxu1 }
 0xa9d   : > { %v2620_v28 = vadd.f32 %v10807_v61, %v1709_v5  ;;  %6947 = vmatmul.f32.gmra.mxu2 %v5742_v14  ;;  %7331 = vmatmul.f32.gmra.mxu3 %v5870_v17  ;;  %v11439_v17 = vld [vmem:[#allocation35_spill] sm:$0xff] }
 0xa9f   : > { %v5214_v44 = vadd.f32 %v4306_v41, %v2620_v28  ;;  %1756 = vmatmul.f32.gmra.mxu0 %v552_v25  ;;  %4353 = vmatmul.f32.gmra.mxu1 %v3148_v36  ;;  %v5747_v25 = vld [vmem:[#allocation2 + $0xc78] sm:$0xff] }
 0xaa0   : > { %v6900_v46 = vpop.f32.mrf.mxu2  ;;  %v7284_v51 = vpop.f32.mrf.mxu3  ;;  %v5875_v28 = vld [vmem:[#allocation2 + $0x1078] sm:$0xff] }
 0xaa1   : > { %v7808_v20 = vadd.f32 %v6900_v46, %v5214_v44  ;;  %v7936_v24 = vadd.f32 %v7284_v51, %v11435_v18  ;;  %v557_v36 = vld [vmem:[#allocation2 + $0xa78] sm:$0xff] }
 0xaa2   : > { %v3153_v51 = vld [vmem:[#allocation2 + $0xb78] sm:$0xff] }
 0xaa3   : > { %8320 = vst [vmem:[%s9101_s18 + $0x9d0] sm:$0xff] %v7808_v20 }
 0xaa4   : > { %8448 = vst [vmem:[%s9101_s18 + $0xdd0] sm:$0xff] %v7936_v24  ;;  %v1712_v23 = vpop.f32.mrf.mxu0  ;;  %v4309_v57 = vpop.f32.mrf.mxu1 }
 0xaa5   : > { %v2621_v45 = vadd.f32 %v10807_v61, %v1712_v23  ;;  %6950 = vmatmul.f32.gmra.mxu2 %v5743_v32  ;;  %7334 = vmatmul.f32.gmra.mxu3 %v5871_v54  ;;  %v11440_v54 = vld [vmem:[#allocation36_spill] sm:$0xff] }
 0xaa7   : > { %v5215_v52 = vadd.f32 %v4309_v57, %v2621_v45  ;;  %1759 = vmatmul.f32.gmra.mxu0 %v553_v27  ;;  %4356 = vmatmul.f32.gmra.mxu1 %v3149_v4  ;;  %v5748_v27 = vld [vmem:[#allocation2 + $0xc80] sm:$0xff] }
 0xaa8   : > { %v6903_v37 = vpop.f32.mrf.mxu2  ;;  %v7287_v3 = vpop.f32.mrf.mxu3  ;;  %v5876_v45 = vld [vmem:[#allocation2 + $0x1080] sm:$0xff] }
 0xaa9   : > { %v7809_v55 = vadd.f32 %v6903_v37, %v5215_v52  ;;  %v7937_v39 = vadd.f32 %v7287_v3, %v11436_v1  ;;  %v558_v4 = vld [vmem:[#allocation2 + $0xa80] sm:$0xff] }
 0xaaa   : > { %v3154_v3 = vld [vmem:[#allocation2 + $0xb80] sm:$0xff] }
 0xaab   : > { %8321 = vst [vmem:[%s9101_s18 + $0x9d8] sm:$0xff] %v7809_v55 }
 0xaac   : > { %8449 = vst [vmem:[%s9101_s18 + $0xdd8] sm:$0xff] %v7937_v39  ;;  %v1715_v31 = vpop.f32.mrf.mxu0  ;;  %v4312_v26 = vpop.f32.mrf.mxu1 }
 0xaad   : > { %v2622_v6 = vadd.f32 %v10807_v61, %v1715_v31  ;;  %6953 = vmatmul.f32.gmra.mxu2 %v5744_v40  ;;  %7337 = vmatmul.f32.gmra.mxu3 %v5872_v58  ;;  %v11441_v58 = vld [vmem:[#allocation37_spill] sm:$0xff] }
 0xaaf   : > { %v5216_v35 = vadd.f32 %v4312_v26, %v2622_v6  ;;  %1762 = vmatmul.f32.gmra.mxu0 %v554_v10  ;;  %4359 = vmatmul.f32.gmra.mxu1 %v3150_v49  ;;  %v5749_v10 = vld [vmem:[#allocation2 + $0xc88] sm:$0xff] }
 0xab0   : > { %v6906_v9 = vpop.f32.mrf.mxu2  ;;  %v7290_v53 = vpop.f32.mrf.mxu3  ;;  %v5877_v6 = vld [vmem:[#allocation2 + $0x1088] sm:$0xff] }
 0xab1   : > { %v7810_v2 = vadd.f32 %v6906_v9, %v5216_v35  ;;  %v7938_v16 = vadd.f32 %v7290_v53, %v11437_v59  ;;  %v559_v49 = vld [vmem:[#allocation2 + $0xa88] sm:$0xff] }
 0xab2   : > { %v3155_v53 = vld [vmem:[#allocation2 + $0xb88] sm:$0xff] }
 0xab3   : > { %8322 = vst [vmem:[%s9101_s18 + $0x9e0] sm:$0xff] %v7810_v2 }
 0xab4   : > { %8450 = vst [vmem:[%s9101_s18 + $0xde0] sm:$0xff] %v7938_v16  ;;  %v1718_v34 = vpop.f32.mrf.mxu0  ;;  %v4315_v8 = vpop.f32.mrf.mxu1 }
 0xab5   : > { %v2623_v0 = vadd.f32 %v10807_v61, %v1718_v34  ;;  %6956 = vmatmul.f32.gmra.mxu2 %v5745_v12  ;;  %7340 = vmatmul.f32.gmra.mxu3 %v5873_v62  ;;  %v11442_v62 = vld [vmem:[#allocation38_spill] sm:$0xff] }
 0xab7   : > { %v5217_v11 = vadd.f32 %v4315_v8, %v2623_v0  ;;  %1765 = vmatmul.f32.gmra.mxu0 %v555_v15  ;;  %4362 = vmatmul.f32.gmra.mxu1 %v3151_v21  ;;  %v5750_v15 = vld [vmem:[#allocation2 + $0xc90] sm:$0xff] }
 0xab8   : > { %v6909_v43 = vpop.f32.mrf.mxu2  ;;  %v7293_v22 = vpop.f32.mrf.mxu3  ;;  %v5878_v0 = vld [vmem:[#allocation2 + $0x1090] sm:$0xff] }
 0xab9   : > { %v7811_v48 = vadd.f32 %v6909_v43, %v5217_v11  ;;  %v7939_v63 = vadd.f32 %v7293_v22, %v11438_v47  ;;  %v560_v21 = vld [vmem:[#allocation2 + $0xa90] sm:$0xff] }
 0xaba   : > { %v3156_v22 = vld [vmem:[#allocation2 + $0xb90] sm:$0xff] }
 0xabb   : > { %8323 = vst [vmem:[%s9101_s18 + $0x9e8] sm:$0xff] %v7811_v48 }
 0xabc   : > { %8451 = vst [vmem:[%s9101_s18 + $0xde8] sm:$0xff] %v7939_v63  ;;  %v1721_v19 = vpop.f32.mrf.mxu0  ;;  %v4318_v29 = vpop.f32.mrf.mxu1 }
 0xabd   : > { %v2624_v42 = vadd.f32 %v10807_v61, %v1721_v19  ;;  %6959 = vmatmul.f32.gmra.mxu2 %v5746_v30  ;;  %7343 = vmatmul.f32.gmra.mxu3 %v5874_v56  ;;  %v11443_v56 = vld [vmem:[#allocation39_spill] sm:$0xff] }
 0xabf   : > { %v5218_v7 = vadd.f32 %v4318_v29, %v2624_v42  ;;  %1768 = vmatmul.f32.gmra.mxu0 %v556_v60  ;;  %4365 = vmatmul.f32.gmra.mxu1 %v3152_v50  ;;  %v5751_v60 = vld [vmem:[#allocation2 + $0xc98] sm:$0xff] }
 0xac0   : > { %v6912_v33 = vpop.f32.mrf.mxu2  ;;  %v7296_v38 = vpop.f32.mrf.mxu3  ;;  %v5879_v42 = vld [vmem:[#allocation2 + $0x1098] sm:$0xff] }
 0xac1   : > { %v7812_v14 = vadd.f32 %v6912_v33, %v5218_v7  ;;  %v7940_v5 = vadd.f32 %v7296_v38, %v11439_v17  ;;  %v561_v50 = vld [vmem:[#allocation2 + $0xa98] sm:$0xff] }
 0xac2   : > { %v3157_v38 = vld [vmem:[#allocation2 + $0xb98] sm:$0xff] }
 0xac3   : > { %8324 = vst [vmem:[%s9101_s18 + $0x9f0] sm:$0xff] %v7812_v14 }
 0xac4   : > { %8452 = vst [vmem:[%s9101_s18 + $0xdf0] sm:$0xff] %v7940_v5  ;;  %v1724_v41 = vpop.f32.mrf.mxu0  ;;  %v4321_v46 = vpop.f32.mrf.mxu1 }
 0xac5   : > { %v2625_v44 = vadd.f32 %v10807_v61, %v1724_v41  ;;  %6962 = vmatmul.f32.gmra.mxu2 %v5747_v25  ;;  %7346 = vmatmul.f32.gmra.mxu3 %v5875_v28  ;;  %v11444_v28 = vld [vmem:[#allocation40_spill] sm:$0xff] }
 0xac7   : > { %v5219_v20 = vadd.f32 %v4321_v46, %v2625_v44  ;;  %1771 = vmatmul.f32.gmra.mxu0 %v557_v36  ;;  %4368 = vmatmul.f32.gmra.mxu1 %v3153_v51  ;;  %v5752_v36 = vld [vmem:[#allocation2 + $0xca0] sm:$0xff] }
 0xac8   : > { %v6915_v18 = vpop.f32.mrf.mxu2  ;;  %v7299_v24 = vpop.f32.mrf.mxu3  ;;  %v5880_v44 = vld [vmem:[#allocation2 + $0x10a0] sm:$0xff] }
 0xac9   : > { %v7813_v32 = vadd.f32 %v6915_v18, %v5219_v20  ;;  %v7941_v23 = vadd.f32 %v7299_v24, %v11440_v54  ;;  %v562_v51 = vld [vmem:[#allocation2 + $0xaa0] sm:$0xff] }
 0xaca   : > { %v3158_v24 = vld [vmem:[#allocation2 + $0xba0] sm:$0xff] }
 0xacb   : > { %8325 = vst [vmem:[%s9101_s18 + $0x9f8] sm:$0xff] %v7813_v32 }
 0xacc   : > { %8453 = vst [vmem:[%s9101_s18 + $0xdf8] sm:$0xff] %v7941_v23  ;;  %v1727_v57 = vpop.f32.mrf.mxu0  ;;  %v4324_v37 = vpop.f32.mrf.mxu1 }
 0xacd   : > { %v2626_v52 = vadd.f32 %v10807_v61, %v1727_v57  ;;  %6965 = vmatmul.f32.gmra.mxu2 %v5748_v27  ;;  %7349 = vmatmul.f32.gmra.mxu3 %v5876_v45  ;;  %v11445_v45 = vld [vmem:[#allocation41_spill] sm:$0xff] }
 0xacf   : > { %v5220_v55 = vadd.f32 %v4324_v37, %v2626_v52  ;;  %1774 = vmatmul.f32.gmra.mxu0 %v558_v4  ;;  %4371 = vmatmul.f32.gmra.mxu1 %v3154_v3  ;;  %v5753_v4 = vld [vmem:[#allocation2 + $0xca8] sm:$0xff] }
 0xad0   : > { %v6918_v1 = vpop.f32.mrf.mxu2  ;;  %v7302_v39 = vpop.f32.mrf.mxu3  ;;  %v5881_v52 = vld [vmem:[#allocation2 + $0x10a8] sm:$0xff] }
 0xad1   : > { %v7814_v40 = vadd.f32 %v6918_v1, %v5220_v55  ;;  %v7942_v31 = vadd.f32 %v7302_v39, %v11441_v58  ;;  %v563_v3 = vld [vmem:[#allocation2 + $0xaa8] sm:$0xff] }
 0xad2   : > { %v3159_v39 = vld [vmem:[#allocation2 + $0xba8] sm:$0xff] }
 0xad3   : > { %8326 = vst [vmem:[%s9101_s18 + $0xa00] sm:$0xff] %v7814_v40 }
 0xad4   : > { %8454 = vst [vmem:[%s9101_s18 + $0xe00] sm:$0xff] %v7942_v31  ;;  %v1730_v26 = vpop.f32.mrf.mxu0  ;;  %v4327_v9 = vpop.f32.mrf.mxu1 }
 0xad5   : > { %v2627_v35 = vadd.f32 %v10807_v61, %v1730_v26  ;;  %6968 = vmatmul.f32.gmra.mxu2 %v5749_v10  ;;  %7352 = vmatmul.f32.gmra.mxu3 %v5877_v6  ;;  %v11446_v6 = vld [vmem:[#allocation42_spill] sm:$0xff] }
 0xad7   : > { %v5221_v2 = vadd.f32 %v4327_v9, %v2627_v35  ;;  %1777 = vmatmul.f32.gmra.mxu0 %v559_v49  ;;  %4374 = vmatmul.f32.gmra.mxu1 %v3155_v53  ;;  %v5754_v49 = vld [vmem:[#allocation2 + $0xcb0] sm:$0xff] }
 0xad8   : > { %v6921_v59 = vpop.f32.mrf.mxu2  ;;  %v7305_v16 = vpop.f32.mrf.mxu3  ;;  %v5882_v35 = vld [vmem:[#allocation2 + $0x10b0] sm:$0xff] }
 0xad9   : > { %v7815_v12 = vadd.f32 %v6921_v59, %v5221_v2  ;;  %v7943_v34 = vadd.f32 %v7305_v16, %v11442_v62  ;;  %v564_v53 = vld [vmem:[#allocation2 + $0xab0] sm:$0xff] }
 0xada   : > { %v3160_v16 = vld [vmem:[#allocation2 + $0xbb0] sm:$0xff] }
 0xadb   : > { %8327 = vst [vmem:[%s9101_s18 + $0xa08] sm:$0xff] %v7815_v12 }
 0xadc   : > { %8455 = vst [vmem:[%s9101_s18 + $0xe08] sm:$0xff] %v7943_v34  ;;  %v1733_v8 = vpop.f32.mrf.mxu0  ;;  %v4330_v43 = vpop.f32.mrf.mxu1 }
 0xadd   : > { %v2628_v11 = vadd.f32 %v10807_v61, %v1733_v8  ;;  %6971 = vmatmul.f32.gmra.mxu2 %v5750_v15  ;;  %7355 = vmatmul.f32.gmra.mxu3 %v5878_v0  ;;  %v11447_v0 = vld [vmem:[#allocation43_spill] sm:$0xff] }
 0xadf   : > { %v5222_v48 = vadd.f32 %v4330_v43, %v2628_v11  ;;  %1780 = vmatmul.f32.gmra.mxu0 %v560_v21  ;;  %4377 = vmatmul.f32.gmra.mxu1 %v3156_v22  ;;  %v5755_v21 = vld [vmem:[#allocation2 + $0xcb8] sm:$0xff] }
 0xae0   : > { %v6924_v47 = vpop.f32.mrf.mxu2  ;;  %v7308_v63 = vpop.f32.mrf.mxu3  ;;  %v5883_v11 = vld [vmem:[#allocation2 + $0x10b8] sm:$0xff] }
 0xae1   : > { %v7816_v30 = vadd.f32 %v6924_v47, %v5222_v48  ;;  %v7944_v19 = vadd.f32 %v7308_v63, %v11443_v56  ;;  %v565_v22 = vld [vmem:[#allocation2 + $0xab8] sm:$0xff] }
 0xae2   : > { %v3161_v63 = vld [vmem:[#allocation2 + $0xbb8] sm:$0xff] }
 0xae3   : > { %8328 = vst [vmem:[%s9101_s18 + $0xa10] sm:$0xff] %v7816_v30 }
 0xae4   : > { %8456 = vst [vmem:[%s9101_s18 + $0xe10] sm:$0xff] %v7944_v19  ;;  %v1736_v29 = vpop.f32.mrf.mxu0  ;;  %v4333_v33 = vpop.f32.mrf.mxu1 }
 0xae5   : > { %v2629_v7 = vadd.f32 %v10807_v61, %v1736_v29  ;;  %6974 = vmatmul.f32.gmra.mxu2 %v5751_v60  ;;  %7358 = vmatmul.f32.gmra.mxu3 %v5879_v42  ;;  %v11448_v42 = vld [vmem:[#allocation44_spill] sm:$0xff] }
 0xae7   : > { %v5223_v14 = vadd.f32 %v4333_v33, %v2629_v7  ;;  %1783 = vmatmul.f32.gmra.mxu0 %v561_v50  ;;  %4380 = vmatmul.f32.gmra.mxu1 %v3157_v38  ;;  %v5756_v50 = vld [vmem:[#allocation2 + $0xcc0] sm:$0xff] }
 0xae8   : > { %v6927_v17 = vpop.f32.mrf.mxu2  ;;  %v7311_v5 = vpop.f32.mrf.mxu3  ;;  %v5884_v7 = vld [vmem:[#allocation2 + $0x10c0] sm:$0xff] }
 0xae9   : > { %v7817_v25 = vadd.f32 %v6927_v17, %v5223_v14  ;;  %v7945_v41 = vadd.f32 %v7311_v5, %v11444_v28  ;;  %v566_v38 = vld [vmem:[#allocation2 + $0xac0] sm:$0xff] }
 0xaea   : > { %v3162_v5 = vld [vmem:[#allocation2 + $0xbc0] sm:$0xff] }
 0xaeb   : > { %8329 = vst [vmem:[%s9101_s18 + $0xa18] sm:$0xff] %v7817_v25 }
 0xaec   : > { %8457 = vst [vmem:[%s9101_s18 + $0xe18] sm:$0xff] %v7945_v41  ;;  %v1739_v46 = vpop.f32.mrf.mxu0  ;;  %v4336_v18 = vpop.f32.mrf.mxu1 }
 0xaed   : > { %v2630_v20 = vadd.f32 %v10807_v61, %v1739_v46  ;;  %6977 = vmatmul.f32.gmra.mxu2 %v5752_v36  ;;  %7361 = vmatmul.f32.gmra.mxu3 %v5880_v44  ;;  %v11449_v44 = vld [vmem:[#allocation45_spill] sm:$0xff] }
 0xaef   : > { %v5224_v32 = vadd.f32 %v4336_v18, %v2630_v20  ;;  %1786 = vmatmul.f32.gmra.mxu0 %v562_v51  ;;  %4383 = vmatmul.f32.gmra.mxu1 %v3158_v24  ;;  %v5757_v51 = vld [vmem:[#allocation2 + $0xcc8] sm:$0xff] }
 0xaf0   : > { %v6930_v54 = vpop.f32.mrf.mxu2  ;;  %v7314_v23 = vpop.f32.mrf.mxu3  ;;  %v5885_v20 = vld [vmem:[#allocation2 + $0x10c8] sm:$0xff] }
 0xaf1   : > { %v7818_v27 = vadd.f32 %v6930_v54, %v5224_v32  ;;  %v7946_v57 = vadd.f32 %v7314_v23, %v11445_v45  ;;  %v567_v24 = vld [vmem:[#allocation2 + $0xac8] sm:$0xff] }
 0xaf2   : > { %v3163_v23 = vld [vmem:[#allocation2 + $0xbc8] sm:$0xff] }
 0xaf3   : > { %8330 = vst [vmem:[%s9101_s18 + $0xa20] sm:$0xff] %v7818_v27 }
 0xaf4   : > { %8458 = vst [vmem:[%s9101_s18 + $0xe20] sm:$0xff] %v7946_v57  ;;  %v1742_v37 = vpop.f32.mrf.mxu0  ;;  %v4339_v1 = vpop.f32.mrf.mxu1 }
 0xaf5   : > { %v2631_v55 = vadd.f32 %v10807_v61, %v1742_v37  ;;  %6980 = vmatmul.f32.gmra.mxu2 %v5753_v4  ;;  %7364 = vmatmul.f32.gmra.mxu3 %v5881_v52  ;;  %v11450_v52 = vld [vmem:[#allocation46_spill] sm:$0xff] }
 0xaf7   : > { %v5225_v40 = vadd.f32 %v4339_v1, %v2631_v55  ;;  %1789 = vmatmul.f32.gmra.mxu0 %v563_v3  ;;  %4386 = vmatmul.f32.gmra.mxu1 %v3159_v39  ;;  %v5758_v3 = vld [vmem:[#allocation2 + $0xcd0] sm:$0xff] }
 0xaf8   : > { %v6933_v58 = vpop.f32.mrf.mxu2  ;;  %v7317_v31 = vpop.f32.mrf.mxu3  ;;  %v5886_v55 = vld [vmem:[#allocation2 + $0x10d0] sm:$0xff] }
 0xaf9   : > { %v7819_v10 = vadd.f32 %v6933_v58, %v5225_v40  ;;  %v7947_v26 = vadd.f32 %v7317_v31, %v11446_v6  ;;  %v568_v39 = vld [vmem:[#allocation2 + $0xad0] sm:$0xff] }
 0xafa   : > { %v3164_v31 = vld [vmem:[#allocation2 + $0xbd0] sm:$0xff] }
 0xafb   : > { %8331 = vst [vmem:[%s9101_s18 + $0xa28] sm:$0xff] %v7819_v10 }
 0xafc   : > { %8459 = vst [vmem:[%s9101_s18 + $0xe28] sm:$0xff] %v7947_v26  ;;  %v1745_v9 = vpop.f32.mrf.mxu0  ;;  %v4342_v59 = vpop.f32.mrf.mxu1 }
 0xafd   : > { %v2632_v2 = vadd.f32 %v10807_v61, %v1745_v9  ;;  %6983 = vmatmul.f32.gmra.mxu2 %v5754_v49  ;;  %7367 = vmatmul.f32.gmra.mxu3 %v5882_v35  ;;  %v11451_v35 = vld [vmem:[#allocation47_spill] sm:$0xff] }
 0xaff   : > { %v5226_v12 = vadd.f32 %v4342_v59, %v2632_v2  ;;  %1792 = vmatmul.f32.gmra.mxu0 %v564_v53  ;;  %4389 = vmatmul.f32.gmra.mxu1 %v3160_v16  ;;  %v5759_v53 = vld [vmem:[#allocation2 + $0xcd8] sm:$0xff] }
 0xb00   : > { %v6936_v62 = vpop.f32.mrf.mxu2  ;;  %v7320_v34 = vpop.f32.mrf.mxu3  ;;  %v5887_v2 = vld [vmem:[#allocation2 + $0x10d8] sm:$0xff] }
 0xb01   : > { %v7820_v15 = vadd.f32 %v6936_v62, %v5226_v12  ;;  %v7948_v8 = vadd.f32 %v7320_v34, %v11447_v0  ;;  %v569_v16 = vld [vmem:[#allocation2 + $0xad8] sm:$0xff] }
 0xb02   : > { %v3165_v34 = vld [vmem:[#allocation2 + $0xbd8] sm:$0xff] }
 0xb03   : > { %8332 = vst [vmem:[%s9101_s18 + $0xa30] sm:$0xff] %v7820_v15 }
 0xb04   : > { %8460 = vst [vmem:[%s9101_s18 + $0xe30] sm:$0xff] %v7948_v8  ;;  %v1748_v43 = vpop.f32.mrf.mxu0  ;;  %v4345_v47 = vpop.f32.mrf.mxu1 }
 0xb05   : > { %v2633_v48 = vadd.f32 %v10807_v61, %v1748_v43  ;;  %6986 = vmatmul.f32.gmra.mxu2 %v5755_v21  ;;  %7370 = vmatmul.f32.gmra.mxu3 %v5883_v11  ;;  %v11452_v11 = vld [vmem:[#allocation48_spill] sm:$0xff] }
 0xb07   : > { %v5227_v30 = vadd.f32 %v4345_v47, %v2633_v48  ;;  %1795 = vmatmul.f32.gmra.mxu0 %v565_v22  ;;  %4392 = vmatmul.f32.gmra.mxu1 %v3161_v63  ;;  %v5760_v22 = vld [vmem:[#allocation2 + $0xce0] sm:$0xff] }
 0xb08   : > { %v6939_v56 = vpop.f32.mrf.mxu2  ;;  %v7323_v19 = vpop.f32.mrf.mxu3  ;;  %v5888_v48 = vld [vmem:[#allocation2 + $0x10e0] sm:$0xff] }
 0xb09   : > { %v7821_v60 = vadd.f32 %v6939_v56, %v5227_v30  ;;  %v7949_v29 = vadd.f32 %v7323_v19, %v11448_v42  ;;  %v570_v63 = vld [vmem:[#allocation2 + $0xae0] sm:$0xff] }
 0xb0a   : > { %v3166_v19 = vld [vmem:[#allocation2 + $0xbe0] sm:$0xff] }
 0xb0b   : > { %8333 = vst [vmem:[%s9101_s18 + $0xa38] sm:$0xff] %v7821_v60 }
 0xb0c   : > { %8461 = vst [vmem:[%s9101_s18 + $0xe38] sm:$0xff] %v7949_v29  ;;  %v1751_v33 = vpop.f32.mrf.mxu0  ;;  %v4348_v17 = vpop.f32.mrf.mxu1 }
 0xb0d   : > { %v2634_v14 = vadd.f32 %v10807_v61, %v1751_v33  ;;  %6989 = vmatmul.f32.gmra.mxu2 %v5756_v50  ;;  %7373 = vmatmul.f32.gmra.mxu3 %v5884_v7  ;;  %v11453_v7 = vld [vmem:[#allocation49_spill] sm:$0xff] }
 0xb0f   : > { %v5228_v25 = vadd.f32 %v4348_v17, %v2634_v14  ;;  %1798 = vmatmul.f32.gmra.mxu0 %v566_v38  ;;  %4395 = vmatmul.f32.gmra.mxu1 %v3162_v5  ;;  %v5761_v38 = vld [vmem:[#allocation2 + $0xce8] sm:$0xff] }
 0xb10   : > { %v6942_v28 = vpop.f32.mrf.mxu2  ;;  %v7326_v41 = vpop.f32.mrf.mxu3  ;;  %v5889_v14 = vld [vmem:[#allocation2 + $0x10e8] sm:$0xff] }
 0xb11   : > { %v7822_v36 = vadd.f32 %v6942_v28, %v5228_v25  ;;  %v7950_v46 = vadd.f32 %v7326_v41, %v11449_v44  ;;  %v571_v5 = vld [vmem:[#allocation2 + $0xae8] sm:$0xff] }
 0xb12   : > { %v3167_v41 = vld [vmem:[#allocation2 + $0xbe8] sm:$0xff] }
 0xb13   : > { %8334 = vst [vmem:[%s9101_s18 + $0xa40] sm:$0xff] %v7822_v36 }
 0xb14   : > { %8462 = vst [vmem:[%s9101_s18 + $0xe40] sm:$0xff] %v7950_v46  ;;  %v1754_v18 = vpop.f32.mrf.mxu0  ;;  %v4351_v54 = vpop.f32.mrf.mxu1 }
 0xb15   : > { %v2635_v32 = vadd.f32 %v10807_v61, %v1754_v18  ;;  %6992 = vmatmul.f32.gmra.mxu2 %v5757_v51  ;;  %7376 = vmatmul.f32.gmra.mxu3 %v5885_v20  ;;  %v11454_v20 = vld [vmem:[#allocation50_spill] sm:$0xff] }
 0xb17   : > { %v5229_v27 = vadd.f32 %v4351_v54, %v2635_v32  ;;  %1801 = vmatmul.f32.gmra.mxu0 %v567_v24  ;;  %4398 = vmatmul.f32.gmra.mxu1 %v3163_v23  ;;  %v5762_v24 = vld [vmem:[#allocation2 + $0xcf0] sm:$0xff] }
 0xb18   : > { %v6945_v45 = vpop.f32.mrf.mxu2  ;;  %v7329_v57 = vpop.f32.mrf.mxu3  ;;  %v5890_v32 = vld [vmem:[#allocation2 + $0x10f0] sm:$0xff] }
 0xb19   : > { %v7823_v4 = vadd.f32 %v6945_v45, %v5229_v27  ;;  %v7951_v37 = vadd.f32 %v7329_v57, %v11450_v52  ;;  %v572_v23 = vld [vmem:[#allocation2 + $0xaf0] sm:$0xff] }
 0xb1a   : > { %v3168_v57 = vld [vmem:[#allocation2 + $0xbf0] sm:$0xff] }
 0xb1b   : > { %8335 = vst [vmem:[%s9101_s18 + $0xa48] sm:$0xff] %v7823_v4 }
 0xb1c   : > { %8463 = vst [vmem:[%s9101_s18 + $0xe48] sm:$0xff] %v7951_v37  ;;  %v1757_v1 = vpop.f32.mrf.mxu0  ;;  %v4354_v58 = vpop.f32.mrf.mxu1 }
 0xb1d   : > { %v2636_v40 = vadd.f32 %v10807_v61, %v1757_v1  ;;  %6995 = vmatmul.f32.gmra.mxu2 %v5758_v3  ;;  %7379 = vmatmul.f32.gmra.mxu3 %v5886_v55  ;;  %v11455_v55 = vld [vmem:[#allocation51_spill] sm:$0xff] }
 0xb1f   : > { %v5230_v10 = vadd.f32 %v4354_v58, %v2636_v40  ;;  %1804 = vmatmul.f32.gmra.mxu0 %v568_v39  ;;  %4401 = vmatmul.f32.gmra.mxu1 %v3164_v31  ;;  %v5763_v39 = vld [vmem:[#allocation2 + $0xcf8] sm:$0xff] }
 0xb20   : > { %v6948_v6 = vpop.f32.mrf.mxu2  ;;  %v7332_v26 = vpop.f32.mrf.mxu3  ;;  %v5891_v40 = vld [vmem:[#allocation2 + $0x10f8] sm:$0xff] }
 0xb21   : > { %v7824_v49 = vadd.f32 %v6948_v6, %v5230_v10  ;;  %v7952_v9 = vadd.f32 %v7332_v26, %v11451_v35  ;;  %v573_v31 = vld [vmem:[#allocation2 + $0xaf8] sm:$0xff] }
 0xb22   : > { %v3169_v26 = vld [vmem:[#allocation2 + $0xbf8] sm:$0xff] }
 0xb23   : > { %8336 = vst [vmem:[%s9101_s18 + $0xa50] sm:$0xff] %v7824_v49 }
 0xb24   : > { %8464 = vst [vmem:[%s9101_s18 + $0xe50] sm:$0xff] %v7952_v9  ;;  %v1760_v59 = vpop.f32.mrf.mxu0  ;;  %v4357_v62 = vpop.f32.mrf.mxu1 }
 0xb25   : > { %v2637_v12 = vadd.f32 %v10807_v61, %v1760_v59  ;;  %6998 = vmatmul.f32.gmra.mxu2 %v5759_v53  ;;  %7382 = vmatmul.f32.gmra.mxu3 %v5887_v2  ;;  %v11456_v2 = vld [vmem:[#allocation52_spill] sm:$0xff] }
 0xb27   : > { %v5231_v15 = vadd.f32 %v4357_v62, %v2637_v12  ;;  %1807 = vmatmul.f32.gmra.mxu0 %v569_v16  ;;  %4404 = vmatmul.f32.gmra.mxu1 %v3165_v34  ;;  %v5764_v16 = vld [vmem:[#allocation2 + $0xd00] sm:$0xff] }
 0xb28   : > { %v6951_v0 = vpop.f32.mrf.mxu2  ;;  %v7335_v8 = vpop.f32.mrf.mxu3  ;;  %v5892_v12 = vld [vmem:[#allocation2 + $0x1100] sm:$0xff] }
 0xb29   : > { %v7825_v21 = vadd.f32 %v6951_v0, %v5231_v15  ;;  %v7953_v43 = vadd.f32 %v7335_v8, %v11452_v11  ;;  %v574_v34 = vld [vmem:[#allocation2 + $0xb00] sm:$0xff] }
 0xb2a   : > { %v3170_v8 = vld [vmem:[#allocation2 + $0xc00] sm:$0xff] }
 0xb2b   : > { %8337 = vst [vmem:[%s9101_s18 + $0xa58] sm:$0xff] %v7825_v21 }
 0xb2c   : > { %8465 = vst [vmem:[%s9101_s18 + $0xe58] sm:$0xff] %v7953_v43  ;;  %v1763_v47 = vpop.f32.mrf.mxu0  ;;  %v4360_v56 = vpop.f32.mrf.mxu1 }
 0xb2d   : > { %v2638_v30 = vadd.f32 %v10807_v61, %v1763_v47  ;;  %7001 = vmatmul.f32.gmra.mxu2 %v5760_v22  ;;  %7385 = vmatmul.f32.gmra.mxu3 %v5888_v48  ;;  %v10925_v61 = vld [vmem:[#allocation7] ss:$0 sm:$0xff]  ;;  %v11457_v48 = vld [vmem:[#allocation53_spill] sm:$0xff] }
 0xb2f   : > { %v5232_v60 = vadd.f32 %v4360_v56, %v2638_v30  ;;  %1810 = vmatmul.f32.gmra.mxu0 %v570_v63  ;;  %4407 = vmatmul.f32.gmra.mxu1 %v3166_v19  ;;  %v5765_v63 = vld [vmem:[#allocation2 + $0xd08] sm:$0xff] }
 0xb30   : > { %v6954_v42 = vpop.f32.mrf.mxu2  ;;  %v7338_v29 = vpop.f32.mrf.mxu3  ;;  %v5893_v30 = vld [vmem:[#allocation2 + $0x1108] sm:$0xff] }
 0xb31   : > { %v7826_v50 = vadd.f32 %v6954_v42, %v5232_v60  ;;  %v7954_v33 = vadd.f32 %v7338_v29, %v11453_v7  ;;  %v575_v19 = vld [vmem:[#allocation2 + $0xb08] sm:$0xff] }
 0xb32   : > { %v3171_v29 = vld [vmem:[#allocation2 + $0xc08] sm:$0xff] }
 0xb33   : > { %8338 = vst [vmem:[%s9101_s18 + $0xa60] sm:$0xff] %v7826_v50 }
 0xb34   : > { %8466 = vst [vmem:[%s9101_s18 + $0xe60] sm:$0xff] %v7954_v33  ;;  %v1766_v17 = vpop.f32.mrf.mxu0  ;;  %v4363_v28 = vpop.f32.mrf.mxu1 }
 0xb35   : > { %v2639_v25 = vadd.f32 %v10925_v61, %v1766_v17  ;;  %7004 = vmatmul.f32.gmra.mxu2 %v5761_v38  ;;  %7388 = vmatmul.f32.gmra.mxu3 %v5889_v14  ;;  %v11458_v14 = vld [vmem:[#allocation54_spill] sm:$0xff] }
 0xb37   : > { %v5233_v36 = vadd.f32 %v4363_v28, %v2639_v25  ;;  %1813 = vmatmul.f32.gmra.mxu0 %v571_v5  ;;  %4410 = vmatmul.f32.gmra.mxu1 %v3167_v41  ;;  %v5766_v5 = vld [vmem:[#allocation2 + $0xd10] sm:$0xff] }
 0xb38   : > { %v6957_v44 = vpop.f32.mrf.mxu2  ;;  %v7341_v46 = vpop.f32.mrf.mxu3  ;;  %v5894_v25 = vld [vmem:[#allocation2 + $0x1110] sm:$0xff] }
 0xb39   : > { %v7827_v51 = vadd.f32 %v6957_v44, %v5233_v36  ;;  %v7955_v18 = vadd.f32 %v7341_v46, %v11454_v20  ;;  %v576_v41 = vld [vmem:[#allocation2 + $0xb10] sm:$0xff] }
 0xb3a   : > { %v3172_v46 = vld [vmem:[#allocation2 + $0xc10] sm:$0xff] }
 0xb3b   : > { %8339 = vst [vmem:[%s9101_s18 + $0xa68] sm:$0xff] %v7827_v51 }
 0xb3c   : > { %8467 = vst [vmem:[%s9101_s18 + $0xe68] sm:$0xff] %v7955_v18  ;;  %v1769_v54 = vpop.f32.mrf.mxu0  ;;  %v4366_v45 = vpop.f32.mrf.mxu1 }
 0xb3d   : > { %v2640_v27 = vadd.f32 %v10925_v61, %v1769_v54  ;;  %7007 = vmatmul.f32.gmra.mxu2 %v5762_v24  ;;  %7391 = vmatmul.f32.gmra.mxu3 %v5890_v32  ;;  %v11459_v32 = vld [vmem:[#allocation55_spill] sm:$0xff] }
 0xb3f   : > { %v5234_v4 = vadd.f32 %v4366_v45, %v2640_v27  ;;  %1816 = vmatmul.f32.gmra.mxu0 %v572_v23  ;;  %4413 = vmatmul.f32.gmra.mxu1 %v3168_v57  ;;  %v5767_v23 = vld [vmem:[#allocation2 + $0xd18] sm:$0xff] }
 0xb40   : > { %v6960_v52 = vpop.f32.mrf.mxu2  ;;  %v7344_v37 = vpop.f32.mrf.mxu3  ;;  %v5895_v27 = vld [vmem:[#allocation2 + $0x1118] sm:$0xff] }
 0xb41   : > { %v7828_v3 = vadd.f32 %v6960_v52, %v5234_v4  ;;  %v7956_v1 = vadd.f32 %v7344_v37, %v11455_v55  ;;  %v577_v57 = vld [vmem:[#allocation2 + $0xb18] sm:$0xff] }
 0xb42   : > { %v3173_v37 = vld [vmem:[#allocation2 + $0xc18] sm:$0xff] }
 0xb43   : > { %8340 = vst [vmem:[%s9101_s18 + $0xa70] sm:$0xff] %v7828_v3 }
 0xb44   : > { %8468 = vst [vmem:[%s9101_s18 + $0xe70] sm:$0xff] %v7956_v1  ;;  %v1772_v58 = vpop.f32.mrf.mxu0  ;;  %v4369_v6 = vpop.f32.mrf.mxu1 }
 0xb45   : > { %v2641_v10 = vadd.f32 %v10925_v61, %v1772_v58  ;;  %7010 = vmatmul.f32.gmra.mxu2 %v5763_v39  ;;  %7394 = vmatmul.f32.gmra.mxu3 %v5891_v40  ;;  %v11460_v40 = vld [vmem:[#allocation56_spill] sm:$0xff] }
 0xb47   : > { %v5235_v49 = vadd.f32 %v4369_v6, %v2641_v10  ;;  %1819 = vmatmul.f32.gmra.mxu0 %v573_v31  ;;  %4416 = vmatmul.f32.gmra.mxu1 %v3169_v26  ;;  %v5768_v31 = vld [vmem:[#allocation2 + $0xd20] sm:$0xff] }
 0xb48   : > { %v6963_v35 = vpop.f32.mrf.mxu2  ;;  %v7347_v9 = vpop.f32.mrf.mxu3  ;;  %v5896_v10 = vld [vmem:[#allocation2 + $0x1120] sm:$0xff] }
 0xb49   : > { %v7829_v53 = vadd.f32 %v6963_v35, %v5235_v49  ;;  %v7957_v59 = vadd.f32 %v7347_v9, %v11456_v2  ;;  %v578_v26 = vld [vmem:[#allocation2 + $0xb20] sm:$0xff] }
 0xb4a   : > { %v3174_v9 = vld [vmem:[#allocation2 + $0xc20] sm:$0xff] }
 0xb4b   : > { %8341 = vst [vmem:[%s9101_s18 + $0xa78] sm:$0xff] %v7829_v53 }
 0xb4c   : > { %8469 = vst [vmem:[%s9101_s18 + $0xe78] sm:$0xff] %v7957_v59  ;;  %v1775_v62 = vpop.f32.mrf.mxu0  ;;  %v4372_v0 = vpop.f32.mrf.mxu1 }
 0xb4d   : > { %v2642_v15 = vadd.f32 %v10925_v61, %v1775_v62  ;;  %7013 = vmatmul.f32.gmra.mxu2 %v5764_v16  ;;  %7397 = vmatmul.f32.gmra.mxu3 %v5892_v12  ;;  %v11461_v12 = vld [vmem:[#allocation57_spill] sm:$0xff] }
 0xb4f   : > { %v5236_v21 = vadd.f32 %v4372_v0, %v2642_v15  ;;  %1822 = vmatmul.f32.gmra.mxu0 %v574_v34  ;;  %4419 = vmatmul.f32.gmra.mxu1 %v3170_v8  ;;  %v5769_v34 = vld [vmem:[#allocation2 + $0xd28] sm:$0xff] }
 0xb50   : > { %v6966_v11 = vpop.f32.mrf.mxu2  ;;  %v7350_v43 = vpop.f32.mrf.mxu3  ;;  %v5897_v15 = vld [vmem:[#allocation2 + $0x1128] sm:$0xff] }
 0xb51   : > { %v7830_v22 = vadd.f32 %v6966_v11, %v5236_v21  ;;  %v7958_v47 = vadd.f32 %v7350_v43, %v11457_v48  ;;  %v579_v8 = vld [vmem:[#allocation2 + $0xb28] sm:$0xff] }
 0xb52   : > { %v3175_v43 = vld [vmem:[#allocation2 + $0xc28] sm:$0xff] }
 0xb53   : > { %8342 = vst [vmem:[%s9101_s18 + $0xa80] sm:$0xff] %v7830_v22 }
 0xb54   : > { %8470 = vst [vmem:[%s9101_s18 + $0xe80] sm:$0xff] %v7958_v47  ;;  %v1778_v56 = vpop.f32.mrf.mxu0  ;;  %v4375_v42 = vpop.f32.mrf.mxu1 }
 0xb55   : > { %v2643_v60 = vadd.f32 %v10925_v61, %v1778_v56  ;;  %7016 = vmatmul.f32.gmra.mxu2 %v5765_v63  ;;  %7400 = vmatmul.f32.gmra.mxu3 %v5893_v30  ;;  %v11462_v30 = vld [vmem:[#allocation58_spill] sm:$0xff] }
 0xb57   : > { %v5237_v50 = vadd.f32 %v4375_v42, %v2643_v60  ;;  %1825 = vmatmul.f32.gmra.mxu0 %v575_v19  ;;  %4422 = vmatmul.f32.gmra.mxu1 %v3171_v29  ;;  %v5770_v19 = vld [vmem:[#allocation2 + $0xd30] sm:$0xff] }
 0xb58   : > { %v6969_v7 = vpop.f32.mrf.mxu2  ;;  %v7353_v33 = vpop.f32.mrf.mxu3  ;;  %v5898_v60 = vld [vmem:[#allocation2 + $0x1130] sm:$0xff] }
 0xb59   : > { %v7831_v38 = vadd.f32 %v6969_v7, %v5237_v50  ;;  %v7959_v17 = vadd.f32 %v7353_v33, %v11458_v14  ;;  %v580_v29 = vld [vmem:[#allocation2 + $0xb30] sm:$0xff] }
 0xb5a   : > { %v3176_v33 = vld [vmem:[#allocation2 + $0xc30] sm:$0xff] }
 0xb5b   : > { %8343 = vst [vmem:[%s9101_s18 + $0xa88] sm:$0xff] %v7831_v38 }
 0xb5c   : > { %8471 = vst [vmem:[%s9101_s18 + $0xe88] sm:$0xff] %v7959_v17  ;;  %v1781_v28 = vpop.f32.mrf.mxu0  ;;  %v4378_v44 = vpop.f32.mrf.mxu1 }
 0xb5d   : > { %v2644_v36 = vadd.f32 %v10925_v61, %v1781_v28  ;;  %7019 = vmatmul.f32.gmra.mxu2 %v5766_v5  ;;  %7403 = vmatmul.f32.gmra.mxu3 %v5894_v25  ;;  %v11463_v25 = vld [vmem:[#allocation59_spill] sm:$0xff] }
 0xb5f   : > { %v5238_v51 = vadd.f32 %v4378_v44, %v2644_v36  ;;  %1828 = vmatmul.f32.gmra.mxu0 %v576_v41  ;;  %4425 = vmatmul.f32.gmra.mxu1 %v3172_v46  ;;  %v5771_v41 = vld [vmem:[#allocation2 + $0xd38] sm:$0xff] }
 0xb60   : > { %v6972_v20 = vpop.f32.mrf.mxu2  ;;  %v7356_v18 = vpop.f32.mrf.mxu3  ;;  %v5899_v36 = vld [vmem:[#allocation2 + $0x1138] sm:$0xff] }
 0xb61   : > { %v7832_v24 = vadd.f32 %v6972_v20, %v5238_v51  ;;  %v7960_v54 = vadd.f32 %v7356_v18, %v11459_v32  ;;  %v581_v46 = vld [vmem:[#allocation2 + $0xb38] sm:$0xff] }
 0xb62   : > { %v3177_v18 = vld [vmem:[#allocation2 + $0xc38] sm:$0xff] }
 0xb63   : > { %8344 = vst [vmem:[%s9101_s18 + $0xa90] sm:$0xff] %v7832_v24 }
 0xb64   : > { %8472 = vst [vmem:[%s9101_s18 + $0xe90] sm:$0xff] %v7960_v54  ;;  %v1784_v45 = vpop.f32.mrf.mxu0  ;;  %v4381_v52 = vpop.f32.mrf.mxu1 }
 0xb65   : > { %v2645_v4 = vadd.f32 %v10925_v61, %v1784_v45  ;;  %7022 = vmatmul.f32.gmra.mxu2 %v5767_v23  ;;  %7406 = vmatmul.f32.gmra.mxu3 %v5895_v27  ;;  %v11464_v27 = vld [vmem:[#allocation60_spill] sm:$0xff] }
 0xb67   : > { %v5239_v3 = vadd.f32 %v4381_v52, %v2645_v4  ;;  %1831 = vmatmul.f32.gmra.mxu0 %v577_v57  ;;  %4428 = vmatmul.f32.gmra.mxu1 %v3173_v37  ;;  %v5772_v57 = vld [vmem:[#allocation2 + $0xd40] sm:$0xff] }
 0xb68   : > { %v6975_v55 = vpop.f32.mrf.mxu2  ;;  %v7359_v1 = vpop.f32.mrf.mxu3  ;;  %v5900_v4 = vld [vmem:[#allocation2 + $0x1140] sm:$0xff] }
 0xb69   : > { %v7833_v39 = vadd.f32 %v6975_v55, %v5239_v3  ;;  %v7961_v58 = vadd.f32 %v7359_v1, %v11460_v40  ;;  %v582_v37 = vld [vmem:[#allocation2 + $0xb40] sm:$0xff] }
 0xb6a   : > { %v3178_v1 = vld [vmem:[#allocation2 + $0xc40] sm:$0xff] }
 0xb6b   : > { %8345 = vst [vmem:[%s9101_s18 + $0xa98] sm:$0xff] %v7833_v39 }
 0xb6c   : > { %8473 = vst [vmem:[%s9101_s18 + $0xe98] sm:$0xff] %v7961_v58  ;;  %v1787_v6 = vpop.f32.mrf.mxu0  ;;  %v4384_v35 = vpop.f32.mrf.mxu1 }
 0xb6d   : > { %v2646_v49 = vadd.f32 %v10925_v61, %v1787_v6  ;;  %7025 = vmatmul.f32.gmra.mxu2 %v5768_v31  ;;  %7409 = vmatmul.f32.gmra.mxu3 %v5896_v10  ;;  %v11465_v10 = vld [vmem:[#allocation61_spill] sm:$0xff] }
 0xb6f   : > { %v5240_v53 = vadd.f32 %v4384_v35, %v2646_v49  ;;  %1834 = vmatmul.f32.gmra.mxu0 %v578_v26  ;;  %4431 = vmatmul.f32.gmra.mxu1 %v3174_v9  ;;  %v5773_v26 = vld [vmem:[#allocation2 + $0xd48] sm:$0xff] }
 0xb70   : > { %v6978_v2 = vpop.f32.mrf.mxu2  ;;  %v7362_v59 = vpop.f32.mrf.mxu3  ;;  %v5901_v49 = vld [vmem:[#allocation2 + $0x1148] sm:$0xff] }
 0xb71   : > { %v7834_v16 = vadd.f32 %v6978_v2, %v5240_v53  ;;  %v7962_v62 = vadd.f32 %v7362_v59, %v11461_v12  ;;  %v583_v9 = vld [vmem:[#allocation2 + $0xb48] sm:$0xff] }
 0xb72   : > { %v3179_v59 = vld [vmem:[#allocation2 + $0xc48] sm:$0xff] }
 0xb73   : > { %8346 = vst [vmem:[%s9101_s18 + $0xaa0] sm:$0xff] %v7834_v16 }
 0xb74   : > { %8474 = vst [vmem:[%s9101_s18 + $0xea0] sm:$0xff] %v7962_v62  ;;  %v1790_v0 = vpop.f32.mrf.mxu0  ;;  %v4387_v11 = vpop.f32.mrf.mxu1 }
 0xb75   : > { %v2647_v21 = vadd.f32 %v10925_v61, %v1790_v0  ;;  %7028 = vmatmul.f32.gmra.mxu2 %v5769_v34  ;;  %7412 = vmatmul.f32.gmra.mxu3 %v5897_v15  ;;  %v11466_v15 = vld [vmem:[#allocation62_spill] sm:$0xff] }
 0xb77   : > { %v5241_v22 = vadd.f32 %v4387_v11, %v2647_v21  ;;  %1837 = vmatmul.f32.gmra.mxu0 %v579_v8  ;;  %4434 = vmatmul.f32.gmra.mxu1 %v3175_v43  ;;  %v5774_v8 = vld [vmem:[#allocation2 + $0xd50] sm:$0xff] }
 0xb78   : > { %v6981_v48 = vpop.f32.mrf.mxu2  ;;  %v7365_v47 = vpop.f32.mrf.mxu3  ;;  %v5902_v21 = vld [vmem:[#allocation2 + $0x1150] sm:$0xff] }
 0xb79   : > { %v7835_v63 = vadd.f32 %v6981_v48, %v5241_v22  ;;  %v7963_v56 = vadd.f32 %v7365_v47, %v11462_v30  ;;  %v584_v43 = vld [vmem:[#allocation2 + $0xb50] sm:$0xff] }
 0xb7a   : > { %v3180_v47 = vld [vmem:[#allocation2 + $0xc50] sm:$0xff] }
 0xb7b   : > { %8347 = vst [vmem:[%s9101_s18 + $0xaa8] sm:$0xff] %v7835_v63 }
 0xb7c   : > { %8475 = vst [vmem:[%s9101_s18 + $0xea8] sm:$0xff] %v7963_v56  ;;  %v1793_v42 = vpop.f32.mrf.mxu0  ;;  %v4390_v7 = vpop.f32.mrf.mxu1 }
 0xb7d   : > { %v2648_v50 = vadd.f32 %v10925_v61, %v1793_v42  ;;  %7031 = vmatmul.f32.gmra.mxu2 %v5770_v19  ;;  %7415 = vmatmul.f32.gmra.mxu3 %v5898_v60  ;;  %v11467_v60 = vld [vmem:[#allocation63_spill] sm:$0xff] }
 0xb7f   : > { %v5242_v38 = vadd.f32 %v4390_v7, %v2648_v50  ;;  %1840 = vmatmul.f32.gmra.mxu0 %v580_v29  ;;  %4437 = vmatmul.f32.gmra.mxu1 %v3176_v33  ;;  %v5775_v29 = vld [vmem:[#allocation2 + $0xd58] sm:$0xff] }
 0xb80   : > { %v6984_v14 = vpop.f32.mrf.mxu2  ;;  %v7368_v17 = vpop.f32.mrf.mxu3  ;;  %v5903_v50 = vld [vmem:[#allocation2 + $0x1158] sm:$0xff] }
 0xb81   : > { %v7836_v5 = vadd.f32 %v6984_v14, %v5242_v38  ;;  %v7964_v28 = vadd.f32 %v7368_v17, %v11463_v25  ;;  %v585_v33 = vld [vmem:[#allocation2 + $0xb58] sm:$0xff] }
 0xb82   : > { %v3181_v17 = vld [vmem:[#allocation2 + $0xc58] sm:$0xff] }
 0xb83   : > { %8348 = vst [vmem:[%s9101_s18 + $0xab0] sm:$0xff] %v7836_v5 }
 0xb84   : > { %8476 = vst [vmem:[%s9101_s18 + $0xeb0] sm:$0xff] %v7964_v28  ;;  %v1796_v44 = vpop.f32.mrf.mxu0  ;;  %v4393_v20 = vpop.f32.mrf.mxu1 }
 0xb85   : > { %v2649_v51 = vadd.f32 %v10925_v61, %v1796_v44  ;;  %7034 = vmatmul.f32.gmra.mxu2 %v5771_v41  ;;  %7418 = vmatmul.f32.gmra.mxu3 %v5899_v36  ;;  %v11468_v36 = vld [vmem:[#allocation64_spill] sm:$0xff] }
 0xb87   : > { %v5243_v24 = vadd.f32 %v4393_v20, %v2649_v51  ;;  %1843 = vmatmul.f32.gmra.mxu0 %v581_v46  ;;  %4440 = vmatmul.f32.gmra.mxu1 %v3177_v18  ;;  %v5776_v46 = vld [vmem:[#allocation2 + $0xd60] sm:$0xff] }
 0xb88   : > { %v6987_v32 = vpop.f32.mrf.mxu2  ;;  %v7371_v54 = vpop.f32.mrf.mxu3  ;;  %v5904_v51 = vld [vmem:[#allocation2 + $0x1160] sm:$0xff] }
 0xb89   : > { %v7837_v23 = vadd.f32 %v6987_v32, %v5243_v24  ;;  %v7965_v45 = vadd.f32 %v7371_v54, %v11464_v27  ;;  %v586_v18 = vld [vmem:[#allocation2 + $0xb60] sm:$0xff] }
 0xb8a   : > { %v3182_v54 = vld [vmem:[#allocation2 + $0xc60] sm:$0xff] }
 0xb8b   : > { %8349 = vst [vmem:[%s9101_s18 + $0xab8] sm:$0xff] %v7837_v23 }
 0xb8c   : > { %8477 = vst [vmem:[%s9101_s18 + $0xeb8] sm:$0xff] %v7965_v45  ;;  %v1799_v52 = vpop.f32.mrf.mxu0  ;;  %v4396_v55 = vpop.f32.mrf.mxu1 }
 0xb8d   : > { %v2650_v3 = vadd.f32 %v10925_v61, %v1799_v52  ;;  %7037 = vmatmul.f32.gmra.mxu2 %v5772_v57  ;;  %7421 = vmatmul.f32.gmra.mxu3 %v5900_v4  ;;  %v11469_v4 = vld [vmem:[#allocation65_spill] sm:$0xff] }
 0xb8f   : > { %v5244_v39 = vadd.f32 %v4396_v55, %v2650_v3  ;;  %1846 = vmatmul.f32.gmra.mxu0 %v582_v37  ;;  %4443 = vmatmul.f32.gmra.mxu1 %v3178_v1  ;;  %v5777_v37 = vld [vmem:[#allocation2 + $0xd68] sm:$0xff] }
 0xb90   : > { %v6990_v40 = vpop.f32.mrf.mxu2  ;;  %v7374_v58 = vpop.f32.mrf.mxu3  ;;  %v5905_v3 = vld [vmem:[#allocation2 + $0x1168] sm:$0xff] }
 0xb91   : > { %v7838_v31 = vadd.f32 %v6990_v40, %v5244_v39  ;;  %v7966_v6 = vadd.f32 %v7374_v58, %v11465_v10  ;;  %v587_v1 = vld [vmem:[#allocation2 + $0xb68] sm:$0xff] }
 0xb92   : > { %v3183_v58 = vld [vmem:[#allocation2 + $0xc68] sm:$0xff] }
 0xb93   : > { %8350 = vst [vmem:[%s9101_s18 + $0xac0] sm:$0xff] %v7838_v31 }
 0xb94   : > { %8478 = vst [vmem:[%s9101_s18 + $0xec0] sm:$0xff] %v7966_v6  ;;  %v1802_v35 = vpop.f32.mrf.mxu0  ;;  %v4399_v2 = vpop.f32.mrf.mxu1 }
 0xb95   : > { %v2651_v53 = vadd.f32 %v10925_v61, %v1802_v35  ;;  %7040 = vmatmul.f32.gmra.mxu2 %v5773_v26  ;;  %7424 = vmatmul.f32.gmra.mxu3 %v5901_v49  ;;  %v11470_v49 = vld [vmem:[#allocation66_spill] sm:$0xff] }
 0xb97   : > { %v5245_v16 = vadd.f32 %v4399_v2, %v2651_v53  ;;  %1849 = vmatmul.f32.gmra.mxu0 %v583_v9  ;;  %4446 = vmatmul.f32.gmra.mxu1 %v3179_v59  ;;  %v5778_v9 = vld [vmem:[#allocation2 + $0xd70] sm:$0xff] }
 0xb98   : > { %v6993_v12 = vpop.f32.mrf.mxu2  ;;  %v7377_v62 = vpop.f32.mrf.mxu3  ;;  %v5906_v53 = vld [vmem:[#allocation2 + $0x1170] sm:$0xff] }
 0xb99   : > { %v7839_v34 = vadd.f32 %v6993_v12, %v5245_v16  ;;  %v7967_v0 = vadd.f32 %v7377_v62, %v11466_v15  ;;  %v588_v59 = vld [vmem:[#allocation2 + $0xb70] sm:$0xff] }
 0xb9a   : > { %v3184_v62 = vld [vmem:[#allocation2 + $0xc70] sm:$0xff] }
 0xb9b   : > { %8351 = vst [vmem:[%s9101_s18 + $0xac8] sm:$0xff] %v7839_v34 }
 0xb9c   : > { %8479 = vst [vmem:[%s9101_s18 + $0xec8] sm:$0xff] %v7967_v0  ;;  %v1805_v11 = vpop.f32.mrf.mxu0  ;;  %v4402_v48 = vpop.f32.mrf.mxu1 }
 0xb9d   : > { %v2652_v22 = vadd.f32 %v10925_v61, %v1805_v11  ;;  %7043 = vmatmul.f32.gmra.mxu2 %v5774_v8  ;;  %7427 = vmatmul.f32.gmra.mxu3 %v5902_v21  ;;  %v11471_v21 = vld [vmem:[#allocation67_spill] sm:$0xff] }
 0xb9f   : > { %v5246_v63 = vadd.f32 %v4402_v48, %v2652_v22  ;;  %1852 = vmatmul.f32.gmra.mxu0 %v584_v43  ;;  %4449 = vmatmul.f32.gmra.mxu1 %v3180_v47  ;;  %v5779_v43 = vld [vmem:[#allocation2 + $0xd78] sm:$0xff] }
 0xba0   : > { %v6996_v30 = vpop.f32.mrf.mxu2  ;;  %v7380_v56 = vpop.f32.mrf.mxu3  ;;  %v5907_v22 = vld [vmem:[#allocation2 + $0x1178] sm:$0xff] }
 0xba1   : > { %v7840_v19 = vadd.f32 %v6996_v30, %v5246_v63  ;;  %v7968_v42 = vadd.f32 %v7380_v56, %v11467_v60  ;;  %v589_v47 = vld [vmem:[#allocation2 + $0xb78] sm:$0xff] }
 0xba2   : > { %v3185_v56 = vld [vmem:[#allocation2 + $0xc78] sm:$0xff] }
 0xba3   : > { %8352 = vst [vmem:[%s9101_s18 + $0xad0] sm:$0xff] %v7840_v19 }
 0xba4   : > { %8480 = vst [vmem:[%s9101_s18 + $0xed0] sm:$0xff] %v7968_v42  ;;  %v1808_v7 = vpop.f32.mrf.mxu0  ;;  %v4405_v14 = vpop.f32.mrf.mxu1 }
 0xba5   : > { %v2653_v38 = vadd.f32 %v10925_v61, %v1808_v7  ;;  %7046 = vmatmul.f32.gmra.mxu2 %v5775_v29  ;;  %7430 = vmatmul.f32.gmra.mxu3 %v5903_v50  ;;  %v11472_v50 = vld [vmem:[#allocation68_spill] sm:$0xff] }
 0xba7   : > { %v5247_v5 = vadd.f32 %v4405_v14, %v2653_v38  ;;  %1855 = vmatmul.f32.gmra.mxu0 %v585_v33  ;;  %4452 = vmatmul.f32.gmra.mxu1 %v3181_v17  ;;  %v5780_v33 = vld [vmem:[#allocation2 + $0xd80] sm:$0xff] }
 0xba8   : > { %v6999_v25 = vpop.f32.mrf.mxu2  ;;  %v7383_v28 = vpop.f32.mrf.mxu3  ;;  %v5908_v38 = vld [vmem:[#allocation2 + $0x1180] sm:$0xff] }
 0xba9   : > { %v7841_v41 = vadd.f32 %v6999_v25, %v5247_v5  ;;  %v7969_v44 = vadd.f32 %v7383_v28, %v11468_v36  ;;  %v590_v17 = vld [vmem:[#allocation2 + $0xb80] sm:$0xff] }
 0xbaa   : > { %v3186_v28 = vld [vmem:[#allocation2 + $0xc80] sm:$0xff] }
 0xbab   : > { %8353 = vst [vmem:[%s9101_s18 + $0xad8] sm:$0xff] %v7841_v41 }
 0xbac   : > { %8481 = vst [vmem:[%s9101_s18 + $0xed8] sm:$0xff] %v7969_v44  ;;  %v1811_v20 = vpop.f32.mrf.mxu0  ;;  %v4408_v32 = vpop.f32.mrf.mxu1 }
 0xbad   : > { %v2654_v24 = vadd.f32 %v10925_v61, %v1811_v20  ;;  %7049 = vmatmul.f32.gmra.mxu2 %v5776_v46  ;;  %7433 = vmatmul.f32.gmra.mxu3 %v5904_v51  ;;  %v11473_v51 = vld [vmem:[#allocation69_spill] sm:$0xff] }
 0xbaf   : > { %v5248_v23 = vadd.f32 %v4408_v32, %v2654_v24  ;;  %1858 = vmatmul.f32.gmra.mxu0 %v586_v18  ;;  %4455 = vmatmul.f32.gmra.mxu1 %v3182_v54  ;;  %v5781_v18 = vld [vmem:[#allocation2 + $0xd88] sm:$0xff] }
 0xbb0   : > { %v7002_v27 = vpop.f32.mrf.mxu2  ;;  %v7386_v45 = vpop.f32.mrf.mxu3  ;;  %v5909_v24 = vld [vmem:[#allocation2 + $0x1188] sm:$0xff] }
 0xbb1   : > { %v7842_v57 = vadd.f32 %v7002_v27, %v5248_v23  ;;  %v7970_v52 = vadd.f32 %v7386_v45, %v11469_v4  ;;  %v591_v54 = vld [vmem:[#allocation2 + $0xb88] sm:$0xff] }
 0xbb2   : > { %v3187_v45 = vld [vmem:[#allocation2 + $0xc88] sm:$0xff] }
 0xbb3   : > { %8354 = vst [vmem:[%s9101_s18 + $0xae0] sm:$0xff] %v7842_v57 }
 0xbb4   : > { %8482 = vst [vmem:[%s9101_s18 + $0xee0] sm:$0xff] %v7970_v52  ;;  %v1814_v55 = vpop.f32.mrf.mxu0  ;;  %v4411_v40 = vpop.f32.mrf.mxu1 }
 0xbb5   : > { %v2655_v39 = vadd.f32 %v10925_v61, %v1814_v55  ;;  %7052 = vmatmul.f32.gmra.mxu2 %v5777_v37  ;;  %7436 = vmatmul.f32.gmra.mxu3 %v5905_v3  ;;  %v11474_v3 = vld [vmem:[#allocation70_spill] sm:$0xff] }
 0xbb7   : > { %v5249_v31 = vadd.f32 %v4411_v40, %v2655_v39  ;;  %1861 = vmatmul.f32.gmra.mxu0 %v587_v1  ;;  %4458 = vmatmul.f32.gmra.mxu1 %v3183_v58  ;;  %v5782_v1 = vld [vmem:[#allocation2 + $0xd90] sm:$0xff] }
 0xbb8   : > { %v7005_v10 = vpop.f32.mrf.mxu2  ;;  %v7389_v6 = vpop.f32.mrf.mxu3  ;;  %v5910_v39 = vld [vmem:[#allocation2 + $0x1190] sm:$0xff] }
 0xbb9   : > { %v7843_v26 = vadd.f32 %v7005_v10, %v5249_v31  ;;  %v7971_v35 = vadd.f32 %v7389_v6, %v11470_v49  ;;  %v592_v58 = vld [vmem:[#allocation2 + $0xb90] sm:$0xff] }
 0xbba   : > { %v3188_v6 = vld [vmem:[#allocation2 + $0xc90] sm:$0xff] }
 0xbbb   : > { %8355 = vst [vmem:[%s9101_s18 + $0xae8] sm:$0xff] %v7843_v26 }
 0xbbc   : > { %8483 = vst [vmem:[%s9101_s18 + $0xee8] sm:$0xff] %v7971_v35  ;;  %v1817_v2 = vpop.f32.mrf.mxu0  ;;  %v4414_v12 = vpop.f32.mrf.mxu1 }
 0xbbd   : > { %v2656_v16 = vadd.f32 %v10925_v61, %v1817_v2  ;;  %7055 = vmatmul.f32.gmra.mxu2 %v5778_v9  ;;  %7439 = vmatmul.f32.gmra.mxu3 %v5906_v53  ;;  %v11475_v53 = vld [vmem:[#allocation71_spill] sm:$0xff] }
 0xbbf   : > { %v5250_v34 = vadd.f32 %v4414_v12, %v2656_v16  ;;  %1864 = vmatmul.f32.gmra.mxu0 %v588_v59  ;;  %4461 = vmatmul.f32.gmra.mxu1 %v3184_v62  ;;  %v5783_v59 = vld [vmem:[#allocation2 + $0xd98] sm:$0xff] }
 0xbc0   : > { %v7008_v15 = vpop.f32.mrf.mxu2  ;;  %v7392_v0 = vpop.f32.mrf.mxu3  ;;  %v5911_v16 = vld [vmem:[#allocation2 + $0x1198] sm:$0xff] }
 0xbc1   : > { %v7844_v8 = vadd.f32 %v7008_v15, %v5250_v34  ;;  %v7972_v11 = vadd.f32 %v7392_v0, %v11471_v21  ;;  %v593_v62 = vld [vmem:[#allocation2 + $0xb98] sm:$0xff] }
 0xbc2   : > { %v3189_v0 = vld [vmem:[#allocation2 + $0xc98] sm:$0xff] }
 0xbc3   : > { %8356 = vst [vmem:[%s9101_s18 + $0xaf0] sm:$0xff] %v7844_v8 }
 0xbc4   : > { %8484 = vst [vmem:[%s9101_s18 + $0xef0] sm:$0xff] %v7972_v11  ;;  %v1820_v48 = vpop.f32.mrf.mxu0  ;;  %v4417_v30 = vpop.f32.mrf.mxu1 }
 0xbc5   : > { %v2657_v63 = vadd.f32 %v10925_v61, %v1820_v48  ;;  %7058 = vmatmul.f32.gmra.mxu2 %v5779_v43  ;;  %7442 = vmatmul.f32.gmra.mxu3 %v5907_v22  ;;  %v11476_v22 = vld [vmem:[#allocation72_spill] sm:$0xff] }
 0xbc7   : > { %v5251_v19 = vadd.f32 %v4417_v30, %v2657_v63  ;;  %1867 = vmatmul.f32.gmra.mxu0 %v589_v47  ;;  %4464 = vmatmul.f32.gmra.mxu1 %v3185_v56  ;;  %v5784_v47 = vld [vmem:[#allocation2 + $0xda0] sm:$0xff] }
 0xbc8   : > { %v7011_v60 = vpop.f32.mrf.mxu2  ;;  %v7395_v42 = vpop.f32.mrf.mxu3  ;;  %v5912_v63 = vld [vmem:[#allocation2 + $0x11a0] sm:$0xff] }
 0xbc9   : > { %v7845_v29 = vadd.f32 %v7011_v60, %v5251_v19  ;;  %v7973_v7 = vadd.f32 %v7395_v42, %v11472_v50  ;;  %v594_v56 = vld [vmem:[#allocation2 + $0xba0] sm:$0xff] }
 0xbca   : > { %v3190_v42 = vld [vmem:[#allocation2 + $0xca0] sm:$0xff] }
 0xbcb   : > { %8357 = vst [vmem:[%s9101_s18 + $0xaf8] sm:$0xff] %v7845_v29 }
 0xbcc   : > { %8485 = vst [vmem:[%s9101_s18 + $0xef8] sm:$0xff] %v7973_v7  ;;  %v1823_v14 = vpop.f32.mrf.mxu0  ;;  %v4420_v25 = vpop.f32.mrf.mxu1 }
 0xbcd   : > { %v2658_v5 = vadd.f32 %v10925_v61, %v1823_v14  ;;  %7061 = vmatmul.f32.gmra.mxu2 %v5780_v33  ;;  %7445 = vmatmul.f32.gmra.mxu3 %v5908_v38  ;;  %v11477_v38 = vld [vmem:[#allocation73_spill] sm:$0xff] }
 0xbcf   : > { %v5252_v41 = vadd.f32 %v4420_v25, %v2658_v5  ;;  %1870 = vmatmul.f32.gmra.mxu0 %v590_v17  ;;  %4467 = vmatmul.f32.gmra.mxu1 %v3186_v28  ;;  %v5785_v17 = vld [vmem:[#allocation2 + $0xda8] sm:$0xff] }
 0xbd0   : > { %v7014_v36 = vpop.f32.mrf.mxu2  ;;  %v7398_v44 = vpop.f32.mrf.mxu3  ;;  %v5913_v5 = vld [vmem:[#allocation2 + $0x11a8] sm:$0xff] }
 0xbd1   : > { %v7846_v46 = vadd.f32 %v7014_v36, %v5252_v41  ;;  %v7974_v20 = vadd.f32 %v7398_v44, %v11473_v51  ;;  %v595_v28 = vld [vmem:[#allocation2 + $0xba8] sm:$0xff] }
 0xbd2   : > { %v3191_v44 = vld [vmem:[#allocation2 + $0xca8] sm:$0xff] }
 0xbd3   : > { %8358 = vst [vmem:[%s9101_s18 + $0xb00] sm:$0xff] %v7846_v46 }
 0xbd4   : > { %8486 = vst [vmem:[%s9101_s18 + $0xf00] sm:$0xff] %v7974_v20  ;;  %v1826_v32 = vpop.f32.mrf.mxu0  ;;  %v4423_v27 = vpop.f32.mrf.mxu1 }
 0xbd5   : > { %v2659_v23 = vadd.f32 %v10925_v61, %v1826_v32  ;;  %7064 = vmatmul.f32.gmra.mxu2 %v5781_v18  ;;  %7448 = vmatmul.f32.gmra.mxu3 %v5909_v24  ;;  %v11478_v24 = vld [vmem:[#allocation74_spill] sm:$0xff] }
 0xbd7   : > { %v5253_v57 = vadd.f32 %v4423_v27, %v2659_v23  ;;  %1873 = vmatmul.f32.gmra.mxu0 %v591_v54  ;;  %4470 = vmatmul.f32.gmra.mxu1 %v3187_v45  ;;  %v5786_v54 = vld [vmem:[#allocation2 + $0xdb0] sm:$0xff] }
 0xbd8   : > { %v7017_v4 = vpop.f32.mrf.mxu2  ;;  %v7401_v52 = vpop.f32.mrf.mxu3  ;;  %v5914_v23 = vld [vmem:[#allocation2 + $0x11b0] sm:$0xff] }
 0xbd9   : > { %v7847_v37 = vadd.f32 %v7017_v4, %v5253_v57  ;;  %v7975_v55 = vadd.f32 %v7401_v52, %v11474_v3  ;;  %v596_v45 = vld [vmem:[#allocation2 + $0xbb0] sm:$0xff] }
 0xbda   : > { %v3192_v52 = vld [vmem:[#allocation2 + $0xcb0] sm:$0xff] }
 0xbdb   : > { %8359 = vst [vmem:[%s9101_s18 + $0xb08] sm:$0xff] %v7847_v37 }
 0xbdc   : > { %8487 = vst [vmem:[%s9101_s18 + $0xf08] sm:$0xff] %v7975_v55  ;;  %v1829_v40 = vpop.f32.mrf.mxu0  ;;  %v4426_v10 = vpop.f32.mrf.mxu1 }
 0xbdd   : > { %v2660_v31 = vadd.f32 %v10925_v61, %v1829_v40  ;;  %7067 = vmatmul.f32.gmra.mxu2 %v5782_v1  ;;  %7451 = vmatmul.f32.gmra.mxu3 %v5910_v39  ;;  %v11479_v39 = vld [vmem:[#allocation75_spill] sm:$0xff] }
 0xbdf   : > { %v5254_v26 = vadd.f32 %v4426_v10, %v2660_v31  ;;  %1876 = vmatmul.f32.gmra.mxu0 %v592_v58  ;;  %4473 = vmatmul.f32.gmra.mxu1 %v3188_v6  ;;  %v5787_v58 = vld [vmem:[#allocation2 + $0xdb8] sm:$0xff] }
 0xbe0   : > { %v7020_v49 = vpop.f32.mrf.mxu2  ;;  %v7404_v35 = vpop.f32.mrf.mxu3  ;;  %v5915_v31 = vld [vmem:[#allocation2 + $0x11b8] sm:$0xff] }
 0xbe1   : > { %v7848_v9 = vadd.f32 %v7020_v49, %v5254_v26  ;;  %v7976_v2 = vadd.f32 %v7404_v35, %v11475_v53  ;;  %v597_v6 = vld [vmem:[#allocation2 + $0xbb8] sm:$0xff] }
 0xbe2   : > { %v3193_v35 = vld [vmem:[#allocation2 + $0xcb8] sm:$0xff] }
 0xbe3   : > { %8360 = vst [vmem:[%s9101_s18 + $0xb10] sm:$0xff] %v7848_v9 }
 0xbe4   : > { %8488 = vst [vmem:[%s9101_s18 + $0xf10] sm:$0xff] %v7976_v2  ;;  %v1832_v12 = vpop.f32.mrf.mxu0  ;;  %v4429_v15 = vpop.f32.mrf.mxu1 }
 0xbe5   : > { %v2661_v34 = vadd.f32 %v10925_v61, %v1832_v12  ;;  %7070 = vmatmul.f32.gmra.mxu2 %v5783_v59  ;;  %7454 = vmatmul.f32.gmra.mxu3 %v5911_v16  ;;  %v11480_v16 = vld [vmem:[#allocation76_spill] sm:$0xff] }
 0xbe7   : > { %v5255_v8 = vadd.f32 %v4429_v15, %v2661_v34  ;;  %1879 = vmatmul.f32.gmra.mxu0 %v593_v62  ;;  %4476 = vmatmul.f32.gmra.mxu1 %v3189_v0  ;;  %v5788_v62 = vld [vmem:[#allocation2 + $0xdc0] sm:$0xff] }
 0xbe8   : > { %v7023_v21 = vpop.f32.mrf.mxu2  ;;  %v7407_v11 = vpop.f32.mrf.mxu3  ;;  %v5916_v34 = vld [vmem:[#allocation2 + $0x11c0] sm:$0xff] }
 0xbe9   : > { %v7849_v43 = vadd.f32 %v7023_v21, %v5255_v8  ;;  %v7977_v48 = vadd.f32 %v7407_v11, %v11476_v22  ;;  %v598_v0 = vld [vmem:[#allocation2 + $0xbc0] sm:$0xff] }
 0xbea   : > { %v3194_v11 = vld [vmem:[#allocation2 + $0xcc0] sm:$0xff] }
 0xbeb   : > { %8361 = vst [vmem:[%s9101_s18 + $0xb18] sm:$0xff] %v7849_v43 }
 0xbec   : > { %8489 = vst [vmem:[%s9101_s18 + $0xf18] sm:$0xff] %v7977_v48  ;;  %v1835_v30 = vpop.f32.mrf.mxu0  ;;  %v4432_v60 = vpop.f32.mrf.mxu1 }
 0xbed   : > { %v2662_v19 = vadd.f32 %v10925_v61, %v1835_v30  ;;  %7073 = vmatmul.f32.gmra.mxu2 %v5784_v47  ;;  %7457 = vmatmul.f32.gmra.mxu3 %v5912_v63  ;;  %v11481_v63 = vld [vmem:[#allocation77_spill] sm:$0xff] }
 0xbef   : > { %v5256_v29 = vadd.f32 %v4432_v60, %v2662_v19  ;;  %1882 = vmatmul.f32.gmra.mxu0 %v594_v56  ;;  %4479 = vmatmul.f32.gmra.mxu1 %v3190_v42  ;;  %v5789_v56 = vld [vmem:[#allocation2 + $0xdc8] sm:$0xff] }
 0xbf0   : > { %v7026_v50 = vpop.f32.mrf.mxu2  ;;  %v7410_v7 = vpop.f32.mrf.mxu3  ;;  %v5917_v19 = vld [vmem:[#allocation2 + $0x11c8] sm:$0xff] }
 0xbf1   : > { %v7850_v33 = vadd.f32 %v7026_v50, %v5256_v29  ;;  %v7978_v14 = vadd.f32 %v7410_v7, %v11477_v38  ;;  %v599_v42 = vld [vmem:[#allocation2 + $0xbc8] sm:$0xff] }
 0xbf2   : > { %v3195_v7 = vld [vmem:[#allocation2 + $0xcc8] sm:$0xff] }
 0xbf3   : > { %8362 = vst [vmem:[%s9101_s18 + $0xb20] sm:$0xff] %v7850_v33 }
 0xbf4   : > { %8490 = vst [vmem:[%s9101_s18 + $0xf20] sm:$0xff] %v7978_v14  ;;  %v1838_v25 = vpop.f32.mrf.mxu0  ;;  %v4435_v36 = vpop.f32.mrf.mxu1 }
 0xbf5   : > { %v2663_v41 = vadd.f32 %v10925_v61, %v1838_v25  ;;  %7076 = vmatmul.f32.gmra.mxu2 %v5785_v17  ;;  %7460 = vmatmul.f32.gmra.mxu3 %v5913_v5  ;;  %v11482_v5 = vld [vmem:[#allocation78_spill] sm:$0xff] }
 0xbf7   : > { %v5257_v46 = vadd.f32 %v4435_v36, %v2663_v41  ;;  %1885 = vmatmul.f32.gmra.mxu0 %v595_v28  ;;  %4482 = vmatmul.f32.gmra.mxu1 %v3191_v44  ;;  %v5790_v28 = vld [vmem:[#allocation2 + $0xdd0] sm:$0xff] }
 0xbf8   : > { %v7029_v51 = vpop.f32.mrf.mxu2  ;;  %v7413_v20 = vpop.f32.mrf.mxu3  ;;  %v5918_v41 = vld [vmem:[#allocation2 + $0x11d0] sm:$0xff] }
 0xbf9   : > { %v7851_v18 = vadd.f32 %v7029_v51, %v5257_v46  ;;  %v7979_v32 = vadd.f32 %v7413_v20, %v11478_v24  ;;  %v600_v44 = vld [vmem:[#allocation2 + $0xbd0] sm:$0xff] }
 0xbfa   : > { %v3196_v20 = vld [vmem:[#allocation2 + $0xcd0] sm:$0xff] }
 0xbfb   : > { %8363 = vst [vmem:[%s9101_s18 + $0xb28] sm:$0xff] %v7851_v18 }
 0xbfc   : > { %8491 = vst [vmem:[%s9101_s18 + $0xf28] sm:$0xff] %v7979_v32  ;;  %v1841_v27 = vpop.f32.mrf.mxu0  ;;  %v4438_v4 = vpop.f32.mrf.mxu1 }
 0xbfd   : > { %v2664_v57 = vadd.f32 %v10925_v61, %v1841_v27  ;;  %7079 = vmatmul.f32.gmra.mxu2 %v5786_v54  ;;  %7463 = vmatmul.f32.gmra.mxu3 %v5914_v23  ;;  %v11483_v23 = vld [vmem:[#allocation79_spill] sm:$0xff] }
 0xbff   : > { %v5258_v37 = vadd.f32 %v4438_v4, %v2664_v57  ;;  %1888 = vmatmul.f32.gmra.mxu0 %v596_v45  ;;  %4485 = vmatmul.f32.gmra.mxu1 %v3192_v52  ;;  %v5791_v45 = vld [vmem:[#allocation2 + $0xdd8] sm:$0xff] }
 0xc00   : > { %v7032_v3 = vpop.f32.mrf.mxu2  ;;  %v7416_v55 = vpop.f32.mrf.mxu3  ;;  %v5919_v57 = vld [vmem:[#allocation2 + $0x11d8] sm:$0xff] }
 0xc01   : > { %v7852_v1 = vadd.f32 %v7032_v3, %v5258_v37  ;;  %v7980_v40 = vadd.f32 %v7416_v55, %v11479_v39  ;;  %v601_v52 = vld [vmem:[#allocation2 + $0xbd8] sm:$0xff] }
 0xc02   : > { %v3197_v55 = vld [vmem:[#allocation2 + $0xcd8] sm:$0xff] }
 0xc03   : > { %8364 = vst [vmem:[%s9101_s18 + $0xb30] sm:$0xff] %v7852_v1 }
 0xc04   : > { %8492 = vst [vmem:[%s9101_s18 + $0xf30] sm:$0xff] %v7980_v40  ;;  %v1844_v10 = vpop.f32.mrf.mxu0  ;;  %v4441_v49 = vpop.f32.mrf.mxu1 }
 0xc05   : > { %v2665_v26 = vadd.f32 %v10925_v61, %v1844_v10  ;;  %7082 = vmatmul.f32.gmra.mxu2 %v5787_v58  ;;  %7466 = vmatmul.f32.gmra.mxu3 %v5915_v31  ;;  %v11484_v31 = vld [vmem:[#allocation80_spill] sm:$0xff] }
 0xc07   : > { %v5259_v9 = vadd.f32 %v4441_v49, %v2665_v26  ;;  %1891 = vmatmul.f32.gmra.mxu0 %v597_v6  ;;  %4488 = vmatmul.f32.gmra.mxu1 %v3193_v35  ;;  %v5792_v6 = vld [vmem:[#allocation2 + $0xde0] sm:$0xff] }
 0xc08   : > { %v7035_v53 = vpop.f32.mrf.mxu2  ;;  %v7419_v2 = vpop.f32.mrf.mxu3  ;;  %v5920_v26 = vld [vmem:[#allocation2 + $0x11e0] sm:$0xff] }
 0xc09   : > { %v7853_v59 = vadd.f32 %v7035_v53, %v5259_v9  ;;  %v7981_v12 = vadd.f32 %v7419_v2, %v11480_v16  ;;  %v602_v35 = vld [vmem:[#allocation2 + $0xbe0] sm:$0xff] }
 0xc0a   : > { %v3198_v2 = vld [vmem:[#allocation2 + $0xce0] sm:$0xff] }
 0xc0b   : > { %8365 = vst [vmem:[%s9101_s18 + $0xb38] sm:$0xff] %v7853_v59 }
 0xc0c   : > { %8493 = vst [vmem:[%s9101_s18 + $0xf38] sm:$0xff] %v7981_v12  ;;  %v1847_v15 = vpop.f32.mrf.mxu0  ;;  %v4444_v21 = vpop.f32.mrf.mxu1 }
 0xc0d   : > { %v2666_v8 = vadd.f32 %v10925_v61, %v1847_v15  ;;  %7085 = vmatmul.f32.gmra.mxu2 %v5788_v62  ;;  %7469 = vmatmul.f32.gmra.mxu3 %v5916_v34  ;;  %v11485_v34 = vld [vmem:[#allocation81_spill] sm:$0xff] }
 0xc0f   : > { %v5260_v43 = vadd.f32 %v4444_v21, %v2666_v8  ;;  %1894 = vmatmul.f32.gmra.mxu0 %v598_v0  ;;  %4491 = vmatmul.f32.gmra.mxu1 %v3194_v11  ;;  %v5793_v0 = vld [vmem:[#allocation2 + $0xde8] sm:$0xff] }
 0xc10   : > { %v7038_v22 = vpop.f32.mrf.mxu2  ;;  %v7422_v48 = vpop.f32.mrf.mxu3  ;;  %v5921_v8 = vld [vmem:[#allocation2 + $0x11e8] sm:$0xff] }
 0xc11   : > { %v7854_v47 = vadd.f32 %v7038_v22, %v5260_v43  ;;  %v7982_v30 = vadd.f32 %v7422_v48, %v11481_v63  ;;  %v603_v11 = vld [vmem:[#allocation2 + $0xbe8] sm:$0xff] }
 0xc12   : > { %v3199_v48 = vld [vmem:[#allocation2 + $0xce8] sm:$0xff] }
 0xc13   : > { %8366 = vst [vmem:[%s9101_s18 + $0xb40] sm:$0xff] %v7854_v47 }
 0xc14   : > { %8494 = vst [vmem:[%s9101_s18 + $0xf40] sm:$0xff] %v7982_v30  ;;  %v1850_v60 = vpop.f32.mrf.mxu0  ;;  %v4447_v50 = vpop.f32.mrf.mxu1 }
 0xc15   : > { %v2667_v29 = vadd.f32 %v10925_v61, %v1850_v60  ;;  %7088 = vmatmul.f32.gmra.mxu2 %v5789_v56  ;;  %7472 = vmatmul.f32.gmra.mxu3 %v5917_v19  ;;  %v11043_v61 = vld [vmem:[#allocation7] ss:$0 sm:$0xff]  ;;  %v11486_v19 = vld [vmem:[#allocation82_spill] sm:$0xff] }
 0xc17   : > { %v5261_v33 = vadd.f32 %v4447_v50, %v2667_v29  ;;  %1897 = vmatmul.f32.gmra.mxu0 %v599_v42  ;;  %4494 = vmatmul.f32.gmra.mxu1 %v3195_v7  ;;  %v5794_v42 = vld [vmem:[#allocation2 + $0xdf0] sm:$0xff] }
 0xc18   : > { %v7041_v38 = vpop.f32.mrf.mxu2  ;;  %v7425_v14 = vpop.f32.mrf.mxu3  ;;  %v5922_v29 = vld [vmem:[#allocation2 + $0x11f0] sm:$0xff] }
 0xc19   : > { %v7855_v17 = vadd.f32 %v7041_v38, %v5261_v33  ;;  %v7983_v25 = vadd.f32 %v7425_v14, %v11482_v5  ;;  %v604_v7 = vld [vmem:[#allocation2 + $0xbf0] sm:$0xff] }
 0xc1a   : > { %v3200_v14 = vld [vmem:[#allocation2 + $0xcf0] sm:$0xff] }
 0xc1b   : > { %8367 = vst [vmem:[%s9101_s18 + $0xb48] sm:$0xff] %v7855_v17 }
 0xc1c   : > { %8495 = vst [vmem:[%s9101_s18 + $0xf48] sm:$0xff] %v7983_v25  ;;  %v1853_v36 = vpop.f32.mrf.mxu0  ;;  %v4450_v51 = vpop.f32.mrf.mxu1 }
 0xc1d   : > { %v2668_v46 = vadd.f32 %v11043_v61, %v1853_v36  ;;  %7091 = vmatmul.f32.gmra.mxu2 %v5790_v28  ;;  %7475 = vmatmul.f32.gmra.mxu3 %v5918_v41  ;;  %v11487_v41 = vld [vmem:[#allocation83_spill] sm:$0xff] }
 0xc1f   : > { %v5262_v18 = vadd.f32 %v4450_v51, %v2668_v46  ;;  %1900 = vmatmul.f32.gmra.mxu0 %v600_v44  ;;  %4497 = vmatmul.f32.gmra.mxu1 %v3196_v20  ;;  %v5795_v44 = vld [vmem:[#allocation2 + $0xdf8] sm:$0xff] }
 0xc20   : > { %v7044_v24 = vpop.f32.mrf.mxu2  ;;  %v7428_v32 = vpop.f32.mrf.mxu3  ;;  %v5923_v46 = vld [vmem:[#allocation2 + $0x11f8] sm:$0xff] }
 0xc21   : > { %v7856_v54 = vadd.f32 %v7044_v24, %v5262_v18  ;;  %v7984_v27 = vadd.f32 %v7428_v32, %v11483_v23  ;;  %v605_v20 = vld [vmem:[#allocation2 + $0xbf8] sm:$0xff] }
 0xc22   : > { %v3201_v32 = vld [vmem:[#allocation2 + $0xcf8] sm:$0xff] }
 0xc23   : > { %8368 = vst [vmem:[%s9101_s18 + $0xb50] sm:$0xff] %v7856_v54 }
 0xc24   : > { %8496 = vst [vmem:[%s9101_s18 + $0xf50] sm:$0xff] %v7984_v27  ;;  %v1856_v4 = vpop.f32.mrf.mxu0  ;;  %v4453_v3 = vpop.f32.mrf.mxu1 }
 0xc25   : > { %v2669_v37 = vadd.f32 %v11043_v61, %v1856_v4  ;;  %7094 = vmatmul.f32.gmra.mxu2 %v5791_v45  ;;  %7478 = vmatmul.f32.gmra.mxu3 %v5919_v57  ;;  %v11488_v57 = vld [vmem:[#allocation84_spill] sm:$0xff] }
 0xc27   : > { %v5263_v1 = vadd.f32 %v4453_v3, %v2669_v37  ;;  %1903 = vmatmul.f32.gmra.mxu0 %v601_v52  ;;  %4500 = vmatmul.f32.gmra.mxu1 %v3197_v55 }
 0xc28   : > { %v7047_v39 = vpop.f32.mrf.mxu2  ;;  %v7431_v40 = vpop.f32.mrf.mxu3 }
 0xc29   : > { %v7857_v58 = vadd.f32 %v7047_v39, %v5263_v1  ;;  %v7985_v10 = vadd.f32 %v7431_v40, %v11484_v31 }
 0xc2b   : > { %8369 = vst [vmem:[%s9101_s18 + $0xb58] sm:$0xff] %v7857_v58  ;;  %v11489_v58 = vld [vmem:[#allocation85_spill] sm:$0xff] }
 0xc2c   : > { %8497 = vst [vmem:[%s9101_s18 + $0xf58] sm:$0xff] %v7985_v10  ;;  %v1859_v49 = vpop.f32.mrf.mxu0  ;;  %v4456_v53 = vpop.f32.mrf.mxu1 }
 0xc2d   : > { %v2670_v9 = vadd.f32 %v11043_v61, %v1859_v49  ;;  %7097 = vmatmul.f32.gmra.mxu2 %v5792_v6  ;;  %7481 = vmatmul.f32.gmra.mxu3 %v5920_v26 }
 0xc2f   : > { %v5264_v59 = vadd.f32 %v4456_v53, %v2670_v9  ;;  %1906 = vmatmul.f32.gmra.mxu0 %v602_v35  ;;  %4503 = vmatmul.f32.gmra.mxu1 %v3198_v2  ;;  %v11490_v2 = vld [vmem:[#allocation86_spill] sm:$0xff] }
 0xc30   : > { %v7050_v16 = vpop.f32.mrf.mxu2  ;;  %v7434_v12 = vpop.f32.mrf.mxu3 }
 0xc31   : > { %v7858_v62 = vadd.f32 %v7050_v16, %v5264_v59  ;;  %v7986_v15 = vadd.f32 %v7434_v12, %v11485_v34 }
 0xc33   : > { %8370 = vst [vmem:[%s9101_s18 + $0xb60] sm:$0xff] %v7858_v62 }
 0xc34   : > { %8498 = vst [vmem:[%s9101_s18 + $0xf60] sm:$0xff] %v7986_v15  ;;  %v1862_v21 = vpop.f32.mrf.mxu0  ;;  %v4459_v22 = vpop.f32.mrf.mxu1 }
 0xc35   : > { %v2671_v43 = vadd.f32 %v11043_v61, %v1862_v21  ;;  %7100 = vmatmul.f32.gmra.mxu2 %v5793_v0  ;;  %7484 = vmatmul.f32.gmra.mxu3 %v5921_v8  ;;  %v11491_v21 = vld [vmem:[#allocation87_spill] sm:$0xff] }
 0xc37   : > { %v5265_v47 = vadd.f32 %v4459_v22, %v2671_v43  ;;  %1909 = vmatmul.f32.gmra.mxu0 %v603_v11  ;;  %4506 = vmatmul.f32.gmra.mxu1 %v3199_v48 }
 0xc38   : > { %v7053_v63 = vpop.f32.mrf.mxu2  ;;  %v7437_v30 = vpop.f32.mrf.mxu3 }
 0xc39   : > { %v7859_v56 = vadd.f32 %v7053_v63, %v5265_v47  ;;  %v7987_v60 = vadd.f32 %v7437_v30, %v11486_v19  ;;  %v11492_v19 = vld [vmem:[#allocation88_spill] sm:$0xff] }
 0xc3b   : > { %8371 = vst [vmem:[%s9101_s18 + $0xb68] sm:$0xff] %v7859_v56 }
 0xc3c   : > { %8499 = vst [vmem:[%s9101_s18 + $0xf68] sm:$0xff] %v7987_v60  ;;  %v1865_v50 = vpop.f32.mrf.mxu0  ;;  %v4462_v38 = vpop.f32.mrf.mxu1 }
 0xc3d   : > { %v2672_v33 = vadd.f32 %v11043_v61, %v1865_v50  ;;  %7103 = vmatmul.f32.gmra.mxu2 %v5794_v42  ;;  %7487 = vmatmul.f32.gmra.mxu3 %v5922_v29 }
 0xc3f   : > { %v5266_v17 = vadd.f32 %v4462_v38, %v2672_v33  ;;  %1912 = vmatmul.f32.gmra.mxu0 %v604_v7  ;;  %4509 = vmatmul.f32.gmra.mxu1 %v3200_v14 }
 0xc40   : > { %v7056_v5 = vpop.f32.mrf.mxu2  ;;  %v7440_v25 = vpop.f32.mrf.mxu3 }
 0xc41   : > { %v7860_v28 = vadd.f32 %v7056_v5, %v5266_v17  ;;  %v7988_v36 = vadd.f32 %v7440_v25, %v11487_v41  ;;  %v11493_v17 = vld [vmem:[#allocation89_spill] sm:$0xff] }
 0xc43   : > { %8372 = vst [vmem:[%s9101_s18 + $0xb70] sm:$0xff] %v7860_v28 }
 0xc44   : > { %8500 = vst [vmem:[%s9101_s18 + $0xf70] sm:$0xff] %v7988_v36  ;;  %v1868_v51 = vpop.f32.mrf.mxu0  ;;  %v4465_v24 = vpop.f32.mrf.mxu1 }
 0xc45   : > { %v2673_v18 = vadd.f32 %v11043_v61, %v1868_v51  ;;  %7106 = vmatmul.f32.gmra.mxu2 %v5795_v44  ;;  %7490 = vmatmul.f32.gmra.mxu3 %v5923_v46 }
 0xc47   : > { %v5267_v54 = vadd.f32 %v4465_v24, %v2673_v18  ;;  %1915 = vmatmul.f32.gmra.mxu0 %v605_v20  ;;  %4512 = vmatmul.f32.gmra.mxu1 %v3201_v32  ;;  %v11494_v20 = vld [vmem:[#allocation90_spill] sm:$0xff] }
 0xc48   : > { %v7059_v23 = vpop.f32.mrf.mxu2  ;;  %v7443_v27 = vpop.f32.mrf.mxu3 }
 0xc49   : > { %v7861_v45 = vadd.f32 %v7059_v23, %v5267_v54  ;;  %v7989_v4 = vadd.f32 %v7443_v27, %v11488_v57 }
 0xc4b   : > { %8373 = vst [vmem:[%s9101_s18 + $0xb78] sm:$0xff] %v7861_v45 }
 0xc4c   : > { %8501 = vst [vmem:[%s9101_s18 + $0xf78] sm:$0xff] %v7989_v4  ;;  %v1871_v52 = vpop.f32.mrf.mxu0  ;;  %v4468_v3 = vpop.f32.mrf.mxu1  ;;  %v11495_v4 = vld [vmem:[#allocation91_spill] sm:$0xff] }
 0xc4d   : > { %v2674_v37 = vadd.f32 %v11043_v61, %v1871_v52 }
 0xc4f   : > { %v5268_v55 = vadd.f32 %v4468_v3, %v2674_v37 }
 0xc50   : > { %v7062_v1 = vpop.f32.mrf.mxu2  ;;  %v7446_v39 = vpop.f32.mrf.mxu3 }
 0xc51   : > { %v7862_v40 = vadd.f32 %v7062_v1, %v5268_v55  ;;  %v7990_v31 = vadd.f32 %v7446_v39, %v11489_v58 }
 0xc53   : > { %8374 = vst [vmem:[%s9101_s18 + $0xb80] sm:$0xff] %v7862_v40 }
 0xc54   : > { %8502 = vst [vmem:[%s9101_s18 + $0xf80] sm:$0xff] %v7990_v31  ;;  %v1874_v10 = vpop.f32.mrf.mxu0  ;;  %v4471_v26 = vpop.f32.mrf.mxu1  ;;  %v11496_v31 = vld [vmem:[#allocation92_spill] sm:$0xff] }
 0xc55   : > { %v2675_v6 = vadd.f32 %v11043_v61, %v1874_v10 }
 0xc57   : > { %v5269_v49 = vadd.f32 %v4471_v26, %v2675_v6 }
 0xc58   : > { %v7065_v35 = vpop.f32.mrf.mxu2  ;;  %v7449_v9 = vpop.f32.mrf.mxu3 }
 0xc59   : > { %v7863_v53 = vadd.f32 %v7065_v35, %v5269_v49  ;;  %v7991_v59 = vadd.f32 %v7449_v9, %v11490_v2 }
 0xc5b   : > { %8375 = vst [vmem:[%s9101_s18 + $0xb88] sm:$0xff] %v7863_v53 }
 0xc5c   : > { %8503 = vst [vmem:[%s9101_s18 + $0xf88] sm:$0xff] %v7991_v59  ;;  %v1877_v16 = vpop.f32.mrf.mxu0  ;;  %v4474_v62 = vpop.f32.mrf.mxu1  ;;  %v11497_v59 = vld [vmem:[#allocation93_spill] sm:$0xff] }
 0xc5d   : > { %v2676_v12 = vadd.f32 %v11043_v61, %v1877_v16 }
 0xc5f   : > { %v5270_v34 = vadd.f32 %v4474_v62, %v2676_v12 }
 0xc60   : > { %v7068_v15 = vpop.f32.mrf.mxu2  ;;  %v7452_v0 = vpop.f32.mrf.mxu3 }
 0xc61   : > { %v7864_v8 = vadd.f32 %v7068_v15, %v5270_v34  ;;  %v7992_v11 = vadd.f32 %v7452_v0, %v11491_v21 }
 0xc63   : > { %8376 = vst [vmem:[%s9101_s18 + $0xb90] sm:$0xff] %v7864_v8 }
 0xc64   : > { %8504 = vst [vmem:[%s9101_s18 + $0xf90] sm:$0xff] %v7992_v11  ;;  %v1880_v43 = vpop.f32.mrf.mxu0  ;;  %v4477_v48 = vpop.f32.mrf.mxu1  ;;  %v11498_v11 = vld [vmem:[#allocation94_spill] sm:$0xff] }
 0xc65   : > { %v2677_v22 = vadd.f32 %v11043_v61, %v1880_v43 }
 0xc67   : > { %v5271_v47 = vadd.f32 %v4477_v48, %v2677_v22 }
 0xc68   : > { %v7071_v63 = vpop.f32.mrf.mxu2  ;;  %v7455_v30 = vpop.f32.mrf.mxu3 }
 0xc69   : > { %v7865_v56 = vadd.f32 %v7071_v63, %v5271_v47  ;;  %v7993_v60 = vadd.f32 %v7455_v30, %v11492_v19 }
 0xc6b   : > { %8377 = vst [vmem:[%s9101_s18 + $0xb98] sm:$0xff] %v7865_v56 }
 0xc6c   : > { %8505 = vst [vmem:[%s9101_s18 + $0xf98] sm:$0xff] %v7993_v60  ;;  %v1883_v42 = vpop.f32.mrf.mxu0  ;;  %v4480_v50 = vpop.f32.mrf.mxu1  ;;  %v11499_v60 = vld [vmem:[#allocation95_spill] sm:$0xff] }
 0xc6d   : > { %v2678_v29 = vadd.f32 %v11043_v61, %v1883_v42 }
 0xc6f   : > { %v5272_v7 = vadd.f32 %v4480_v50, %v2678_v29 }
 0xc70   : > { %v7074_v33 = vpop.f32.mrf.mxu2  ;;  %v7458_v38 = vpop.f32.mrf.mxu3 }
 0xc71   : > { %v7866_v14 = vadd.f32 %v7074_v33, %v5272_v7  ;;  %v7994_v5 = vadd.f32 %v7458_v38, %v11493_v17 }
 0xc73   : > { %8378 = vst [vmem:[%s9101_s18 + $0xba0] sm:$0xff] %v7866_v14 }
 0xc74   : > { %8506 = vst [vmem:[%s9101_s18 + $0xfa0] sm:$0xff] %v7994_v5  ;;  %v1886_v25 = vpop.f32.mrf.mxu0  ;;  %v4483_v41 = vpop.f32.mrf.mxu1  ;;  %v11500_v5 = vld [vmem:[#allocation96_spill] sm:$0xff] }
 0xc75   : > { %v2679_v28 = vadd.f32 %v11043_v61, %v1886_v25 }
 0xc77   : > { %v5273_v36 = vadd.f32 %v4483_v41, %v2679_v28 }
 0xc78   : > { %v7077_v44 = vpop.f32.mrf.mxu2  ;;  %v7461_v46 = vpop.f32.mrf.mxu3 }
 0xc79   : > { %v7867_v51 = vadd.f32 %v7077_v44, %v5273_v36  ;;  %v7995_v18 = vadd.f32 %v7461_v46, %v11494_v20 }
 0xc7b   : > { %8379 = vst [vmem:[%s9101_s18 + $0xba8] sm:$0xff] %v7867_v51 }
 0xc7c   : > { %8507 = vst [vmem:[%s9101_s18 + $0xfa8] sm:$0xff] %v7995_v18  ;;  %v1889_v24 = vpop.f32.mrf.mxu0  ;;  %v4486_v54 = vpop.f32.mrf.mxu1  ;;  %v11501_v18 = vld [vmem:[#allocation97_spill] sm:$0xff] }
 0xc7d   : > { %v2680_v32 = vadd.f32 %v11043_v61, %v1889_v24 }
 0xc7f   : > { %v5274_v23 = vadd.f32 %v4486_v54, %v2680_v32 }
 0xc80   : > { %v7080_v27 = vpop.f32.mrf.mxu2  ;;  %v7464_v45 = vpop.f32.mrf.mxu3 }
 0xc81   : > { %v7868_v57 = vadd.f32 %v7080_v27, %v5274_v23  ;;  %v7996_v52 = vadd.f32 %v7464_v45, %v11495_v4 }
 0xc83   : > { %8380 = vst [vmem:[%s9101_s18 + $0xbb0] sm:$0xff] %v7868_v57 }
 0xc84   : > { %8508 = vst [vmem:[%s9101_s18 + $0xfb0] sm:$0xff] %v7996_v52  ;;  %v1892_v37 = vpop.f32.mrf.mxu0  ;;  %v4489_v55 = vpop.f32.mrf.mxu1  ;;  %v11502_v52 = vld [vmem:[#allocation98_spill] sm:$0xff] }
 0xc85   : > { %v2681_v3 = vadd.f32 %v11043_v61, %v1892_v37 }
 0xc87   : > { %v5275_v1 = vadd.f32 %v4489_v55, %v2681_v3 }
 0xc88   : > { %v7083_v39 = vpop.f32.mrf.mxu2  ;;  %v7467_v40 = vpop.f32.mrf.mxu3 }
 0xc89   : > { %v7869_v58 = vadd.f32 %v7083_v39, %v5275_v1  ;;  %v7997_v10 = vadd.f32 %v7467_v40, %v11496_v31 }
 0xc8b   : > { %8381 = vst [vmem:[%s9101_s18 + $0xbb8] sm:$0xff] %v7869_v58 }
 0xc8c   : > { %8509 = vst [vmem:[%s9101_s18 + $0xfb8] sm:$0xff] %v7997_v10  ;;  %v1895_v6 = vpop.f32.mrf.mxu0  ;;  %v4492_v49 = vpop.f32.mrf.mxu1  ;;  %v11503_v10 = vld [vmem:[#allocation99_spill] sm:$0xff] }
 0xc8d   : > { %v2682_v26 = vadd.f32 %v11043_v61, %v1895_v6 }
 0xc8f   : > { %v5276_v35 = vadd.f32 %v4492_v49, %v2682_v26 }
 0xc90   : > { %v7086_v9 = vpop.f32.mrf.mxu2  ;;  %v7470_v53 = vpop.f32.mrf.mxu3 }
 0xc91   : > { %v7870_v2 = vadd.f32 %v7086_v9, %v5276_v35  ;;  %v7998_v16 = vadd.f32 %v7470_v53, %v11497_v59 }
 0xc93   : > { %8382 = vst [vmem:[%s9101_s18 + $0xbc0] sm:$0xff] %v7870_v2 }
 0xc94   : > { %8510 = vst [vmem:[%s9101_s18 + $0xfc0] sm:$0xff] %v7998_v16  ;;  %v1898_v12 = vpop.f32.mrf.mxu0  ;;  %v4495_v34 = vpop.f32.mrf.mxu1 }
 0xc95   : > { %v2683_v62 = vadd.f32 %v11043_v61, %v1898_v12 }
 0xc97   : > { %v5277_v15 = vadd.f32 %v4495_v34, %v2683_v62 }
 0xc98   : > { %v7089_v0 = vpop.f32.mrf.mxu2  ;;  %v7473_v8 = vpop.f32.mrf.mxu3 }
 0xc99   : > { %v7871_v21 = vadd.f32 %v7089_v0, %v5277_v15  ;;  %v7999_v43 = vadd.f32 %v7473_v8, %v11498_v11 }
 0xc9b   : > { %8383 = vst [vmem:[%s9101_s18 + $0xbc8] sm:$0xff] %v7871_v21 }
 0xc9c   : > { %8511 = vst [vmem:[%s9101_s18 + $0xfc8] sm:$0xff] %v7999_v43  ;;  %v1901_v22 = vpop.f32.mrf.mxu0  ;;  %v4498_v47 = vpop.f32.mrf.mxu1 }
 0xc9d   : > { %v2684_v48 = vadd.f32 %v11043_v61, %v1901_v22 }
 0xc9f   : > { %v5278_v63 = vadd.f32 %v4498_v47, %v2684_v48 }
 0xca0   : > { %v7092_v30 = vpop.f32.mrf.mxu2  ;;  %v7476_v56 = vpop.f32.mrf.mxu3 }
 0xca1   : > { %v7872_v19 = vadd.f32 %v7092_v30, %v5278_v63  ;;  %v8000_v42 = vadd.f32 %v7476_v56, %v11499_v60 }
 0xca3   : > { %8384 = vst [vmem:[%s9101_s18 + $0xbd0] sm:$0xff] %v7872_v19 }
 0xca4   : > { %8512 = vst [vmem:[%s9101_s18 + $0xfd0] sm:$0xff] %v8000_v42  ;;  %v1904_v29 = vpop.f32.mrf.mxu0  ;;  %v4501_v7 = vpop.f32.mrf.mxu1 }
 0xca5   : > { %v2685_v50 = vadd.f32 %v11043_v61, %v1904_v29 }
 0xca7   : > { %v5279_v33 = vadd.f32 %v4501_v7, %v2685_v50 }
 0xca8   : > { %v7095_v38 = vpop.f32.mrf.mxu2  ;;  %v7479_v14 = vpop.f32.mrf.mxu3 }
 0xca9   : > { %v7873_v17 = vadd.f32 %v7095_v38, %v5279_v33  ;;  %v8001_v25 = vadd.f32 %v7479_v14, %v11500_v5 }
 0xcab   : > { %8385 = vst [vmem:[%s9101_s18 + $0xbd8] sm:$0xff] %v7873_v17 }
 0xcac   : > { %8513 = vst [vmem:[%s9101_s18 + $0xfd8] sm:$0xff] %v8001_v25  ;;  %v1907_v28 = vpop.f32.mrf.mxu0  ;;  %v4504_v36 = vpop.f32.mrf.mxu1 }
 0xcad   : > { %v2686_v41 = vadd.f32 %v11043_v61, %v1907_v28 }
 0xcaf   : > { %v5280_v44 = vadd.f32 %v4504_v36, %v2686_v41 }
 0xcb0   : > { %v7098_v46 = vpop.f32.mrf.mxu2  ;;  %v7482_v51 = vpop.f32.mrf.mxu3 }
 0xcb1   : > { %v7874_v20 = vadd.f32 %v7098_v46, %v5280_v44  ;;  %v8002_v24 = vadd.f32 %v7482_v51, %v11501_v18 }
 0xcb3   : > { %8386 = vst [vmem:[%s9101_s18 + $0xbe0] sm:$0xff] %v7874_v20 }
 0xcb4   : > { %8514 = vst [vmem:[%s9101_s18 + $0xfe0] sm:$0xff] %v8002_v24  ;;  %v1910_v32 = vpop.f32.mrf.mxu0  ;;  %v4507_v23 = vpop.f32.mrf.mxu1 }
 0xcb5   : > { %v2687_v54 = vadd.f32 %v11043_v61, %v1910_v32 }
 0xcb7   : > { %v5281_v27 = vadd.f32 %v4507_v23, %v2687_v54 }
 0xcb8   : > { %v7101_v45 = vpop.f32.mrf.mxu2  ;;  %v7485_v57 = vpop.f32.mrf.mxu3 }
 0xcb9   : > { %v7875_v4 = vadd.f32 %v7101_v45, %v5281_v27  ;;  %v8003_v37 = vadd.f32 %v7485_v57, %v11502_v52 }
 0xcbb   : > { %8387 = vst [vmem:[%s9101_s18 + $0xbe8] sm:$0xff] %v7875_v4 }
 0xcbc   : > { %8515 = vst [vmem:[%s9101_s18 + $0xfe8] sm:$0xff] %v8003_v37  ;;  %v1913_v3 = vpop.f32.mrf.mxu0  ;;  %v4510_v1 = vpop.f32.mrf.mxu1 }
 0xcbd   : > { %v2688_v55 = vadd.f32 %v11043_v61, %v1913_v3 }
 0xcbf   : > { %v5282_v39 = vadd.f32 %v4510_v1, %v2688_v55 }
 0xcc0   : > { %v7104_v40 = vpop.f32.mrf.mxu2  ;;  %v7488_v58 = vpop.f32.mrf.mxu3 }
 0xcc1   : > { %v7876_v31 = vadd.f32 %v7104_v40, %v5282_v39  ;;  %v8004_v6 = vadd.f32 %v7488_v58, %v11503_v10 }
 0xcc3   : > { %8388 = vst [vmem:[%s9101_s18 + $0xbf0] sm:$0xff] %v7876_v31 }
 0xcc4   : > { %8516 = vst [vmem:[%s9101_s18 + $0xff0] sm:$0xff] %v8004_v6  ;;  %v1916_v26 = vpop.f32.mrf.mxu0  ;;  %v4513_v35 = vpop.f32.mrf.mxu1 }
 0xcc5   : > { %v2689_v49 = vadd.f32 %v11043_v61, %v1916_v26 }
 0xcc7   : > { %v5283_v9 = vadd.f32 %v4513_v35, %v2689_v49 }
 0xcc8   : > { %v7107_v53 = vpop.f32.mrf.mxu2  ;;  %v7491_v2 = vpop.f32.mrf.mxu3 }
 0xcc9   : > { %v7877_v59 = vadd.f32 %v7107_v53, %v5283_v9  ;;  %v8005_v16 = vadd.f32 %v7491_v2, %v10610_v13 }
 0xccb   : > { %8389 = vst [vmem:[%s9101_s18 + $0xbf8] sm:$0xff] %v7877_v59 }
 0xccc   : > { %8517 = vst [vmem:[%s9101_s18 + $0xff8] sm:$0xff] %v8005_v16 }
 0xccd   : > { %8915 = shalt.err (!%p8912_p13)
}
 0xcce   : > { %s8983_s19 = smov 128   ;;  %s8984_s10 = smov 8  }
 0xccf   : > { %8718 = dma.vmem_to_hbm [thread:$0]  (%p9045_p4), %s8534_s29, 65536, %s8536_s30, %s8519_s15, %s8983_s19, %s8983_s19, %s8984_s10  }
 0xcd0 PF: > { %p8735_p0 = scmp.ge.s32.totalorder %s8976_s17, 2  ;;  %s8550_s11 = sand.u32 1, %s8956_s12  }
 0xcd1   : > { %s8551_s18 = scalar_lea.sflag [#allocation6], %s8550_s11 }
 0xcd2   : > { %p8728_p1 = pnand %p8735_p0, %p9052_p8 }
 0xcd4   : > { %p8729_p2 = pneg %p8728_p1 }
 0xcd6   : > { %8951 = dma.done.wait (%p8729_p2), %s8551_s18, 65536  }
 0xcd7   : > { %8953 = vsyncadd (%p8729_p2), %s8551_s18, 4294901760  ;;  %s18_s17 = sadd.s32 1, %s8976_s17   ;;  %s11504_s12 = smov %s8960_s13 }
 0xcd8   : > { %p15_p3 = scmp.ge.s32.totalorder %s18_s17, 4   ;;  %s11505_s13 = smov %s8964_s14 }
 0xcd9   : > { %s11506_s14 = smov %s9058_s25  ;;  %s11507_s15 = smov %s8972_s16 }
 0xcda   : > { %s11508_s16 = smov %s11510_s20  ;;  %17 = sbr.rel (!%p15_p3) target bundleno = 6 (0x6), region = 94 }
 0xcdf   :  { %8557 = vsyncpa [#allocation5], 1 }
 0xce0   :  { %8559 = vsyncpa [#allocation5 + $0x1], 1 }
 0xce1   :  { %8560 = vsyncpa [#allocation8], 1 }
 0xce2   :  { %8561 = vsyncpa [#allocation6], 1 }
 0xce3   :  { %8563 = vsyncpa [#allocation6 + $0x1], 1 }
 0xce4   :  { %8564 = vsyncmov [#allocation3] }
 0xce7   :  { %s8565_s22 = vpop.sfrf %8564 }
 0xce8   :  { %p8659_p4 = scmp.ne.s32.totalorder %s8565_s22, 0 }
 0xcea   :  { %8569 = shalt.err (%p8659_p4)  }
 0xceb   :  { %8571 = vsyncmov [#allocation3 + $0x1] }
 0xcee   :  { %s8572_s24 = vpop.sfrf %8571 }
 0xcef   :  { %p8660_p8 = scmp.ne.s32.totalorder %s8572_s24, 0 }
 0xcf1   :  { %8576 = shalt.err (%p8660_p8)  }

</bundles_post_ra>
